<compile_context>
chip_gen: v5e
topology: v5e:2x2
jax: 0.10.0
libtpu: 0.0.40
codegen_flags: <defaults>
</compile_context>

<pallas_src>
import math
from functools import partial

import numpy as np
import jax
import jax.numpy as jnp
from jax.experimental import pallas as pl
from jax.experimental.pallas import tpu as pltpu

# ---------------- configuration (mirrors ImplicitNet.__init__) ----------------
FF = True
K_FF = 1.0
D_IN = 3
DIMS = [32, 32, 32]          # hidden dims passed to the module
SKIP_IN = (2,)               # skip connection into layer 2
BETA = 100.0                 # Softplus beta
SOFTPLUS_THRESHOLD = 20.0    # PyTorch default threshold
RADIUS_INIT = 1.0

# After __init__ with FF=True: dims = [32, 32, 32, 32, 1]  -> num_layers = 5
FULL_DIMS = [DIMS[0]] + DIMS + [1]
NUM_LAYERS = len(FULL_DIMS)

TM_MAX = 4096                # max points per grid step (multiple of 128)

# f32 for exact parity with the PyTorch reference; jnp.bfloat16 is the
# v6e/v7x fast path for the EUP-bound sin/cos + matmul inputs.
COMPUTE_DTYPE = jnp.float32


def _softplus(x):
    # torch.nn.Softplus(beta, threshold): x if beta*x > threshold else log1p(exp(beta*x))/beta
    z = BETA * x
    safe = jnp.minimum(z, SOFTPLUS_THRESHOLD)
    return jnp.where(z > SOFTPLUS_THRESHOLD, x, jnp.log1p(jnp.exp(safe)) / BETA)


# ------------------------------- Pallas kernel --------------------------------
def implicit_kernel(x_ref, bff_ref, w0_ref, b0_ref, w1_ref, b1_ref,
                    w2h_ref, w2x_ref, b2_ref, w3_ref, b3_ref, o_ref):
    cd = COMPUTE_DTYPE
    x_f32 = x_ref[...]                                           # (3, TM) f32
    x_cd = x_f32.astype(cd)

    # Fourier features: proj = (2*pi*B)^T @ x   (2*pi folded into bff at prep)
    proj = jnp.dot(bff_ref[...], x_f32,
                   preferred_element_type=jnp.float32)           # (16, TM)
    proj = proj.astype(cd)
    # sublane-contiguous stack (16|16 -> 32): no XLU, single K=32 contraction
    sc = jnp.concatenate([jnp.sin(proj), jnp.cos(proj)], axis=0)  # (32, TM)

    # layer 0: merged sin/cos weight (32, 32)
    h = _softplus(jnp.dot(w0_ref[...], sc,
                          preferred_element_type=jnp.float32)
                  + b0_ref[...])                                 # (32, TM)

    # layer 1: output padded 29 -> 32 (extra rows inert: matching w2h cols = 0)
    h = _softplus(jnp.dot(w1_ref[...], h.astype(cd),
                          preferred_element_type=jnp.float32)
                  + b1_ref[...])                                 # (32, TM)

    # layer 2: skip connection.  cat([h, x], -1)/sqrt(2) replaced by two dots
    # summed into the same accumulator; 1/sqrt(2) folded into w2h/w2x at prep.
    h = _softplus(jnp.dot(w2h_ref[...], h.astype(cd),
                          preferred_element_type=jnp.float32)
                  + jnp.dot(w2x_ref[...], x_cd,
                            preferred_element_type=jnp.float32)
                  + b2_ref[...])                                 # (32, TM)

    # layer 3: final linear, no activation -> lane-dense (1, TM) store
    o_ref[...] = (jnp.dot(w3_ref[...], h.astype(cd),
                          preferred_element_type=jnp.float32)
                  + b3_ref[...])                                 # (1, TM)


# -------------------- kernel-layout parameter preparation ----------------------
def prepare_kernel_params(params):
    """Natural (torch-like) params -> feature-major kernel params.

    Call ONCE and reuse the result; this is hoisted out of the per-call path.
    """
    (bff, w0, b0, w1, b1, w2, b2, w3, b3) = params
    skip_h = FULL_DIMS[2] - D_IN       # 29 (hidden part feeding the skip layer)
    pad = FULL_DIMS[2] - skip_h        # 3  (padding to reach a clean 32)
    inv_sqrt2 = np.float32(1.0 / np.sqrt(2.0))

    bff_k = jnp.asarray((2.0 * math.pi) * bff.T, jnp.float32)          # (16, 3)
    w0_k = jnp.asarray(w0.T, jnp.float32)                              # (32, 32) [sin|cos]
    b0_k = jnp.asarray(b0.T, jnp.float32)                              # (32, 1)
    # layer 1: (29-out) padded to 32 rows of zeros
    w1_k = jnp.pad(jnp.asarray(w1.T, jnp.float32), ((0, pad), (0, 0))) # (32, 32)
    b1_k = jnp.pad(jnp.asarray(b1.T, jnp.float32), ((0, pad), (0, 0))) # (32, 1)
    # layer 2: hidden part padded with 3 zero COLUMNS so padded h rows are inert
    w2h_k = jnp.pad(jnp.asarray(w2[:skip_h, :].T, jnp.float32) * inv_sqrt2,
                    ((0, 0), (0, pad)))                                # (32, 32)
    w2x_k = jnp.asarray(w2[skip_h:, :].T, jnp.float32) * inv_sqrt2     # (32, 3)
    b2_k = jnp.asarray(b2.T, jnp.float32)                              # (32, 1)
    w3_k = jnp.asarray(w3.T, jnp.float32)                              # (1, 32)
    b3_k = jnp.asarray(b3.T, jnp.float32)                              # (1, 1)

    cd = COMPUTE_DTYPE
    # matmul weights in compute dtype; Fourier proj + biases stay f32
    return (bff_k,
            w0_k.astype(cd), b0_k,
            w1_k.astype(cd), b1_k,
            w2h_k.astype(cd), w2x_k.astype(cd), b2_k,
            w3_k.astype(cd), b3_k)


# -------------------------------- wrapper --------------------------------------
def _pick_tm(n):
    """Largest tile <= TM_MAX (multiple of 128) with n_tiles >= 2 for v7x."""
    half = -(-n // 2)                          # cdiv(n, 2)
    tm = ((half + 127) // 128) * 128
    return max(128, min(TM_MAX, tm))


@partial(jax.jit, static_argnames=("tm",))
def _implicit_net_forward(x, kparams, tm):
    """x: (N, 3) f32, kparams: prepared tuple -> (N, 1) f32. Fully jitted."""
    N = x.shape[0]
    n_tiles = pl.cdiv(N, tm)
    n_pad = n_tiles * tm

    x_t = jnp.asarray(x, jnp.float32).T                  # (3, N) feature-major
    if n_pad != N:
        x_t = jnp.pad(x_t, ((0, 0), (0, n_pad - N)))     # ragged tail -> zeros

    def _full_spec(a):
        return pl.BlockSpec(a.shape, lambda i: (0,) * a.ndim)

    out_t = pl.pallas_call(
        implicit_kernel,
        out_shape=jax.ShapeDtypeStruct((1, n_pad), jnp.float32),
        grid=(n_tiles,),
        in_specs=[pl.BlockSpec((D_IN, tm), lambda i: (0, i))]   # x (3, TM)
                 + [_full_spec(a) for a in kparams],            # weights untiled
        out_specs=pl.BlockSpec((1, tm), lambda i: (0, i)),      # lane-dense out
        compiler_params=pltpu.CompilerParams(
            dimension_semantics=("parallel",),
            vmem_limit_bytes=32 * 1024 * 1024),
    )(x_t, *kparams)

    return out_t[0, :N][:, None]                         # back to (N, 1)


def implicit_net_pallas(x, kparams, tm=None):
    if tm is None:
        tm = _pick_tm(x.shape[0])
    return _implicit_net_forward(x, kparams, tm)


# ------------------------ deterministic parameter init -------------------------
def init_params(key):
    keys = jax.random.split(key, 8)

    # FourierLayer buffer B: (3, dims[0]//2) * k
    bff = jax.random.normal(keys[0], (D_IN, FULL_DIMS[0] // 2), jnp.float32) * K_FF

    def out_dim(layer):
        if layer + 1 in SKIP_IN:
            return FULL_DIMS[layer + 1] - D_IN
        return FULL_DIMS[layer + 1]

    params = [bff]
    for layer in range(NUM_LAYERS - 1):
        din, dout = FULL_DIMS[layer], out_dim(layer)
        if layer == NUM_LAYERS - 2:
            # geometric init for last layer
            w = (np.sqrt(np.pi) / np.sqrt(din)
                 + 1e-5 * jax.random.normal(keys[layer + 1], (din, dout), jnp.float32))
            b = jnp.full((1, dout), -RADIUS_INIT, jnp.float32)
        else:
            w = (np.sqrt(2.0) / np.sqrt(dout)
                 ) * jax.random.normal(keys[layer + 1], (din, dout), jnp.float32)
            b = jnp.zeros((1, dout), jnp.float32)
        params += [w.astype(jnp.float32), b]
    return tuple(params)


# ----------------------------- pure-JAX reference ------------------------------
def implicit_net_ref(x, params):
    (bff, w0, b0, w1, b1, w2, b2, w3, b3) = params
    proj = (2.0 * math.pi) * x @ bff
    h = jnp.concatenate([jnp.sin(proj), jnp.cos(proj)], axis=-1)
    h = _softplus(h @ w0 + b0)
    h = _softplus(h @ w1 + b1)
    h = jnp.concatenate([h, x], axis=-1) / np.sqrt(2.0)
    h = _softplus(h @ w2 + b2)
    return h @ w3 + b3


if __name__ == "__main__":
    key = jax.random.PRNGKey(0)
    kp, kx = jax.random.split(key)
    params = init_params(kp)
    kparams = prepare_kernel_params(params)     # hoisted: done once, reused

    N = 2000  # deliberately not a multiple of the tile to exercise the padded tail
    x = jax.random.normal(kx, (N, D_IN), jnp.float32)

    out = implicit_net_pallas(x, kparams)
    out = jax.block_until_ready(out)

    ref = implicit_net_ref(x, params)
    np.testing.assert_allclose(np.asarray(out), np.asarray(ref), rtol=1e-5, atol=1e-5)

    print("KERNEL_OK")
</pallas_src>

<mosaic_0001>
module attributes {stable_mosaic.version = 11 : i64} {
  func.func @implicit_kernel(%arg0: i32, %arg1: memref<3x1024xf32, #tpu.memory_space<vmem>>, %arg2: memref<16x3xf32, #tpu.memory_space<vmem>>, %arg3: memref<32x32xf32, #tpu.memory_space<vmem>>, %arg4: memref<32x1xf32, #tpu.memory_space<vmem>>, %arg5: memref<32x32xf32, #tpu.memory_space<vmem>>, %arg6: memref<32x1xf32, #tpu.memory_space<vmem>>, %arg7: memref<32x32xf32, #tpu.memory_space<vmem>>, %arg8: memref<32x3xf32, #tpu.memory_space<vmem>>, %arg9: memref<32x1xf32, #tpu.memory_space<vmem>>, %arg10: memref<1x32xf32, #tpu.memory_space<vmem>>, %arg11: memref<1x1xf32, #tpu.memory_space<vmem>>, %arg12: memref<1x1024xf32, #tpu.memory_space<vmem>>) attributes {dimension_semantics = [#tpu.dimension_semantics<parallel>], iteration_bounds = array<i64: 2>, scalar_prefetch = 0 : i64, scratch_operands = 0 : i64, tpu.core_type = #tpu.core_type<tc>, window_params = [{transform_indices = @transform_0, window_bounds = array<i64: 3, 1024>}, {pipeline_mode = #tpu.pipeline_mode<synchronous>, transform_indices = @transform_1, window_bounds = array<i64: 16, 3>}, {pipeline_mode = #tpu.pipeline_mode<synchronous>, transform_indices = @transform_2, window_bounds = array<i64: 32, 32>}, {pipeline_mode = #tpu.pipeline_mode<synchronous>, transform_indices = @transform_3, window_bounds = array<i64: 32, 1>}, {pipeline_mode = #tpu.pipeline_mode<synchronous>, transform_indices = @transform_4, window_bounds = array<i64: 32, 32>}, {pipeline_mode = #tpu.pipeline_mode<synchronous>, transform_indices = @transform_5, window_bounds = array<i64: 32, 1>}, {pipeline_mode = #tpu.pipeline_mode<synchronous>, transform_indices = @transform_6, window_bounds = array<i64: 32, 32>}, {pipeline_mode = #tpu.pipeline_mode<synchronous>, transform_indices = @transform_7, window_bounds = array<i64: 32, 3>}, {pipeline_mode = #tpu.pipeline_mode<synchronous>, transform_indices = @transform_8, window_bounds = array<i64: 32, 1>}, {pipeline_mode = #tpu.pipeline_mode<synchronous>, transform_indices = @transform_9, window_bounds = array<i64: 1, 32>}, {pipeline_mode = #tpu.pipeline_mode<synchronous>, transform_indices = @transform_10, window_bounds = array<i64: 1, 1>}, {transform_indices = @transform_11, window_bounds = array<i64: 1, 1024>}]} {
    %c0 = arith.constant 0 : index
    %c0_0 = arith.constant 0 : index
    %0 = vector.load %arg1[%c0, %c0_0] : memref<3x1024xf32, #tpu.memory_space<vmem>>, vector<3x1024xf32>
    %c0_1 = arith.constant 0 : index
    %c0_2 = arith.constant 0 : index
    %1 = vector.load %arg2[%c0_1, %c0_2] : memref<16x3xf32, #tpu.memory_space<vmem>>, vector<16x3xf32>
    %cst = arith.constant dense<0.000000e+00> : vector<16x1024xf32>
    %2 = tpu.matmul %1, %0, %cst {dimension_numbers = #tpu.dot_dimension_numbers<[1], [0], [0], [1], [0, 0, 1, 1], [], []>} : vector<16x3xf32>, vector<3x1024xf32>, vector<16x1024xf32> -> vector<16x1024xf32>
    %3 = math.sin %2 : vector<16x1024xf32>
    %4 = math.cos %2 : vector<16x1024xf32>
    %5 = tpu.concatenate %3, %4 in 0 : vector<16x1024xf32>, vector<16x1024xf32> -> vector<32x1024xf32>
    %c0_3 = arith.constant 0 : index
    %c0_4 = arith.constant 0 : index
    %6 = vector.load %arg3[%c0_3, %c0_4] : memref<32x32xf32, #tpu.memory_space<vmem>>, vector<32x32xf32>
    %cst_5 = arith.constant dense<0.000000e+00> : vector<32x1024xf32>
    %7 = tpu.matmul %6, %5, %cst_5 {dimension_numbers = #tpu.dot_dimension_numbers<[1], [0], [0], [1], [0, 0, 1, 1], [], []>} : vector<32x32xf32>, vector<32x1024xf32>, vector<32x1024xf32> -> vector<32x1024xf32>
    %c0_6 = arith.constant 0 : index
    %c0_7 = arith.constant 0 : index
    %8 = vector.load %arg4[%c0_6, %c0_7] : memref<32x1xf32, #tpu.memory_space<vmem>>, vector<32x1xf32>
    %9 = vector.broadcast %8 : vector<32x1xf32> to vector<32x1024xf32>
    %10 = arith.addf %7, %9 : vector<32x1024xf32>
    %cst_8 = arith.constant 1.000000e+02 : f32
    %11 = vector.broadcast %cst_8 : f32 to vector<32x1024xf32>
    %12 = arith.mulf %11, %10 : vector<32x1024xf32>
    %cst_9 = arith.constant 2.000000e+01 : f32
    %13 = vector.broadcast %cst_9 : f32 to vector<32x1024xf32>
    %14 = arith.minimumf %12, %13 : vector<32x1024xf32>
    %cst_10 = arith.constant 2.000000e+01 : f32
    %15 = vector.broadcast %cst_10 : f32 to vector<32x1024xf32>
    %16 = arith.cmpf ogt, %12, %15 : vector<32x1024xf32>
    %17 = math.exp %14 : vector<32x1024xf32>
    %18 = math.log1p %17 : vector<32x1024xf32>
    %cst_11 = arith.constant 1.000000e+02 : f32
    %19 = vector.broadcast %cst_11 : f32 to vector<32x1024xf32>
    %20 = arith.divf %18, %19 : vector<32x1024xf32>
    %21 = arith.select %16, %10, %20 : vector<32x1024xi1>, vector<32x1024xf32>
    %c0_12 = arith.constant 0 : index
    %c0_13 = arith.constant 0 : index
    %22 = vector.load %arg5[%c0_12, %c0_13] : memref<32x32xf32, #tpu.memory_space<vmem>>, vector<32x32xf32>
    %cst_14 = arith.constant dense<0.000000e+00> : vector<32x1024xf32>
    %23 = tpu.matmul %22, %21, %cst_14 {dimension_numbers = #tpu.dot_dimension_numbers<[1], [0], [0], [1], [0, 0, 1, 1], [], []>} : vector<32x32xf32>, vector<32x1024xf32>, vector<32x1024xf32> -> vector<32x1024xf32>
    %c0_15 = arith.constant 0 : index
    %c0_16 = arith.constant 0 : index
    %24 = vector.load %arg6[%c0_15, %c0_16] : memref<32x1xf32, #tpu.memory_space<vmem>>, vector<32x1xf32>
    %25 = vector.broadcast %24 : vector<32x1xf32> to vector<32x1024xf32>
    %26 = arith.addf %23, %25 : vector<32x1024xf32>
    %cst_17 = arith.constant 1.000000e+02 : f32
    %27 = vector.broadcast %cst_17 : f32 to vector<32x1024xf32>
    %28 = arith.mulf %27, %26 : vector<32x1024xf32>
    %cst_18 = arith.constant 2.000000e+01 : f32
    %29 = vector.broadcast %cst_18 : f32 to vector<32x1024xf32>
    %30 = arith.minimumf %28, %29 : vector<32x1024xf32>
    %cst_19 = arith.constant 2.000000e+01 : f32
    %31 = vector.broadcast %cst_19 : f32 to vector<32x1024xf32>
    %32 = arith.cmpf ogt, %28, %31 : vector<32x1024xf32>
    %33 = math.exp %30 : vector<32x1024xf32>
    %34 = math.log1p %33 : vector<32x1024xf32>
    %cst_20 = arith.constant 1.000000e+02 : f32
    %35 = vector.broadcast %cst_20 : f32 to vector<32x1024xf32>
    %36 = arith.divf %34, %35 : vector<32x1024xf32>
    %37 = arith.select %32, %26, %36 : vector<32x1024xi1>, vector<32x1024xf32>
    %c0_21 = arith.constant 0 : index
    %c0_22 = arith.constant 0 : index
    %38 = vector.load %arg7[%c0_21, %c0_22] : memref<32x32xf32, #tpu.memory_space<vmem>>, vector<32x32xf32>
    %cst_23 = arith.constant dense<0.000000e+00> : vector<32x1024xf32>
    %39 = tpu.matmul %38, %37, %cst_23 {dimension_numbers = #tpu.dot_dimension_numbers<[1], [0], [0], [1], [0, 0, 1, 1], [], []>} : vector<32x32xf32>, vector<32x1024xf32>, vector<32x1024xf32> -> vector<32x1024xf32>
    %c0_24 = arith.constant 0 : index
    %c0_25 = arith.constant 0 : index
    %40 = vector.load %arg8[%c0_24, %c0_25] : memref<32x3xf32, #tpu.memory_space<vmem>>, vector<32x3xf32>
    %cst_26 = arith.constant dense<0.000000e+00> : vector<32x1024xf32>
    %41 = tpu.matmul %40, %0, %cst_26 {dimension_numbers = #tpu.dot_dimension_numbers<[1], [0], [0], [1], [0, 0, 1, 1], [], []>} : vector<32x3xf32>, vector<3x1024xf32>, vector<32x1024xf32> -> vector<32x1024xf32>
    %42 = arith.addf %39, %41 : vector<32x1024xf32>
    %c0_27 = arith.constant 0 : index
    %c0_28 = arith.constant 0 : index
    %43 = vector.load %arg9[%c0_27, %c0_28] : memref<32x1xf32, #tpu.memory_space<vmem>>, vector<32x1xf32>
    %44 = vector.broadcast %43 : vector<32x1xf32> to vector<32x1024xf32>
    %45 = arith.addf %42, %44 : vector<32x1024xf32>
    %cst_29 = arith.constant 1.000000e+02 : f32
    %46 = vector.broadcast %cst_29 : f32 to vector<32x1024xf32>
    %47 = arith.mulf %46, %45 : vector<32x1024xf32>
    %cst_30 = arith.constant 2.000000e+01 : f32
    %48 = vector.broadcast %cst_30 : f32 to vector<32x1024xf32>
    %49 = arith.minimumf %47, %48 : vector<32x1024xf32>
    %cst_31 = arith.constant 2.000000e+01 : f32
    %50 = vector.broadcast %cst_31 : f32 to vector<32x1024xf32>
    %51 = arith.cmpf ogt, %47, %50 : vector<32x1024xf32>
    %52 = math.exp %49 : vector<32x1024xf32>
    %53 = math.log1p %52 : vector<32x1024xf32>
    %cst_32 = arith.constant 1.000000e+02 : f32
    %54 = vector.broadcast %cst_32 : f32 to vector<32x1024xf32>
    %55 = arith.divf %53, %54 : vector<32x1024xf32>
    %56 = arith.select %51, %45, %55 : vector<32x1024xi1>, vector<32x1024xf32>
    %c0_33 = arith.constant 0 : index
    %c0_34 = arith.constant 0 : index
    %57 = vector.load %arg10[%c0_33, %c0_34] : memref<1x32xf32, #tpu.memory_space<vmem>>, vector<1x32xf32>
    %cst_35 = arith.constant dense<0.000000e+00> : vector<1x1024xf32>
    %58 = tpu.matmul %57, %56, %cst_35 {dimension_numbers = #tpu.dot_dimension_numbers<[1], [0], [0], [1], [0, 0, 1, 1], [], []>} : vector<1x32xf32>, vector<32x1024xf32>, vector<1x1024xf32> -> vector<1x1024xf32>
    %c0_36 = arith.constant 0 : index
    %c0_37 = arith.constant 0 : index
    %59 = vector.load %arg11[%c0_36, %c0_37] : memref<1x1xf32, #tpu.memory_space<vmem>>, vector<1x1xf32>
    %60 = vector.broadcast %59 : vector<1x1xf32> to vector<1x1024xf32>
    %61 = arith.addf %58, %60 : vector<1x1024xf32>
    %c0_38 = arith.constant 0 : index
    %c0_39 = arith.constant 0 : index
    %62 = vector.load %arg12[%c0_38, %c0_39] : memref<1x1024xf32, #tpu.memory_space<vmem>>, vector<1x1024xf32>
    tpu.vector_store %arg12[%c0_38, %c0_39], %61 {strides = array<i32>} : memref<1x1024xf32, #tpu.memory_space<vmem>>, vector<1x1024xf32>,
    return
  }
  func.func @transform_0(%arg0: i32) -> (i32, i32) {
    %c0_i32 = arith.constant 0 : i32
    %c0_i32_0 = arith.constant 0 : i32
    return %c0_i32, %arg0 : i32, i32
  }
  func.func @transform_1(%arg0: i32) -> (i32, i32) {
    %c0_i32 = arith.constant 0 : i32
    %c0_i32_0 = arith.constant 0 : i32
    %c0_i32_1 = arith.constant 0 : i32
    return %c0_i32, %c0_i32_0 : i32, i32
  }
  func.func @transform_2(%arg0: i32) -> (i32, i32) {
    %c0_i32 = arith.constant 0 : i32
    %c0_i32_0 = arith.constant 0 : i32
    %c0_i32_1 = arith.constant 0 : i32
    return %c0_i32, %c0_i32_0 : i32, i32
  }
  func.func @transform_3(%arg0: i32) -> (i32, i32) {
    %c0_i32 = arith.constant 0 : i32
    %c0_i32_0 = arith.constant 0 : i32
    %c0_i32_1 = arith.constant 0 : i32
    return %c0_i32, %c0_i32_0 : i32, i32
  }
  func.func @transform_4(%arg0: i32) -> (i32, i32) {
    %c0_i32 = arith.constant 0 : i32
    %c0_i32_0 = arith.constant 0 : i32
    %c0_i32_1 = arith.constant 0 : i32
    return %c0_i32, %c0_i32_0 : i32, i32
  }
  func.func @transform_5(%arg0: i32) -> (i32, i32) {
    %c0_i32 = arith.constant 0 : i32
    %c0_i32_0 = arith.constant 0 : i32
    %c0_i32_1 = arith.constant 0 : i32
    return %c0_i32, %c0_i32_0 : i32, i32
  }
  func.func @transform_6(%arg0: i32) -> (i32, i32) {
    %c0_i32 = arith.constant 0 : i32
    %c0_i32_0 = arith.constant 0 : i32
    %c0_i32_1 = arith.constant 0 : i32
    return %c0_i32, %c0_i32_0 : i32, i32
  }
  func.func @transform_7(%arg0: i32) -> (i32, i32) {
    %c0_i32 = arith.constant 0 : i32
    %c0_i32_0 = arith.constant 0 : i32
    %c0_i32_1 = arith.constant 0 : i32
    return %c0_i32, %c0_i32_0 : i32, i32
  }
  func.func @transform_8(%arg0: i32) -> (i32, i32) {
    %c0_i32 = arith.constant 0 : i32
    %c0_i32_0 = arith.constant 0 : i32
    %c0_i32_1 = arith.constant 0 : i32
    return %c0_i32, %c0_i32_0 : i32, i32
  }
  func.func @transform_9(%arg0: i32) -> (i32, i32) {
    %c0_i32 = arith.constant 0 : i32
    %c0_i32_0 = arith.constant 0 : i32
    %c0_i32_1 = arith.constant 0 : i32
    return %c0_i32, %c0_i32_0 : i32, i32
  }
  func.func @transform_10(%arg0: i32) -> (i32, i32) {
    %c0_i32 = arith.constant 0 : i32
    %c0_i32_0 = arith.constant 0 : i32
    %c0_i32_1 = arith.constant 0 : i32
    return %c0_i32, %c0_i32_0 : i32, i32
  }
  func.func @transform_11(%arg0: i32) -> (i32, i32) {
    %c0_i32 = arith.constant 0 : i32
    %c0_i32_0 = arith.constant 0 : i32
    return %c0_i32, %arg0 : i32, i32
  }
}

</mosaic_0001>

<bundles_post_ra>
// kernel: _implicit_net_forward.1
= control target key start
LH: loop header
LB: loop body
LE: loop exit
PB: predicated region body
PF: predicated region fallthrough
CT: control target
= control target key end

     0   :  { %s9250_s19 = smov 0   ;;  %s14698_s0 = inlined_call_operand.vmem [shape: f32[3,2048], index: 0, kind: input, shape index: {}]   ;;  %s14699_s1 = inlined_call_operand.vmem [shape: f32[16,3], index: 1, kind: input, shape index: {}]   ;;  %s14700_s2 = inlined_call_operand.vmem [shape: f32[32,32], index: 2, kind: input, shape index: {}]   ;;  %s14701_s3 = inlined_call_operand.vmem [shape: f32[32,1], index: 3, kind: input, shape index: {}]   ;;  %s14702_s4 = inlined_call_operand.vmem [shape: f32[32,32], index: 4, kind: input, shape index: {}]   ;;  %s14703_s5 = inlined_call_operand.vmem [shape: f32[32,1], index: 5, kind: input, shape index: {}]   ;;  %s14704_s6 = inlined_call_operand.vmem [shape: f32[32,32], index: 6, kind: input, shape index: {}]   ;;  %s14705_s7 = inlined_call_operand.vmem [shape: f32[32,3], index: 7, kind: input, shape index: {}]   ;;  %s14706_s8 = inlined_call_operand.vmem [shape: f32[32,1], index: 8, kind: input, shape index: {}]   ;;  %s14707_s9 = inlined_call_operand.vmem [shape: f32[1,32], index: 9, kind: input, shape index: {}]   ;;  %s14708_s10 = inlined_call_operand.<no memory space> [shape: f32[1,1], index: 10, kind: input, shape index: {}]   ;;  %s14709_s11 = inlined_call_operand.vmem [shape: f32[1,2048], index: 11, kind: output, shape index: {}]  }
   0x1   :  { %v16_v0 = vstv %s14708_s10 }
   0x2   :  { %17 = vst [vmem:[#allocation2] sm:$0x1] %v16_v0 }
   0x3 LB: > { %s8490_s20 = sadd.s32 4294967295, %s9177_s19   ;;  %p8494_p0 = scmp.ge.s32.totalorder %s9177_s19, 1  ;;  %s9177_s19 = sphi %s9250_s19, %s23_s19  }
   0x4   : > { %p340_p1 = scmp.lt.s32.totalorder %s9177_s19, 3 }
   0x6   : > { %p341_p2 = pnand %p8494_p0, %p340_p1 }
   0x8   : > { %344 = sbr.rel (%p341_p2) target bundleno = 1659 (0x67b), region = 64 }
   0xd   : > { %s8495_s21 = sshll.u32 %s8490_s20, 3  ;;  %vm14818_vm0 = vcmask 1042432   ;;  %v394_v5 = vld [vmem:[%s14699_s1] sm:$0xff]  ;;  %vm14817_vm1 = vcmask 23552   ;;  %v395_v14 = vld [vmem:[%s14699_s1 + $0x8] sm:$0xff]  ;;  %v14715_v15 = vmov 0  }
   0xe   : > { %p380_p3 = scmp.lt.s32.totalorder %s8495_s21, 15  ;;  %8781 = vset.pattern.permute.xlu1 %v14715_v15  ;;  %8780 = vset.pattern.permute.xlu0 %v14715_v15  ;;  %v14735_v31 = vmov 920167782   ;;  %v14729_v33 = vmov 1326507024  }
   0xf   : > { %8782 = vset.pattern.permute.xlu2 %v14715_v15  ;;  %v14723_v37 = vmov 2475754826   ;;  %v14727_v39 = vmov 2131351028   ;;  %v14731_v42 = vmov 2102212464  }
  0x10   : > { %s15715_s21 = smov (!%p380_p3, %s8495_s21), 15 }
  0x11   : > { %s8496_s10 = sshll.u32 %s15715_s21, 2 }
  0x12   : > { %s383_s24 = scalar_lea.vmem %s14698_s0, %s8496_s10  ;;  %s388_s10 = scalar_lea.vmem %s14709_s11, %s15715_s21 }
  0x13   : > { %v390_v1 = vld [vmem:[%s383_s24] sm:$0x77]  ;;  %v391_v2 = vld [vmem:[%s383_s24 + $0x8] sm:$0x77]  ;;  %v392_v3 = vld [vmem:[%s383_s24 + $0x10] sm:$0x77] }
  0x14   : > { %400 = vst [vmem:[#allocation1] ss:$2 sm:$0xff] %v390_v1  ;;  %v393_v4 = vld [vmem:[%s383_s24 + $0x18] sm:$0x77] }
  0x15   : > { %402 = vst [vmem:[#allocation1 + $0x10] ss:$2 sm:$0xff] %v391_v2 }
  0x16   : > { %404 = vst [vmem:[#allocation1 + $0x20] ss:$2 sm:$0xff] %v392_v3 }
  0x17   : > { %406 = vst [vmem:[#allocation1 + $0x30] ss:$2 sm:$0xff] %v393_v4 }
  0x1b   : > { %v407_v6 = vld.sshfl [vmem:[#allocation1] sm:$0xff pattern:$0x75316420]  ;;  %v408_v7 = vld.sshfl [vmem:[#allocation1 + $0x8] sm:$0xff pattern:$0x75316420] }
  0x1c   : > { %8498 = vmatpush.msk.msra.mxu0 %vm14818_vm0, %v407_v6  ;;  %8501 = vmatpush.msk.msra.mxu1 %vm14818_vm0, %v408_v7  ;;  %7151 = vst [vmem:[#allocation1] ss:$2 sm:$0xff] %v390_v1  ;;  %v409_v8 = vld.sshfl [vmem:[#allocation1 + $0x10] sm:$0xff pattern:$0x75316420] }
  0x1d   : > { %8504 = vmatpush.msk.msra.mxu2 %vm14818_vm0, %v409_v8  ;;  %v410_v9 = vld.sshfl [vmem:[#allocation1 + $0x18] sm:$0xff pattern:$0x75316420]  ;;  %8499 = vmatmul.msk.f32.vlgmr.msra.gmra.mxu0 %vm14817_vm1, %v394_v5  ;;  %v411_v10 = vld.sshfl [vmem:[#allocation1 + $0x20] sm:$0xff pattern:$0x75316420] }
  0x1e   : > { %8507 = vmatpush.msk.msra.mxu3 %vm14818_vm0, %v410_v9  ;;  %7153 = vst [vmem:[#allocation1 + $0x10] ss:$2 sm:$0xff] %v391_v2  ;;  %8502 = vmatmul.msk.f32.vlgmr.msra.gmra.mxu1 %vm14817_vm1, %v394_v5  ;;  %v412_v11 = vld.sshfl [vmem:[#allocation1 + $0x28] sm:$0xff pattern:$0x75316420] }
  0x1f   : > { %8505 = vmatmul.msk.f32.vlgmr.msra.gmra.mxu2 %vm14817_vm1, %v394_v5  ;;  %8508 = vmatmul.msk.f32.vlgmr.msra.gmra.mxu3 %vm14817_vm1, %v394_v5  ;;  %7155 = vst [vmem:[#allocation1 + $0x20] ss:$2 sm:$0xff] %v392_v3  ;;  %v413_v12 = vld.sshfl [vmem:[#allocation1 + $0x30] sm:$0xff pattern:$0x75316420] }
  0x20   : > { %8510 = vmatpush.msk.msrb.mxu0 %vm14818_vm0, %v411_v10  ;;  %8513 = vmatpush.msk.msrb.mxu1 %vm14818_vm0, %v412_v11  ;;  %v414_v13 = vld.sshfl [vmem:[#allocation1 + $0x38] sm:$0xff pattern:$0x75316420]  ;;  %v14717_v3 = vmov 683565275  }
  0x21   : > { %8516 = vmatpush.msk.msrb.mxu2 %vm14818_vm0, %v413_v12  ;;  %8519 = vmatpush.msk.msrb.mxu3 %vm14818_vm0, %v414_v13  ;;  %7157 = vst [vmem:[#allocation1 + $0x30] ss:$2 sm:$0xff] %v393_v4 }
  0x25   : > { %8500 = vmatmul.msk.f32.gmra.mxu0 %vm14817_vm1, %v395_v14 }
  0x26   : > { %8503 = vmatmul.msk.f32.gmra.mxu1 %vm14817_vm1, %v395_v14 }
  0x27   : > { %8506 = vmatmul.msk.f32.gmra.mxu2 %vm14817_vm1, %v395_v14  ;;  %8509 = vmatmul.msk.f32.gmra.mxu3 %vm14817_vm1, %v395_v14 }
  0x2d   : > { %8511 = vmatmul.msk.f32.vlgmr.msrb.gmra.mxu0 %vm14817_vm1, %v394_v5 }
  0x2e   : > { %8514 = vmatmul.msk.f32.vlgmr.msrb.gmra.mxu1 %vm14817_vm1, %v394_v5 }
  0x2f   : > { %8517 = vmatmul.msk.f32.vlgmr.msrb.gmra.mxu2 %vm14817_vm1, %v394_v5  ;;  %8520 = vmatmul.msk.f32.vlgmr.msrb.gmra.mxu3 %vm14817_vm1, %v394_v5 }
  0x35   : > { %8512 = vmatmul.msk.f32.gmra.mxu0 %vm14817_vm1, %v395_v14 }
  0x36   : > { %8515 = vmatmul.msk.f32.gmra.mxu1 %vm14817_vm1, %v395_v14 }
  0x37   : > { %8518 = vmatmul.msk.f32.gmra.mxu2 %vm14817_vm1, %v395_v14  ;;  %8521 = vmatmul.msk.f32.gmra.mxu3 %vm14817_vm1, %v395_v14 }
  0x9a   : > { %v9297_v16 = vpop.f32.mrf.mxu0 }
  0x9b   : > { %14992 = vst [vmem:[#allocation3_spill] sm:$0xff] %v9297_v16  ;;  %v626_v17 = vand.u32 2139095040, %v9297_v16  ;;  %v9300_v19 = vpop.f32.mrf.mxu1  ;;  %v14713_v30 = vand.u32 2147483647, %v9297_v16 }
  0x9c   : > { %14993 = vst [vmem:[#allocation4_spill] sm:$0xff] %v9300_v19  ;;  %v781_v21 = vand.u32 2139095040, %v9300_v19  ;;  %v14712_v51 = vand.u32 2147483647, %v9300_v19 }
  0x9d   : > { %v627_v18 = vshrl.u32 %v626_v17, 23  ;;  %v630_v44 = vand.u32 8388607, %v14713_v30 }
  0x9e   : > { %v782_v23 = vshrl.u32 %v781_v21, 23  ;;  %v785_v62 = vand.u32 8388607, %v14712_v51 }
  0x9f   : > { %v8522_v20 = vadd.s32 4294967169, %v627_v18  ;;  %v631_v52 = vor.u32 8388608, %v630_v44 }
  0xa0   : > { %v8525_v24 = vadd.s32 4294967169, %v782_v23  ;;  %v786_v11 = vor.u32 8388608, %v785_v62 }
  0xa1   : > { %v633_v22 = vadd.s32 1, %v8522_v20  ;;  %v9349_v61 = vshll.u32 %v631_v52, 8 }
  0xa2   : > { %v788_v27 = vadd.s32 1, %v8525_v24  ;;  %v9347_v60 = vpop.f32.mrf.mxu2 }
  0xa3   : > { %vm634_vm2 = vcmp.gt.s32.totalorder %v633_v22, 0  ;;  %14994 = vst [vmem:[#allocation5_spill] sm:$0xff] %v9347_v60  ;;  %v936_v7 = vand.u32 2139095040, %v9347_v60  ;;  %v672_v12 = vand.u32 65535, %v9349_v61 }
  0xa4   : > { %v635_v25 = vsel %vm634_vm2, %v633_v22, 0  ;;  %vm789_vm3 = vcmp.gt.s32.totalorder %v788_v27, 0  ;;  %14995 = vst [vmem:[#allocation6_spill] sm:$0xff] %v9349_v61 }
  0xa5   : > { %v637_v26 = vand.u32 31, %v635_v25  ;;  %v790_v29 = vsel %vm789_vm3, %v788_v27, 0  ;;  %v9309_v35 = vshrl.u32 %v635_v25, 5  ;;  %v937_v22 = vshrl.u32 %v936_v7, 23 }
  0xa6   : > { %v9311_v36 = vand.u32 31, %v790_v29  ;;  %v9345_v59 = vshrl.u32 %v790_v29, 5 }
  0xa7   : > { %v9303_v28 = vsub.s32 32, %v637_v26  ;;  %v652_v32 = vshll.u32 %v14735_v31, %v637_v26  ;;  %v643_v38 = vshll.u32 %v14723_v37, %v637_v26  ;;  %v646_v41 = vshll.u32 %v14727_v39, %v637_v26 }
  0xa8   : > { %v649_v46 = vshll.u32 %v14731_v42, %v637_v26  ;;  %vm658_vm4 = vcmp.lt.s32.totalorder %v9309_v35, 4  ;;  %v9326_v48 = vsub.s32 32, %v9311_v36  ;;  %vm655_vm5 = vcmp.lt.s32.totalorder %v9309_v35, 1 }
  0xa9   : > { %v653_v34 = vshrl.u32 %v14729_v33, %v9303_v28  ;;  %v644_v40 = vshrl.u32 %v14727_v39, %v9303_v28  ;;  %v647_v43 = vshrl.u32 %v14731_v42, %v9303_v28  ;;  %v650_v47 = vshrl.u32 %v14735_v31, %v9303_v28 }
  0xaa   : > { %vm657_vm6 = vcmp.lt.s32.totalorder %v9309_v35, 3  ;;  %v807_v55 = vshll.u32 %v14735_v31, %v9311_v36  ;;  %v808_v56 = vshrl.u32 %v14729_v33, %v9326_v48  ;;  %vm656_vm7 = vcmp.lt.s32.totalorder %v9309_v35, 2 }
  0xab   : > { %v654_v45 = vor.u32 %v653_v34, %v652_v32  ;;  %v9328_v49 = vor.u32 %v644_v40, %v643_v38  ;;  %v648_v50 = vor.u32 %v647_v43, %v646_v41  ;;  %v651_v54 = vor.u32 %v650_v47, %v649_v46  ;;  %v9411_v46 = vpop.f32.mrf.mxu0 }
  0xac   : > { %v798_v63 = vshll.u32 %v14723_v37, %v9311_v36  ;;  %v799_v0 = vshrl.u32 %v14727_v39, %v9326_v48  ;;  %v801_v1 = vshll.u32 %v14727_v39, %v9311_v36  ;;  %v802_v2 = vshrl.u32 %v14731_v42, %v9326_v48 }
  0xad   : > { %v668_v53 = vsel %vm658_vm4, %v654_v45, 1326507024  ;;  %v667_v57 = vsel %vm655_vm5, %v9328_v49, %v648_v50  ;;  %v640_v4 = vshll.u32 %v14717_v3, %v637_v26  ;;  %v809_v6 = vor.u32 %v808_v56, %v807_v55 }
  0xae   : > { %v669_v58 = vsel %vm657_vm6, %v651_v54, %v668_v53  ;;  %v641_v8 = vshrl.u32 %v14723_v37, %v9303_v28  ;;  %v804_v9 = vshll.u32 %v14731_v42, %v9311_v36  ;;  %v805_v10 = vshrl.u32 %v14735_v31, %v9326_v48 }
  0xaf   : > { %v9364_v5 = vsel %vm656_vm7, %v667_v57, %v669_v58  ;;  %vm813_vm8 = vcmp.lt.s32.totalorder %v9345_v59, 4  ;;  %v800_v14 = vor.u32 %v799_v0, %v798_v63  ;;  %v803_v17 = vor.u32 %v802_v2, %v801_v1 }
  0xb0   : > { %v675_v13 = vshrl.u32 %v9364_v5, 16  ;;  %vm810_vm9 = vcmp.lt.s32.totalorder %v9345_v59, 1  ;;  %vm812_vm10 = vcmp.lt.s32.totalorder %v9345_v59, 3  ;;  %v823_v18 = vsel %vm813_vm8, %v809_v6, 1326507024 }
  0xb1   : > { %v642_v20 = vor.u32 %v641_v8, %v640_v4  ;;  %v806_v21 = vor.u32 %v805_v10, %v804_v9  ;;  %v639_v23 = vshrl.u32 %v14717_v3, %v9303_v28  ;;  %v664_v24 = vsel %vm658_vm4, %v651_v54, 920167782  ;;  %v9432_v4 = vpop.f32.mrf.mxu3 }
  0xb2   : > { %v674_v25 = vand.u32 65535, %v9364_v5  ;;  %v9385_v26 = vshll.u32 %v786_v11, 8  ;;  %v9387_v27 = vmul.u32 %v675_v13, %v672_v12  ;;  %vm811_vm11 = vcmp.lt.s32.totalorder %v9345_v59, 2  ;;  %14998 = vst [vmem:[#allocation9_spill] sm:$0xff] %v9432_v4 }
  0xb3   : > { %v822_v29 = vsel %vm810_vm9, %v800_v14, %v803_v17  ;;  %v824_v32 = vsel %vm812_vm10, %v806_v21, %v823_v18  ;;  %v795_v28 = vshll.u32 %v14717_v3, %v9311_v36  ;;  %v796_v34 = vshrl.u32 %v14723_v37, %v9326_v48 }
  0xb4   : > { %14996 = vst [vmem:[#allocation7_spill] sm:$0xff] %v9385_v26  ;;  %v660_v38 = vsel %vm658_vm4, %v648_v50, 2102212464  ;;  %v663_v40 = vsel %vm655_vm5, %v642_v20, %v9328_v49  ;;  %v665_v41 = vsel %vm657_vm6, %v648_v50, %v664_v24  ;;  %v8528_v43 = vadd.s32 4294967169, %v937_v22 }
  0xb5   : > { %14997 = vst [vmem:[#allocation8_spill] sm:$0xff] %v9387_v27  ;;  %v825_v44 = vsel %vm811_vm11, %v822_v29, %v824_v32  ;;  %v9408_v45 = vand.u32 65535, %v9385_v26  ;;  %v14711_v36 = vand.u32 2147483647, %v9347_v60  ;;  %v659_v47 = vsel %vm655_vm5, %v639_v23, %v642_v20 }
  0xb6   : > { %v676_v52 = vmul.u32 %v674_v25, %v672_v12  ;;  %v680_v53 = vshll.u32 %v9387_v27, 16  ;;  %v794_v50 = vshrl.u32 %v14717_v3, %v9326_v48  ;;  %v661_v54 = vsel %vm657_vm6, %v9328_v49, %v660_v38 }
  0xb7   : > { %v666_v55 = vsel %vm656_vm7, %v663_v40, %v665_v41  ;;  %v797_v56 = vor.u32 %v796_v34, %v795_v28  ;;  %v815_v57 = vsel %vm813_vm8, %v803_v17, 2102212464  ;;  %v819_v58 = vsel %vm813_vm8, %v806_v21, 920167782 }
  0xb8   : > { %v830_v62 = vshrl.u32 %v825_v44, 16  ;;  %v943_v63 = vadd.s32 1, %v8528_v43  ;;  %v1866_v0 = vand.u32 2139095040, %v9411_v46  ;;  %v673_v48 = vshrl.u32 %v9349_v61, 16 }
  0xb9   : > { %v696_v1 = vand.u32 65535, %v666_v55  ;;  %v828_v2 = vshrl.u32 %v9385_v26, 16  ;;  %v940_v49 = vand.u32 8388607, %v14711_v36  ;;  %v9436_v5 = vsel %vm656_vm7, %v659_v47, %v661_v54 }
  0xba   : > { %14999 = vst [vmem:[#allocation10_spill] sm:$0xff] %v9436_v5  ;;  %vm9438_vm12 = vc.u32 %v676_v52, %v680_v53  ;;  %v697_v7 = vshrl.u32 %v666_v55, 16  ;;  %v814_v8 = vsel %vm810_vm9, %v794_v50, %v797_v56  ;;  %v816_v9 = vsel %vm812_vm10, %v800_v14, %v815_v57 }
  0xbb   : > { %v818_v10 = vsel %vm810_vm9, %v797_v56, %v800_v14  ;;  %v820_v11 = vsel %vm812_vm10, %v803_v17, %v819_v58  ;;  %v829_v35 = vand.u32 65535, %v825_v44  ;;  %v9451_v18 = vmul.u32 %v830_v62, %v9408_v45 }
  0xbc   : > { %vm944_vm13 = vcmp.gt.s32.totalorder %v943_v63, 0  ;;  %v14710_v20 = vand.u32 2147483647, %v9432_v4  ;;  %v1867_v21 = vshrl.u32 %v1866_v0, 23  ;;  %v9454_v22 = vmul.u32 %v674_v25, %v673_v48 }
  0xbd   : > { %15002 = vst [vmem:[#allocation11_spill] sm:$0xff] %v9451_v18  ;;  %v679_v23 = vmul.u32 %v675_v13, %v673_v48  ;;  %v9456_v24 = vmul.u32 %v696_v1, %v672_v12  ;;  %v9460_v14 = vmul.u32 %v697_v7, %v672_v12  ;;  %v9462_v32 = vmul.u32 %v696_v1, %v673_v48 }
  0xbe   : > { %15003 = vst [vmem:[#allocation12_spill] sm:$0xff] %v9454_v22  ;;  %v821_v17 = vsel %vm811_vm11, %v818_v10, %v820_v11  ;;  %v941_v28 = vor.u32 8388608, %v940_v49  ;;  %v685_v34 = vsel %vm9438_vm12, 1, %v14715_v15  ;;  %v9471_v13 = vsel %vm811_vm11, %v814_v8, %v816_v9  ;;  %v9510_v11 = vpop.f32.mrf.mxu1 }
  0xbf   : > { %15004 = vst [vmem:[#allocation13_spill] sm:$0xff] %v9456_v24  ;;  %v831_v25 = vmul.u32 %v829_v35, %v9408_v45  ;;  %v945_v38 = vsel %vm944_vm13, %v943_v63, 0  ;;  %v835_v12 = vshll.u32 %v9451_v18, 16  ;;  %v1091_v40 = vand.u32 2139095040, %v9432_v4 }
  0xc0   : > { %15005 = vst [vmem:[#allocation14_spill] sm:$0xff] %v9460_v14  ;;  %v1095_v41 = vand.u32 8388607, %v14710_v20  ;;  %v8546_v43 = vadd.s32 4294967169, %v1867_v21  ;;  %v9479_v47 = vmul.u32 %v697_v7, %v673_v48  ;;  %v851_v50 = vand.u32 65535, %v821_v17 }
  0xc1   : > { %15006 = vst [vmem:[#allocation15_spill] sm:$0xff] %v9462_v32  ;;  %v852_v54 = vshrl.u32 %v821_v17, 16  ;;  %v9481_v59 = vadd.s32 %v680_v53, %v676_v52  ;;  %v9483_v55 = vmul.u32 %v829_v35, %v828_v2  ;;  %v947_v56 = vand.u32 31, %v945_v38 }
  0xc2   : > { %15007 = vst [vmem:[#allocation16_spill] sm:$0xff] %v9471_v13  ;;  %v9485_v57 = vshll.u32 %v941_v28, 8  ;;  %v9487_v58 = vadd.s32 %v685_v34, %v679_v23  ;;  %v14714_v0 = vand.u32 2147483647, %v9411_v46  ;;  %v1873_v1 = vadd.s32 1, %v8546_v43 }
  0xc3   : > { %15008 = vst [vmem:[#allocation17_spill] sm:$0xff] %v9479_v47  ;;  %v9492_v49 = vmul.u32 %v830_v62, %v828_v2  ;;  %vm839_vm14 = vc.u32 %v831_v25, %v835_v12  ;;  %v1092_v48 = vshrl.u32 %v1091_v40, 23  ;;  %v1096_v6 = vor.u32 8388608, %v1095_v41 }
  0xc4   : > { %15009 = vst [vmem:[#allocation18_spill] sm:$0xff] %v9481_v59  ;;  %v9495_v52 = vmul.u32 %v851_v50, %v9408_v45  ;;  %v9498_v53 = vmul.u32 %v852_v54, %v9408_v45  ;;  %v9500_v7 = vmul.u32 %v851_v50, %v828_v2  ;;  %vm1874_vm15 = vcmp.gt.s32.totalorder %v1873_v1, 0 }
  0xc5   : > { %15010 = vst [vmem:[#allocation19_spill] sm:$0xff] %v9483_v55  ;;  %v9503_v9 = vmul.u32 %v852_v54, %v828_v2  ;;  %v9505_v10 = vsub.s32 32, %v947_v56  ;;  %v9508_v62 = vand.u32 65535, %v9485_v57  ;;  %v9513_v35 = vsel %vm839_vm14, 1, %v14715_v15 }
  0xc6   : > { %15011 = vst [vmem:[#allocation20_spill] sm:$0xff] %v9485_v57  ;;  %v9515_v21 = vadd.s32 %v835_v12, %v831_v25  ;;  %v9518_v45 = vshrl.u32 %v9485_v57, 16  ;;  %v1870_v23 = vand.u32 8388607, %v14714_v0  ;;  %v9522_v2 = vshrl.u32 %v945_v38, 5 }
  0xc7   : > { %15012 = vst [vmem:[#allocation21_spill] sm:$0xff] %v9487_v58  ;;  %v9524_v17 = vadd.s32 4294967169, %v1092_v48  ;;  %v9526_v28 = vshll.u32 %v1096_v6, 8  ;;  %v1875_v34 = vsel %vm1874_vm15, %v1873_v1, 0  ;;  %v950_v40 = vshll.u32 %v14717_v3, %v947_v56 }
  0xc8   : > { %15013 = vst [vmem:[#allocation22_spill] sm:$0xff] %v9495_v52  ;;  %v9530_v41 = vshll.u32 %v14723_v37, %v947_v56  ;;  %v1877_v25 = vand.u32 31, %v1875_v34  ;;  %v2021_v12 = vand.u32 2139095040, %v9510_v11  ;;  %v9535_v43 = vshrl.u32 %v14717_v3, %v9505_v10 }
  0xc9   : > { %15014 = vst [vmem:[#allocation23_spill] sm:$0xff] %v9498_v53  ;;  %v9538_v38 = vshll.u32 %v14727_v39, %v947_v56  ;;  %v9541_v50 = vshll.u32 %v14731_v42, %v947_v56  ;;  %v9544_v54 = vshll.u32 %v14735_v31, %v947_v56  ;;  %v1871_v1 = vor.u32 8388608, %v1870_v23 }
  0xca   : > { %15015 = vst [vmem:[#allocation24_spill] sm:$0xff] %v9500_v7  ;;  %v9546_v48 = vshrl.u32 %v1875_v34, 5  ;;  %v1878_v6 = vsub.s32 32, %v1877_v25  ;;  %v1880_v20 = vshll.u32 %v14717_v3, %v1877_v25  ;;  %v951_v36 = vshrl.u32 %v14723_v37, %v9505_v10 }
  0xcb   : > { %15016 = vst [vmem:[#allocation25_spill] sm:$0xff] %v9503_v9  ;;  %v1883_v51 = vshll.u32 %v14723_v37, %v1877_v25  ;;  %v1886_v30 = vshll.u32 %v14727_v39, %v1877_v25  ;;  %v1889_v63 = vshll.u32 %v14731_v42, %v1877_v25  ;;  %v9556_v29 = vshrl.u32 %v14727_v39, %v9505_v10 }
  0xcc   : > { %15017 = vst [vmem:[#allocation26_spill] sm:$0xff] %v9515_v21  ;;  %v1881_v56 = vshrl.u32 %v14723_v37, %v1878_v6  ;;  %v1884_v23 = vshrl.u32 %v14727_v39, %v1878_v6  ;;  %v2022_v34 = vshrl.u32 %v2021_v12, 23  ;;  %v1887_v8 = vshrl.u32 %v14731_v42, %v1878_v6 }
  0xcd   : > { %15018 = vst [vmem:[#allocation27_spill] sm:$0xff] %v9526_v28  ;;  %v1890_v44 = vshrl.u32 %v14735_v31, %v1878_v6  ;;  %v1892_v0 = vshll.u32 %v14735_v31, %v1877_v25  ;;  %v1893_v15 = vshrl.u32 %v14729_v33, %v1878_v6  ;;  %vm1895_vm2 = vcmp.lt.s32.totalorder %v9546_v48, 1 }
  0xce   : > { %v9564_v3 = vor.u32 %v1881_v56, %v1880_v20  ;;  %v9566_v4 = vor.u32 %v1884_v23, %v1883_v51  ;;  %v9569_v60 = vshll.u32 %v1871_v1, 8  ;;  %v1888_v37 = vor.u32 %v1887_v8, %v1886_v30 }
  0xcf   : > { %v1891_v19 = vor.u32 %v1890_v44, %v1889_v63  ;;  %v1894_v39 = vor.u32 %v1893_v15, %v1892_v0  ;;  %vm1897_vm3 = vcmp.lt.s32.totalorder %v9546_v48, 3  ;;  %vm1896_vm4 = vcmp.lt.s32.totalorder %v9546_v48, 2 }
  0xd0   : > { %vm1898_vm5 = vcmp.lt.s32.totalorder %v9546_v48, 4  ;;  %v1903_v20 = vsel %vm1895_vm2, %v9564_v3, %v9566_v4  ;;  %v8549_v51 = vadd.s32 4294967169, %v2022_v34  ;;  %v1907_v30 = vsel %vm1895_vm2, %v9566_v4, %v1888_v37 }
  0xd1   : > { %v1904_v25 = vsel %vm1898_vm5, %v1891_v19, 920167782  ;;  %v1908_v15 = vsel %vm1898_vm5, %v1894_v39, 1326507024  ;;  %v1912_v8 = vand.u32 65535, %v9569_v60  ;;  %v1913_v12 = vshrl.u32 %v9569_v60, 16 }
  0xd2   : > { %v1905_v63 = vsel %vm1897_vm3, %v1888_v37, %v1904_v25  ;;  %v1909_v0 = vsel %vm1897_vm3, %v1891_v19, %v1908_v15  ;;  %v9594_v1 = vshrl.u32 %v14731_v42, %v9505_v10  ;;  %v2028_v23 = vadd.s32 1, %v8549_v51 }
  0xd3   : > { %v1906_v56 = vsel %vm1896_vm4, %v1903_v20, %v1905_v63  ;;  %v1910_v39 = vsel %vm1896_vm4, %v1907_v30, %v1909_v0  ;;  %v9600_v19 = vor.u32 %v951_v36, %v950_v40  ;;  %v9604_v15 = vshrl.u32 %v14735_v31, %v9505_v10 }
  0xd4   : > { %v1914_v34 = vand.u32 65535, %v1910_v39  ;;  %v1915_v25 = vshrl.u32 %v1910_v39, 16  ;;  %v1936_v44 = vand.u32 65535, %v1906_v56  ;;  %v1937_v33 = vshrl.u32 %v1906_v56, 16 }
  0xd5   : > { %v15019_v42 = vmov 1326507024   ;;  %v15020_v20 = vand.u32 2147483647, %v9510_v11  ;;  %v15021_v26 = vmov 683565275   ;;  %v9657_v27 = vor.u32 %v9556_v29, %v9530_v41 }
  0xd6   : > { %v9608_v13 = vshrl.u32 %v15019_v42, %v9505_v10  ;;  %v1879_v30 = vshrl.u32 %v15021_v26, %v1878_v6  ;;  %v1916_v51 = vmul.u32 %v1914_v34, %v1912_v8  ;;  %v1917_v0 = vmul.u32 %v1915_v25, %v1912_v8 }
  0xd7   : > { %v2025_v63 = vand.u32 8388607, %v15020_v20  ;;  %v9613_v39 = vmul.u32 %v1914_v34, %v1913_v12  ;;  %v1938_v56 = vmul.u32 %v1936_v44, %v1912_v8  ;;  %v1939_v36 = vmul.u32 %v1937_v33, %v1912_v8 }
  0xd8   : > { %v9615_v40 = vmul.u32 %v1936_v44, %v1913_v12  ;;  %vm2029_vm6 = vcmp.gt.s32.totalorder %v2028_v23, 0  ;;  %v1900_v31 = vsel %vm1898_vm5, %v1888_v37, 2102212464  ;;  %v1919_v16 = vmul.u32 %v1915_v25, %v1913_v12 }
  0xd9   : > { %v1920_v10 = vshll.u32 %v1917_v0, 16  ;;  %v1922_v5 = vshll.u32 %v9613_v39, 16  ;;  %v1941_v61 = vmul.u32 %v1937_v33, %v1913_v12  ;;  %v1942_v20 = vshll.u32 %v1939_v36, 16 }
  0xda   : > { %v1944_v6 = vshll.u32 %v9615_v40, 16  ;;  %v2026_v9 = vor.u32 8388608, %v2025_v63  ;;  %v1921_v52 = vshrl.u32 %v1917_v0, 16  ;;  %v2030_v7 = vsel %vm2029_vm6, %v2028_v23, 0 }
  0xdb   : > { %vm1924_vm7 = vc.u32 %v1916_v51, %v1920_v10  ;;  %v1926_v34 = vadd.s32 %v1920_v10, %v1916_v51  ;;  %v15022_v8 = vmov 0   ;;  %v1943_v18 = vshrl.u32 %v1939_v36, 16 }
  0xdc   : > { %v1925_v44 = vsel %vm1924_vm7, 1, %v15022_v8  ;;  %vm1946_vm8 = vc.u32 %v1938_v56, %v1942_v20  ;;  %v1948_v53 = vadd.s32 %v1942_v20, %v1938_v56  ;;  %v2032_v25 = vand.u32 31, %v2030_v7 }
  0xdd   : > { %v1927_v21 = vadd.s32 %v1925_v44, %v1919_v16  ;;  %vm1928_vm9 = vc.u32 %v1926_v34, %v1922_v5  ;;  %v1947_v37 = vsel %vm1946_vm8, 1, %v15022_v8  ;;  %v9624_v55 = vshrl.u32 %v2030_v7, 5 }
  0xde   : > { %v1929_v33 = vsel %vm1928_vm9, 1, %v15022_v8  ;;  %v1949_v12 = vadd.s32 %v1947_v37, %v1941_v61  ;;  %vm1950_vm10 = vc.u32 %v1948_v53, %v1944_v6  ;;  %v9627_v23 = vsub.s32 32, %v2032_v25 }
  0xdf   : > { %v1931_v63 = vadd.s32 %v1929_v33, %v1927_v21  ;;  %v1951_v51 = vsel %vm1950_vm10, 1, %v15022_v8  ;;  %v2035_v0 = vshll.u32 %v15021_v26, %v2032_v25  ;;  %v15023_v56 = vmov 2475754826  }
  0xe0   : > { %v1953_v36 = vadd.s32 %v1951_v51, %v1949_v12  ;;  %v2038_v16 = vshll.u32 %v15023_v56, %v2032_v25  ;;  %v15024_v5 = vmov 2131351028   ;;  %v15025_v20 = vmov 2102212464  }
  0xe1   : > { %v2041_v10 = vshll.u32 %v15024_v5, %v2032_v25  ;;  %v2044_v34 = vshll.u32 %v15025_v20, %v2032_v25  ;;  %v1923_v44 = vshrl.u32 %v9613_v39, 16  ;;  %v2036_v61 = vshrl.u32 %v15023_v56, %v9627_v23 }
  0xe2   : > { %v2039_v7 = vshrl.u32 %v15024_v5, %v9627_v23  ;;  %v9638_v21 = vshll.u32 %v2026_v9, 8  ;;  %v1945_v37 = vshrl.u32 %v9615_v40, 16  ;;  %v2042_v33 = vshrl.u32 %v15025_v20, %v9627_v23 }
  0xe3   : > { %v15026_v12 = vmov 920167782   ;;  %v1954_v24 = vadd.s32 %v1953_v36, %v1943_v18  ;;  %v9646_v39 = vor.u32 %v2036_v61, %v2035_v0  ;;  %v2048_v14 = vshrl.u32 %v15019_v42, %v9627_v23 }
  0xe4   : > { %v2045_v51 = vshrl.u32 %v15026_v12, %v9627_v23  ;;  %v2047_v47 = vshll.u32 %v15026_v12, %v2032_v25  ;;  %v9648_v32 = vor.u32 %v2039_v7, %v2038_v16  ;;  %v1932_v9 = vadd.s32 %v1931_v63, %v1921_v52 }
  0xe5   : > { %v9652_v58 = vor.u32 %v2042_v33, %v2041_v10  ;;  %vm2050_vm11 = vcmp.lt.s32.totalorder %v9624_v55, 1  ;;  %v1899_v18 = vsel %vm1895_vm2, %v1879_v30, %v9564_v3  ;;  %v1901_v25 = vsel %vm1897_vm3, %v9566_v4, %v1900_v31 }
  0xe6   : > { %v2046_v40 = vor.u32 %v2045_v51, %v2044_v34  ;;  %v2049_v0 = vor.u32 %v2048_v14, %v2047_v47  ;;  %vm2051_vm12 = vcmp.lt.s32.totalorder %v9624_v55, 2  ;;  %vm2052_vm13 = vcmp.lt.s32.totalorder %v9624_v55, 3 }
  0xe7   : > { %vm2053_vm14 = vcmp.lt.s32.totalorder %v9624_v55, 4  ;;  %v2067_v52 = vand.u32 65535, %v9638_v21  ;;  %vm968_vm15 = vcmp.lt.s32.totalorder %v9522_v2, 4  ;;  %v1955_v29 = vadd.s32 %v1954_v24, %v1945_v37 }
  0xe8   : > { %v2058_v3 = vsel %vm2050_vm11, %v9646_v39, %v9648_v32  ;;  %v2059_v31 = vsel %vm2053_vm14, %v2046_v40, 920167782  ;;  %v2062_v4 = vsel %vm2050_vm11, %v9648_v32, %v9652_v58  ;;  %v9680_v14 = vadd.s32 %v1932_v9, %v1923_v44 }
  0xe9   : > { %v9682_v47 = vadd.s32 %v1948_v53, %v1944_v6  ;;  %v2060_v24 = vsel %vm2052_vm13, %v9652_v58, %v2059_v31  ;;  %v2063_v41 = vsel %vm2053_vm14, %v2049_v0, 1326507024  ;;  %v9691_v30 = vor.u32 %v9594_v1, %v9538_v38 }
  0xea   : > { %v9694_v63 = vadd.s32 1, %v9524_v17  ;;  %v2061_v36 = vsel %vm2051_vm12, %v2058_v3, %v2060_v24  ;;  %v2064_v53 = vsel %vm2052_vm13, %v2046_v40, %v2063_v41  ;;  %v2068_v16 = vshrl.u32 %v9638_v21, 16 }
  0xeb   : > { %v2065_v6 = vsel %vm2051_vm12, %v2062_v4, %v2064_v53  ;;  %v2091_v10 = vand.u32 65535, %v2061_v36  ;;  %v2092_v34 = vshrl.u32 %v2061_v36, 16  ;;  %vm965_vm2 = vcmp.lt.s32.totalorder %v9522_v2, 1 }
  0xec   : > { %v1902_v38 = vsel %vm1896_vm4, %v1899_v18, %v1901_v25  ;;  %v1959_v17 = vadd.s32 1, %v1955_v29  ;;  %v2069_v1 = vand.u32 65535, %v2065_v6  ;;  %v2070_v44 = vshrl.u32 %v2065_v6, 16 }
  0xed   : > { %vm1958_vm3 = vc.u32 %v9680_v14, %v9682_v47  ;;  %v2093_v61 = vmul.u32 %v2091_v10, %v2067_v52  ;;  %v2094_v7 = vmul.u32 %v2092_v34, %v2067_v52  ;;  %v2095_v37 = vmul.u32 %v2091_v10, %v2068_v16 }
  0xee   : > { %v964_v33 = vor.u32 %v9608_v13, %v9544_v54  ;;  %vm967_vm5 = vcmp.lt.s32.totalorder %v9522_v2, 3  ;;  %v2071_v51 = vmul.u32 %v2069_v1, %v2067_v52  ;;  %v2072_v9 = vmul.u32 %v2070_v44, %v2067_v52 }
  0xef   : > { %v2073_v40 = vmul.u32 %v2069_v1, %v2068_v16  ;;  %v1956_v48 = vmul.u32 %v9569_v60, %v1902_v38  ;;  %v2096_v18 = vmul.u32 %v2092_v34, %v2068_v16  ;;  %v2097_v25 = vshll.u32 %v2094_v7, 16 }
  0xf0   : > { %v2099_v0 = vshll.u32 %v2095_v37, 16  ;;  %v1960_v3 = vsel %vm1958_vm3, %v1959_v17, %v1955_v29  ;;  %v2074_v31 = vmul.u32 %v2070_v44, %v2068_v16  ;;  %v2075_v4 = vshll.u32 %v2072_v9, 16 }
  0xf1   : > { %v2077_v24 = vshll.u32 %v2073_v40, 16  ;;  %v961_v41 = vor.u32 %v9604_v15, %v9541_v50  ;;  %vm966_vm4 = vcmp.lt.s32.totalorder %v9522_v2, 2  ;;  %v970_v13 = vsel %vm968_vm15, %v9691_v30, 2102212464  ;;  %v9724_v15 = vpop.f32.mrf.mxu2 }
  0xf2   : > { %vm2101_vm6 = vc.u32 %v2093_v61, %v2097_v25  ;;  %v2103_v54 = vadd.s32 %v2097_v25, %v2093_v61  ;;  %v978_v60 = vsel %vm968_vm15, %v964_v33, 1326507024  ;;  %vm2079_vm7 = vc.u32 %v2071_v51, %v2075_v4  ;;  %15027 = vst [vmem:[#allocation28_spill] sm:$0xff] %v9724_v15 }
  0xf3   : > { %v2081_v52 = vadd.s32 %v2075_v4, %v2071_v51  ;;  %v2102_v29 = vsel %vm2101_vm6, 1, %v15022_v8  ;;  %v9721_v36 = vadd.s32 %v1960_v3, %v1956_v48  ;;  %v2080_v53 = vsel %vm2079_vm7, 1, %v15022_v8 }
  0xf4   : > { %v2104_v50 = vadd.s32 %v2102_v29, %v2096_v18  ;;  %vm2105_vm8 = vc.u32 %v2103_v54, %v2099_v0  ;;  %v2076_v6 = vshrl.u32 %v2072_v9, 16  ;;  %v2082_v16 = vadd.s32 %v2080_v53, %v2074_v31 }
  0xf5   : > { %vm2083_vm9 = vc.u32 %v2081_v52, %v2077_v24  ;;  %v2098_v10 = vshrl.u32 %v2094_v7, 16  ;;  %v974_v34 = vsel %vm968_vm15, %v961_v41, 920167782  ;;  %v977_v38 = vsel %vm965_vm2, %v9657_v27, %v9691_v30 }
  0xf6   : > { %v2084_v17 = vsel %vm2083_vm9, 1, %v15022_v8  ;;  %v2106_v1 = vsel %vm2105_vm8, 1, %v15022_v8  ;;  %v2100_v61 = vshrl.u32 %v2095_v37, 16  ;;  %v2176_v51 = vand.u32 2139095040, %v9724_v15 }
  0xf7   : > { %v2086_v44 = vadd.s32 %v2084_v17, %v2082_v16  ;;  %v2108_v33 = vadd.s32 %v2106_v1, %v2104_v50  ;;  %v979_v7 = vsel %vm967_vm5, %v961_v41, %v978_v60  ;;  %v2034_v9 = vshrl.u32 %v15021_v26, %v9627_v23 }
  0xf8   : > { %v2055_v48 = vsel %vm2053_vm14, %v9652_v58, 2102212464  ;;  %v2078_v18 = vshrl.u32 %v2073_v40, 16  ;;  %v1962_v25 = vadd.s32 536870912, %v9721_v36  ;;  %v2177_v4 = vshrl.u32 %v2176_v51, 23 }
  0xf9   : > { %v2087_v3 = vadd.s32 %v2086_v44, %v2076_v6  ;;  %v2109_v31 = vadd.s32 %v2108_v33, %v2098_v10  ;;  %v969_v37 = vsel %vm965_vm2, %v9535_v43, %v9600_v19  ;;  %v971_v24 = vsel %vm967_vm5, %v9657_v27, %v970_v13 }
  0xfa   : > { %v973_v58 = vsel %vm965_vm2, %v9600_v19, %v9657_v27  ;;  %v975_v23 = vsel %vm967_vm5, %v9691_v30, %v974_v34  ;;  %v980_v40 = vsel %vm966_vm4, %v977_v38, %v979_v7  ;;  %vm1099_vm10 = vcmp.gt.s32.totalorder %v9694_v63, 0 }
  0xfb   : > { %v2110_v41 = vadd.s32 %v2109_v31, %v2100_v61  ;;  %v8552_v43 = vadd.s32 4294967169, %v2177_v4  ;;  %v2054_v13 = vsel %vm2050_vm11, %v2034_v9, %v9646_v39  ;;  %v2056_v60 = vsel %vm2052_vm13, %v9648_v32, %v2055_v48 }
  0xfc   : > { %v9766_v27 = vadd.s32 %v2087_v3, %v2078_v18  ;;  %v9768_v19 = vadd.s32 %v2103_v54, %v2099_v0  ;;  %v9772_v30 = vadd.s32 %v9513_v35, %v9492_v49  ;;  %v9776_v52 = vsel %vm966_vm4, %v973_v58, %v975_v23  ;;  %v9791_v35 = vpop.f32.mrf.mxu3 }
  0xfd   : > { %v9779_v29 = vand.u32 65535, %v9526_v28  ;;  %v9781_v39 = vshrl.u32 %v1962_v25, 30  ;;  %v9785_v32 = vsel %vm966_vm4, %v969_v37, %v971_v24  ;;  %v9788_v0 = vshrl.u32 %v9526_v28, 16  ;;  %15031 = vst [vmem:[#allocation32_spill] sm:$0xff] %v9791_v35 }
  0xfe   : > { %15028 = vst [vmem:[#allocation29_spill] sm:$0xff] %v9772_v30  ;;  %v14752_v54 = vand.u32 2147483647, %v9724_v15  ;;  %v2183_v49 = vadd.s32 1, %v8552_v43  ;;  %v984_v53 = vand.u32 65535, %v980_v40  ;;  %v1100_v50 = vsel %vm1099_vm10, %v9694_v63, 0 }
  0xff   : > { %15029 = vst [vmem:[#allocation30_spill] sm:$0xff] %v9781_v39  ;;  %v2057_v6 = vsel %vm2051_vm12, %v2054_v13, %v2056_v60  ;;  %v2114_v16 = vadd.s32 1, %v2110_v41  ;;  %v985_v2 = vshrl.u32 %v980_v40, 16  ;;  %v1006_v10 = vand.u32 65535, %v9776_v52 }
 0x100   : > { %15030 = vst [vmem:[#allocation31_spill] sm:$0xff] %v9785_v32  ;;  %vm2113_vm11 = vc.u32 %v9766_v27, %v9768_v19  ;;  %vm2184_vm13 = vcmp.gt.s32.totalorder %v2183_v49, 0  ;;  %v1964_v38 = vshll.u32 %v9781_v39, 30  ;;  %v2331_v1 = vand.u32 2139095040, %v9791_v35 }
 0x101   : > { %v2185_v17 = vsel %vm2184_vm13, %v2183_v49, 0  ;;  %v1007_v63 = vshrl.u32 %v9776_v52, 16  ;;  %v9806_v55 = vshrl.u32 %v1100_v50, 5  ;;  %v2111_v44 = vmul.u32 %v9638_v21, %v2057_v6 }
 0x102   : > { %v2180_v61 = vand.u32 8388607, %v14752_v54  ;;  %v9812_v33 = vmul.u32 %v984_v53, %v9508_v62  ;;  %v9814_v51 = vand.u32 31, %v1100_v50  ;;  %v2115_v7 = vsel %vm2113_vm11, %v2114_v16, %v2110_v41 }
 0x103   : > { %v2187_v9 = vand.u32 31, %v2185_v17  ;;  %v9817_v48 = vmul.u32 %v985_v2, %v9508_v62  ;;  %v9820_v18 = vmul.u32 %v984_v53, %v9518_v45  ;;  %v9823_v25 = vmul.u32 %v985_v2, %v9518_v45 }
 0x104   : > { %v9826_v21 = vmul.u32 %v1006_v10, %v9508_v62  ;;  %v9829_v3 = vsub.s32 %v9721_v36, %v1964_v38  ;;  %v14751_v4 = vand.u32 2147483647, %v9791_v35  ;;  %v2332_v37 = vshrl.u32 %v2331_v1, 23 }
 0x105   : > { %15032 = vst [vmem:[#allocation33_spill] sm:$0xff] %v9817_v48  ;;  %v9831_v31 = vsub.s32 32, %v2187_v9  ;;  %v9834_v24 = vadd.s32 %v2115_v7, %v2111_v44  ;;  %v2181_v58 = vor.u32 8388608, %v2180_v61  ;;  %v9836_v23 = vshrl.u32 %v2185_v17, 5 }
 0x106   : > { %15033 = vst [vmem:[#allocation34_spill] sm:$0xff] %v9820_v18  ;;  %v2190_v40 = vshll.u32 %v15021_v26, %v2187_v9  ;;  %v2193_v43 = vshll.u32 %v15023_v56, %v2187_v9  ;;  %v2196_v60 = vshll.u32 %v15024_v5, %v2187_v9  ;;  %v2199_v52 = vshll.u32 %v15025_v20, %v2187_v9 }
 0x107   : > { %15034 = vst [vmem:[#allocation35_spill] sm:$0xff] %v9826_v21  ;;  %v2191_v41 = vshrl.u32 %v15023_v56, %v9831_v31  ;;  %v2194_v36 = vshrl.u32 %v15024_v5, %v9831_v31  ;;  %v2197_v13 = vshrl.u32 %v15025_v20, %v9831_v31  ;;  %v2200_v49 = vshrl.u32 %v15026_v12, %v9831_v31 }
 0x108   : > { %v2203_v53 = vshrl.u32 %v15019_v42, %v9831_v31  ;;  %v2202_v16 = vshll.u32 %v15026_v12, %v2187_v9  ;;  %v8555_v2 = vadd.s32 4294967169, %v2332_v37  ;;  %v9858_v38 = vmul.u32 %v1007_v63, %v9508_v62 }
 0x109   : > { %v9852_v50 = vor.u32 %v2191_v41, %v2190_v40  ;;  %v9854_v6 = vor.u32 %v2194_v36, %v2193_v43  ;;  %v2117_v17 = vadd.s32 536870912, %v9834_v24  ;;  %v2198_v1 = vor.u32 %v2197_v13, %v2196_v60 }
 0x10a   : > { %15035 = vst [vmem:[#allocation36_spill] sm:$0xff] %v9858_v38  ;;  %v2201_v44 = vor.u32 %v2200_v49, %v2199_v52  ;;  %v9862_v61 = vmul.u32 %v1006_v10, %v9518_v45  ;;  %vm1966_vm12 = vcmp.lt.s32.totalorder %v9829_v3, 0  ;;  %v2204_v7 = vor.u32 %v2203_v53, %v2202_v16 }
 0x10b   : > { %vm2205_vm14 = vcmp.lt.s32.totalorder %v9836_v23, 1  ;;  %v1967_v40 = vsub.s32 0, %v9829_v3  ;;  %vm2208_vm15 = vcmp.lt.s32.totalorder %v9836_v23, 4  ;;  %v2335_v9 = vand.u32 8388607, %v14751_v4 }
 0x10c   : > { %15036 = vst [vmem:[#allocation37_spill] sm:$0xff] %v9862_v61  ;;  %v2213_v62 = vsel %vm2205_vm14, %v9852_v50, %v9854_v6  ;;  %vm2207_vm2 = vcmp.lt.s32.totalorder %v9836_v23, 3  ;;  %v2214_v10 = vsel %vm2208_vm15, %v2201_v44, 920167782  ;;  %v9877_v37 = vshll.u32 %v2181_v58, 8 }
 0x10d   : > { %v2338_v41 = vadd.s32 1, %v8555_v2  ;;  %v9879_v43 = vshrl.u32 %v2117_v17, 30  ;;  %vm2206_vm3 = vcmp.lt.s32.totalorder %v9836_v23, 2  ;;  %v2215_v36 = vsel %vm2207_vm2, %v2198_v1, %v2214_v10 }
 0x10e   : > { %v2217_v13 = vsel %vm2205_vm14, %v9854_v6, %v2198_v1  ;;  %v9888_v60 = vmul.u32 %v1007_v63, %v9518_v45  ;;  %v9891_v52 = vsub.s32 32, %v9814_v51  ;;  %v2216_v58 = vsel %vm2206_vm3, %v2213_v62, %v2215_v36 }
 0x10f   : > { %15037 = vst [vmem:[#allocation38_spill] sm:$0xff] %v9879_v43  ;;  %v2218_v49 = vsel %vm2208_vm15, %v2204_v7, 1326507024  ;;  %v9900_v53 = vsel %vm1966_vm12, %v1967_v40, %v9829_v3  ;;  %v2247_v2 = vshrl.u32 %v2216_v58, 16  ;;  %v2336_v45 = vor.u32 8388608, %v2335_v9 }
 0x110   : > { %15038 = vst [vmem:[#allocation39_spill] sm:$0xff] %v9888_v60  ;;  %v2219_v16 = vsel %vm2207_vm2, %v2201_v44, %v2218_v49  ;;  %v2222_v17 = vand.u32 65535, %v9877_v37  ;;  %v2246_v10 = vand.u32 65535, %v2216_v58  ;;  %vm2339_vm5 = vcmp.gt.s32.totalorder %v2338_v41, 0 }
 0x111   : > { %v2220_v63 = vsel %vm2206_vm3, %v2217_v13, %v2219_v16  ;;  %v2119_v62 = vshll.u32 %v9879_v43, 30  ;;  %v2223_v7 = vshrl.u32 %v9877_v37, 16  ;;  %v9911_v40 = vshll.u32 %v15023_v56, %v9814_v51 }
 0x112   : > { %v2224_v36 = vand.u32 65535, %v2220_v63  ;;  %v2225_v34 = vshrl.u32 %v2220_v63, 16  ;;  %v9915_v44 = vshll.u32 %v15024_v5, %v9814_v51  ;;  %v9919_v9 = vshll.u32 %v15025_v20, %v9814_v51 }
 0x113   : > { %v2249_v13 = vmul.u32 %v2247_v2, %v2222_v17  ;;  %v9923_v58 = vshll.u32 %v15026_v12, %v9814_v51  ;;  %v2340_v63 = vsel %vm2339_vm5, %v2338_v41, 0  ;;  %v9927_v4 = vshrl.u32 %v15019_v42, %v9891_v52 }
 0x114   : > { %v2227_v49 = vmul.u32 %v2225_v34, %v2222_v17  ;;  %v2228_v16 = vmul.u32 %v2224_v36, %v2223_v7  ;;  %v1969_v54 = vclz %v9900_v53  ;;  %v2250_v32 = vmul.u32 %v2246_v10, %v2223_v7 }
 0x115   : > { %v9930_v57 = vshll.u32 %v2336_v45, 8  ;;  %v9933_v60 = vsub.s32 %v9834_v24, %v2119_v62  ;;  %v2189_v21 = vshrl.u32 %v15021_v26, %v9831_v31  ;;  %v2226_v61 = vmul.u32 %v2224_v36, %v2222_v17 }
 0x116   : > { %v2230_v38 = vshll.u32 %v2227_v49, 16  ;;  %v2210_v41 = vsel %vm2208_vm15, %v2198_v1, 2102212464  ;;  %v2248_v30 = vmul.u32 %v2246_v10, %v2222_v17  ;;  %v2252_v59 = vshll.u32 %v2249_v13, 16 }
 0x117   : > { %v2342_v22 = vand.u32 31, %v2340_v63  ;;  %v2229_v43 = vmul.u32 %v2225_v34, %v2223_v7  ;;  %v2232_v39 = vshll.u32 %v2228_v16, 16  ;;  %v2251_v35 = vmul.u32 %v2247_v2, %v2223_v7 }
 0x118   : > { %vm2234_vm4 = vc.u32 %v2226_v61, %v2230_v38  ;;  %v2236_v53 = vadd.s32 %v2230_v38, %v2226_v61  ;;  %v2254_v24 = vshll.u32 %v2250_v32, 16  ;;  %vm2256_vm6 = vc.u32 %v2248_v30, %v2252_v59 }
 0x119   : > { %v2235_v45 = vsel %vm2234_vm4, 1, %v15022_v8  ;;  %v2257_v31 = vsel %vm2256_vm6, 1, %v15022_v8  ;;  %v2258_v36 = vadd.s32 %v2252_v59, %v2248_v30  ;;  %v2209_v1 = vsel %vm2205_vm14, %v2189_v21, %v9852_v50 }
 0x11a   : > { %v2237_v62 = vadd.s32 %v2235_v45, %v2229_v43  ;;  %vm2238_vm7 = vc.u32 %v2236_v53, %v2232_v39  ;;  %v2259_v34 = vadd.s32 %v2257_v31, %v2251_v35  ;;  %v9945_v10 = vsub.s32 32, %v2342_v22 }
 0x11b   : > { %v2239_v17 = vsel %vm2238_vm7, 1, %v15022_v8  ;;  %v2211_v38 = vsel %vm2207_vm2, %v9854_v6, %v2210_v41  ;;  %v2231_v61 = vshrl.u32 %v2227_v49, 16  ;;  %vm2260_vm8 = vc.u32 %v2258_v36, %v2254_v24 }
 0x11c   : > { %v2241_v2 = vadd.s32 %v2239_v17, %v2237_v62  ;;  %v2233_v39 = vshrl.u32 %v2228_v16, 16  ;;  %v2261_v43 = vsel %vm2260_vm8, 1, %v15022_v8  ;;  %v9951_v59 = vshrl.u32 %v2340_v63, 5 }
 0x11d   : > { %v2346_v30 = vshrl.u32 %v15023_v56, %v9945_v10  ;;  %v2253_v50 = vshrl.u32 %v2249_v13, 16  ;;  %v2263_v35 = vadd.s32 %v2261_v43, %v2259_v34  ;;  %v2349_v7 = vshrl.u32 %v15024_v5, %v9945_v10 }
 0x11e   : > { %v2242_v21 = vadd.s32 %v2241_v2, %v2231_v61  ;;  %v2255_v53 = vshrl.u32 %v2250_v32, 16  ;;  %v2345_v6 = vshll.u32 %v15021_v26, %v2342_v22  ;;  %v2348_v49 = vshll.u32 %v15023_v56, %v2342_v22 }
 0x11f   : > { %v2352_v16 = vshrl.u32 %v15025_v20, %v9945_v10  ;;  %v9963_v63 = vadd.s32 %v2258_v36, %v2254_v24  ;;  %v2264_v45 = vadd.s32 %v2263_v35, %v2253_v50  ;;  %v2351_v62 = vshll.u32 %v15024_v5, %v2342_v22 }
 0x120   : > { %v9961_v41 = vadd.s32 %v2242_v21, %v2233_v39  ;;  %v9966_v13 = vor.u32 %v2346_v30, %v2345_v6  ;;  %v9968_v31 = vor.u32 %v2349_v7, %v2348_v49  ;;  %v2354_v32 = vshll.u32 %v15025_v20, %v2342_v22 }
 0x121   : > { %15040 = vst [vmem:[#allocation41_spill] sm:$0xff] %v9963_v63  ;;  %v2355_v17 = vshrl.u32 %v15026_v12, %v9945_v10  ;;  %v8547_v34 = vadd.s32 4294967294, %v1969_v54  ;;  %v2212_v61 = vsel %vm2206_vm3, %v2209_v1, %v2211_v38  ;;  %v2265_v2 = vadd.s32 %v2264_v45, %v2255_v53 }
 0x122   : > { %15039 = vst [vmem:[#allocation40_spill] sm:$0xff] %v9961_v41  ;;  %v2353_v39 = vor.u32 %v2352_v16, %v2351_v62  ;;  %vm2268_vm9 = vc.u32 %v9961_v41, %v9963_v63  ;;  %v2357_v36 = vshll.u32 %v15026_v12, %v2342_v22  ;;  %v2358_v43 = vshrl.u32 %v15019_v42, %v9945_v10 }
 0x123   : > { %v2356_v24 = vor.u32 %v2355_v17, %v2354_v32  ;;  %v2122_v30 = vsub.s32 0, %v9933_v60  ;;  %v2269_v21 = vadd.s32 1, %v2265_v2  ;;  %vm2360_vm10 = vcmp.lt.s32.totalorder %v9951_v59, 1 }
 0x124   : > { %v2377_v54 = vand.u32 65535, %v9930_v57  ;;  %v2266_v23 = vmul.u32 %v9877_v37, %v2212_v61  ;;  %v2359_v1 = vor.u32 %v2358_v43, %v2357_v36  ;;  %vm2363_vm11 = vcmp.lt.s32.totalorder %v9951_v59, 4 }
 0x125   : > { %v2368_v22 = vsel %vm2360_vm10, %v9966_v13, %v9968_v31  ;;  %v2270_v38 = vsel %vm2268_vm9, %v2269_v21, %v2265_v2  ;;  %vm2362_vm13 = vcmp.lt.s32.totalorder %v9951_v59, 3  ;;  %v2369_v50 = vsel %vm2363_vm11, %v2356_v24, 920167782  ;;  %v10012_v21 = vpop.f32.mrf.mxu0 }
 0x126   : > { %v2372_v35 = vsel %vm2360_vm10, %v9968_v31, %v2353_v39  ;;  %v2271_v7 = vadd.s32 %v2270_v38, %v2266_v23  ;;  %vm2361_vm12 = vcmp.lt.s32.totalorder %v9951_v59, 2  ;;  %v2370_v37 = vsel %vm2362_vm13, %v2353_v39, %v2369_v50  ;;  %15041 = vst [vmem:[#allocation42_spill] sm:$0xff] %v10012_v21 }
 0x127   : > { %v2373_v53 = vsel %vm2363_vm11, %v2359_v1, 1326507024  ;;  %vm2121_vm14 = vcmp.lt.s32.totalorder %v9933_v60, 0  ;;  %v2371_v6 = vsel %vm2361_vm12, %v2368_v22, %v2370_v37  ;;  %v2378_v16 = vshrl.u32 %v9930_v57, 16 }
 0x128   : > { %v2374_v49 = vsel %vm2362_vm13, %v2356_v24, %v2373_v53  ;;  %v2272_v45 = vadd.s32 536870912, %v2271_v7  ;;  %v2401_v32 = vand.u32 65535, %v2371_v6  ;;  %v2402_v17 = vshrl.u32 %v2371_v6, 16 }
 0x129   : > { %v2375_v62 = vsel %vm2361_vm12, %v2372_v35, %v2374_v49  ;;  %v1109_v61 = vshrl.u32 %v15024_v5, %v9891_v52  ;;  %v1112_v2 = vshrl.u32 %v15025_v20, %v9891_v52  ;;  %v1115_v24 = vshrl.u32 %v15026_v12, %v9891_v52 }
 0x12a   : > { %v2379_v36 = vand.u32 65535, %v2375_v62  ;;  %v2380_v43 = vshrl.u32 %v2375_v62, 16  ;;  %v2123_v23 = vsel %vm2121_vm14, %v2122_v30, %v9933_v60  ;;  %v2404_v1 = vmul.u32 %v2402_v17, %v2377_v54 }
 0x12b   : > { %v2405_v22 = vmul.u32 %v2401_v32, %v2378_v16  ;;  %v1119_v38 = vor.u32 %v9927_v4, %v9923_v58  ;;  %vm8548_vm15 = vcmp.lt.s32.totalorder %v8547_v34, 0  ;;  %v10019_v37 = vshrl.u32 %v2272_v45, 30 }
 0x12c   : > { %v2382_v50 = vmul.u32 %v2380_v43, %v2377_v54  ;;  %v2383_v35 = vmul.u32 %v2379_v36, %v2378_v16  ;;  %v2403_v53 = vmul.u32 %v2401_v32, %v2377_v54  ;;  %v2407_v6 = vshll.u32 %v2404_v1, 16 }
 0x12d   : > { %15042 = vst [vmem:[#allocation43_spill] sm:$0xff] %v10019_v37  ;;  %v1246_v49 = vand.u32 2139095040, %v10012_v21  ;;  %v2124_v62 = vclz %v2123_v23  ;;  %v2381_v15 = vmul.u32 %v2379_v36, %v2377_v54  ;;  %v2384_v20 = vmul.u32 %v2380_v43, %v2378_v16 }
 0x12e   : > { %v2385_v5 = vshll.u32 %v2382_v50, 16  ;;  %v2387_v42 = vshll.u32 %v2383_v35, 16  ;;  %v2406_v30 = vmul.u32 %v2402_v17, %v2378_v16  ;;  %v2409_v12 = vshll.u32 %v2405_v22, 16 }
 0x12f   : > { %vm2411_vm2 = vc.u32 %v2403_v53, %v2407_v6  ;;  %v2413_v58 = vadd.s32 %v2407_v6, %v2403_v53  ;;  %v10024_v45 = vsel %vm8548_vm15, 0, %v8547_v34  ;;  %v2274_v32 = vshll.u32 %v10019_v37, 30 }
 0x130   : > { %vm2389_vm3 = vc.u32 %v2381_v15, %v2385_v5  ;;  %v2391_v63 = vadd.s32 %v2385_v5, %v2381_v15  ;;  %v2412_v4 = vsel %vm2411_vm2, 1, %v15022_v8  ;;  %v2365_v54 = vsel %vm2363_vm11, %v2353_v39, 2102212464 }
 0x131   : > { %v2390_v41 = vsel %vm2389_vm3, 1, %v15022_v8  ;;  %v2414_v23 = vadd.s32 %v2412_v4, %v2406_v30  ;;  %vm2415_vm4 = vc.u32 %v2413_v58, %v2409_v12  ;;  %vm1120_vm6 = vcmp.lt.s32.totalorder %v9806_v55, 1 }
 0x132   : > { %v2392_v36 = vadd.s32 %v2390_v41, %v2384_v20  ;;  %vm2393_vm5 = vc.u32 %v2391_v63, %v2387_v42  ;;  %vm1122_vm7 = vcmp.lt.s32.totalorder %v9806_v55, 3  ;;  %v8550_v5 = vadd.s32 4294967294, %v2124_v62 }
 0x133   : > { %v2344_v15 = vshrl.u32 %v15021_v26, %v9945_v10  ;;  %v2394_v34 = vsel %vm2393_vm5, 1, %v15022_v8  ;;  %v2416_v16 = vsel %vm2415_vm4, 1, %v15022_v8  ;;  %v2386_v17 = vshrl.u32 %v2382_v50, 16 }
 0x134   : > { %v2396_v43 = vadd.s32 %v2394_v34, %v2392_v36  ;;  %v2408_v53 = vshrl.u32 %v2404_v1, 16  ;;  %v2418_v6 = vadd.s32 %v2416_v16, %v2414_v23  ;;  %v1977_v20 = vsub.s32 4294967266, %v10024_v45 }
 0x135   : > { %v10037_v42 = vsub.s32 %v2271_v7, %v2274_v32  ;;  %v2364_v41 = vsel %vm2360_vm10, %v2344_v15, %v9966_v13  ;;  %v2366_v10 = vsel %vm2362_vm13, %v9968_v31, %v2365_v54  ;;  %vm1121_vm8 = vcmp.lt.s32.totalorder %v9806_v55, 2 }
 0x136   : > { %v2388_v63 = vshrl.u32 %v2383_v35, 16  ;;  %v2397_v39 = vadd.s32 %v2396_v43, %v2386_v17  ;;  %v2410_v50 = vshrl.u32 %v2405_v22, 16  ;;  %v2419_v62 = vadd.s32 %v2418_v6, %v2408_v53 }
 0x137   : > { %v1110_v1 = vor.u32 %v1109_v61, %v9911_v40  ;;  %v1113_v30 = vor.u32 %v1112_v2, %v9915_v44  ;;  %v1116_v7 = vor.u32 %v1115_v24, %v9919_v9  ;;  %vm1123_vm9 = vcmp.lt.s32.totalorder %v9806_v55, 4 }
 0x138   : > { %v1133_v13 = vsel %vm1123_vm9, %v1119_v38, 1326507024  ;;  %vm8551_vm10 = vcmp.lt.s32.totalorder %v8550_v5, 0  ;;  %v10052_v4 = vadd.s32 %v2397_v39, %v2388_v63  ;;  %v2420_v31 = vadd.s32 %v2419_v62, %v2410_v50  ;;  %v10100_v50 = vpop.f32.mrf.mxu1 }
 0x139   : > { %v1978_v32 = vadd.s32 127, %v1977_v20  ;;  %v2277_v35 = vsub.s32 0, %v10037_v42  ;;  %v2367_v22 = vsel %vm2361_vm12, %v2364_v41, %v2366_v10  ;;  %v10057_v40 = vadd.s32 %v2413_v58, %v2409_v12  ;;  %15046 = vst [vmem:[#allocation45_spill] sm:$0xff] %v10100_v50 }
 0x13a   : > { %v990_v44 = vshll.u32 %v9817_v48, 16  ;;  %v1106_v9 = vshrl.u32 %v15023_v56, %v9891_v52  ;;  %vm2276_vm11 = vcmp.lt.s32.totalorder %v10037_v42, 0  ;;  %v1247_v61 = vshrl.u32 %v1246_v49, 23 }
 0x13b   : > { %v1973_v2 = vsub.s32 32, %v10024_v45  ;;  %v10064_v24 = vsel %vm8551_vm10, 0, %v8550_v5  ;;  %vm2423_vm13 = vc.u32 %v10052_v4, %v10057_v40  ;;  %v2424_v38 = vadd.s32 1, %v2420_v31 }
 0x13c   : > { %v1105_v12 = vshll.u32 %v15021_v26, %v9814_v51  ;;  %v1132_v59 = vsel %vm1120_vm6, %v1110_v1, %v1113_v30  ;;  %v1134_v58 = vsel %vm1122_vm7, %v1116_v7, %v1133_v13  ;;  %v2421_v23 = vmul.u32 %v9930_v57, %v2367_v22 }
 0x13d   : > { %v1957_v49 = vadd.s32 %v9682_v47, %v9680_v14  ;;  %v1979_v54 = vshll.u32 %v1978_v32, 23  ;;  %v2278_v36 = vsel %vm2276_vm11, %v2277_v35, %v10037_v42  ;;  %v2425_v5 = vsel %vm2423_vm13, %v2424_v38, %v2420_v31 }
 0x13e   : > { %v2132_v34 = vsub.s32 4294967266, %v10064_v24  ;;  %v2426_v51 = vadd.s32 %v2425_v5, %v2421_v23  ;;  %v8534_v16 = vadd.s32 4294967169, %v1247_v61  ;;  %vm10081_vm12 = vc.u32 %v9812_v33, %v990_v44 }
 0x13f   : > { %v1107_v43 = vor.u32 %v1106_v9, %v1105_v12  ;;  %v10087_v57 = vsel %vm1121_vm8, %v1132_v59, %v1134_v58  ;;  %v1975_v14 = vshrl.u32 %v1957_v49, %v1973_v2  ;;  %v10090_v47 = vadd.s32 %v990_v44, %v9812_v33 }
 0x140   : > { %v1104_v53 = vshrl.u32 %v15021_v26, %v9891_v52  ;;  %v2279_v6 = vclz %v2278_v36  ;;  %v2427_v20 = vadd.s32 536870912, %v2426_v51  ;;  %v1125_v41 = vsel %vm1123_vm9, %v1113_v30, 2102212464 }
 0x141   : > { %15045 = vst [vmem:[#allocation44_spill] sm:$0xff] %v10090_v47  ;;  %v1129_v10 = vsel %vm1123_vm9, %v1116_v7, 920167782  ;;  %v1974_v63 = vshll.u32 %v9829_v3, %v10024_v45  ;;  %v1980_v39 = vor.u32 4788187, %v1979_v54  ;;  %v1140_v33 = vshrl.u32 %v10087_v57, 16 }
 0x142   : > { %v2133_v62 = vadd.s32 127, %v2132_v34  ;;  %v10103_v13 = vshrl.u32 %v2427_v20, 30  ;;  %v1253_v52 = vadd.s32 1, %v8534_v16  ;;  %v995_v31 = vsel %vm10081_vm12, 1, %v15022_v8 }
 0x143   : > { %v1128_v32 = vsel %vm1120_vm6, %v1107_v43, %v1110_v1  ;;  %v1976_v7 = vor.u32 %v1975_v14, %v1974_v63  ;;  %v2128_v35 = vsub.s32 32, %v10064_v24  ;;  %v1130_v3 = vsel %vm1122_vm7, %v1113_v30, %v1129_v10 }
 0x144   : > { %15047 = vst [vmem:[#allocation46_spill] sm:$0xff] %v10103_v13  ;;  %v8553_v45 = vadd.s32 4294967294, %v2279_v6  ;;  %v2429_v22 = vshll.u32 %v10103_v13, 30  ;;  %v1401_v44 = vand.u32 2139095040, %v10100_v50  ;;  %v1124_v9 = vsel %vm1120_vm6, %v1104_v53, %v1107_v43 }
 0x145   : > { %v1126_v61 = vsel %vm1122_vm7, %v1110_v1, %v1125_v41  ;;  %v1981_v2 = vand.u32 2147483647, %v1980_v39  ;;  %v2112_v38 = vadd.s32 %v9768_v19, %v9766_v27  ;;  %v10122_v12 = vmul.u32 %v1140_v33, %v9779_v29 }
 0x146   : > { %v2134_v59 = vshll.u32 %v2133_v62, 23  ;;  %v10124_v30 = vsub.s32 %v2426_v51, %v2429_v22  ;;  %vm1254_vm14 = vcmp.gt.s32.totalorder %v1253_v52, 0  ;;  %v1131_v58 = vsel %vm1121_vm8, %v1128_v32, %v1130_v3 }
 0x147   : > { %15048 = vst [vmem:[#allocation47_spill] sm:$0xff] %v10122_v12  ;;  %v1139_v23 = vand.u32 65535, %v10087_v57  ;;  %v1983_v49 = vcvt.s32.f32 %v1976_v7  ;;  %v2130_v54 = vshrl.u32 %v2112_v38, %v2128_v35  ;;  %vm8554_vm15 = vcmp.lt.s32.totalorder %v8553_v45, 0 }
 0x148   : > { %vm2431_vm2 = vcmp.lt.s32.totalorder %v10124_v30, 0  ;;  %v2432_v1 = vsub.s32 0, %v10124_v30  ;;  %v1402_v27 = vshrl.u32 %v1401_v44, 23  ;;  %v10132_v19 = vadd.s32 %v995_v31, %v9823_v25 }
 0x149   : > { %v10136_v36 = vsel %vm1121_vm8, %v1124_v9, %v1126_v61  ;;  %v1984_v5 = vmul.f32 %v1983_v49, %v1981_v2  ;;  %v1255_v34 = vsel %vm1254_vm14, %v1253_v52, 0  ;;  %v1145_v51 = vshll.u32 %v10122_v12, 16 }
 0x14a   : > { %15049 = vst [vmem:[#allocation48_spill] sm:$0xff] %v10132_v19  ;;  %v2129_v16 = vshll.u32 %v9933_v60, %v10064_v24  ;;  %v2135_v17 = vor.u32 4788187, %v2134_v59  ;;  %v2433_v43 = vsel %vm2431_vm2, %v2432_v1, %v10124_v30  ;;  %v1161_v57 = vand.u32 65535, %v1131_v58 }
 0x14b   : > { %15050 = vst [vmem:[#allocation49_spill] sm:$0xff] %v10136_v36  ;;  %v1162_v14 = vshrl.u32 %v1131_v58, 16  ;;  %v10142_v53 = vsel %vm8554_vm15, 0, %v8553_v45  ;;  %v2434_v25 = vclz %v2433_v43  ;;  %v1141_v6 = vmul.u32 %v1139_v23, %v9779_v29 }
 0x14c   : > { %v2131_v55 = vor.u32 %v2130_v54, %v2129_v16  ;;  %v1257_v20 = vand.u32 31, %v1255_v34  ;;  %v8537_v41 = vadd.s32 4294967169, %v1402_v27  ;;  %v15051_v63 = vand.u32 2147483647, %v9411_v46  ;;  %v15061_v54 = vld [vmem:[#allocation41_spill] sm:$0xff] }
 0x14d   : > { %vm1865_vm5 = vcmp.lt.s32.totalorder %v9411_v46, 0  ;;  %v1985_v24 = vxor.u32 2147483648, %v1984_v5  ;;  %vm1149_vm4 = vc.u32 %v1141_v6, %v1145_v51  ;;  %v2136_v39 = vand.u32 2147483647, %v2135_v17 }
 0x14e   : > { %vm10149_vm3 = vcmp.le.f32.partialorder %v15051_v63, 0.7853982  ;;  %v2287_v62 = vsub.s32 4294967266, %v10142_v53  ;;  %v1408_v52 = vadd.s32 1, %v8537_v41  ;;  %v10156_v31 = vmul.u32 %v1139_v23, %v9788_v0 }
 0x14f   : > { %v10159_v32 = vmul.u32 %v1161_v57, %v9779_v29  ;;  %v10162_v7 = vmul.u32 %v1162_v14, %v9779_v29  ;;  %v8556_v35 = vadd.s32 4294967294, %v2434_v25  ;;  %v10165_v3 = vmul.u32 %v1161_v57, %v9788_v0 }
 0x150   : > { %15054 = vst [vmem:[#allocation50_spill] sm:$0xff] %v10156_v31  ;;  %v2138_v45 = vcvt.s32.f32 %v2131_v55  ;;  %v14774_v22 = vand.u32 2147483647, %v10012_v21  ;;  %v1258_v44 = vsub.s32 32, %v1257_v20  ;;  %v1144_v9 = vmul.u32 %v1140_v33, %v9788_v0  ;;  %v15060_v33 = vld [vmem:[#allocation40_spill] sm:$0xff] }
 0x151   : > { %15055 = vst [vmem:[#allocation51_spill] sm:$0xff] %v10159_v32  ;;  %v1150_v61 = vsel %vm1149_vm4, 1, %v15022_v8  ;;  %v10171_v2 = vmul.u32 %v1162_v14, %v9788_v0  ;;  %v1986_v38 = vsel %vm1865_vm5, %v1985_v24, %v1984_v5  ;;  %v2283_v59 = vsub.s32 32, %v10142_v53 }
 0x152   : > { %15056 = vst [vmem:[#allocation52_spill] sm:$0xff] %v10162_v7  ;;  %v2139_v29 = vmul.f32 %v2138_v45, %v2136_v39  ;;  %v2288_v58 = vadd.s32 127, %v2287_v62  ;;  %vm1409_vm6 = vcmp.gt.s32.totalorder %v1408_v52, 0  ;;  %v10177_v49 = vadd.s32 %v1145_v51, %v1141_v6 }
 0x153   : > { %15057 = vst [vmem:[#allocation53_spill] sm:$0xff] %v10165_v3  ;;  %vm14850_vm7 = vcmp.lt.s32.totalorder %v9510_v11, 0  ;;  %vm8557_vm8 = vcmp.lt.s32.totalorder %v8556_v35, 0  ;;  %v2267_v1 = vadd.s32 %v15061_v54, %v15060_v33  ;;  %v1250_v0 = vand.u32 8388607, %v14774_v22  ;;  %v10218_v22 = vpop.f32.mrf.mxu2 }
 0x154   : > { %15058 = vst [vmem:[#allocation54_spill] sm:$0xff] %v10171_v2  ;;  %v15062_v27 = vmov 920167782   ;;  %v15063_v16 = vmov 1326507024   ;;  %v10186_v43 = vadd.s32 %v1150_v61, %v1144_v9  ;;  %v10191_v51 = vsel %vm10149_vm3, %v9411_v46, %v1986_v38 }
 0x155   : > { %15059 = vst [vmem:[#allocation55_spill] sm:$0xff] %v10177_v49  ;;  %v1272_v5 = vshll.u32 %v15062_v27, %v1257_v20  ;;  %v1273_v17 = vshrl.u32 %v15063_v16, %v1258_v44  ;;  %v10193_v57 = vshrl.u32 %v1255_v34, 5  ;;  %v1410_v14 = vsel %vm1409_vm6, %v1408_v52, 0 }
 0x156   : > { %15064 = vst [vmem:[#allocation40_spill] sm:$0xff] %v10186_v43  ;;  %v2140_v25 = vxor.u32 2147483648, %v2139_v29  ;;  %v2285_v6 = vshrl.u32 %v2267_v1, %v2283_v59  ;;  %v2289_v55 = vshll.u32 %v2288_v58, 23  ;;  %v10195_v41 = vsel %vm8557_vm8, 0, %v8556_v35 }
 0x157   : > { %v1263_v63 = vshll.u32 %v15023_v56, %v1257_v20  ;;  %v15065_v24 = vmov 2131351028   ;;  %v15066_v45 = vmov 2102212464   ;;  %v2284_v61 = vshll.u32 %v10037_v42, %v10142_v53  ;;  %15067 = vst [vmem:[#allocation41_spill] sm:$0xff] %v10218_v22 }
 0x158   : > { %v1264_v39 = vshrl.u32 %v15065_v24, %v1258_v44  ;;  %v1266_v62 = vshll.u32 %v15065_v24, %v1257_v20  ;;  %v1267_v9 = vshrl.u32 %v15066_v45, %v1258_v44  ;;  %v1251_v38 = vor.u32 8388608, %v1250_v0 }
 0x159   : > { %v1274_v34 = vor.u32 %v1273_v17, %v1272_v5  ;;  %v10203_v33 = vand.u32 31, %v1410_v14  ;;  %v2442_v52 = vsub.s32 4294967266, %v10195_v41  ;;  %v1269_v35 = vshll.u32 %v15066_v45, %v1257_v20 }
 0x15a   : > { %v1270_v59 = vshrl.u32 %v15062_v27, %v1258_v44  ;;  %vm1278_vm9 = vcmp.lt.s32.totalorder %v10193_v57, 4  ;;  %v10211_v58 = vsel %vm14850_vm7, %v2140_v25, %v2139_v29  ;;  %v2290_v54 = vor.u32 4788187, %v2289_v55 }
 0x15b   : > { %v1260_v1 = vshll.u32 %v15021_v26, %v1257_v20  ;;  %v14775_v42 = vand.u32 2147483647, %v10100_v50  ;;  %v2286_v53 = vor.u32 %v2285_v6, %v2284_v61  ;;  %v1261_v0 = vshrl.u32 %v15023_v56, %v1258_v44 }
 0x15c   : > { %v10216_v5 = vor.u32 %v1264_v39, %v1263_v63  ;;  %v1268_v17 = vor.u32 %v1267_v9, %v1266_v62  ;;  %vm1275_vm10 = vcmp.lt.s32.totalorder %v10193_v57, 1  ;;  %vm1277_vm11 = vcmp.lt.s32.totalorder %v10193_v57, 3 }
 0x15d   : > { %v1288_v29 = vsel %vm1278_vm9, %v1274_v34, 1326507024  ;;  %v10225_v25 = vsub.s32 32, %v10203_v33  ;;  %v2443_v20 = vadd.s32 127, %v2442_v52  ;;  %v1259_v6 = vshrl.u32 %v15021_v26, %v1258_v44 }
 0x15e   : > { %v1271_v55 = vor.u32 %v1270_v59, %v1269_v35  ;;  %v10228_v61 = vshll.u32 %v1251_v38, 8  ;;  %v2291_v63 = vand.u32 2147483647, %v2290_v54  ;;  %v2438_v39 = vsub.s32 32, %v10195_v41 }
 0x15f   : > { %v1405_v62 = vand.u32 8388607, %v14775_v42  ;;  %v1556_v9 = vand.u32 2139095040, %v10218_v22  ;;  %v1262_v10 = vor.u32 %v1261_v0, %v1260_v1  ;;  %vm1276_vm13 = vcmp.lt.s32.totalorder %v10193_v57, 2 }
 0x160   : > { %15068 = vst [vmem:[#allocation56_spill] sm:$0xff] %v10228_v61  ;;  %v1287_v34 = vsel %vm1275_vm10, %v10216_v5, %v1268_v17  ;;  %v1289_v44 = vsel %vm1277_vm11, %v1271_v55, %v1288_v29  ;;  %v2293_v38 = vcvt.s32.f32 %v2286_v53  ;;  %v2422_v52 = vadd.s32 %v10057_v40, %v10052_v4 }
 0x161   : > { %v1427_v35 = vshll.u32 %v15062_v27, %v10203_v33  ;;  %v1428_v59 = vshrl.u32 %v15063_v16, %v10225_v25  ;;  %v2444_v54 = vshll.u32 %v2443_v20, 23  ;;  %v1279_v1 = vsel %vm1275_vm10, %v1259_v6, %v1262_v10  ;;  %v15072_v6 = vld [vmem:[#allocation28_spill] sm:$0xff] }
 0x162   : > { %v10249_v0 = vand.u32 65535, %v10228_v61  ;;  %v10251_v42 = vshrl.u32 %v1410_v14, 5  ;;  %v2294_v29 = vmul.f32 %v2293_v38, %v2291_v63  ;;  %v2440_v53 = vshrl.u32 %v2422_v52, %v2438_v39 }
 0x163   : > { %v1284_v4 = vsel %vm1278_vm9, %v1271_v55, 920167782  ;;  %v10257_v40 = vsel %vm1276_vm13, %v1287_v34, %v1289_v44  ;;  %v15069_v23 = vand.u32 2147483647, %v9510_v11  ;;  %vm14849_vm14 = vcmp.lt.s32.totalorder %v15072_v6, 0 }
 0x164   : > { %v1418_v14 = vshll.u32 %v15023_v56, %v10203_v33  ;;  %v1419_v63 = vshrl.u32 %v15065_v24, %v10225_v25  ;;  %v1421_v55 = vshll.u32 %v15065_v24, %v10203_v33  ;;  %v1422_v39 = vshrl.u32 %v15066_v45, %v10225_v25 }
 0x165   : > { %vm10261_vm12 = vcmp.le.f32.partialorder %v15069_v23, 0.7853982  ;;  %v2439_v23 = vshll.u32 %v10124_v30, %v10195_v41  ;;  %v1283_v34 = vsel %vm1275_vm10, %v1262_v10, %v10216_v5  ;;  %v1429_v44 = vor.u32 %v1428_v59, %v1427_v35 }
 0x166   : > { %v1557_v38 = vshrl.u32 %v1556_v9, 23  ;;  %v2445_v52 = vor.u32 4788187, %v2444_v54  ;;  %v1424_v15 = vshll.u32 %v15066_v45, %v10203_v33  ;;  %v1425_v50 = vshrl.u32 %v15062_v27, %v10225_v25 }
 0x167   : > { %vm1433_vm15 = vcmp.lt.s32.totalorder %v10251_v42, 4  ;;  %v15073_v21 = vand.u32 2147483647, %v15072_v6  ;;  %v15074_v36 = vmov 0  ;;  %v2295_v30 = vxor.u32 2147483648, %v2294_v29 }
 0x168   : > { %v1280_v10 = vsel %vm1278_vm9, %v1268_v17, 2102212464  ;;  %v1285_v41 = vsel %vm1277_vm11, %v1268_v17, %v1284_v4  ;;  %v14784_v9 = vshrl.u32 %v10257_v40, 16  ;;  %v2441_v35 = vor.u32 %v2440_v53, %v2439_v23 }
 0x169   : > { %vm10286_vm2 = vcmp.le.f32.partialorder %v15073_v21, 0.7853982  ;;  %v1406_v59 = vor.u32 8388608, %v1405_v62  ;;  %v1420_v54 = vor.u32 %v1419_v63, %v1418_v14  ;;  %v1423_v28 = vor.u32 %v1422_v39, %v1421_v55  ;;  %v15078_v39 = vld [vmem:[#allocation32_spill] sm:$0xff] }
 0x16a   : > { %v15075_v36 = vsel %vm10286_vm2, 4294967295, %v15074_v36  ;;  %vm1430_vm4 = vcmp.lt.s32.totalorder %v10251_v42, 1  ;;  %vm1432_vm6 = vcmp.lt.s32.totalorder %v10251_v42, 3  ;;  %v1443_v21 = vsel %vm1433_vm15, %v1429_v44, 1326507024 }
 0x16b   : > { %15076 = vst [vmem:[#allocation57_spill] sm:$0xff] %v15075_v36  ;;  %v8540_v2 = vadd.s32 4294967169, %v1557_v38  ;;  %v2446_v12 = vand.u32 2147483647, %v2445_v52  ;;  %v1415_v3 = vshll.u32 %v15021_v26, %v10203_v33  ;;  %v1416_v17 = vshrl.u32 %v15023_v56, %v10225_v25 }
 0x16c   : > { %v1426_v4 = vor.u32 %v1425_v50, %v1424_v15  ;;  %v1281_v62 = vsel %vm1277_vm11, %v10216_v5, %v1280_v10  ;;  %v1286_v53 = vsel %vm1276_vm13, %v1283_v34, %v1285_v41  ;;  %v1294_v14 = vand.u32 65535, %v10257_v40 }
 0x16d   : > { %v10312_v63 = vmul.u32 %v14784_v9, %v10249_v0  ;;  %v2448_v55 = vcvt.s32.f32 %v2441_v35  ;;  %vm1431_vm8 = vcmp.lt.s32.totalorder %v10251_v42, 2  ;;  %v1442_v15 = vsel %vm1430_vm4, %v1420_v54, %v1423_v28 }
 0x16e   : > { %v1444_v50 = vsel %vm1432_vm6, %v1426_v4, %v1443_v21  ;;  %v10323_v33 = vsel %vm10261_vm12, %v9510_v11, %v10211_v58  ;;  %v2296_v5 = vsel %vm14849_vm14, %v2295_v30, %v2294_v29  ;;  %vm14825_vm9 = vcmp.lt.s32.totalorder %v15078_v39, 0 }
 0x16f   : > { %15077 = vst [vmem:[#allocation58_spill] sm:$0xff] %v10312_v63  ;;  %v10328_v23 = vshll.u32 %v1406_v59, 8  ;;  %v1563_v34 = vadd.s32 1, %v8540_v2  ;;  %v2449_v44 = vmul.f32 %v2448_v55, %v2446_v12  ;;  %v10332_v38 = vsel %vm1276_vm13, %v1279_v1, %v1281_v62 }
 0x170   : > { %15080 = vst [vmem:[#allocation60_spill] sm:$0xff] %v10332_v38  ;;  %v1293_v52 = vshrl.u32 %v10228_v61, 16  ;;  %v1417_v10 = vor.u32 %v1416_v17, %v1415_v3  ;;  %v1316_v41 = vand.u32 65535, %v1286_v53  ;;  %v1317_v35 = vshrl.u32 %v1286_v53, 16 }
 0x171   : > { %15079 = vst [vmem:[#allocation59_spill] sm:$0xff] %v10328_v23  ;;  %v1439_v58 = vsel %vm1433_vm15, %v1426_v4, 920167782  ;;  %v1445_v29 = vsel %vm1431_vm8, %v1442_v15, %v1444_v50  ;;  %v10342_v2 = vsel %vm10286_vm2, %v15072_v6, %v2296_v5  ;;  %v15082_v12 = vand.u32 2147483647, %v15078_v39 }
 0x172   : > { %15081 = vst [vmem:[#allocation61_spill] sm:$0xff] %v10342_v2  ;;  %v15083_v57 = vmov 0  ;;  %v1296_v3 = vmul.u32 %v1294_v14, %v10249_v0  ;;  %v1300_v1 = vshll.u32 %v10312_v63, 16  ;;  %v1414_v59 = vshrl.u32 %v15021_v26, %v10225_v25 }
 0x173   : > { %vm10346_vm10 = vcmp.le.f32.partialorder %v15082_v12, 0.7853982  ;;  %v1435_v21 = vsel %vm1433_vm15, %v1423_v28, 2102212464  ;;  %v1447_v17 = vand.u32 65535, %v10328_v23  ;;  %vm1564_vm11 = vcmp.gt.s32.totalorder %v1563_v34, 0 }
 0x174   : > { %v15084_v57 = vsel %vm10346_vm10, 4294967295, %v15083_v57  ;;  %v2450_v4 = vxor.u32 2147483648, %v2449_v44  ;;  %v1438_v62 = vsel %vm1430_vm4, %v1417_v10, %v1420_v54  ;;  %v1440_v53 = vsel %vm1432_vm6, %v1423_v28, %v1439_v58 }
 0x175   : > { %15085 = vst [vmem:[#allocation62_spill] sm:$0xff] %v15084_v57  ;;  %v1450_v55 = vshrl.u32 %v1445_v29, 16  ;;  %v10364_v15 = vmul.f32 %v10191_v51, %v10191_v51  ;;  %v10368_v25 = vmul.f32 %v10323_v33, %v10323_v33  ;;  %v10371_v50 = vmul.u32 %v1316_v41, %v10249_v0 }
 0x176   : > { %v10377_v12 = vmul.f32 %v10342_v2, %v10342_v2  ;;  %vm1304_vm13 = vc.u32 %v1296_v3, %v1300_v1  ;;  %v10380_v28 = vmul.u32 %v1317_v35, %v10249_v0  ;;  %v1565_v58 = vsel %vm1564_vm11, %v1563_v34, 0 }
 0x177   : > { %15086 = vst [vmem:[#allocation63_spill] sm:$0xff] %v10371_v50  ;;  %v10382_v9 = vmul.u32 %v1294_v14, %v1293_v52  ;;  %v1434_v30 = vsel %vm1430_vm4, %v1414_v59, %v1417_v10  ;;  %v1436_v63 = vsel %vm1432_vm6, %v1420_v54, %v1435_v21  ;;  %v1441_v5 = vsel %vm1431_vm8, %v1438_v62, %v1440_v53  ;;  %v10396_v14 = vpop.f32.mrf.mxu0 }
 0x178   : > { %15087 = vst [vmem:[#allocation64_spill] sm:$0xff] %v10377_v12  ;;  %v2451_v38 = vsel %vm14825_vm9, %v2450_v4, %v2449_v44  ;;  %v1449_v61 = vand.u32 65535, %v1445_v29  ;;  %v10392_v50 = vmul.u32 %v1450_v55, %v1447_v17  ;;  %v15091_v0 = vand.u32 2147483647, %v10218_v22  ;;  %v10420_v22 = vpop.f32.mrf.mxu3 }
 0x179   : > { %15088 = vst [vmem:[#allocation65_spill] sm:$0xff] %v10380_v28  ;;  %v15093_v28 = vshrl.u32 %v10257_v40, 16  ;;  %v1305_v59 = vsel %vm1304_vm13, 1, %v15022_v8  ;;  %v10401_v54 = vmul.u32 %v1316_v41, %v1293_v52  ;;  %v1567_v21 = vand.u32 31, %v1565_v58 }
 0x17a   : > { %15089 = vst [vmem:[#allocation66_spill] sm:$0xff] %v10382_v9  ;;  %v1560_v34 = vand.u32 8388607, %v15091_v0  ;;  %v10405_v62 = vsel %vm1431_vm8, %v1434_v30, %v1436_v63  ;;  %v1448_v44 = vshrl.u32 %v10328_v23, 16  ;;  %v1471_v29 = vand.u32 65535, %v1441_v5 }
 0x17b   : > { %15090 = vst [vmem:[#allocation67_spill] sm:$0xff] %v10392_v50  ;;  %v1299_v10 = vmul.u32 %v15093_v28, %v1293_v52  ;;  %v1472_v4 = vshrl.u32 %v1441_v5, 16  ;;  %v10411_v53 = vsel %vm10346_vm10, %v15078_v39, %v2451_v38  ;;  %v10414_v28 = vmul.u32 %v1317_v35, %v1293_v52 }
 0x17c   : > { %15092 = vst [vmem:[#allocation68_spill] sm:$0xff] %v10396_v14  ;;  %v2486_v41 = vand.u32 2139095040, %v10396_v14  ;;  %v10417_v0 = vadd.s32 %v1300_v1, %v1296_v3  ;;  %v1451_v42 = vmul.u32 %v1449_v61, %v1447_v17  ;;  %v1455_v63 = vshll.u32 %v10392_v50, 16 }
 0x17d   : > { %15094 = vst [vmem:[#allocation69_spill] sm:$0xff] %v10401_v54  ;;  %v1561_v30 = vor.u32 8388608, %v1560_v34  ;;  %v10422_v5 = vadd.s32 %v1305_v59, %v1299_v10  ;;  %v1568_v54 = vsub.s32 32, %v1567_v21  ;;  %v10429_v52 = vmul.f32 %v10411_v53, %v10411_v53 }
 0x17e   : > { %15095 = vst [vmem:[#allocation70_spill] sm:$0xff] %v10405_v62  ;;  %v10431_v35 = vmul.u32 %v1471_v29, %v1447_v17  ;;  %v10433_v3 = vmul.u32 %v1472_v4, %v1447_v17  ;;  %v10435_v1 = vmul.u32 %v1471_v29, %v1448_v44  ;;  %v10437_v34 = vmul.u32 %v1449_v61, %v1448_v44 }
 0x17f   : > { %15096 = vst [vmem:[#allocation71_spill] sm:$0xff] %v10411_v53  ;;  %v1454_v10 = vmul.u32 %v1450_v55, %v1448_v44  ;;  %v1711_v59 = vand.u32 2139095040, %v10420_v22  ;;  %v2487_v50 = vshrl.u32 %v2486_v41, 23  ;;  %vm1459_vm15 = vc.u32 %v1451_v42, %v1455_v63 }
 0x180   : > { %15097 = vst [vmem:[#allocation72_spill] sm:$0xff] %v10414_v28  ;;  %v10440_v38 = vmul.u32 %v1472_v4, %v1448_v44  ;;  %v1570_v40 = vshll.u32 %v15021_v26, %v1567_v21  ;;  %v10443_v62 = vshll.u32 %v1561_v30, 8  ;;  %v1571_v23 = vshrl.u32 %v15023_v56, %v1568_v54 }
 0x181   : > { %15098 = vst [vmem:[#allocation73_spill] sm:$0xff] %v10417_v0  ;;  %v1573_v17 = vshll.u32 %v15023_v56, %v1567_v21  ;;  %v1574_v29 = vshrl.u32 %v15065_v24, %v1568_v54  ;;  %v10448_v61 = vshrl.u32 %v1565_v58, 5  ;;  %v1579_v55 = vshll.u32 %v15066_v45, %v1567_v21 }
 0x182   : > { %15099 = vst [vmem:[#allocation74_spill] sm:$0xff] %v10420_v22  ;;  %v1580_v41 = vshrl.u32 %v15062_v27, %v1568_v54  ;;  %v1460_v30 = vsel %vm1459_vm15, 1, %v15022_v8  ;;  %v1583_v58 = vshrl.u32 %v15063_v16, %v1568_v54  ;;  %v1569_v0 = vshrl.u32 %v15021_v26, %v1568_v54 }
 0x183   : > { %15100 = vst [vmem:[#allocation75_spill] sm:$0xff] %v10422_v5  ;;  %v1577_v5 = vshrl.u32 %v15066_v45, %v1568_v54  ;;  %v1572_v9 = vor.u32 %v1571_v23, %v1570_v40  ;;  %v1575_v28 = vor.u32 %v1574_v29, %v1573_v17  ;;  %vm1585_vm6 = vcmp.lt.s32.totalorder %v10448_v61, 1 }
 0x184   : > { %15101 = vst [vmem:[#allocation76_spill] sm:$0xff] %v10429_v52  ;;  %v1581_v44 = vor.u32 %v1580_v41, %v1579_v55  ;;  %v10462_v4 = vand.u32 65535, %v10443_v62  ;;  %vm1588_vm8 = vcmp.lt.s32.totalorder %v10448_v61, 4  ;;  %v15110_v23 = vand.u32 2147483647, %v10420_v22  ;;  %v10478_v41 = vpop.f32.mrf.mxu1 }
 0x185   : > { %15102 = vst [vmem:[#allocation77_spill] sm:$0xff] %v10431_v35  ;;  %v8558_v35 = vadd.s32 4294967169, %v2487_v50  ;;  %v1582_v50 = vshll.u32 %v15062_v27, %v1567_v21  ;;  %v10476_v40 = vadd.s32 %v1460_v30, %v1454_v10  ;;  %vm1587_vm11 = vcmp.lt.s32.totalorder %v10448_v61, 3 }
 0x186   : > { %15103 = vst [vmem:[#allocation78_spill] sm:$0xff] %v10433_v3  ;;  %v1576_v3 = vshll.u32 %v15065_v24, %v1567_v21  ;;  %v10470_v21 = vshrl.u32 %v10443_v62, 16  ;;  %v10474_v54 = vand.u32 8388607, %v15110_v23  ;;  %vm1586_vm13 = vcmp.lt.s32.totalorder %v10448_v61, 2 }
 0x187   : > { %15104 = vst [vmem:[#allocation79_spill] sm:$0xff] %v10435_v1  ;;  %v2493_v1 = vadd.s32 1, %v8558_v35  ;;  %v15108_v35 = vand.u32 2147483647, %v10396_v14  ;;  %v1584_v29 = vor.u32 %v1583_v58, %v1582_v50  ;;  %v2641_v58 = vand.u32 2139095040, %v10478_v41 }
 0x188   : > { %15105 = vst [vmem:[#allocation80_spill] sm:$0xff] %v10437_v34  ;;  %v10466_v34 = vadd.s32 %v1455_v63, %v1451_v42  ;;  %v1578_v17 = vor.u32 %v1577_v5, %v1576_v3  ;;  %v1589_v42 = vsel %vm1585_vm6, %v1569_v0, %v1572_v9  ;;  %v1593_v63 = vsel %vm1585_vm6, %v1572_v9, %v1575_v28 }
 0x189   : > { %15106 = vst [vmem:[#allocation81_spill] sm:$0xff] %v10440_v38  ;;  %v1712_v38 = vshrl.u32 %v1711_v59, 23  ;;  %vm2494_vm4 = vcmp.gt.s32.totalorder %v2493_v1, 0  ;;  %v2490_v59 = vand.u32 8388607, %v15108_v35  ;;  %v2642_v2 = vshrl.u32 %v2641_v58, 23 }
 0x18a   : > { %15107 = vst [vmem:[#allocation82_spill] sm:$0xff] %v10443_v62  ;;  %v2495_v55 = vsel %vm2494_vm4, %v2493_v1, 0  ;;  %v1590_v10 = vsel %vm1588_vm8, %v1578_v17, 2102212464  ;;  %v1594_v5 = vsel %vm1588_vm8, %v1581_v44, 920167782  ;;  %v1597_v9 = vsel %vm1585_vm6, %v1575_v28, %v1578_v17 }
 0x18b   : > { %15109 = vst [vmem:[#allocation83_spill] sm:$0xff] %v10466_v34  ;;  %v10485_v35 = vadd.s32 4294967169, %v1712_v38  ;;  %v2497_v22 = vand.u32 31, %v2495_v55  ;;  %v2491_v3 = vor.u32 8388608, %v2490_v59  ;;  %v10491_v1 = vshrl.u32 %v2495_v55, 5 }
 0x18c   : > { %15111 = vst [vmem:[#allocation84_spill] sm:$0xff] %v10476_v40  ;;  %v1598_v59 = vsel %vm1588_vm8, %v1584_v29, 1326507024 }
 0x18d   : > { %15112 = vst [vmem:[#allocation85_spill] sm:$0xff] %v10478_v41  ;;  %v2498_v30 = vsub.s32 32, %v2497_v22  ;;  %v2500_v50 = vshll.u32 %v15021_v26, %v2497_v22  ;;  %v2503_v0 = vshll.u32 %v15023_v56, %v2497_v22  ;;  %v2506_v38 = vshll.u32 %v15065_v24, %v2497_v22 }
 0x18e   : > { %v2509_v23 = vshll.u32 %v15066_v45, %v2497_v22  ;;  %v2512_v40 = vshll.u32 %v15062_v27, %v2497_v22  ;;  %vm2515_vm15 = vcmp.lt.s32.totalorder %v10491_v1, 1  ;;  %v10510_v49 = vshll.u32 %v2491_v3, 8 }
 0x18f   : > { %v2501_v55 = vshrl.u32 %v15023_v56, %v2498_v30  ;;  %v2504_v34 = vshrl.u32 %v15065_v24, %v2498_v30  ;;  %v2507_v43 = vshrl.u32 %v15066_v45, %v2498_v30  ;;  %v2510_v32 = vshrl.u32 %v15062_v27, %v2498_v30 }
 0x190   : > { %v2513_v7 = vshrl.u32 %v15063_v16, %v2498_v30  ;;  %vm2517_vm4 = vcmp.lt.s32.totalorder %v10491_v1, 3  ;;  %vm2518_vm6 = vcmp.lt.s32.totalorder %v10491_v1, 4  ;;  %vm2516_vm8 = vcmp.lt.s32.totalorder %v10491_v1, 2 }
 0x191   : > { %v2502_v22 = vor.u32 %v2501_v55, %v2500_v50  ;;  %v10512_v31 = vor.u32 %v2504_v34, %v2503_v0  ;;  %v2508_v53 = vor.u32 %v2507_v43, %v2506_v38  ;;  %v2511_v29 = vor.u32 %v2510_v32, %v2509_v23 }
 0x192   : > { %v2514_v52 = vor.u32 %v2513_v7, %v2512_v40  ;;  %v1591_v32 = vsel %vm1587_vm11, %v1575_v28, %v1590_v10  ;;  %v2532_v40 = vand.u32 65535, %v10510_v49  ;;  %v2533_v58 = vshrl.u32 %v10510_v49, 16 }
 0x193   : > { %v2523_v12 = vsel %vm2515_vm15, %v2502_v22, %v10512_v31  ;;  %v2527_v3 = vsel %vm2515_vm15, %v10512_v31, %v2508_v53  ;;  %v2524_v7 = vsel %vm2518_vm6, %v2511_v29, 920167782  ;;  %v8561_v38 = vadd.s32 4294967169, %v2642_v2 }
 0x194   : > { %v2528_v43 = vsel %vm2518_vm6, %v2514_v52, 1326507024  ;;  %v2525_v50 = vsel %vm2517_vm4, %v2508_v53, %v2524_v7  ;;  %v1595_v28 = vsel %vm1587_vm11, %v1578_v17, %v1594_v5  ;;  %v1599_v10 = vsel %vm1587_vm11, %v1581_v44, %v1598_v59 }
 0x195   : > { %v2529_v0 = vsel %vm2517_vm4, %v2511_v29, %v2528_v43  ;;  %v2526_v52 = vsel %vm2516_vm8, %v2523_v12, %v2525_v50  ;;  %v10546_v29 = vsel %vm1586_vm13, %v1589_v42, %v1591_v32  ;;  %v2499_v17 = vshrl.u32 %v15021_v26, %v2498_v30 }
 0x196   : > { %v2530_v23 = vsel %vm2516_vm8, %v2527_v3, %v2529_v0  ;;  %v2556_v34 = vand.u32 65535, %v2526_v52  ;;  %v2557_v57 = vshrl.u32 %v2526_v52, 16  ;;  %15113 = vst [vmem:[#allocation86_spill] sm:$0xff] %v10546_v29  ;;  %v15114_v44 = vand.u32 2147483647, %v10478_v41 }
 0x197   : > { %v2534_v55 = vand.u32 65535, %v2530_v23  ;;  %v2535_v7 = vshrl.u32 %v2530_v23, 16  ;;  %v2648_v3 = vadd.s32 1, %v8561_v38  ;;  %v10556_v50 = vsel %vm1586_vm13, %v1593_v63, %v1595_v28 }
 0x198   : > { %v2645_v5 = vand.u32 8388607, %v15114_v44  ;;  %v2558_v0 = vmul.u32 %v2556_v34, %v2532_v40  ;;  %v2559_v52 = vmul.u32 %v2557_v57, %v2532_v40  ;;  %v2560_v42 = vmul.u32 %v2556_v34, %v2533_v58 }
 0x199   : > { %v2536_v59 = vmul.u32 %v2534_v55, %v2532_v40  ;;  %v2537_v12 = vmul.u32 %v2535_v7, %v2532_v40  ;;  %v10552_v43 = vmul.u32 %v2534_v55, %v2533_v58  ;;  %v10560_v32 = vsel %vm1586_vm13, %v1597_v9, %v1599_v10 }
 0x19a   : > { %v2539_v30 = vmul.u32 %v2535_v7, %v2533_v58  ;;  %v2519_v55 = vsel %vm2515_vm15, %v2499_v17, %v2502_v22  ;;  %v2561_v2 = vmul.u32 %v2557_v57, %v2533_v58  ;;  %v2562_v38 = vshll.u32 %v2559_v52, 16 }
 0x19b   : > { %v2540_v23 = vshll.u32 %v2537_v12, 16  ;;  %v2542_v44 = vshll.u32 %v10552_v43, 16  ;;  %v2564_v41 = vshll.u32 %v2560_v42, 16  ;;  %v2646_v28 = vor.u32 8388608, %v2645_v5 }
 0x19c   : > { %vm2649_vm1 = vcmp.gt.s32.totalorder %v2648_v3, 0  ;;  %vm2566_vm0 = vc.u32 %v2558_v0, %v2562_v38  ;;  %v2568_v61 = vadd.s32 %v2562_v38, %v2558_v0  ;;  %v2520_v40 = vsel %vm2518_vm6, %v2508_v53, 2102212464 }
 0x19d   : > { %vm2544_vm11 = vc.u32 %v2536_v59, %v2540_v23  ;;  %v2546_v63 = vadd.s32 %v2540_v23, %v2536_v59  ;;  %v2650_v9 = vsel %vm2649_vm1, %v2648_v3, 0  ;;  %v2567_v7 = vsel %vm2566_vm0, 1, %v15022_v8 }
 0x19e   : > { %v2545_v34 = vsel %vm2544_vm11, 1, %v15022_v8  ;;  %v2563_v22 = vshrl.u32 %v2559_v52, 16  ;;  %v2569_v58 = vadd.s32 %v2567_v7, %v2561_v2  ;;  %vm2570_vm15 = vc.u32 %v2568_v61, %v2564_v41 }
 0x19f   : > { %v2547_v10 = vadd.s32 %v2545_v34, %v2539_v30  ;;  %vm2548_vm13 = vc.u32 %v2546_v63, %v2542_v44  ;;  %v2541_v17 = vshrl.u32 %v2537_v12, 16  ;;  %v2571_v59 = vsel %vm2570_vm15, 1, %v15022_v8 }
 0x1a0   : > { %v2549_v57 = vsel %vm2548_vm13, 1, %v15022_v8  ;;  %v2652_v23 = vand.u32 31, %v2650_v9  ;;  %v2521_v3 = vsel %vm2517_vm4, %v10512_v31, %v2520_v40  ;;  %v2573_v0 = vadd.s32 %v2571_v59, %v2569_v58 }
 0x1a1   : > { %v2551_v5 = vadd.s32 %v2549_v57, %v2547_v10  ;;  %v10574_v53 = vshrl.u32 %v2650_v9, 5  ;;  %v10576_v30 = vshll.u32 %v2646_v28, 8  ;;  %v2565_v44 = vshrl.u32 %v2560_v42, 16 }
 0x1a2   : > { %v10578_v38 = vsub.s32 32, %v2652_v23  ;;  %v2655_v2 = vshll.u32 %v15021_v26, %v2652_v23  ;;  %v2658_v12 = vshll.u32 %v15023_v56, %v2652_v23  ;;  %v2574_v52 = vadd.s32 %v2573_v0, %v2563_v22 }
 0x1a3   : > { %v2661_v63 = vshll.u32 %v15065_v24, %v2652_v23  ;;  %v2664_v34 = vshll.u32 %v15066_v45, %v2652_v23  ;;  %v2667_v10 = vshll.u32 %v15062_v27, %v2652_v23  ;;  %v2543_v31 = vshrl.u32 %v10552_v43, 16 }
 0x1a4   : > { %v2552_v9 = vadd.s32 %v2551_v5, %v2541_v17  ;;  %v2656_v28 = vshrl.u32 %v15023_v56, %v10578_v38  ;;  %v2659_v42 = vshrl.u32 %v15065_v24, %v10578_v38  ;;  %v2662_v40 = vshrl.u32 %v15066_v45, %v10578_v38 }
 0x1a5   : > { %v2665_v7 = vshrl.u32 %v15062_v27, %v10578_v38  ;;  %v2668_v57 = vshrl.u32 %v15063_v16, %v10578_v38  ;;  %vm2670_vm0 = vcmp.lt.s32.totalorder %v10574_v53, 1  ;;  %vm2672_vm1 = vcmp.lt.s32.totalorder %v10574_v53, 3 }
 0x1a6   : > { %v10597_v22 = vor.u32 %v2656_v28, %v2655_v2  ;;  %v10599_v43 = vor.u32 %v2659_v42, %v2658_v12  ;;  %vm2673_vm4 = vcmp.lt.s32.totalorder %v10574_v53, 4  ;;  %v2575_v58 = vadd.s32 %v2574_v52, %v2565_v44 }
 0x1a7   : > { %v10603_v17 = vor.u32 %v2662_v40, %v2661_v63  ;;  %v2666_v5 = vor.u32 %v2665_v7, %v2664_v34  ;;  %v2669_v59 = vor.u32 %v2668_v57, %v2667_v10  ;;  %v10605_v23 = vadd.s32 %v2552_v9, %v2543_v31  ;;  %v10637_v31 = vpop.f32.mrf.mxu2 }
 0x1a8   : > { %v10607_v0 = vadd.s32 %v2568_v61, %v2564_v41  ;;  %vm2671_vm6 = vcmp.lt.s32.totalorder %v10574_v53, 2  ;;  %v2678_v2 = vsel %vm2670_vm0, %v10597_v22, %v10599_v43  ;;  %v10615_v12 = vadd.s32 1, %v10485_v35  ;;  %15115 = vst [vmem:[#allocation87_spill] sm:$0xff] %v10637_v31 }
 0x1a9   : > { %v2522_v44 = vsel %vm2516_vm8, %v2519_v55, %v2521_v3  ;;  %v2679_v52 = vsel %vm2673_vm4, %v2666_v5, 920167782  ;;  %v2682_v41 = vsel %vm2670_vm0, %v10599_v43, %v10603_v17  ;;  %v2683_v63 = vsel %vm2673_vm4, %v2669_v59, 1326507024 }
 0x1aa   : > { %v2680_v61 = vsel %vm2672_vm1, %v10603_v17, %v2679_v52  ;;  %v2687_v35 = vand.u32 65535, %v10576_v30  ;;  %v2688_v1 = vshrl.u32 %v10576_v30, 16  ;;  %v1604_v55 = vand.u32 65535, %v10560_v32 }
 0x1ab   : > { %v2579_v3 = vadd.s32 1, %v2575_v58  ;;  %v2681_v34 = vsel %vm2671_vm6, %v2678_v2, %v2680_v61  ;;  %v2684_v10 = vsel %vm2672_vm1, %v2666_v5, %v2683_v63  ;;  %vm2578_vm8 = vc.u32 %v10605_v23, %v10607_v0 }
 0x1ac   : > { %v2685_v9 = vsel %vm2671_vm6, %v2682_v41, %v2684_v10  ;;  %v2711_v28 = vand.u32 65535, %v2681_v34  ;;  %v2712_v42 = vshrl.u32 %v2681_v34, 16  ;;  %v1605_v40 = vshrl.u32 %v10560_v32, 16 }
 0x1ad   : > { %v2576_v7 = vmul.u32 %v10510_v49, %v2522_v44  ;;  %v2689_v57 = vand.u32 65535, %v2685_v9  ;;  %v2690_v59 = vshrl.u32 %v2685_v9, 16  ;;  %v2796_v5 = vand.u32 2139095040, %v10637_v31 }
 0x1ae   : > { %v2713_v2 = vmul.u32 %v2711_v28, %v2687_v35  ;;  %v2714_v52 = vmul.u32 %v2712_v42, %v2687_v35  ;;  %v10645_v61 = vmul.u32 %v2711_v28, %v2688_v1  ;;  %v2580_v63 = vsel %vm2578_vm8, %v2579_v3, %v2575_v58 }
 0x1af   : > { %v2691_v39 = vmul.u32 %v2689_v57, %v2687_v35  ;;  %v2692_v36 = vmul.u32 %v2690_v59, %v2687_v35  ;;  %v10648_v13 = vmul.u32 %v2689_v57, %v2688_v1  ;;  %v1626_v41 = vand.u32 65535, %v10556_v50 }
 0x1b0   : > { %v1627_v34 = vshrl.u32 %v10556_v50, 16  ;;  %v2716_v32 = vmul.u32 %v2712_v42, %v2688_v1  ;;  %v2717_v10 = vshll.u32 %v2714_v52, 16  ;;  %v2694_v44 = vmul.u32 %v2690_v59, %v2688_v1 }
 0x1b1   : > { %v2695_v9 = vshll.u32 %v2692_v36, 16  ;;  %v2697_v28 = vshll.u32 %v10648_v13, 16  ;;  %vm1719_vm11 = vcmp.gt.s32.totalorder %v10615_v12, 0  ;;  %v10656_v58 = vadd.s32 %v2580_v63, %v2576_v7 }
 0x1b2   : > { %v2719_v35 = vshll.u32 %v10645_v61, 16  ;;  %vm2721_vm13 = vc.u32 %v2713_v2, %v2717_v10  ;;  %v2797_v3 = vshrl.u32 %v2796_v5, 23  ;;  %v2723_v42 = vadd.s32 %v2717_v10, %v2713_v2 }
 0x1b3   : > { %vm2699_vm15 = vc.u32 %v2691_v39, %v2695_v9  ;;  %v2701_v57 = vadd.s32 %v2695_v9, %v2691_v39  ;;  %v2722_v50 = vsel %vm2721_vm13, 1, %v15022_v8  ;;  %v10661_v48 = vmul.u32 %v1604_v55, %v10462_v4 }
 0x1b4   : > { %v15116_v1 = vor.u32 8388608, %v10474_v54  ;;  %v2700_v49 = vsel %vm2699_vm15, 1, %v15022_v8  ;;  %v2724_v7 = vadd.s32 %v2722_v50, %v2716_v32  ;;  %v10669_v63 = vmul.u32 %v1605_v40, %v10462_v4 }
 0x1b5   : > { %v2702_v29 = vadd.s32 %v2700_v49, %v2694_v44  ;;  %vm2703_vm8 = vc.u32 %v2701_v57, %v2697_v28  ;;  %vm2725_vm9 = vc.u32 %v2723_v42, %v2719_v35  ;;  %v2582_v39 = vadd.s32 536870912, %v10656_v58 }
 0x1b6   : > { %v10665_v59 = vshll.u32 %v15116_v1, 8  ;;  %15118 = vst [vmem:[#allocation89_spill] sm:$0xff] %v10669_v63  ;;  %v2704_v2 = vsel %vm2703_vm8, 1, %v15022_v8  ;;  %v2726_v5 = vsel %vm2725_vm9, 1, %v15022_v8  ;;  %v8564_v10 = vadd.s32 4294967169, %v2797_v3 }
 0x1b7   : > { %v2696_v9 = vshrl.u32 %v2692_v36, 16  ;;  %v2706_v54 = vadd.s32 %v2704_v2, %v2702_v29  ;;  %v2718_v1 = vshrl.u32 %v2714_v52, 16  ;;  %v2728_v62 = vadd.s32 %v2726_v5, %v2724_v7 }
 0x1b8   : > { %15117 = vst [vmem:[#allocation88_spill] sm:$0xff] %v10665_v59  ;;  %v10675_v6 = vmul.u32 %v1604_v55, %v10470_v21  ;;  %v10678_v32 = vmul.u32 %v1605_v40, %v10470_v21  ;;  %v10681_v49 = vmul.u32 %v1626_v41, %v10462_v4  ;;  %v2803_v44 = vadd.s32 1, %v8564_v10 }
 0x1b9   : > { %v10684_v28 = vmul.u32 %v1627_v34, %v10462_v4  ;;  %v10687_v57 = vmul.u32 %v1626_v41, %v10470_v21  ;;  %v2654_v36 = vshrl.u32 %v15021_v26, %v10578_v38  ;;  %v14828_v29 = vand.u32 2147483647, %v10637_v31 }
 0x1ba   : > { %15119 = vst [vmem:[#allocation90_spill] sm:$0xff] %v10675_v6  ;;  %v10692_v55 = vshrl.u32 %v2582_v39, 30  ;;  %v2675_v40 = vsel %vm2673_vm4, %v10603_v17, 2102212464  ;;  %v2698_v52 = vshrl.u32 %v10648_v13, 16  ;;  %vm2804_vm9 = vcmp.gt.s32.totalorder %v2803_v44, 0 }
 0x1bb   : > { %15120 = vst [vmem:[#allocation91_spill] sm:$0xff] %v10678_v32  ;;  %v2707_v3 = vadd.s32 %v2706_v54, %v2696_v9  ;;  %v2720_v4 = vshrl.u32 %v10645_v61, 16  ;;  %v2729_v50 = vadd.s32 %v2728_v62, %v2718_v1  ;;  %v2805_v41 = vsel %vm2804_vm9, %v2803_v44, 0 }
 0x1bc   : > { %15121 = vst [vmem:[#allocation92_spill] sm:$0xff] %v10681_v49  ;;  %v1610_v7 = vshll.u32 %v10669_v63, 16  ;;  %v10702_v2 = vmul.u32 %v1627_v34, %v10470_v21  ;;  %v2807_v39 = vand.u32 31, %v2805_v41  ;;  %v1720_v17 = vsel %vm1719_vm11, %v10615_v12, 0 }
 0x1bd   : > { %15122 = vst [vmem:[#allocation93_spill] sm:$0xff] %v10684_v28  ;;  %v2674_v13 = vsel %vm2670_vm0, %v2654_v36, %v10597_v22  ;;  %v2676_v62 = vsel %vm2672_vm1, %v10599_v43, %v2675_v40  ;;  %v2800_v61 = vand.u32 8388607, %v14828_v29  ;;  %v2584_v5 = vshll.u32 %v10692_v55, 30 }
 0x1be   : > { %15123 = vst [vmem:[#allocation94_spill] sm:$0xff] %v10687_v57  ;;  %v10716_v21 = vadd.s32 %v2723_v42, %v2719_v35  ;;  %v10718_v34 = vsub.s32 32, %v2807_v39  ;;  %v2810_v10 = vshll.u32 %v15021_v26, %v2807_v39  ;;  %v10721_v12 = vadd.s32 %v2707_v3, %v2698_v52 }
 0x1bf   : > { %15124 = vst [vmem:[#allocation95_spill] sm:$0xff] %v10692_v55  ;;  %v2730_v9 = vadd.s32 %v2729_v50, %v2720_v4  ;;  %v2813_v22 = vshll.u32 %v15023_v56, %v2807_v39  ;;  %v2816_v54 = vshll.u32 %v15065_v24, %v2807_v39  ;;  %v10726_v43 = vand.u32 65535, %v10665_v59 }
 0x1c0   : > { %15125 = vst [vmem:[#allocation96_spill] sm:$0xff] %v10702_v2  ;;  %v10728_v1 = vshrl.u32 %v2805_v41, 5  ;;  %v2811_v35 = vshrl.u32 %v15023_v56, %v10718_v34  ;;  %v2814_v42 = vshrl.u32 %v15065_v24, %v10718_v34  ;;  %v1722_v44 = vand.u32 31, %v1720_v17 }
 0x1c1   : > { %15126 = vst [vmem:[#allocation97_spill] sm:$0xff] %v10726_v43  ;;  %v2677_v36 = vsel %vm2671_vm6, %v2674_v13, %v2676_v62  ;;  %v2801_v40 = vor.u32 8388608, %v2800_v61  ;;  %v2817_v52 = vshrl.u32 %v15066_v45, %v10718_v34  ;;  %v2819_v50 = vshll.u32 %v15066_v45, %v2807_v39 }
 0x1c2   : > { %v10738_v3 = vor.u32 %v2811_v35, %v2810_v10  ;;  %v10740_v4 = vor.u32 %v2814_v42, %v2813_v22  ;;  %v2820_v41 = vshrl.u32 %v15062_v27, %v10718_v34  ;;  %v10746_v38 = vsub.s32 %v10656_v58, %v2584_v5 }
 0x1c3   : > { %vm2733_vm0 = vc.u32 %v10721_v12, %v10716_v21  ;;  %v2734_v53 = vadd.s32 1, %v2730_v9  ;;  %v10750_v13 = vor.u32 %v2817_v52, %v2816_v54  ;;  %v2822_v61 = vshll.u32 %v15062_v27, %v2807_v39 }
 0x1c4   : > { %v2821_v62 = vor.u32 %v2820_v41, %v2819_v50  ;;  %v2823_v10 = vshrl.u32 %v15063_v16, %v10718_v34  ;;  %vm2825_vm1 = vcmp.lt.s32.totalorder %v10728_v1, 1  ;;  %vm10757_vm4 = vc.u32 %v10661_v48, %v1610_v7 }
 0x1c5   : > { %v2731_v58 = vmul.u32 %v10576_v30, %v2677_v36  ;;  %vm2827_vm6 = vcmp.lt.s32.totalorder %v10728_v1, 3  ;;  %v10763_v5 = vshll.u32 %v2801_v40, 8  ;;  %vm2826_vm11 = vcmp.lt.s32.totalorder %v10728_v1, 2 }
 0x1c6   : > { %v2824_v54 = vor.u32 %v2823_v10, %v2822_v61  ;;  %vm2828_vm13 = vcmp.lt.s32.totalorder %v10728_v1, 4  ;;  %v2833_v39 = vsel %vm2825_vm1, %v10738_v3, %v10740_v4  ;;  %v10771_v35 = vshrl.u32 %v1720_v17, 5  ;;  %v15135_v1 = vld [vmem:[#allocation30_spill] sm:$0xff] }
 0x1c7   : > { %v2587_v42 = vsub.s32 0, %v10746_v38  ;;  %v2735_v30 = vsel %vm2733_vm0, %v2734_v53, %v2730_v9  ;;  %v2834_v36 = vsel %vm2828_vm13, %v2821_v62, 920167782  ;;  %vm2586_vm15 = vcmp.lt.s32.totalorder %v10746_v38, 0 }
 0x1c8   : > { %v2835_v40 = vsel %vm2827_vm6, %v10750_v13, %v2834_v36  ;;  %v2837_v17 = vsel %vm2825_vm1, %v10740_v4, %v10750_v13  ;;  %v2838_v52 = vsel %vm2828_vm13, %v2824_v54, 1326507024  ;;  %v10792_v9 = vsel %vm10757_vm4, 1, %v15022_v8 }
 0x1c9   : > { %15129 = vst [vmem:[#allocation98_spill] sm:$0xff] %v10792_v9  ;;  %v10795_v50 = vadd.s32 %v1610_v7, %v10661_v48  ;;  %v10798_v41 = vshrl.u32 %v10665_v59, 16  ;;  %v2836_v53 = vsel %vm2826_vm11, %v2833_v39, %v2835_v40  ;;  %v1723_v61 = vsub.s32 32, %v1722_v44 }
 0x1ca   : > { %v10802_v10 = vadd.s32 %v2735_v30, %v2731_v58  ;;  %v2839_v54 = vsel %vm2827_vm6, %v2821_v62, %v2838_v52  ;;  %v2842_v36 = vand.u32 65535, %v10763_v5  ;;  %v1725_v22 = vshll.u32 %v15021_v26, %v1722_v44  ;;  %v10813_v30 = vpop.f32.mrf.mxu3 }
 0x1cb   : > { %15130 = vst [vmem:[#allocation99_spill] sm:$0xff] %v10795_v50  ;;  %v1728_v29 = vshll.u32 %v15023_v56, %v1722_v44  ;;  %v2588_v48 = vsel %vm2586_vm15, %v2587_v42, %v10746_v38  ;;  %v2840_v7 = vsel %vm2826_vm11, %v2837_v17, %v2839_v54  ;;  %v2843_v2 = vshrl.u32 %v10763_v5, 16 }
 0x1cc   : > { %15131 = vst [vmem:[#allocation100_spill] sm:$0xff] %v10798_v41  ;;  %v2844_v39 = vand.u32 65535, %v2840_v7  ;;  %v2845_v40 = vshrl.u32 %v2840_v7, 16  ;;  %v2867_v58 = vshrl.u32 %v2836_v53, 16  ;;  %v1731_v62 = vshll.u32 %v15065_v24, %v1722_v44 }
 0x1cd   : > { %15132 = vst [vmem:[#allocation101_spill] sm:$0xff] %v10813_v30  ;;  %v1734_v52 = vshll.u32 %v15066_v45, %v1722_v44  ;;  %v1737_v63 = vshll.u32 %v15062_v27, %v1722_v44  ;;  %v2866_v49 = vand.u32 65535, %v2836_v53  ;;  %v1726_v57 = vshrl.u32 %v15023_v56, %v1723_v61 }
 0x1ce   : > { %v1729_v42 = vshrl.u32 %v15065_v24, %v1723_v61  ;;  %v2737_v17 = vadd.s32 536870912, %v10802_v10  ;;  %v10821_v54 = vmul.u32 %v2845_v40, %v2842_v36  ;;  %v1732_v7 = vshrl.u32 %v15066_v45, %v1723_v61 }
 0x1cf   : > { %v2589_v50 = vclz %v2588_v48  ;;  %v10824_v6 = vmul.u32 %v2867_v58, %v2842_v36  ;;  %v2951_v28 = vand.u32 2139095040, %v10813_v30  ;;  %v1738_v31 = vshrl.u32 %v15063_v16, %v1723_v61 }
 0x1d0   : > { %v2846_v41 = vmul.u32 %v2844_v39, %v2842_v36  ;;  %v10828_v44 = vmul.u32 %v2844_v39, %v2843_v2  ;;  %v2850_v53 = vshll.u32 %v10821_v54, 16  ;;  %v10832_v55 = vshrl.u32 %v15021_v26, %v1723_v61 }
 0x1d1   : > { %v2868_v19 = vmul.u32 %v2866_v49, %v2842_v36  ;;  %v10834_v37 = vmul.u32 %v2866_v49, %v2843_v2  ;;  %v2872_v47 = vshll.u32 %v10824_v6, 16  ;;  %v10837_v48 = vor.u32 %v1726_v57, %v1725_v22 }
 0x1d2   : > { %v1735_v18 = vshrl.u32 %v15062_v27, %v1723_v61  ;;  %vm1740_vm8 = vcmp.lt.s32.totalorder %v10771_v35, 1  ;;  %v10841_v43 = vshrl.u32 %v2737_v17, 30  ;;  %v10843_v39 = vor.u32 %v1729_v42, %v1728_v29 }
 0x1d3   : > { %v10845_v59 = vor.u32 %v1732_v7, %v1731_v62  ;;  %v8559_v14 = vadd.s32 4294967294, %v2589_v50  ;;  %v2952_v9 = vshrl.u32 %v2951_v28, 23  ;;  %v1739_v32 = vor.u32 %v1738_v31, %v1737_v63 }
 0x1d4   : > { %v2852_v49 = vshll.u32 %v10828_v44, 16  ;;  %vm2854_vm9 = vc.u32 %v2846_v41, %v2850_v53  ;;  %v2856_v36 = vadd.s32 %v2850_v53, %v2846_v41  ;;  %vm14855_vm0 = vcmp.lt.s32.totalorder %v10771_v35, 4 }
 0x1d5   : > { %v14852_v57 = vshll.u32 %v10834_v37, 16  ;;  %vm2876_vm4 = vc.u32 %v2868_v19, %v2872_v47  ;;  %v10850_v61 = vadd.s32 %v2872_v47, %v2868_v19  ;;  %v10852_v22 = vor.u32 %v1735_v18, %v1734_v52 }
 0x1d6   : > { %vm1742_vm15 = vcmp.lt.s32.totalorder %v10771_v35, 3  ;;  %v2739_v29 = vshll.u32 %v10841_v43, 30  ;;  %v2849_v50 = vmul.u32 %v2845_v40, %v2843_v2  ;;  %vm8560_vm14 = vcmp.lt.s32.totalorder %v8559_v14, 0 }
 0x1d7   : > { %v2855_v31 = vsel %vm2854_vm9, 1, %v15022_v8  ;;  %v2871_v63 = vmul.u32 %v2867_v58, %v2843_v2  ;;  %v8567_v28 = vadd.s32 4294967169, %v2952_v9  ;;  %v1753_v41 = vsel %vm14855_vm0, %v1739_v32, 1326507024 }
 0x1d8   : > { %vm2858_vm7 = vc.u32 %v2856_v36, %v2852_v49  ;;  %v2877_v62 = vsel %vm2876_vm4, 1, %v15022_v8  ;;  %v14851_v47 = vand.u32 2147483647, %v10813_v30  ;;  %v10864_v18 = vsel %vm14855_vm0, %v10845_v59, 2102212464 }
 0x1d9   : > { %v2809_v19 = vshrl.u32 %v15021_v26, %v10718_v34  ;;  %vm2880_vm9 = vc.u32 %v10850_v61, %v14852_v57  ;;  %v2958_v2 = vadd.s32 1, %v8567_v28  ;;  %v10875_v32 = vsel %vm1740_vm8, %v10843_v39, %v10845_v59 }
 0x1da   : > { %v10877_v9 = vsel %vm8560_vm14, 0, %v8559_v14  ;;  %v10880_v40 = vsub.s32 %v10802_v10, %v2739_v29  ;;  %v2857_v58 = vadd.s32 %v2855_v31, %v2849_v50  ;;  %v10885_v34 = vsel %vm1742_vm15, %v10852_v22, %v1753_v41 }
 0x1db   : > { %v2859_v52 = vsel %vm2858_vm7, 1, %v15022_v8  ;;  %v2879_v42 = vadd.s32 %v2877_v62, %v2871_v63  ;;  %vm2959_vm4 = vcmp.gt.s32.totalorder %v2958_v2, 0  ;;  %v10890_v17 = vadd.s32 %v10607_v0, %v10605_v23 }
 0x1dc   : > { %v2881_v14 = vsel %vm2880_vm9, 1, %v15022_v8  ;;  %v2955_v10 = vand.u32 8388607, %v14851_v47  ;;  %v2960_v7 = vsel %vm2959_vm4, %v2958_v2, 0  ;;  %v10900_v36 = vsel %vm2825_vm1, %v2809_v19, %v10738_v3 }
 0x1dd   : > { %v2962_v29 = vand.u32 31, %v2960_v7  ;;  %vm2741_vm7 = vcmp.lt.s32.totalorder %v10880_v40, 0  ;;  %v2830_v23 = vsel %vm2828_vm13, %v10750_v13, 2102212464  ;;  %v2851_v0 = vshrl.u32 %v10821_v54, 16 }
 0x1de   : > { %v2861_v50 = vadd.s32 %v2859_v52, %v2857_v58  ;;  %v2883_v31 = vadd.s32 %v2881_v14, %v2879_v42  ;;  %v2956_v62 = vor.u32 8388608, %v2955_v10  ;;  %v2873_v47 = vshrl.u32 %v10824_v6, 16 }
 0x1df   : > { %v10907_v63 = vsub.s32 32, %v2962_v29  ;;  %v2965_v28 = vshll.u32 %v15021_v26, %v2962_v29  ;;  %v2968_v41 = vshll.u32 %v15023_v56, %v2962_v29  ;;  %v2971_v3 = vshll.u32 %v15065_v24, %v2962_v29 }
 0x1e0   : > { %v2974_v19 = vshll.u32 %v15066_v45, %v2962_v29  ;;  %v2977_v2 = vshll.u32 %v15062_v27, %v2962_v29  ;;  %v10915_v13 = vshrl.u32 %v2960_v7, 5  ;;  %v2742_v52 = vsub.s32 0, %v10880_v40 }
 0x1e1   : > { %v2966_v54 = vshrl.u32 %v15023_v56, %v10907_v63  ;;  %v2969_v58 = vshrl.u32 %v15065_v24, %v10907_v63  ;;  %v2972_v42 = vshrl.u32 %v15066_v45, %v10907_v63  ;;  %v2975_v14 = vshrl.u32 %v15062_v27, %v10907_v63 }
 0x1e2   : > { %v2978_v10 = vshrl.u32 %v15063_v16, %v10907_v63  ;;  %v2862_v6 = vadd.s32 %v2861_v50, %v2851_v0  ;;  %v2884_v7 = vadd.s32 %v2883_v31, %v2873_v47  ;;  %v10934_v57 = vshll.u32 %v2956_v62, 8 }
 0x1e3   : > { %v10928_v29 = vor.u32 %v2966_v54, %v2965_v28  ;;  %v10930_v53 = vor.u32 %v2969_v58, %v2968_v41  ;;  %v10932_v56 = vor.u32 %v2972_v42, %v2971_v3  ;;  %v2976_v24 = vor.u32 %v2975_v14, %v2974_v19 }
 0x1e4   : > { %v2979_v49 = vor.u32 %v2978_v10, %v2977_v2  ;;  %v2853_v45 = vshrl.u32 %v10828_v44, 16  ;;  %v2875_v30 = vshrl.u32 %v10834_v37, 16  ;;  %vm2980_vm14 = vcmp.lt.s32.totalorder %v10915_v13, 1 }
 0x1e5   : > { %vm2982_vm1 = vcmp.lt.s32.totalorder %v10915_v13, 3  ;;  %v2743_v27 = vsel %vm2741_vm7, %v2742_v52, %v10880_v40  ;;  %vm2981_vm13 = vcmp.lt.s32.totalorder %v10915_v13, 2  ;;  %vm2983_vm9 = vcmp.lt.s32.totalorder %v10915_v13, 4 }
 0x1e6   : > { %v2988_v16 = vsel %vm2980_vm14, %v10928_v29, %v10930_v53  ;;  %v10949_v44 = vadd.s32 %v2862_v6, %v2853_v45  ;;  %v2885_v47 = vadd.s32 %v2884_v7, %v2875_v30  ;;  %v2989_v0 = vsel %vm2983_vm9, %v2976_v24, 920167782 }
 0x1e7   : > { %v2992_v50 = vsel %vm2980_vm14, %v10930_v53, %v10932_v56  ;;  %v2990_v31 = vsel %vm2982_vm1, %v10932_v56, %v2989_v0  ;;  %v2993_v28 = vsel %vm2983_vm9, %v2979_v49, 1326507024  ;;  %v2997_v41 = vand.u32 65535, %v10934_v57 }
 0x1e8   : > { %v2998_v62 = vshrl.u32 %v10934_v57, 16  ;;  %v2744_v30 = vclz %v2743_v27  ;;  %v2831_v3 = vsel %vm2827_vm6, %v10740_v4, %v2830_v23  ;;  %v2991_v19 = vsel %vm2981_vm13, %v2988_v16, %v2990_v31 }
 0x1e9   : > { %v2994_v2 = vsel %vm2982_vm1, %v2976_v24, %v2993_v28  ;;  %v15133_v54 = vshll.u32 %v10834_v37, 16  ;;  %v3021_v52 = vand.u32 65535, %v2991_v19  ;;  %v3022_v42 = vshrl.u32 %v2991_v19, 16 }
 0x1ea   : > { %v2995_v49 = vsel %vm2981_vm13, %v2992_v50, %v2994_v2  ;;  %v2889_v4 = vadd.s32 1, %v2885_v47  ;;  %v15134_v16 = vsub.s32 4294967266, %v10877_v9  ;;  %v8562_v50 = vadd.s32 4294967294, %v2744_v30 }
 0x1eb   : > { %v10974_v58 = vadd.s32 %v10850_v61, %v15133_v54  ;;  %v2999_v23 = vand.u32 65535, %v2995_v49  ;;  %v3000_v10 = vshrl.u32 %v2995_v49, 16  ;;  %v3023_v6 = vmul.u32 %v3021_v52, %v2997_v41 }
 0x1ec   : > { %v3024_v7 = vmul.u32 %v3022_v42, %v2997_v41  ;;  %v3025_v37 = vmul.u32 %v3021_v52, %v2998_v62  ;;  %v2832_v61 = vsel %vm2826_vm11, %v10900_v36, %v2831_v3  ;;  %v10987_v0 = vadd.s32 127, %v15134_v16 }
 0x1ed   : > { %vm2888_vm6 = vc.u32 %v10949_v44, %v10974_v58  ;;  %v3001_v24 = vmul.u32 %v2999_v23, %v2997_v41  ;;  %v3002_v45 = vmul.u32 %v3000_v10, %v2997_v41  ;;  %v3003_v27 = vmul.u32 %v2999_v23, %v2998_v62 }
 0x1ee   : > { %v3026_v31 = vmul.u32 %v3022_v42, %v2998_v62  ;;  %v3027_v28 = vshll.u32 %v3024_v7, 16  ;;  %v2890_v19 = vsel %vm2888_vm6, %v2889_v4, %v2885_v47  ;;  %v3004_v2 = vmul.u32 %v3000_v10, %v2998_v62 }
 0x1ef   : > { %v3005_v54 = vshll.u32 %v3002_v45, 16  ;;  %v3007_v49 = vshll.u32 %v3003_v27, 16  ;;  %v2886_v52 = vmul.u32 %v10763_v5, %v2832_v61  ;;  %v3029_v14 = vshll.u32 %v3025_v37, 16 }
 0x1f0   : > { %vm3031_vm4 = vc.u32 %v3023_v6, %v3027_v28  ;;  %v1987_v36 = vsub.s32 4, %v15135_v1  ;;  %v3033_v23 = vadd.s32 %v3027_v28, %v3023_v6  ;;  %v1992_v47 = vmul.f32 -0.001358992, %v10364_v15 }
 0x1f1   : > { %vm3009_vm11 = vc.u32 %v3001_v24, %v3005_v54  ;;  %v3011_v41 = vadd.s32 %v3005_v54, %v3001_v24  ;;  %v3032_v3 = vsel %vm3031_vm4, 1, %v15022_v8  ;;  %v10992_v16 = vadd.s32 %v2890_v19, %v2886_v52 }
 0x1f2   : > { %v3010_v30 = vsel %vm3009_vm11, 1, %v15022_v8  ;;  %v3034_v42 = vadd.s32 %v3032_v3, %v3026_v31  ;;  %v2964_v62 = vshrl.u32 %v15021_v26, %v10907_v63  ;;  %vm3035_vm6 = vc.u32 %v3033_v23, %v3029_v14 }
 0x1f3   : > { %v3012_v5 = vadd.s32 %v3010_v30, %v3004_v2  ;;  %vm3013_vm7 = vc.u32 %v3011_v41, %v3007_v49  ;;  %vm8563_vm0 = vcmp.lt.s32.totalorder %v8562_v50, 0  ;;  %v2985_v4 = vsel %vm2983_vm9, %v10932_v56, 2102212464 }
 0x1f4   : > { %v3014_v10 = vsel %vm3013_vm7, 1, %v15022_v8  ;;  %v1988_v6 = vsel %vm1865_vm5, %v1987_v36, %v15135_v1  ;;  %v3006_v61 = vshrl.u32 %v3002_v45, 16  ;;  %v3036_v31 = vsel %vm3035_vm6, 1, %v15022_v8 }
 0x1f5   : > { %v3016_v24 = vadd.s32 %v3014_v10, %v3012_v5  ;;  %v1993_v28 = vadd.f32 0.041655596, %v1992_v47  ;;  %v2892_v26 = vadd.s32 536870912, %v10992_v16  ;;  %v3028_v63 = vshrl.u32 %v3024_v7, 16 }
 0x1f6   : > { %v3038_v19 = vadd.s32 %v3036_v31, %v3034_v42  ;;  %v1999_v2 = vmul.f32 -0.00019511016, %v10364_v15  ;;  %v2984_v56 = vsel %vm2980_vm14, %v2964_v62, %v10928_v29  ;;  %v3008_v54 = vshrl.u32 %v3003_v27, 16 }
 0x1f7   : > { %v3017_v49 = vadd.s32 %v3016_v24, %v3006_v61  ;;  %v1994_v52 = vmul.f32 %v1993_v28, %v10364_v15  ;;  %v2986_v45 = vsel %vm2982_vm1, %v10930_v53, %v2985_v4  ;;  %v3030_v1 = vshrl.u32 %v3025_v37, 16 }
 0x1f8   : > { %v3039_v36 = vadd.s32 %v3038_v19, %v3028_v63  ;;  %v2000_v41 = vadd.f32 0.008332121, %v1999_v2  ;;  %v11017_v7 = vadd.s32 %v3033_v23, %v3029_v14  ;;  %v2147_v42 = vmul.f32 -0.001358992, %v10368_v25 }
 0x1f9   : > { %v11015_v3 = vadd.s32 %v3017_v49, %v3008_v54  ;;  %v1995_v30 = vadd.f32 -0.4999988, %v1994_v52  ;;  %v15136_v29 = vsub.s32 32, %v10877_v9  ;;  %v11025_v62 = vsel %vm10149_vm3, 0, %v1988_v6  ;;  %v15137_v6 = vld [vmem:[#allocation38_spill] sm:$0xff] }
 0x1fa   : > { %v3040_v47 = vadd.s32 %v3039_v36, %v3030_v1  ;;  %v2001_v53 = vmul.f32 %v2000_v41, %v10364_v15  ;;  %v11028_v37 = vshrl.u32 %v2892_v26, 30  ;;  %v2987_v14 = vsel %vm2981_vm13, %v2984_v56, %v2986_v45 }
 0x1fb   : > { %v2595_v27 = vshrl.u32 %v10890_v17, %v15136_v29  ;;  %vm3043_vm5 = vc.u32 %v11015_v3, %v11017_v7  ;;  %v1996_v23 = vmul.f32 %v1995_v30, %v10364_v15  ;;  %v2599_v5 = vshll.u32 %v10987_v0, 23 }
 0x1fc   : > { %v11037_v17 = vsel %vm8563_vm0, 0, %v8562_v50  ;;  %v3044_v60 = vadd.s32 1, %v3040_v47  ;;  %v2002_v4 = vadd.f32 -0.16666654, %v2001_v53  ;;  %v4479_v10 = vand.u32 3, %v11025_v62 }
 0x1fd   : > { %v2142_v61 = vsub.s32 4, %v15137_v6  ;;  %v2148_v24 = vadd.f32 0.041655596, %v2147_v42  ;;  %v2154_v13 = vmul.f32 -0.00019511016, %v10368_v25  ;;  %v3041_v31 = vmul.u32 %v10934_v57, %v2987_v14  ;;  %v15143_v14 = vld [vmem:[#allocation8_spill] sm:$0xff] }
 0x1fe   : > { %v3045_v28 = vsel %vm3043_vm5, %v3044_v60, %v3040_v47  ;;  %v11043_v26 = vadd.f32 1.0, %v1996_v23  ;;  %v2003_v63 = vmul.f32 %v2002_v4, %v10364_v15  ;;  %v11048_v0 = vadd.s32 %v10716_v21, %v10721_v12  ;;  %v15142_v47 = vld [vmem:[#allocation18_spill] sm:$0xff]  ;;  %v15144_v4 = vld [vmem:[#allocation21_spill] sm:$0xff] }
 0x1ff   : > { %v2894_v50 = vshll.u32 %v11028_v37, 30  ;;  %v2149_v19 = vmul.f32 %v2148_v24, %v10368_v25  ;;  %v2155_v2 = vadd.f32 0.008332121, %v2154_v13  ;;  %v15138_v56 = vshll.u32 %v10746_v38, %v10877_v9 }
 0x200   : > { %v11057_v57 = vor.u32 4788187, %v2599_v5  ;;  %v11059_v49 = vadd.s32 %v3045_v28, %v3041_v31  ;;  %v2004_v52 = vadd.f32 1.0, %v2003_v63  ;;  %v2752_v15 = vsub.s32 4294967266, %v11037_v17 }
 0x201   : > { %v11055_v54 = vor.u32 %v2595_v27, %v15138_v56  ;;  %vm15139_vm3 = vcmp.lt.s32.totalorder %v9510_v11, 0  ;;  %v2150_v12 = vadd.f32 -0.4999988, %v2149_v19  ;;  %v2156_v45 = vmul.f32 %v2155_v2, %v10368_v25  ;;  %v15146_v19 = vld [vmem:[#allocation15_spill] sm:$0xff] }
 0x202   : > { %v2143_v21 = vsel %vm15139_vm3, %v2142_v61, %v15137_v6  ;;  %v11067_v1 = vmul.f32 %v2004_v52, %v10191_v51  ;;  %v14859_v38 = vxor.u32 2147483648, %v11043_v26  ;;  %vm4480_vm0 = vcmp.lt.s32.totalorder %v4479_v10, 2  ;;  %v15140_v51 = vld [vmem:[#allocation12_spill] sm:$0xff]  ;;  %v15145_v61 = vld [vmem:[#allocation14_spill] sm:$0xff] }
 0x203   : > { %vm4481_vm14 = vcmp.eq.s32.totalorder %v4479_v10, 0  ;;  %v11071_v9 = vsub.s32 %v10992_v16, %v2894_v50  ;;  %vm4484_vm1 = vcmp.eq.s32.totalorder %v4479_v10, 2  ;;  %v2151_v36 = vmul.f32 %v2150_v12, %v10368_v25 }
 0x204   : > { %v2157_v41 = vadd.f32 -0.16666654, %v2156_v45  ;;  %v3047_v30 = vadd.s32 536870912, %v11059_v49  ;;  %v14860_v42 = vxor.u32 2147483648, %v11067_v1  ;;  %v11078_v29 = vsel %vm10261_vm12, 0, %v2143_v21  ;;  %v15148_v21 = vld [vmem:[#allocation13_spill] sm:$0xff] }
 0x205   : > { %v15141_v27 = vshll.u32 %v15140_v51, 16  ;;  %v11083_v53 = vadd.f32 1.0, %v2151_v36  ;;  %v681_v23 = vshrl.u32 %v15143_v14, 16  ;;  %v4486_v20 = vsel %vm4484_vm1, %v14859_v38, %v11067_v1  ;;  %v15190_v38 = vld [vmem:[#allocation36_spill] sm:$0xff] }
 0x206   : > { %v2158_v16 = vmul.f32 %v2157_v41, %v10368_v25  ;;  %v4483_v60 = vsel %vm4481_vm14, %v11043_v26, %v14860_v42  ;;  %v702_v24 = vshll.u32 %v15145_v61, 16  ;;  %vm2006_vm12 = vweird.f32 %v9411_v46 }
 0x207   : > { %vm688_vm13 = vc.u32 %v15142_v47, %v15141_v27  ;;  %v4487_v25 = vsel %vm4480_vm0, %v4483_v60, %v4486_v20  ;;  %v4633_v31 = vand.u32 3, %v11078_v29  ;;  %v11099_v28 = vadd.s32 127, %v2752_v15 }
 0x208   : > { %v689_v5 = vsel %vm688_vm13, 1, %v15022_v8  ;;  %v2159_v13 = vadd.f32 1.0, %v2158_v16  ;;  %v2897_v63 = vsub.s32 0, %v11071_v9  ;;  %v4488_v50 = vsel %vm2006_vm12, nan, %v4487_v25  ;;  %v15152_v25 = vld [vmem:[#allocation26_spill] sm:$0xff] }
 0x209   : > { %v691_v6 = vadd.s32 %v689_v5, %v15144_v4  ;;  %v704_v2 = vshll.u32 %v15146_v19, 16  ;;  %v11105_v56 = vshrl.u32 %v3047_v30, 30  ;;  %5620 = vmatpush.msra.mxu0 %v4488_v50  ;;  %v14857_v10 = vxor.u32 2147483648, %v11083_v53  ;;  %v15149_v30 = vld [vmem:[#allocation17_spill] sm:$0xff] }
 0x20a   : > { %v11108_v52 = vmul.f32 %v2159_v13, %v10323_v33  ;;  %vm706_vm9 = vc.u32 %v15148_v21, %v702_v24  ;;  %v683_v15 = vshrl.u32 %v15140_v51, 16  ;;  %v708_v36 = vadd.s32 %v702_v24, %v15148_v21  ;;  %v15153_v13 = vld [vmem:[#allocation23_spill] sm:$0xff] }
 0x20b   : > { %15147 = vst [vmem:[#allocation30_spill] sm:$0xff] %v11105_v56  ;;  %v692_v12 = vadd.s32 %v691_v6, %v681_v23  ;;  %v707_v45 = vsel %vm706_vm9, 1, %v15022_v8  ;;  %vm2161_vm4 = vweird.f32 %v9510_v11  ;;  %vm4634_vm11 = vcmp.lt.s32.totalorder %v4633_v31, 2  ;;  %v15154_v21 = vld [vmem:[#allocation11_spill] sm:$0xff] }
 0x20c   : > { %v14858_v41 = vxor.u32 2147483648, %v11108_v52  ;;  %v709_v27 = vadd.s32 %v707_v45, %v15149_v30  ;;  %vm4635_vm7 = vcmp.eq.s32.totalorder %v4633_v31, 0  ;;  %vm4638_vm6 = vcmp.eq.s32.totalorder %v4633_v31, 2  ;;  %v15156_v30 = vld [vmem:[#allocation24_spill] sm:$0xff] }
 0x20d   : > { %v703_v33 = vshrl.u32 %v15145_v61, 16  ;;  %vm710_vm5 = vc.u32 %v708_v36, %v704_v2  ;;  %v3049_v47 = vshll.u32 %v11105_v56, 30  ;;  %v4640_v16 = vsel %vm4638_vm6, %v14857_v10, %v11108_v52  ;;  %v15150_v61 = vld [vmem:[#allocation19_spill] sm:$0xff] }
 0x20e   : > { %v4637_v51 = vsel %vm4635_vm7, %v11083_v53, %v14858_v41  ;;  %v711_v14 = vsel %vm710_vm5, 1, %v15022_v8  ;;  %v11127_v5 = vadd.s32 %v692_v12, %v683_v15  ;;  %v705_v60 = vshrl.u32 %v15146_v19, 16 }
 0x20f   : > { %v4641_v23 = vsel %vm4634_vm11, %v4637_v51, %v4640_v16  ;;  %v713_v20 = vadd.s32 %v711_v14, %v709_v27  ;;  %vm1741_vm3 = vcmp.lt.s32.totalorder %v10771_v35, 2  ;;  %v11133_v6 = vadd.s32 %v708_v36, %v704_v2  ;;  %v15155_v2 = vld [vmem:[#allocation29_spill] sm:$0xff] }
 0x210   : > { %v4642_v4 = vsel %vm2161_vm4, nan, %v4641_v23  ;;  %v15151_v24 = vshll.u32 %v15150_v61, 16  ;;  %v857_v31 = vshll.u32 %v15153_v13, 16  ;;  %vm2896_vm14 = vcmp.lt.s32.totalorder %v11071_v9, 0 }
 0x211   : > { %5649 = vmatpush.msra.mxu1 %v4642_v4  ;;  %v714_v50 = vadd.s32 %v713_v20, %v703_v33  ;;  %v836_v19 = vshrl.u32 %v15154_v21, 16  ;;  %v2601_v12 = vand.u32 2147483647, %v11057_v57  ;;  %v2748_v45 = vsub.s32 32, %v11037_v17  ;;  %v15157_v57 = vld [vmem:[#allocation22_spill] sm:$0xff] }
 0x212   : > { %vm843_vm0 = vc.u32 %v15152_v25, %v15151_v24  ;;  %v859_v27 = vshll.u32 %v15156_v30, 16  ;;  %v2749_v51 = vshll.u32 %v10880_v40, %v11037_v17  ;;  %v2754_v16 = vshll.u32 %v11099_v28, 23  ;;  %v15158_v28 = vld [vmem:[#allocation25_spill] sm:$0xff] }
 0x213   : > { %v844_v15 = vsel %vm843_vm0, 1, %v15022_v8  ;;  %v11150_v14 = vsub.s32 %v11059_v49, %v3049_v47  ;;  %v715_v33 = vadd.s32 %v714_v50, %v705_v60  ;;  %v2898_v23 = vsel %vm2896_vm14, %v2897_v63, %v11071_v9 }
 0x214   : > { %v846_v36 = vadd.s32 %v844_v15, %v15155_v2  ;;  %vm718_vm1 = vc.u32 %v11127_v5, %v11133_v6  ;;  %vm861_vm13 = vc.u32 %v15157_v57, %v857_v31  ;;  %v863_v20 = vadd.s32 %v857_v31, %v15157_v57  ;;  %v15159_v31 = vld [vmem:[#allocation6_spill] sm:$0xff] }
 0x215   : > { %v719_v4 = vadd.s32 1, %v715_v33  ;;  %v838_v24 = vshrl.u32 %v15150_v61, 16  ;;  %v862_v40 = vsel %vm861_vm13, 1, %v15022_v8  ;;  %v2750_v17 = vshrl.u32 %v11048_v0, %v2748_v45  ;;  %v15160_v61 = vld [vmem:[#allocation10_spill] sm:$0xff] }
 0x216   : > { %v847_v25 = vadd.s32 %v846_v36, %v836_v19  ;;  %v858_v49 = vshrl.u32 %v15153_v13, 16  ;;  %v864_v47 = vadd.s32 %v862_v40, %v15158_v28  ;;  %vm865_vm9 = vc.u32 %v863_v20, %v859_v27  ;;  %v15165_v28 = vld [vmem:[#allocation91_spill] sm:$0xff] }
 0x217   : > { %v2899_v63 = vclz %v2898_v23  ;;  %v3052_v60 = vsub.s32 0, %v11150_v14  ;;  %v720_v50 = vsel %vm718_vm1, %v719_v4, %v715_v33  ;;  %v866_v21 = vsel %vm865_vm9, 1, %v15022_v8 }
 0x218   : > { %vm3051_vm11 = vcmp.lt.s32.totalorder %v11150_v14, 0  ;;  %v15161_v19 = vmul.u32 %v15159_v31, %v15160_v61  ;;  %v860_v2 = vshrl.u32 %v15156_v30, 16  ;;  %v868_v0 = vadd.s32 %v866_v21, %v864_v47  ;;  %v15166_v47 = vld [vmem:[#allocation98_spill] sm:$0xff] }
 0x219   : > { %v1744_v13 = vsel %vm1740_vm8, %v10832_v55, %v10837_v48  ;;  %v2755_v45 = vor.u32 4788187, %v2754_v16  ;;  %v11173_v36 = vadd.s32 %v847_v25, %v838_v24  ;;  %v11175_v33 = vadd.s32 %v863_v20, %v859_v27 }
 0x21a   : > { %v721_v15 = vadd.s32 %v720_v50, %v15161_v19  ;;  %v1746_v23 = vsel %vm1742_vm15, %v10843_v39, %v10864_v18  ;;  %v2603_v57 = vcvt.s32.f32 %v11055_v54  ;;  %v869_v30 = vadd.s32 %v868_v0, %v858_v49  ;;  %v15163_v54 = vld [vmem:[#allocation3_spill] sm:$0xff]  ;;  %v15168_v50 = vld [vmem:[#allocation68_spill] sm:$0xff] }
 0x21b   : > { %vm15162_vm7 = vcmp.lt.s32.totalorder %v10771_v35, 4  ;;  %v11189_v55 = vsel %vm1741_vm3, %v10875_v32, %v10885_v34  ;;  %v2751_v27 = vor.u32 %v2750_v17, %v2749_v51  ;;  %v3053_v16 = vsel %vm3051_vm11, %v3052_v60, %v11150_v14  ;;  %v15170_v0 = vld [vmem:[#allocation7_spill] sm:$0xff] }
 0x21c   : > { %v722_v4 = vadd.s32 536870912, %v721_v15  ;;  %v1749_v40 = vsel %vm15162_vm7, %v10852_v22, 920167782  ;;  %v2604_v20 = vmul.f32 %v2603_v57, %v2601_v12  ;;  %v8565_v24 = vadd.s32 4294967294, %v2899_v63 }
 0x21d   : > { %v870_v25 = vadd.s32 %v869_v30, %v860_v2  ;;  %vm625_vm6 = vcmp.lt.s32.totalorder %v15163_v54, 0  ;;  %v11195_v49 = vsel %vm1741_vm3, %v1744_v13, %v1746_v23  ;;  %v1748_v22 = vsel %vm1740_vm8, %v10837_v48, %v10843_v39  ;;  %v15171_v13 = vld [vmem:[#allocation16_spill] sm:$0xff] }
 0x21e   : > { %v723_v18 = vshrl.u32 %v722_v4, 30  ;;  %15164 = vst [vmem:[#allocation38_spill] sm:$0xff] %v11195_v49  ;;  %v2756_v32 = vand.u32 2147483647, %v2755_v45  ;;  %vm873_vm5 = vc.u32 %v11173_v36, %v11175_v33  ;;  %v1750_v34 = vsel %vm1742_vm15, %v10845_v59, %v1749_v40 }
 0x21f   : > { %v3054_v12 = vclz %v3053_v16  ;;  %v874_v17 = vadd.s32 1, %v870_v25  ;;  %v11208_v63 = vadd.s32 %v15166_v47, %v15165_v28  ;;  %v14856_v60 = vshrl.u32 %v11189_v55, 16  ;;  %v15173_v16 = vld [vmem:[#allocation97_spill] sm:$0xff]  ;;  %v15175_v28 = vld [vmem:[#allocation34_spill] sm:$0xff] }
 0x220   : > { %v724_v51 = vshll.u32 %v723_v18, 30  ;;  %vm14864_vm0 = vcmp.lt.s32.totalorder %v15168_v50, 0  ;;  %v2758_v48 = vcvt.s32.f32 %v2751_v27  ;;  %v2605_v39 = vxor.u32 2147483648, %v2604_v20 }
 0x221   : > { %15167 = vst [vmem:[#allocation12_spill] sm:$0xff] %v11208_v63  ;;  %vm8566_vm8 = vcmp.lt.s32.totalorder %v8565_v24, 0  ;;  %v875_v31 = vsel %vm873_vm5, %v874_v17, %v870_v25  ;;  %v11214_v61 = vsel %vm1741_vm3, %v1748_v22, %v1750_v34  ;;  %v15172_v45 = vmul.u32 %v15170_v0, %v15171_v13 }
 0x222   : > { %v725_v21 = vsub.s32 %v721_v15, %v724_v51  ;;  %v11218_v2 = vmul.f32 %v2758_v48, %v2756_v32  ;;  %v8568_v57 = vadd.s32 4294967294, %v3054_v12  ;;  %v747_v30 = vsub.s32 4, %v723_v18  ;;  %v15174_v12 = vld [vmem:[#allocation4_spill] sm:$0xff] }
 0x223   : > { %v876_v23 = vadd.s32 %v875_v31, %v15172_v45  ;;  %v11225_v35 = vsel %vm8566_vm8, 0, %v8565_v24  ;;  %v11230_v25 = vmul.u32 %v14856_v60, %v15173_v16  ;;  %v11235_v32 = vsel %vm14864_vm0, %v2605_v39, %v2604_v20  ;;  %v15177_v48 = vld [vmem:[#allocation44_spill] sm:$0xff] }
 0x224   : > { %vm726_vm15 = vcmp.lt.s32.totalorder %v725_v21, 0  ;;  %v727_v4 = vsub.s32 0, %v725_v21  ;;  %vm780_vm3 = vcmp.lt.s32.totalorder %v15174_v12, 0  ;;  %v15176_v47 = vshll.u32 %v15175_v28, 16  ;;  %v15185_v15 = vld [vmem:[#allocation48_spill] sm:$0xff] }
 0x225   : > { %v877_v27 = vadd.s32 536870912, %v876_v23  ;;  %vm8569_vm1 = vcmp.lt.s32.totalorder %v8568_v57, 0  ;;  %v748_v0 = vsel %vm625_vm6, %v747_v30, %v723_v18  ;;  %v2007_v20 = vadd.s32 3, %v11025_v62  ;;  %v15184_v18 = vld [vmem:[#allocation43_spill] sm:$0xff] }
 0x226   : > { %v728_v34 = vsel %vm726_vm15, %v727_v4, %v725_v21  ;;  %vm998_vm14 = vc.u32 %v15177_v48, %v15176_v47  ;;  %v15178_v13 = vand.u32 2147483647, %v15163_v54  ;;  %v15181_v47 = vand.u32 2147483647, %v15174_v12 }
 0x227   : > { %v729_v17 = vclz %v728_v34  ;;  %v878_v24 = vshrl.u32 %v877_v27, 30  ;;  %v717_v34 = vadd.s32 %v11133_v6, %v11127_v5  ;;  %v2162_v62 = vadd.s32 3, %v11078_v29 }
 0x228   : > { %vm11249_vm13 = vcmp.le.f32.partialorder %v15178_v13, 0.7853982  ;;  %vm11257_vm9 = vcmp.le.f32.partialorder %v15181_v47, 0.7853982  ;;  %v2297_v30 = vsub.s32 4, %v15184_v18  ;;  %v999_v13 = vsel %vm998_vm14, 1, %v15022_v8 }
 0x229   : > { %v8523_v4 = vadd.s32 4294967294, %v729_v17  ;;  %v879_v27 = vshll.u32 %v878_v24, 30  ;;  %v11264_v19 = vsel %vm8569_vm1, 0, %v8568_v57  ;;  %v750_v17 = vsel %vm11249_vm13, 0, %v748_v0 }
 0x22a   : > { %v872_v6 = vadd.s32 %v11175_v33, %v11173_v36  ;;  %v902_v47 = vsub.s32 4, %v878_v24  ;;  %v11272_v40 = vand.u32 3, %v2007_v20  ;;  %v1001_v57 = vadd.s32 %v999_v13, %v15185_v15  ;;  %v15188_v20 = vld [vmem:[#allocation33_spill] sm:$0xff]  ;;  %v15189_v15 = vld [vmem:[#allocation46_spill] sm:$0xff] }
 0x22b   : > { %vm8524_vm11 = vcmp.lt.s32.totalorder %v8523_v4, 0  ;;  %v11268_v22 = vsub.s32 %v876_v23, %v879_v27  ;;  %v11277_v51 = vand.u32 3, %v2162_v62  ;;  %v767_v0 = vadd.s32 3, %v750_v17  ;;  %v15186_v23 = vld [vmem:[#allocation28_spill] sm:$0xff] }
 0x22c   : > { %v732_v5 = vsel %vm8524_vm11, 0, %v8523_v4  ;;  %vm15187_vm5 = vcmp.lt.s32.totalorder %v15186_v23, 0  ;;  %v991_v39 = vshrl.u32 %v15188_v20, 16  ;;  %v903_v41 = vsel %vm780_vm3, %v902_v47, %v878_v24 }
 0x22d   : > { %v733_v29 = vsub.s32 32, %v732_v5  ;;  %v737_v60 = vsub.s32 4294967266, %v732_v5  ;;  %vm881_vm7 = vcmp.lt.s32.totalorder %v11268_v22, 0  ;;  %v882_v31 = vsub.s32 0, %v11268_v22 }
 0x22e   : > { %v2298_v4 = vsel %vm15187_vm5, %v2297_v30, %v15184_v18  ;;  %v734_v27 = vshll.u32 %v725_v21, %v732_v5  ;;  %v2452_v13 = vsub.s32 4, %v15189_v15  ;;  %v1012_v62 = vshll.u32 %v15190_v38, 16  ;;  %v15195_v5 = vld [vmem:[#allocation35_spill] sm:$0xff] }
 0x22f   : > { %v735_v36 = vshrl.u32 %v717_v34, %v733_v29  ;;  %v738_v33 = vadd.s32 127, %v737_v60  ;;  %v883_v10 = vsel %vm881_vm7, %v882_v31, %v11268_v22  ;;  %v1002_v63 = vadd.s32 %v1001_v57, %v991_v39  ;;  %v15192_v39 = vld [vmem:[#allocation32_spill] sm:$0xff] }
 0x230   : > { %v884_v59 = vclz %v883_v10  ;;  %v11288_v56 = vand.u32 3, %v750_v17  ;;  %v11290_v21 = vand.u32 3, %v767_v0  ;;  %v11294_v34 = vsel %vm10286_vm2, 0, %v2298_v4 }
 0x231   : > { %v736_v42 = vor.u32 %v735_v36, %v734_v27  ;;  %v739_v49 = vshll.u32 %v738_v33, 23  ;;  %v993_v31 = vshrl.u32 %v15175_v28, 16  ;;  %v905_v30 = vsel %vm11257_vm9, 0, %v903_v41  ;;  %v15194_v28 = vld [vmem:[#allocation37_spill] sm:$0xff] }
 0x232   : > { %v8526_v24 = vadd.s32 4294967294, %v884_v59  ;;  %vm2010_vm8 = vcmp.eq.s32.totalorder %v11272_v40, 0  ;;  %vm2013_vm15 = vcmp.eq.s32.totalorder %v11272_v40, 2  ;;  %vm2165_vm14 = vcmp.eq.s32.totalorder %v11277_v51, 0 }
 0x233   : > { %v740_v18 = vor.u32 4788187, %v739_v49  ;;  %vm2009_vm1 = vcmp.lt.s32.totalorder %v11272_v40, 2  ;;  %vm15193_vm2 = vcmp.lt.s32.totalorder %v15192_v39, 0  ;;  %v1014_v49 = vshll.u32 %v15194_v28, 16 }
 0x234   : > { %v2453_v17 = vsel %vm15193_vm2, %v2452_v13, %v15189_v15  ;;  %vm1016_vm11 = vc.u32 %v15195_v5, %v1012_v62  ;;  %v743_v47 = vcvt.s32.f32 %v736_v42  ;;  %vm8527_vm7 = vcmp.lt.s32.totalorder %v8526_v24, 0 }
 0x235   : > { %v741_v41 = vand.u32 2147483647, %v740_v18  ;;  %vm2168_vm5 = vcmp.eq.s32.totalorder %v11277_v51, 2  ;;  %v11311_v29 = vadd.s32 %v1002_v63, %v993_v31  ;;  %v887_v57 = vsel %vm8527_vm7, 0, %v8526_v24  ;;  %v15197_v24 = vld [vmem:[#allocation64_spill] sm:$0xff] }
 0x236   : > { %v11313_v0 = vand.u32 3, %v905_v30  ;;  %vm2164_vm0 = vcmp.lt.s32.totalorder %v11277_v51, 2  ;;  %v922_v4 = vadd.s32 3, %v905_v30  ;;  %v11317_v27 = vadd.s32 %v1012_v62, %v15195_v5 }
 0x237   : > { %v744_v36 = vmul.f32 %v743_v47, %v741_v41  ;;  %v888_v33 = vsub.s32 32, %v887_v57  ;;  %v892_v20 = vsub.s32 4294967266, %v887_v57  ;;  %v1017_v15 = vsel %vm1016_vm11, 1, %v15022_v8  ;;  %v15198_v41 = vld [vmem:[#allocation39_spill] sm:$0xff] }
 0x238   : > { %v889_v42 = vshll.u32 %v11268_v22, %v887_v57  ;;  %v11322_v13 = vand.u32 3, %v11294_v34  ;;  %v11326_v60 = vsel %vm10346_vm10, 0, %v2453_v17  ;;  %vm1020_vm2 = vc.u32 %v11317_v27, %v1014_v49 }
 0x239   : > { %v745_v62 = vxor.u32 2147483648, %v744_v36  ;;  %v890_v31 = vshrl.u32 %v872_v6, %v888_v33  ;;  %v893_v18 = vadd.s32 127, %v892_v20  ;;  %v2302_v30 = vmul.f32 -0.001358992, %v15197_v24 }
 0x23a   : > { %v11332_v5 = vand.u32 3, %v922_v4  ;;  %v2309_v22 = vmul.f32 -0.00019511016, %v15197_v24  ;;  %v1019_v47 = vadd.s32 %v1017_v15, %v15198_v41  ;;  %v1021_v57 = vsel %vm1020_vm2, 1, %v15022_v8 }
 0x23b   : > { %v746_v17 = vsel %vm625_vm6, %v745_v62, %v744_v36  ;;  %v891_v63 = vor.u32 %v890_v31, %v889_v42  ;;  %v894_v59 = vshll.u32 %v893_v18, 23  ;;  %v2303_v10 = vadd.f32 0.041655596, %v2302_v30 }
 0x23c   : > { %v11342_v6 = vsel %vm11249_vm13, %v15163_v54, %v746_v17  ;;  %v15199_v4 = vxor.u32 2147483648, %v11067_v1  ;;  %v15200_v20 = vxor.u32 2147483648, %v11043_v26  ;;  %v15201_v15 = vxor.u32 2147483648, %v11108_v52 }
 0x23d   : > { %v751_v42 = vmul.f32 %v11342_v6, %v11342_v6  ;;  %v895_v62 = vor.u32 4788187, %v894_v59  ;;  %v898_v31 = vcvt.s32.f32 %v891_v63  ;;  %v2304_v41 = vmul.f32 %v2303_v10, %v15197_v24 }
 0x23e   : > { %v2012_v33 = vsel %vm2010_vm8, %v11043_v26, %v15199_v4  ;;  %v2015_v36 = vsel %vm2013_vm15, %v15200_v20, %v11067_v1  ;;  %v2167_v45 = vsel %vm2165_vm14, %v11083_v53, %v15201_v15  ;;  %v15202_v1 = vxor.u32 2147483648, %v11083_v53  ;;  %v15203_v53 = vld [vmem:[#allocation76_spill] sm:$0xff] }
 0x23f   : > { %v2016_v18 = vsel %vm2009_vm1, %v2012_v33, %v2015_v36  ;;  %v2310_v17 = vadd.f32 0.008332121, %v2309_v22  ;;  %v752_v4 = vmul.f32 -0.001358992, %v751_v42  ;;  %v759_v20 = vmul.f32 -0.00019511016, %v751_v42 }
 0x240   : > { %v11365_v26 = vsel %vm2006_vm12, nan, %v2016_v18  ;;  %v2170_v30 = vsel %vm2168_vm5, %v15202_v1, %v11108_v52  ;;  %v896_v59 = vand.u32 2147483647, %v895_v62  ;;  %v2305_v63 = vadd.f32 -0.4999988, %v2304_v41 }
 0x241   : > { %v2171_v40 = vsel %vm2164_vm0, %v2167_v45, %v2170_v30  ;;  %v2311_v33 = vmul.f32 %v2310_v17, %v15197_v24  ;;  %v2457_v36 = vmul.f32 -0.001358992, %v15203_v53  ;;  %v753_v15 = vadd.f32 0.041655596, %v752_v4 }
 0x242   : > { %v11377_v46 = vsel %vm2161_vm4, nan, %v2171_v40  ;;  %v760_v52 = vadd.f32 0.008332121, %v759_v20  ;;  %v899_v18 = vmul.f32 %v898_v31, %v896_v59  ;;  %v2464_v10 = vmul.f32 -0.00019511016, %v15203_v53 }
 0x243   : > { %v2306_v22 = vmul.f32 %v2305_v63, %v15197_v24  ;;  %v2312_v62 = vadd.f32 -0.16666654, %v2311_v33  ;;  %v2458_v1 = vadd.f32 0.041655596, %v2457_v36  ;;  %v11384_v51 = vand.u32 3, %v11326_v60 }
 0x244   : > { %v754_v11 = vmul.f32 %v753_v15, %v751_v42  ;;  %v761_v45 = vmul.f32 %v760_v52, %v751_v42  ;;  %v900_v30 = vxor.u32 2147483648, %v899_v18  ;;  %vm4789_vm10 = vcmp.eq.s32.totalorder %v11322_v13, 0 }
 0x245   : > { %vm4792_vm12 = vcmp.eq.s32.totalorder %v11322_v13, 2  ;;  %v2465_v41 = vadd.f32 0.008332121, %v2464_v10  ;;  %v11388_v17 = vadd.f32 1.0, %v2306_v22  ;;  %v2313_v31 = vmul.f32 %v2312_v62, %v15197_v24  ;;  %v15204_v10 = vld [vmem:[#allocation61_spill] sm:$0xff] }
 0x246   : > { %v2459_v4 = vmul.f32 %v2458_v1, %v15203_v53  ;;  %v1023_v20 = vadd.s32 %v1021_v57, %v1019_v47  ;;  %v755_v59 = vadd.f32 -0.4999988, %v754_v11  ;;  %v762_v40 = vadd.f32 -0.16666654, %v761_v45 }
 0x247   : > { %vm3252_vm4 = vcmp.eq.s32.totalorder %v11288_v56, 2  ;;  %v901_v63 = vsel %vm780_vm3, %v900_v30, %v899_v18  ;;  %vm4788_vm6 = vcmp.lt.s32.totalorder %v11322_v13, 2  ;;  %v2466_v33 = vmul.f32 %v2465_v41, %v15203_v53 }
 0x248   : > { %vm3249_vm0 = vcmp.eq.s32.totalorder %v11288_v56, 0  ;;  %v11401_v24 = vsel %vm11257_vm9, %v15174_v12, %v901_v63  ;;  %vm770_vm13 = vcmp.eq.s32.totalorder %v11290_v21, 0  ;;  %v2314_v47 = vadd.f32 1.0, %v2313_v31 }
 0x249   : > { %v2460_v57 = vadd.f32 -0.4999988, %v2459_v4  ;;  %v11407_v36 = vadd.s32 %v11317_v27, %v1014_v49  ;;  %v756_v15 = vmul.f32 %v755_v59, %v751_v42  ;;  %v763_v52 = vmul.f32 %v762_v40, %v751_v42 }
 0x24a   : > { %vm3248_vm3 = vcmp.lt.s32.totalorder %v11288_v56, 2  ;;  %v906_v18 = vmul.f32 %v11401_v24, %v11401_v24  ;;  %vm773_vm8 = vcmp.eq.s32.totalorder %v11290_v21, 2  ;;  %vm14870_vm9 = vweird.f32 %v15186_v23 }
 0x24b   : > { %v2467_v48 = vadd.f32 -0.16666654, %v2466_v33  ;;  %vm766_vm15 = vweird.f32 %v15163_v54  ;;  %vm769_vm14 = vcmp.lt.s32.totalorder %v11290_v21, 2  ;;  %v11417_v22 = vmul.f32 %v2314_v47, %v15204_v10 }
 0x24c   : > { %v14865_v49 = vxor.u32 2147483648, %v11388_v17  ;;  %v2461_v27 = vmul.f32 %v2460_v57, %v15203_v53  ;;  %v15205_v42 = vshrl.u32 %v15190_v38, 16  ;;  %v757_v1 = vadd.f32 1.0, %v756_v15 }
 0x24d   : > { %v764_v11 = vadd.f32 1.0, %v763_v52  ;;  %v907_v45 = vmul.f32 -0.001358992, %v906_v18  ;;  %v914_v30 = vmul.f32 -0.00019511016, %v906_v18  ;;  %vm4943_vm1 = vcmp.eq.s32.totalorder %v11384_v51, 0 }
 0x24e   : > { %v1024_v62 = vadd.s32 %v1023_v20, %v15205_v42  ;;  %vm4946_vm11 = vcmp.eq.s32.totalorder %v11384_v51, 2  ;;  %v14866_v41 = vxor.u32 2147483648, %v11417_v22  ;;  %v11426_v31 = vadd.f32 1.0, %v2461_v27  ;;  %v15207_v42 = vld [vmem:[#allocation71_spill] sm:$0xff] }
 0x24f   : > { %v2468_v4 = vmul.f32 %v2467_v48, %v15203_v53  ;;  %vm4942_vm7 = vcmp.lt.s32.totalorder %v11384_v51, 2  ;;  %vm1028_vm5 = vc.u32 %v11311_v29, %v11407_v36  ;;  %v765_v38 = vmul.f32 %v764_v11, %v11342_v6 }
 0x250   : > { %v774_v20 = vxor.u32 2147483648, %v757_v1  ;;  %v908_v59 = vadd.f32 0.041655596, %v907_v45  ;;  %v915_v40 = vadd.f32 0.008332121, %v914_v30  ;;  %vm2471_vm2 = vweird.f32 %v15192_v39  ;;  %v11731_v39 = vld [vmem:[%s14700_s2 + $0x8] sm:$0xff] }
 0x251   : > { %v4791_v63 = vsel %vm4789_vm10, %v11388_v17, %v14866_v41  ;;  %v4794_v53 = vsel %vm4792_vm12, %v14865_v49, %v11417_v22  ;;  %v2469_v33 = vadd.f32 1.0, %v2468_v4  ;;  %v15206_v6 = vshrl.u32 %v15194_v28, 16 }
 0x252   : > { %v771_v57 = vxor.u32 2147483648, %v765_v38  ;;  %v909_v15 = vmul.f32 %v908_v59, %v906_v18  ;;  %v916_v52 = vmul.f32 %v915_v40, %v906_v18  ;;  %v14867_v48 = vxor.u32 2147483648, %v11426_v31 }
 0x253   : > { %v1025_v47 = vadd.s32 %v1024_v62, %v15206_v6  ;;  %v3254_v10 = vsel %vm3252_vm4, %v774_v20, %v765_v38  ;;  %v4795_v27 = vsel %vm4788_vm6, %v4791_v63, %v4794_v53  ;;  %v11452_v11 = vmul.f32 %v2469_v33, %v15207_v42  ;;  %v15212_v42 = vld [vmem:[#allocation31_spill] sm:$0xff] }
 0x254   : > { %v3251_v30 = vsel %vm3249_vm0, %v757_v1, %v771_v57  ;;  %v910_v28 = vadd.f32 -0.4999988, %v909_v15  ;;  %v917_v62 = vadd.f32 -0.16666654, %v916_v52  ;;  %v772_v4 = vsel %vm770_vm13, %v757_v1, %v771_v57  ;;  %v15210_v57 = vld [vmem:[#allocation55_spill] sm:$0xff] }
 0x255   : > { %v1029_v45 = vadd.s32 1, %v1025_v47  ;;  %v3255_v59 = vsel %vm3248_vm3, %v3251_v30, %v3254_v10  ;;  %v775_v40 = vsel %vm773_vm8, %v774_v20, %v765_v38  ;;  %v4796_v13 = vsel %vm14870_vm9, nan, %v4795_v27  ;;  %v15208_v38 = vld [vmem:[#allocation50_spill] sm:$0xff]  ;;  %v15211_v27 = vld [vmem:[#allocation20_spill] sm:$0xff] }
 0x256   : > { %v14868_v63 = vxor.u32 2147483648, %v11452_v11  ;;  %v3256_v53 = vsel %vm766_vm15, nan, %v3255_v59  ;;  %v911_v33 = vmul.f32 %v910_v28, %v906_v18  ;;  %v918_v6 = vmul.f32 %v917_v62, %v906_v18  ;;  %5678 = vmatpush.msra.mxu2 %v4796_v13 }
 0x257   : > { %vm3402_vm10 = vcmp.lt.s32.totalorder %v11313_v0, 2  ;;  %v776_v1 = vsel %vm769_vm14, %v772_v4, %v775_v40  ;;  %5621 = vmatpush.msra.mxu0 %v3256_v53  ;;  %vm921_vm12 = vweird.f32 %v15174_v12  ;;  %v4948_v18 = vsel %vm4946_vm11, %v14867_v48, %v11452_v11  ;;  %v15214_v4 = vld [vmem:[#allocation52_spill] sm:$0xff]  ;;  %v15227_v12 = vld [vmem:[#allocation65_spill] sm:$0xff] }
 0x258   : > { %v4945_v56 = vsel %vm4943_vm1, %v11426_v31, %v14868_v63  ;;  %v1030_v21 = vsel %vm1028_vm5, %v1029_v45, %v1025_v47  ;;  %v15209_v20 = vshll.u32 %v15208_v38, 16  ;;  %v912_v15 = vadd.f32 1.0, %v911_v33  ;;  %v11498_v47 = vld [vmem:[%s14700_s2] sm:$0xff] }
 0x259   : > { %v919_v52 = vadd.f32 1.0, %v918_v6  ;;  %v4949_v10 = vsel %vm4942_vm7, %v4945_v56, %v4948_v18  ;;  %v15213_v30 = vmul.u32 %v15211_v27, %v15212_v42  ;;  %5622 = vmatpush.msra.mxu0 %v11365_v26  ;;  %vm14873_vm6 = vcmask 261120   ;;  %v15218_v26 = vld [vmem:[#allocation85_spill] sm:$0xff]  ;;  %v15219_v56 = vld [vmem:[#allocation51_spill] sm:$0xff] }
 0x25a   : > { %vm1153_vm4 = vc.u32 %v15210_v57, %v15209_v20  ;;  %v4950_v62 = vsel %vm2471_vm2, nan, %v4949_v10  ;;  %v1167_v51 = vshll.u32 %v15214_v4, 16  ;;  %v15215_v59 = vand.u32 2147483647, %v15168_v50  ;;  %v15220_v20 = vld [vmem:[#allocation40_spill] sm:$0xff]  ;;  %v15222_v10 = vld [vmem:[#allocation47_spill] sm:$0xff] }
 0x25b   : > { %v1031_v28 = vadd.s32 %v1030_v21, %v15213_v30  ;;  %v1154_v45 = vsel %vm1153_vm4, 1, %v15022_v8  ;;  %vm14869_vm13 = vcmp.lt.s32.totalorder %v15218_v26, 0  ;;  %v920_v13 = vmul.f32 %v919_v52, %v11401_v24  ;;  %5707 = vmatpush.msra.mxu3 %v4950_v62 }
 0x25c   : > { %vm11504_vm0 = vcmp.le.f32.partialorder %v15215_v59, 0.7853982  ;;  %v929_v53 = vxor.u32 2147483648, %v912_v15  ;;  %v777_v33 = vsel %vm766_vm15, nan, %v776_v1  ;;  %vm3403_vm3 = vcmp.eq.s32.totalorder %v11313_v0, 0  ;;  %v15221_v1 = vld [vmem:[#allocation53_spill] sm:$0xff] }
 0x25d   : > { %v1032_v6 = vadd.s32 536870912, %v1031_v28  ;;  %vm3406_vm8 = vcmp.eq.s32.totalorder %v11313_v0, 2  ;;  %5623 = vmatpush.msra.mxu0 %v777_v33  ;;  %vm1171_vm14 = vc.u32 %v15219_v56, %v1167_v51  ;;  %v1173_v18 = vadd.s32 %v1167_v51, %v15219_v56 }
 0x25e   : > { %v926_v21 = vxor.u32 2147483648, %v920_v13  ;;  %8618 = vmatmul.msk.f32.vlgmr.msra.gmra.mxu0 %vm14873_vm6, %v11498_v47  ;;  %v1156_v54 = vadd.s32 %v1154_v45, %v15220_v20  ;;  %v1169_v57 = vshll.u32 %v15221_v1, 16  ;;  %v3408_v52 = vsel %vm3406_vm8, %v929_v53, %v920_v13  ;;  %v15223_v45 = vld [vmem:[#allocation54_spill] sm:$0xff] }
 0x25f   : > { %v11518_v24 = vshrl.u32 %v1032_v6, 30  ;;  %vm925_vm15 = vcmp.eq.s32.totalorder %v11332_v5, 0  ;;  %v1146_v27 = vshrl.u32 %v15222_v10, 16  ;;  %v1172_v42 = vsel %vm1171_vm14, 1, %v15022_v8 }
 0x260   : > { %v3405_v30 = vsel %vm3403_vm3, %v912_v15, %v926_v21  ;;  %v927_v62 = vsel %vm925_vm15, %v912_v15, %v926_v21  ;;  %vm1175_vm1 = vc.u32 %v1173_v18, %v1169_v57  ;;  %vm924_vm11 = vcmp.lt.s32.totalorder %v11332_v5, 2 }
 0x261   : > { %v1034_v51 = vshll.u32 %v11518_v24, 30  ;;  %v3409_v59 = vsel %vm3402_vm10, %v3405_v30, %v3408_v52  ;;  %vm928_vm7 = vcmp.eq.s32.totalorder %v11332_v5, 2  ;;  %v1174_v33 = vadd.s32 %v1172_v42, %v15223_v45 }
 0x262   : > { %v3410_v6 = vsel %vm921_vm12, nan, %v3409_v59  ;;  %v930_v56 = vsel %vm928_vm7, %v929_v53, %v920_v13  ;;  %v1157_v10 = vadd.s32 %v1156_v54, %v1146_v27  ;;  %v15224_v15 = vsub.s32 4294967266, %v11225_v35 }
 0x263   : > { %v11533_v20 = vsub.s32 %v1031_v28, %v1034_v51  ;;  %v3062_v49 = vsub.s32 4294967266, %v11264_v19  ;;  %5650 = vmatpush.msra.mxu1 %v3410_v6  ;;  %v931_v0 = vsel %vm924_vm11, %v927_v62, %v930_v56  ;;  %v1176_v52 = vsel %vm1175_vm1, 1, %v15022_v8 }
 0x264   : > { %v2908_v21 = vadd.s32 127, %v15224_v15  ;;  %v1148_v42 = vshrl.u32 %v15208_v38, 16  ;;  %v1178_v30 = vadd.s32 %v1176_v52, %v1174_v33  ;;  %v11546_v28 = vsel %vm11504_vm0, %v15168_v50, %v11235_v32 }
 0x265   : > { %vm1036_vm5 = vcmp.lt.s32.totalorder %v11533_v20, 0  ;;  %v1037_v5 = vsub.s32 0, %v11533_v20  ;;  %v15225_v13 = vxor.u32 2147483648, %v11218_v2  ;;  %v2887_v54 = vadd.s32 %v10974_v58, %v10949_v44  ;;  %5651 = vmatpush.msra.mxu1 %v11377_v46 }
 0x266   : > { %v1168_v38 = vshrl.u32 %v15214_v4, 16  ;;  %v932_v32 = vsel %vm921_vm12, nan, %v931_v0  ;;  %v11564_v51 = vadd.s32 %v1157_v10, %v1148_v42  ;;  %v3063_v59 = vadd.s32 127, %v3062_v49  ;;  %v15230_v42 = vld [vmem:[#allocation72_spill] sm:$0xff]  ;;  %8619 = vmatmul.msk.f32.gmra.mxu0 %vm14873_vm6, %v11731_v39 }
 0x267   : > { %v11553_v53 = vsel %vm14869_vm13, %v15225_v13, %v11218_v2  ;;  %v1038_v62 = vsel %vm1036_vm5, %v1037_v5, %v11533_v20  ;;  %5652 = vmatpush.msra.mxu1 %v932_v32  ;;  %v1170_v45 = vshrl.u32 %v15221_v1, 16  ;;  %v15226_v58 = vsub.s32 32, %v11225_v35  ;;  %v15228_v1 = vld [vmem:[#allocation69_spill] sm:$0xff] }
 0x268   : > { %v1039_v2 = vclz %v1038_v62  ;;  %v1179_v44 = vadd.s32 %v1178_v30, %v1168_v38  ;;  %v2909_v4 = vshll.u32 %v2908_v21, 23  ;;  %8622 = vmatmul.msk.f32.vlgmr.msra.gmra.mxu1 %vm14873_vm6, %v11498_v47  ;;  %v11571_v33 = vadd.s32 %v1173_v18, %v1169_v57  ;;  %v15229_v21 = vld [vmem:[#allocation63_spill] sm:$0xff]  ;;  %v15231_v62 = vld [vmem:[#allocation5_spill] sm:$0xff] }
 0x269   : > { %v2905_v46 = vshrl.u32 %v2887_v54, %v15226_v58  ;;  %v1322_v6 = vshll.u32 %v15227_v12, 16  ;;  %v3042_v56 = vadd.s32 %v11017_v7, %v11015_v3  ;;  %v3058_v49 = vsub.s32 32, %v11264_v19  ;;  %v15235_v58 = vld [vmem:[#allocation66_spill] sm:$0xff] }
 0x26a   : > { %v8529_v10 = vadd.s32 4294967294, %v1039_v2  ;;  %v1180_v15 = vadd.s32 %v1179_v44, %v1170_v45  ;;  %vm1183_vm10 = vc.u32 %v11564_v51, %v11571_v33  ;;  %v1324_v0 = vshll.u32 %v15228_v1, 16  ;;  %v15232_v2 = vld [vmem:[#allocation27_spill] sm:$0xff] }
 0x26b   : > { %vm1326_vm12 = vc.u32 %v15229_v21, %v1322_v6  ;;  %v1328_v52 = vadd.s32 %v1322_v6, %v15229_v21  ;;  %v3064_v18 = vshll.u32 %v3063_v59, 23  ;;  %v1027_v3 = vadd.s32 %v11407_v36, %v11311_v29  ;;  %v15233_v59 = vld [vmem:[#allocation49_spill] sm:$0xff] }
 0x26c   : > { %vm8530_vm4 = vcmp.lt.s32.totalorder %v8529_v10, 0  ;;  %v1184_v57 = vadd.s32 1, %v1180_v15  ;;  %v1327_v5 = vsel %vm1326_vm12, 1, %v15022_v8  ;;  %vm935_vm8 = vcmp.lt.s32.totalorder %v15231_v62, 0  ;;  %v15237_v21 = vld [vmem:[#allocation73_spill] sm:$0xff] }
 0x26d   : > { %v1042_v7 = vsel %vm8530_vm4, 0, %v8529_v10  ;;  %v1329_v30 = vadd.s32 %v1327_v5, %v15230_v42  ;;  %vm1330_vm3 = vc.u32 %v1328_v52, %v1324_v0  ;;  %v15234_v45 = vmul.u32 %v15232_v2, %v15233_v59  ;;  %v15238_v42 = vld [vmem:[#allocation58_spill] sm:$0xff] }
 0x26e   : > { %v1043_v13 = vsub.s32 32, %v1042_v7  ;;  %v1044_v54 = vshll.u32 %v11533_v20, %v1042_v7  ;;  %v1047_v38 = vsub.s32 4294967266, %v1042_v7  ;;  %v1185_v32 = vsel %vm1183_vm10, %v1184_v57, %v1180_v15  ;;  %v15239_v7 = vld [vmem:[#allocation75_spill] sm:$0xff] }
 0x26f   : > { %v1186_v44 = vadd.s32 %v1185_v32, %v15234_v45  ;;  %v15236_v6 = vshll.u32 %v15235_v58, 16  ;;  %v1323_v29 = vshrl.u32 %v15227_v12, 16  ;;  %v1331_v36 = vsel %vm1330_vm3, 1, %v15022_v8 }
 0x270   : > { %v1045_v10 = vshrl.u32 %v1027_v3, %v1043_v13  ;;  %v1048_v5 = vadd.s32 127, %v1047_v38  ;;  %v1301_v20 = vshrl.u32 %v15238_v42, 16  ;;  %v1325_v2 = vshrl.u32 %v15228_v1, 16  ;;  %8623 = vmatmul.msk.f32.gmra.mxu1 %vm14873_vm6, %v11731_v39 }
 0x271   : > { %vm1308_vm14 = vc.u32 %v15237_v21, %v15236_v6  ;;  %v1187_v57 = vadd.s32 536870912, %v1186_v44  ;;  %v1333_v32 = vadd.s32 %v1331_v36, %v1329_v30  ;;  %v2910_v59 = vor.u32 4788187, %v2909_v4 }
 0x272   : > { %v1309_v15 = vsel %vm1308_vm14, 1, %v15022_v8  ;;  %v1046_v45 = vor.u32 %v1045_v10, %v1044_v54  ;;  %v1049_v48 = vshll.u32 %v1048_v5, 23  ;;  %v1303_v6 = vshrl.u32 %v15235_v58, 16 }
 0x273   : > { %v1311_v41 = vadd.s32 %v1309_v15, %v15239_v7  ;;  %v3060_v12 = vshrl.u32 %v3042_v56, %v3058_v49  ;;  %v1188_v21 = vshrl.u32 %v1187_v57, 30  ;;  %v1334_v3 = vadd.s32 %v1333_v32, %v1323_v29  ;;  %v15240_v15 = vld [vmem:[#allocation9_spill] sm:$0xff] }
 0x274   : > { %v3059_v13 = vshll.u32 %v11150_v14, %v11264_v19  ;;  %v3065_v38 = vor.u32 4788187, %v3064_v18  ;;  %v1050_v42 = vor.u32 4788187, %v1049_v48  ;;  %v1057_v27 = vsub.s32 4, %v11518_v24 }
 0x275   : > { %v1312_v63 = vadd.s32 %v1311_v41, %v1301_v20  ;;  %vm14871_vm15 = vcmp.lt.s32.totalorder %v15240_v15, 0  ;;  %v1189_v1 = vshll.u32 %v1188_v21, 30  ;;  %v11607_v4 = vadd.s32 %v1328_v52, %v1324_v0 }
 0x276   : > { %v1335_v54 = vadd.s32 %v1334_v3, %v1325_v2  ;;  %v15241_v56 = vand.u32 2147483647, %v15218_v26  ;;  %v15244_v14 = vshll.u32 %v11071_v9, %v11225_v35  ;;  %v1051_v48 = vand.u32 2147483647, %v1050_v42 }
 0x277   : > { %v11605_v30 = vadd.s32 %v1312_v63, %v1303_v6  ;;  %v1053_v49 = vcvt.s32.f32 %v1046_v45  ;;  %v11620_v18 = vmul.f32 %v11546_v28, %v11546_v28  ;;  %v3061_v0 = vor.u32 %v3060_v12, %v3059_v13 }
 0x278   : > { %vm11611_vm1 = vcmp.le.f32.partialorder %v15241_v56, 0.7853982  ;;  %v2906_v19 = vor.u32 %v2905_v46, %v15244_v14  ;;  %v11628_v52 = vsub.s32 %v1186_v44, %v1189_v1  ;;  %v2911_v58 = vand.u32 2147483647, %v2910_v59  ;;  %v15249_v14 = vld [vmem:[#allocation56_spill] sm:$0xff] }
 0x279   : > { %v11626_v63 = vsel %vm11611_vm1, %v15218_v26, %v11553_v53  ;;  %v1054_v29 = vmul.f32 %v1053_v49, %v1051_v48  ;;  %v1058_v9 = vsel %vm935_vm8, %v1057_v27, %v11518_v24  ;;  %v1339_v35 = vadd.s32 1, %v1335_v54 }
 0x27a   : > { %v3066_v46 = vand.u32 2147483647, %v3065_v38  ;;  %vm1191_vm11 = vcmp.lt.s32.totalorder %v11628_v52, 0  ;;  %v1192_v36 = vsub.s32 0, %v11628_v52  ;;  %vm1338_vm7 = vc.u32 %v11605_v30, %v11607_v4 }
 0x27b   : > { %v2913_v53 = vcvt.s32.f32 %v2906_v19  ;;  %v15245_v10 = vand.u32 2147483647, %v15231_v62  ;;  %v1055_v44 = vxor.u32 2147483648, %v1054_v29  ;;  %v1212_v5 = vsub.s32 4, %v1188_v21  ;;  %v15250_v19 = vld [vmem:[#allocation60_spill] sm:$0xff] }
 0x27c   : > { %v11641_v20 = vmul.f32 %v11626_v63, %v11626_v63  ;;  %v3068_v24 = vcvt.s32.f32 %v3061_v0  ;;  %v1193_v57 = vsel %vm1191_vm11, %v1192_v36, %v11628_v52  ;;  %v1340_v59 = vsel %vm1338_vm7, %v1339_v35, %v1335_v54  ;;  %v15252_v0 = vld [vmem:[#allocation78_spill] sm:$0xff]  ;;  %v15254_v35 = vld [vmem:[#allocation67_spill] sm:$0xff] }
 0x27d   : > { %vm934_vm5 = vcmp.le.f32.partialorder %v15245_v10, 0.7853982  ;;  %v11644_v7 = vmul.f32 %v2913_v53, %v2911_v58  ;;  %v1056_v2 = vsel %vm935_vm8, %v1055_v44, %v1054_v29  ;;  %v1194_v32 = vclz %v1193_v57  ;;  %v15253_v29 = vld [vmem:[#allocation79_spill] sm:$0xff]  ;;  %v15255_v10 = vld [vmem:[#allocation80_spill] sm:$0xff] }
 0x27e   : > { %v1060_v27 = vsel %vm934_vm5, 0, %v1058_v9  ;;  %v11648_v45 = vmul.f32 %v3068_v24, %v3066_v46  ;;  %v11651_v6 = vsel %vm934_vm5, %v15231_v62, %v1056_v2  ;;  %v15246_v12 = vand.u32 2147483647, %v15240_v15 }
 0x27f   : > { %v1182_v13 = vadd.s32 %v11571_v33, %v11564_v51  ;;  %v1061_v38 = vmul.f32 %v11651_v6, %v11651_v6  ;;  %v11663_v42 = vand.u32 3, %v1060_v27  ;;  %v8532_v1 = vadd.s32 4294967294, %v1194_v32 }
 0x280   : > { %vm11655_vm10 = vcmp.le.f32.partialorder %v15246_v12, 0.7853982  ;;  %v1213_v54 = vsel %vm14871_vm15, %v1212_v5, %v1188_v21  ;;  %v1077_v56 = vadd.s32 3, %v1060_v27  ;;  %v15251_v48 = vmul.u32 %v15249_v14, %v15250_v19  ;;  %v15257_v5 = vld [vmem:[#allocation83_spill] sm:$0xff] }
 0x281   : > { %v1477_v58 = vshll.u32 %v15252_v0, 16  ;;  %v1062_v51 = vmul.f32 -0.001358992, %v1061_v38  ;;  %v1069_v33 = vmul.f32 -0.00019511016, %v1061_v38  ;;  %vm8533_vm12 = vcmp.lt.s32.totalorder %v8532_v1, 0 }
 0x282   : > { %v11670_v49 = vadd.s32 %v1340_v59, %v15251_v48  ;;  %v1197_v36 = vsel %vm8533_vm12, 0, %v8532_v1  ;;  %v1215_v53 = vsel %vm11655_vm10, 0, %v1213_v54  ;;  %v2472_v21 = vadd.s32 3, %v11326_v60 }
 0x283   : > { %v15256_v44 = vshll.u32 %v15255_v10, 16  ;;  %v1063_v27 = vadd.f32 0.041655596, %v1062_v51  ;;  %v1070_v57 = vadd.f32 0.008332121, %v1069_v33  ;;  %v1198_v2 = vsub.s32 32, %v1197_v36 }
 0x284   : > { %v2317_v32 = vadd.s32 3, %v11294_v34  ;;  %v1202_v59 = vsub.s32 4294967266, %v1197_v36  ;;  %v11686_v12 = vand.u32 3, %v1077_v56  ;;  %v1342_v1 = vadd.s32 536870912, %v11670_v49 }
 0x285   : > { %vm11681_vm4 = vc.u32 %v15257_v5, %v15256_v44  ;;  %v1458_v54 = vshrl.u32 %v15255_v10, 16  ;;  %v1064_v60 = vmul.f32 %v1063_v27, %v1061_v38  ;;  %v1071_v14 = vmul.f32 %v1070_v57, %v1061_v38 }
 0x286   : > { %v1200_v19 = vshrl.u32 %v1182_v13, %v1198_v2  ;;  %v2473_v48 = vand.u32 3, %v2472_v21  ;;  %v1199_v44 = vshll.u32 %v11628_v52, %v1197_v36  ;;  %v1203_v5 = vadd.s32 127, %v1202_v59  ;;  %v15260_v52 = vld [vmem:[#allocation95_spill] sm:$0xff] }
 0x287   : > { %v11691_v9 = vand.u32 3, %v1215_v53  ;;  %v1464_v34 = vsel %vm11681_vm4, 1, %v15022_v8  ;;  %v1065_v51 = vadd.f32 -0.4999988, %v1064_v60  ;;  %v1072_v56 = vadd.f32 -0.16666654, %v1071_v14 }
 0x288   : > { %v2318_v33 = vand.u32 3, %v2317_v32  ;;  %v11696_v46 = vadd.s32 3, %v1215_v53  ;;  %vm3557_vm3 = vcmp.eq.s32.totalorder %v11663_v42, 0  ;;  %vm3560_vm8 = vcmp.eq.s32.totalorder %v11663_v42, 2 }
 0x289   : > { %v1201_v13 = vor.u32 %v1200_v19, %v1199_v44  ;;  %v1204_v21 = vshll.u32 %v1203_v5, 23  ;;  %vm1080_vm14 = vcmp.eq.s32.totalorder %v11686_v12, 0  ;;  %vm1083_vm11 = vcmp.eq.s32.totalorder %v11686_v12, 2 }
 0x28a   : > { %v2607_v36 = vsub.s32 4, %v15260_v52  ;;  %v11703_v27 = vshrl.u32 %v1342_v1, 30  ;;  %v1066_v24 = vmul.f32 %v1065_v51, %v1061_v38  ;;  %v1073_v57 = vmul.f32 %v1072_v56, %v1061_v38 }
 0x28b   : > { %vm3556_vm7 = vcmp.lt.s32.totalorder %v11663_v42, 2  ;;  %vm2475_vm5 = vcmp.eq.s32.totalorder %v2473_v48, 0  ;;  %vm2478_vm12 = vcmp.eq.s32.totalorder %v2473_v48, 2  ;;  %v1205_v53 = vor.u32 4788187, %v1204_v21 }
 0x28c   : > { %vm2474_vm13 = vcmp.lt.s32.totalorder %v2473_v48, 2  ;;  %v15261_v2 = vxor.u32 2147483648, %v11452_v11  ;;  %v15262_v59 = vxor.u32 2147483648, %v11426_v31  ;;  %v1067_v1 = vadd.f32 1.0, %v1066_v24  ;;  %v15265_v24 = vld [vmem:[#allocation84_spill] sm:$0xff] }
 0x28d   : > { %v1074_v14 = vadd.f32 1.0, %v1073_v57  ;;  %vm2320_vm9 = vcmp.eq.s32.totalorder %v2318_v33, 0  ;;  %vm1079_vm15 = vcmp.lt.s32.totalorder %v11686_v12, 2  ;;  %v1206_v19 = vand.u32 2147483647, %v1205_v53 }
 0x28e   : > { %v2477_v32 = vsel %vm2475_vm5, %v11426_v31, %v15261_v2  ;;  %v2480_v60 = vsel %vm2478_vm12, %v15262_v59, %v11452_v11  ;;  %v1208_v44 = vcvt.s32.f32 %v1201_v13  ;;  %vm15263_vm4 = vcmp.lt.s32.totalorder %v15168_v50, 0  ;;  %v5572_v13 = vld [vmem:[%s14701_s3 + $0x8] sm:$0xff] }
 0x28f   : > { %v2481_v38 = vsel %vm2474_vm13, %v2477_v32, %v2480_v60  ;;  %v2608_v48 = vsel %vm15263_vm4, %v2607_v36, %v15260_v52  ;;  %v1075_v51 = vmul.f32 %v1074_v14, %v11651_v6  ;;  %v1084_v31 = vxor.u32 2147483648, %v1067_v1  ;;  %5582 = vperm.xlu1 %8781, %v5572_v13   ;;  %v5574_v6 = vld [vmem:[%s14701_s3 + $0x18] sm:$0xff] }
 0x290   : > { %v11716_v5 = vsel %vm2471_vm2, nan, %v2481_v38  ;;  %v15264_v11 = vxor.u32 2147483648, %v11417_v22  ;;  %vm2323_vm13 = vcmp.eq.s32.totalorder %v2318_v33, 2  ;;  %v1209_v21 = vmul.f32 %v1208_v44, %v1206_v19  ;;  %5592 = vperm.xlu0 %8780, %v5574_v6  }
 0x291   : > { %v2612_v52 = vmul.f32 -0.001358992, %v11620_v18  ;;  %v2619_v36 = vmul.f32 -0.00019511016, %v11620_v18  ;;  %v11739_v57 = vadd.s32 %v1464_v34, %v15265_v24  ;;  %v1081_v53 = vxor.u32 2147483648, %v1075_v51 }
 0x292   : > { %v2322_v56 = vsel %vm2320_vm9, %v11388_v17, %v15264_v11  ;;  %vm2319_vm9 = vcmp.lt.s32.totalorder %v2318_v33, 2  ;;  %v15266_v2 = vxor.u32 2147483648, %v11388_v17  ;;  %v11750_v59 = vsel %vm11504_vm0, 0, %v2608_v48 }
 0x293   : > { %v1210_v60 = vxor.u32 2147483648, %v1209_v21  ;;  %v2613_v34 = vadd.f32 0.041655596, %v2612_v52  ;;  %v2620_v38 = vadd.f32 0.008332121, %v2619_v36  ;;  %v3559_v33 = vsel %vm3557_vm3, %v1067_v1, %v1081_v53 }
 0x294   : > { %v2325_v32 = vsel %vm2323_vm13, %v15266_v2, %v11417_v22  ;;  %v3562_v17 = vsel %vm3560_vm8, %v1084_v31, %v1075_v51  ;;  %v1082_v22 = vsel %vm1080_vm14, %v1067_v1, %v1081_v53  ;;  %v1085_v19 = vsel %vm1083_vm11, %v1084_v31, %v1075_v51 }
 0x295   : > { %v2326_v14 = vsel %vm2319_vm9, %v2322_v56, %v2325_v32  ;;  %v3563_v40 = vsel %vm3556_vm7, %v3559_v33, %v3562_v17  ;;  %vm15267_vm2 = vcmp.lt.s32.totalorder %v15240_v15, 0  ;;  %v2614_v48 = vmul.f32 %v2613_v34, %v11620_v18 }
 0x296   : > { %v1211_v44 = vsel %vm15267_vm2, %v1210_v60, %v1209_v21  ;;  %v11766_v11 = vand.u32 3, %v11750_v59  ;;  %vm15268_vm0 = vweird.f32 %v15231_v62  ;;  %v2621_v51 = vmul.f32 %v2620_v38, %v11620_v18 }
 0x297   : > { %v3564_v56 = vsel %vm15268_vm0, nan, %v3563_v40  ;;  %v11773_v1 = vsel %vm11655_vm10, %v15240_v15, %v1211_v44  ;;  %v2762_v42 = vsub.s32 4, %v10841_v43  ;;  %v1086_v13 = vsel %vm1079_vm15, %v1082_v22, %v1085_v19  ;;  %vm15270_vm15 = vmmov %vm15268_vm0 }
 0x298   : > { %5679 = vmatpush.msra.mxu2 %v3564_v56  ;;  %v1216_v31 = vmul.f32 %v11773_v1, %v11773_v1  ;;  %v2615_v21 = vadd.f32 -0.4999988, %v2614_v48  ;;  %v1344_v6 = vshll.u32 %v11703_v27, 30  ;;  %vm15269_vm3 = vweird.f32 %v15186_v23 }
 0x299   : > { %v2327_v52 = vsel %vm15269_vm3, nan, %v2326_v14  ;;  %v11785_v3 = vand.u32 3, %v11696_v46  ;;  %v2622_v36 = vadd.f32 -0.16666654, %v2621_v51  ;;  %v2767_v24 = vmul.f32 -0.001358992, %v11641_v20 }
 0x29a   : > { %v1217_v53 = vmul.f32 -0.001358992, %v1216_v31  ;;  %v1224_v2 = vmul.f32 -0.00019511016, %v1216_v31  ;;  %5680 = vmatpush.msra.mxu2 %v2327_v52  ;;  %v2616_v32 = vmul.f32 %v2615_v21, %v11620_v18  ;;  %v2774_v12 = vmul.f32 -0.00019511016, %v11641_v20 }
 0x29b   : > { %v1087_v60 = vsel %vm15270_vm15, nan, %v1086_v13  ;;  %v2623_v34 = vmul.f32 %v2622_v36, %v11620_v18  ;;  %vm5096_vm10 = vcmp.lt.s32.totalorder %v11766_v11, 2  ;;  %vm15271_vm8 = vcmp.lt.s32.totalorder %v15218_v26, 0 }
 0x29c   : > { %v2763_v23 = vsel %vm15271_vm8, %v2762_v42, %v10841_v43  ;;  %v2768_v46 = vadd.f32 0.041655596, %v2767_v24  ;;  %v1218_v14 = vadd.f32 0.041655596, %v1217_v53  ;;  %v1225_v38 = vadd.f32 0.008332121, %v1224_v2  ;;  %5681 = vmatpush.msra.mxu2 %v1087_v60 }
 0x29d   : > { %v11797_v33 = vadd.f32 1.0, %v2616_v32  ;;  %v11800_v17 = vsub.s32 %v11670_v49, %v1344_v6  ;;  %8626 = vmatmul.msk.f32.vlgmr.msra.gmra.mxu2 %vm14873_vm6, %v11498_v47  ;;  %v2624_v62 = vadd.f32 1.0, %v2623_v34  ;;  %vm5097_vm14 = vcmp.eq.s32.totalorder %v11766_v11, 0 }
 0x29e   : > { %v2769_v18 = vmul.f32 %v2768_v46, %v11641_v20  ;;  %v2775_v22 = vadd.f32 0.008332121, %v2774_v12  ;;  %v1219_v19 = vmul.f32 %v1218_v14, %v1216_v31  ;;  %v1226_v43 = vmul.f32 %v1225_v38, %v1216_v31 }
 0x29f   : > { %v2634_v40 = vxor.u32 2147483648, %v11797_v33  ;;  %v11809_v44 = vsel %vm11611_vm1, 0, %v2763_v23  ;;  %v11812_v49 = vmul.f32 %v2624_v62, %v11546_v28  ;;  %vm5100_vm11 = vcmp.eq.s32.totalorder %v11766_v11, 2 }
 0x2a0   : > { %v2770_v48 = vadd.f32 -0.4999988, %v2769_v18  ;;  %v2776_v56 = vmul.f32 %v2775_v22, %v11641_v20  ;;  %v1220_v51 = vadd.f32 -0.4999988, %v1219_v19  ;;  %v1227_v42 = vadd.f32 -0.16666654, %v1226_v43 }
 0x2a1   : > { %vm3714_vm7 = vcmp.eq.s32.totalorder %v11691_v9, 2  ;;  %vm1346_vm5 = vcmp.lt.s32.totalorder %v11800_v17, 0  ;;  %v1347_v13 = vsub.s32 0, %v11800_v17  ;;  %vm3711_vm12 = vcmp.eq.s32.totalorder %v11691_v9, 0 }
 0x2a2   : > { %vm1235_vm1 = vcmp.eq.s32.totalorder %v11785_v3, 0  ;;  %v2631_v28 = vxor.u32 2147483648, %v11812_v49  ;;  %v2771_v41 = vmul.f32 %v2770_v48, %v11641_v20  ;;  %v2777_v21 = vadd.f32 -0.16666654, %v2776_v56 }
 0x2a3   : > { %v5249_v6 = vand.u32 3, %v11809_v44  ;;  %v1221_v52 = vmul.f32 %v1220_v51, %v1216_v31  ;;  %v1228_v36 = vmul.f32 %v1227_v42, %v1216_v31  ;;  %vm3710_vm4 = vcmp.lt.s32.totalorder %v11691_v9, 2  ;;  %v15272_v42 = vld [vmem:[#allocation77_spill] sm:$0xff] }
 0x2a4   : > { %v5102_v24 = vsel %vm5100_vm11, %v2634_v40, %v11812_v49  ;;  %v1348_v53 = vsel %vm1346_vm5, %v1347_v13, %v11800_v17  ;;  %vm1231_vm13 = vweird.f32 %v15240_v15  ;;  %v5099_v2 = vsel %vm5097_vm14, %v11797_v33, %v2631_v28 }
 0x2a5   : > { %v11837_v32 = vadd.f32 1.0, %v2771_v41  ;;  %v2778_v31 = vmul.f32 %v2777_v21, %v11641_v20  ;;  %v1349_v12 = vclz %v1348_v53  ;;  %v1222_v60 = vadd.f32 1.0, %v1221_v52  ;;  %8627 = vmatmul.msk.f32.gmra.mxu2 %vm14873_vm6, %v11731_v39  ;;  %v15273_v52 = vld [vmem:[#allocation42_spill] sm:$0xff] }
 0x2a6   : > { %v1229_v34 = vadd.f32 1.0, %v1228_v36  ;;  %vm1234_vm9 = vcmp.lt.s32.totalorder %v11785_v3, 2  ;;  %vm14876_vm2 = vweird.f32 %v15168_v50  ;;  %v5103_v23 = vsel %vm5096_vm10, %v5099_v2, %v5102_v24 }
 0x2a7   : > { %vm1238_vm0 = vcmp.eq.s32.totalorder %v11785_v3, 2  ;;  %v5104_v46 = vsel %vm14876_vm2, nan, %v5103_v23  ;;  %v2779_v14 = vadd.f32 1.0, %v2778_v31  ;;  %v8535_v38 = vadd.s32 4294967294, %v1349_v12 }
 0x2a8   : > { %v1230_v20 = vmul.f32 %v1229_v34, %v11773_v1  ;;  %v1239_v62 = vxor.u32 2147483648, %v1222_v60  ;;  %5736 = vmatpush.msrb.mxu0 %v5104_v46  ;;  %vm14874_vm3 = vweird.f32 %v15218_v26  ;;  %v1337_v11 = vadd.s32 %v11607_v4, %v11605_v30 }
 0x2a9   : > { %v11854_v18 = vmul.f32 %v2779_v14, %v11626_v63  ;;  %v14872_v22 = vxor.u32 2147483648, %v11837_v32  ;;  %vm5250_vm15 = vcmp.lt.s32.totalorder %v5249_v6, 2  ;;  %vm8536_vm10 = vcmp.lt.s32.totalorder %v8535_v38, 0  ;;  %v15275_v14 = vld [vmem:[#allocation81_spill] sm:$0xff] }
 0x2aa   : > { %v1236_v19 = vxor.u32 2147483648, %v1230_v20  ;;  %vm5251_vm8 = vcmp.eq.s32.totalorder %v5249_v6, 0  ;;  %vm5254_vm14 = vcmp.eq.s32.totalorder %v5249_v6, 2  ;;  %v1352_v43 = vsel %vm8536_vm10, 0, %v8535_v38 }
 0x2ab   : > { %v3716_v1 = vsel %vm3714_vm7, %v1239_v62, %v1230_v20  ;;  %v2786_v48 = vxor.u32 2147483648, %v11854_v18  ;;  %v1353_v56 = vsub.s32 32, %v1352_v43  ;;  %v1354_v51 = vshll.u32 %v11800_v17, %v1352_v43 }
 0x2ac   : > { %v3713_v30 = vsel %vm3711_vm12, %v1222_v60, %v1236_v19  ;;  %v1237_v4 = vsel %vm1235_vm1, %v1222_v60, %v1236_v19  ;;  %v1357_v63 = vsub.s32 4294967266, %v1352_v43  ;;  %vm1481_vm11 = vc.u32 %v15272_v42, %v1477_v58 }
 0x2ad   : > { %v3717_v13 = vsel %vm3710_vm4, %v3713_v30, %v3716_v1  ;;  %v5253_v41 = vsel %vm5251_vm8, %v11837_v32, %v2786_v48  ;;  %v5256_v17 = vsel %vm5254_vm14, %v14872_v22, %v11854_v18  ;;  %v1355_v21 = vshrl.u32 %v1337_v11, %v1353_v56 }
 0x2ae   : > { %vm1245_vm7 = vcmp.lt.s32.totalorder %v15273_v52, 0  ;;  %v3718_v36 = vsel %vm1231_vm13, nan, %v3717_v13  ;;  %v1240_v24 = vsel %vm1238_vm0, %v1239_v62, %v1230_v20  ;;  %v5257_v9 = vsel %vm5250_vm15, %v5253_v41, %v5256_v17  ;;  %v15277_v62 = vld [vmem:[#allocation100_spill] sm:$0xff] }
 0x2af   : > { %v1358_v53 = vadd.s32 127, %v1357_v63  ;;  %5708 = vmatpush.msra.mxu3 %v3718_v36  ;;  %v1241_v2 = vsel %vm1234_vm9, %v1237_v4, %v1240_v24  ;;  %v5258_v31 = vsel %vm14874_vm3, nan, %v5257_v9  ;;  %v1482_v12 = vsel %vm1481_vm11, 1, %v15022_v8 }
 0x2b0   : > { %v1483_v60 = vadd.s32 %v1477_v58, %v15272_v42  ;;  %5765 = vmatpush.msrb.mxu1 %v5258_v31  ;;  %v1356_v34 = vor.u32 %v1355_v21, %v1354_v51  ;;  %v15274_v6 = vshrl.u32 %v15254_v35, 16  ;;  %v1484_v38 = vadd.s32 %v1482_v12, %v15275_v14  ;;  %v15286_v31 = vld [vmem:[#allocation101_spill] sm:$0xff] }
 0x2b1   : > { %v1359_v23 = vshll.u32 %v1358_v53, 23  ;;  %v15276_v3 = vand.u32 65535, %v11189_v55  ;;  %5709 = vmatpush.msra.mxu3 %v11716_v5  ;;  %v1478_v58 = vshrl.u32 %v15252_v0, 16  ;;  %v15279_v43 = vshll.u32 %v15253_v29, 16 }
 0x2b2   : > { %v1467_v46 = vadd.s32 %v11739_v57, %v15274_v6  ;;  %v1765_v35 = vshll.u32 %v11230_v25, 16  ;;  %v1242_v57 = vsel %vm1231_vm13, nan, %v1241_v2  ;;  %v2915_v51 = vxor.u32 2147483648, %v11644_v7 }
 0x2b3   : > { %v1761_v20 = vmul.u32 %v15276_v3, %v15173_v16  ;;  %v15278_v11 = vmov %v15276_v3  ;;  %vm1485_vm5 = vc.u32 %v1483_v60, %v15279_v43  ;;  %v1360_v1 = vor.u32 4788187, %v1359_v23  ;;  %5710 = vmatpush.msra.mxu3 %v1242_v57 }
 0x2b4   : > { %v11900_v19 = vmul.u32 %v15278_v11, %v15277_v62  ;;  %v1486_v56 = vsel %vm1485_vm5, 1, %v15022_v8  ;;  %v3070_v30 = vxor.u32 2147483648, %v11648_v45  ;;  %v1480_v5 = vshrl.u32 %v15253_v29, 16  ;;  %8630 = vmatmul.msk.f32.vlgmr.msra.gmra.mxu3 %vm14873_vm6, %v11498_v47 }
 0x2b5   : > { %v1488_v4 = vadd.s32 %v1486_v56, %v1484_v38  ;;  %v1361_v0 = vand.u32 2147483647, %v1360_v1  ;;  %v1363_v63 = vcvt.s32.f32 %v1356_v34  ;;  %v11917_v15 = vadd.s32 %v1467_v46, %v1458_v54 }
 0x2b6   : > { %v15280_v42 = vmov %v15279_v43  ;;  %v15281_v41 = vshrl.u32 %v11189_v55, 16  ;;  %v15282_v21 = vand.u32 65535, %v11214_v61  ;;  %v1367_v47 = vsub.s32 4, %v11703_v27  ;;  %v15285_v55 = vld [vmem:[#allocation87_spill] sm:$0xff] }
 0x2b7   : > { %v11921_v13 = vadd.s32 %v1483_v60, %v15280_v42  ;;  %v1489_v24 = vadd.s32 %v1488_v4, %v1478_v58  ;;  %v15283_v10 = vshrl.u32 %v11214_v61, 16  ;;  %vm2795_vm12 = vcmp.lt.s32.totalorder %v15285_v55, 0 }
 0x2b8   : > { %v1764_v17 = vmul.u32 %v15281_v41, %v15277_v62  ;;  %v11929_v36 = vmul.u32 %v15282_v21, %v15173_v16  ;;  %v15284_v29 = vmov %v15282_v21  ;;  %v1364_v53 = vmul.f32 %v1363_v63, %v1361_v0  ;;  %v15298_v21 = vld [vmem:[#allocation93_spill] sm:$0xff] }
 0x2b9   : > { %v11935_v54 = vmul.u32 %v15283_v10, %v15173_v16  ;;  %v11940_v9 = vmul.u32 %v15284_v29, %v15277_v62  ;;  %vm1769_vm1 = vc.u32 %v1761_v20, %v1765_v35  ;;  %v2916_v2 = vsel %vm2795_vm12, %v2915_v51, %v11644_v7  ;;  %v15295_v51 = vld [vmem:[#allocation59_spill] sm:$0xff] }
 0x2ba   : > { %vm2950_vm4 = vcmp.lt.s32.totalorder %v15286_v31, 0  ;;  %v1490_v12 = vadd.s32 %v1489_v24, %v1480_v5  ;;  %v15287_v16 = vmov %v15283_v10  ;;  %v1365_v23 = vxor.u32 2147483648, %v1364_v53 }
 0x2bb   : > { %v11950_v60 = vmul.u32 %v15287_v16, %v15277_v62  ;;  %v3071_v34 = vsel %vm2950_vm4, %v3070_v30, %v11648_v45  ;;  %vm1493_vm13 = vc.u32 %v11917_v15, %v11921_v13  ;;  %v15288_v6 = vand.u32 2147483647, %v15285_v55  ;;  %v15296_v30 = vld [vmem:[#allocation70_spill] sm:$0xff]  ;;  %v15303_v16 = vld [vmem:[#allocation45_spill] sm:$0xff] }
 0x2bc   : > { %v15291_v46 = vand.u32 2147483647, %v15273_v52  ;;  %v1368_v61 = vsel %vm1245_vm7, %v1367_v47, %v11703_v27  ;;  %v1494_v14 = vadd.s32 1, %v1490_v12  ;;  %v1770_v45 = vsel %vm1769_vm1, 1, %v15022_v8  ;;  %8631 = vmatmul.msk.f32.gmra.mxu3 %vm14873_vm6, %v11731_v39 }
 0x2bd   : > { %vm11959_vm9 = vcmp.le.f32.partialorder %v15288_v6, 0.7853982  ;;  %v15292_v3 = vand.u32 2147483647, %v15286_v31  ;;  %v1366_v11 = vsel %vm1245_vm7, %v1365_v23, %v1364_v53  ;;  %v15297_v5 = vmul.u32 %v15295_v51, %v15296_v30  ;;  %v15299_v53 = vld [vmem:[#allocation90_spill] sm:$0xff] }
 0x2be   : > { %vm1244_vm0 = vcmp.le.f32.partialorder %v15291_v46, 0.7853982  ;;  %v11972_v38 = vsel %vm11959_vm9, %v15285_v55, %v2916_v2  ;;  %v1495_v57 = vsel %vm1493_vm13, %v1494_v14, %v1490_v12  ;;  %v2627_v0 = vadd.s32 3, %v11750_v59  ;;  %v15301_v12 = vld [vmem:[#allocation99_spill] sm:$0xff] }
 0x2bf   : > { %vm11976_vm15 = vcmp.le.f32.partialorder %v15292_v3, 0.7853982  ;;  %v11989_v43 = vsel %vm1244_vm0, %v15273_v52, %v1366_v11  ;;  %v1370_v1 = vsel %vm1244_vm0, 0, %v1368_v61  ;;  %v1496_v4 = vadd.s32 %v1495_v57, %v15297_v5 }
 0x2c0   : > { %v11986_v27 = vsel %vm11976_vm15, %v15286_v31, %v3071_v34  ;;  %v1371_v56 = vmul.f32 %v11989_v43, %v11989_v43  ;;  %v11999_v63 = vadd.s32 %v1765_v35, %v1761_v20  ;;  %v12001_v42 = vadd.s32 %v1770_v45, %v1764_v17  ;;  %v15302_v35 = vld [vmem:[#allocation94_spill] sm:$0xff]  ;;  %v15304_v45 = vld [vmem:[#allocation92_spill] sm:$0xff] }
 0x2c1   : > { %v12005_v41 = vmul.f32 %v11972_v38, %v11972_v38  ;;  %v1632_v47 = vshll.u32 %v15298_v21, 16  ;;  %v1497_v29 = vadd.s32 536870912, %v1496_v4  ;;  %v15300_v2 = vshll.u32 %v15299_v53, 16 }
 0x2c2   : > { %v1372_v24 = vmul.f32 -0.001358992, %v1371_v56  ;;  %v1379_v10 = vmul.f32 -0.00019511016, %v1371_v56  ;;  %v12013_v39 = vmul.f32 %v11986_v27, %v11986_v27  ;;  %v12015_v59 = vand.u32 3, %v1370_v1 }
 0x2c3   : > { %vm1618_vm10 = vc.u32 %v15301_v12, %v15300_v2  ;;  %v2782_v20 = vadd.s32 3, %v11809_v44  ;;  %v1634_v17 = vshll.u32 %v15302_v35, 16  ;;  %vm14875_vm8 = vcmp.lt.s32.totalorder %v15303_v16, 0 }
 0x2c4   : > { %v1373_v34 = vadd.f32 0.041655596, %v1372_v24  ;;  %v1380_v23 = vadd.f32 0.008332121, %v1379_v10  ;;  %v1498_v6 = vshrl.u32 %v1497_v29, 30  ;;  %v12020_v46 = vand.u32 3, %v2627_v0 }
 0x2c5   : > { %v2917_v61 = vsub.s32 4, %v11028_v37  ;;  %v1619_v14 = vsel %vm1618_vm10, 1, %v15022_v8  ;;  %vm1636_vm14 = vc.u32 %v15304_v45, %v1632_v47  ;;  %v1638_v3 = vadd.s32 %v1632_v47, %v15304_v45  ;;  %v15308_v24 = vld [vmem:[#allocation30_spill] sm:$0xff] }
 0x2c6   : > { %v1374_v11 = vmul.f32 %v1373_v34, %v1371_v56  ;;  %v1381_v57 = vmul.f32 %v1380_v23, %v1371_v56  ;;  %v1499_v44 = vshll.u32 %v1498_v6, 30  ;;  %v1387_v51 = vadd.s32 3, %v1370_v1  ;;  %v15309_v1 = vld [vmem:[#allocation12_spill] sm:$0xff]  ;;  %v15310_v23 = vld [vmem:[#allocation89_spill] sm:$0xff] }
 0x2c7   : > { %v15305_v30 = vand.u32 2147483647, %v15303_v16  ;;  %v12032_v0 = vand.u32 3, %v2782_v20  ;;  %v3072_v10 = vsub.s32 4, %v15308_v24  ;;  %v1637_v29 = vsel %vm1636_vm14, 1, %v15022_v8 }
 0x2c8   : > { %vm1640_vm7 = vc.u32 %v1638_v3, %v1634_v17  ;;  %v1375_v47 = vadd.f32 -0.4999988, %v1374_v11  ;;  %v1382_v2 = vadd.f32 -0.16666654, %v1381_v57  ;;  %v12038_v12 = vsub.s32 %v1496_v4, %v1499_v44 }
 0x2c9   : > { %vm12028_vm11 = vcmp.le.f32.partialorder %v15305_v30, 0.7853982  ;;  %v1621_v34 = vadd.s32 %v1619_v14, %v15309_v1  ;;  %vm3865_vm5 = vcmp.eq.s32.totalorder %v12015_v59, 0  ;;  %vm3868_vm1 = vcmp.eq.s32.totalorder %v12015_v59, 2  ;;  %v15311_v30 = vld [vmem:[#allocation96_spill] sm:$0xff] }
 0x2ca   : > { %v2918_v20 = vsel %vm2795_vm12, %v2917_v61, %v11028_v37  ;;  %v1611_v45 = vshrl.u32 %v15310_v23, 16  ;;  %v1639_v58 = vadd.s32 %v1637_v29, %v15311_v30  ;;  %v1641_v22 = vsel %vm1640_vm7, 1, %v15022_v8 }
 0x2cb   : > { %v1376_v11 = vmul.f32 %v1375_v47, %v1371_v56  ;;  %v1383_v57 = vmul.f32 %v1382_v2, %v1371_v56  ;;  %vm3864_vm13 = vcmp.lt.s32.totalorder %v12015_v59, 2  ;;  %vm1501_vm0 = vcmp.lt.s32.totalorder %v12038_v12, 0 }
 0x2cc   : > { %v1502_v4 = vsub.s32 0, %v12038_v12  ;;  %vm1386_vm10 = vweird.f32 %v15273_v52  ;;  %v1522_v14 = vsub.s32 4, %v1498_v6  ;;  %v12053_v44 = vand.u32 3, %v1387_v51 }
 0x2cd   : > { %v1633_v37 = vshrl.u32 %v15298_v21, 16  ;;  %v1643_v61 = vadd.s32 %v1641_v22, %v1639_v58  ;;  %v1377_v1 = vadd.f32 1.0, %v1376_v11  ;;  %v1384_v29 = vadd.f32 1.0, %v1383_v57 }
 0x2ce   : > { %v1503_v23 = vsel %vm1501_vm0, %v1502_v4, %v12038_v12  ;;  %v1622_v47 = vadd.s32 %v1621_v34, %v1611_v45  ;;  %v1492_v56 = vadd.s32 %v11921_v13, %v11917_v15  ;;  %v12061_v30 = vsel %vm11959_vm9, 0, %v2918_v20 }
 0x2cf   : > { %v1504_v2 = vclz %v1503_v23  ;;  %v3073_v51 = vsel %vm2950_vm4, %v3072_v10, %v15308_v24  ;;  %v1385_v21 = vmul.f32 %v1384_v29, %v11989_v43  ;;  %v1394_v22 = vxor.u32 2147483648, %v1377_v1 }
 0x2d0   : > { %v1613_v58 = vshrl.u32 %v15299_v53, 16  ;;  %v1644_v11 = vadd.s32 %v1643_v61, %v1633_v37  ;;  %v1523_v34 = vsel %vm14875_vm8, %v1522_v14, %v1498_v6  ;;  %vm2630_vm12 = vcmp.eq.s32.totalorder %v12020_v46, 0 }
 0x2d1   : > { %v8538_v57 = vadd.s32 4294967294, %v1504_v2  ;;  %vm2633_vm14 = vcmp.eq.s32.totalorder %v12020_v46, 2  ;;  %vm2785_vm9 = vcmp.eq.s32.totalorder %v12032_v0, 0  ;;  %vm2788_vm7 = vcmp.eq.s32.totalorder %v12032_v0, 2 }
 0x2d2   : > { %vm1390_vm4 = vcmp.eq.s32.totalorder %v12053_v44, 0  ;;  %v1635_v15 = vshrl.u32 %v15302_v35, 16  ;;  %v1391_v13 = vxor.u32 2147483648, %v1385_v21  ;;  %vm2629_vm0 = vcmp.lt.s32.totalorder %v12020_v46, 2 }
 0x2d3   : > { %vm2784_vm6 = vcmp.lt.s32.totalorder %v12032_v0, 2  ;;  %vm1389_vm3 = vcmp.lt.s32.totalorder %v12053_v44, 2  ;;  %vm1393_vm8 = vcmp.eq.s32.totalorder %v12053_v44, 2  ;;  %v12082_v7 = vsel %vm11976_vm15, 0, %v3073_v51  ;;  %v15315_v44 = vld [vmem:[#allocation82_spill] sm:$0xff] }
 0x2d4   : > { %v12084_v43 = vadd.s32 %v1622_v47, %v1613_v58  ;;  %vm8539_vm2 = vcmp.lt.s32.totalorder %v8538_v57, 0  ;;  %v12087_v53 = vand.u32 3, %v12061_v30  ;;  %v1642_v6 = vadd.s32 %v1638_v3, %v1634_v17 }
 0x2d5   : > { %v1645_v24 = vadd.s32 %v1644_v11, %v1635_v15  ;;  %v3867_v10 = vsel %vm3865_vm5, %v1377_v1, %v1391_v13  ;;  %v3870_v20 = vsel %vm3868_vm1, %v1394_v22, %v1385_v21  ;;  %v1507_v45 = vsel %vm8539_vm2, 0, %v8538_v57 }
 0x2d6   : > { %v1525_v62 = vsel %vm12028_vm11, 0, %v1523_v34  ;;  %v3871_v4 = vsel %vm3864_vm13, %v3867_v10, %v3870_v20  ;;  %v1508_v14 = vsub.s32 32, %v1507_v45  ;;  %v1509_v37 = vshll.u32 %v12038_v12, %v1507_v45 }
 0x2d7   : > { %v1512_v61 = vsub.s32 4294967266, %v1507_v45  ;;  %v3872_v35 = vsel %vm1386_vm10, nan, %v3871_v4  ;;  %v12103_v17 = vand.u32 3, %v12082_v7  ;;  %vm1648_vm15 = vc.u32 %v12084_v43, %v1642_v6  ;;  %v15316_v45 = vld [vmem:[#allocation86_spill] sm:$0xff] }
 0x2d8   : > { %v1649_v3 = vadd.s32 1, %v1645_v24  ;;  %5737 = vmatpush.msrb.mxu0 %v3872_v35  ;;  %v1510_v29 = vshrl.u32 %v1492_v56, %v1508_v14  ;;  %v12106_v47 = vand.u32 3, %v1525_v62  ;;  %v12108_v59 = vadd.s32 3, %v1525_v62 }
 0x2d9   : > { %v1513_v23 = vadd.s32 127, %v1512_v61  ;;  %v1392_v12 = vsel %vm1390_vm4, %v1377_v1, %v1391_v13  ;;  %v1395_v2 = vsel %vm1393_vm8, %v1394_v22, %v1385_v21  ;;  %v2922_v51 = vmul.f32 -0.001358992, %v12005_v41  ;;  %v5573_v61 = vld [vmem:[%s14701_s3 + $0x10] sm:$0xff] }
 0x2da   : > { %v2929_v58 = vmul.f32 -0.00019511016, %v12005_v41  ;;  %v1511_v11 = vor.u32 %v1510_v29, %v1509_v37  ;;  %v3077_v34 = vmul.f32 -0.001358992, %v12013_v39  ;;  %v1650_v56 = vsel %vm1648_vm15, %v1649_v3, %v1645_v24  ;;  %v12162_v37 = vld [vmem:[%s14700_s2 + $0x10] sm:$0xff]  ;;  %5587 = vperm.xlu0 %8780, %v5573_v61  }
 0x2db   : > { %v1514_v57 = vshll.u32 %v1513_v23, 23  ;;  %v2632_v15 = vsel %vm2630_vm12, %v11797_v33, %v2631_v28  ;;  %v2635_v1 = vsel %vm2633_vm14, %v2634_v40, %v11812_v49  ;;  %v2787_v21 = vsel %vm2785_vm9, %v11837_v32, %v2786_v48 }
 0x2dc   : > { %v15312_v22 = vxor.u32 2147483648, %v11837_v32  ;;  %v2636_v28 = vsel %vm2629_vm0, %v2632_v15, %v2635_v1  ;;  %v1396_v40 = vsel %vm1389_vm3, %v1392_v12, %v1395_v2  ;;  %v1518_v49 = vcvt.s32.f32 %v1511_v11 }
 0x2dd   : > { %v1515_v24 = vor.u32 4788187, %v1514_v57  ;;  %vm15313_vm2 = vweird.f32 %v15168_v50  ;;  %vm15314_vm8 = vweird.f32 %v15218_v26  ;;  %v2923_v46 = vadd.f32 0.041655596, %v2922_v51 }
 0x2de   : > { %v2790_v13 = vsel %vm2788_vm7, %v15312_v22, %v11854_v18  ;;  %v2637_v48 = vsel %vm15313_vm2, nan, %v2636_v28  ;;  %v5571_v18 = vld [vmem:[%s14701_s3] sm:$0xff]  ;;  %v2930_v0 = vadd.f32 0.008332121, %v2929_v58  ;;  %v3078_v20 = vadd.f32 0.041655596, %v3077_v34 }
 0x2df   : > { %v2791_v33 = vsel %vm2784_vm6, %v2787_v21, %v2790_v13  ;;  %v1516_v10 = vand.u32 2147483647, %v1515_v24  ;;  %5738 = vmatpush.msrb.mxu0 %v2637_v48  ;;  %5577 = vperm.xlu1 %8781, %v5571_v18   ;;  %v15317_v62 = vmul.u32 %v15315_v44, %v15316_v45  ;;  %v1397_v50 = vsel %vm1386_vm10, nan, %v1396_v40 }
 0x2e0   : > { %v12147_v32 = vsel %vm15314_vm8, nan, %v2791_v33  ;;  %v2924_v26 = vmul.f32 %v2923_v46, %v12005_v41  ;;  %v3084_v14 = vmul.f32 -0.00019511016, %v12013_v39  ;;  %v15318_v35 = vshll.u32 %v11900_v19, 16 }
 0x2e1   : > { %v1651_v4 = vadd.s32 %v1650_v56, %v15317_v62  ;;  %v1519_v52 = vmul.f32 %v1518_v49, %v1516_v10  ;;  %5739 = vmatpush.msrb.mxu0 %v1397_v50  ;;  %v2931_v29 = vmul.f32 %v2930_v0, %v12005_v41  ;;  %v3079_v23 = vmul.f32 %v3078_v20, %v12013_v39 }
 0x2e2   : > { %vm12170_vm6 = vc.u32 %v11999_v63, %v15318_v35  ;;  %vm15321_vm3 = vcmask 261120   ;;  %v2925_v2 = vadd.f32 -0.4999988, %v2924_v26  ;;  %v3085_v51 = vadd.f32 0.008332121, %v3084_v14 }
 0x2e3   : > { %8624 = vmatmul.msk.f32.gmra.mxu1 %vm15321_vm3, %v12162_v37  ;;  %v1652_v12 = vadd.s32 536870912, %v1651_v4  ;;  %vm15322_vm5 = vmmov %vm15321_vm3  ;;  %v12181_v63 = vadd.s32 %v1642_v6, %v12084_v43  ;;  %v1787_v58 = vshll.u32 %v11935_v54, 16  ;;  %v1520_v11 = vxor.u32 2147483648, %v1519_v52 }
 0x2e4   : > { %8620 = vmatmul.msk.f32.gmra.mxu0 %vm15322_vm5, %v12162_v37  ;;  %v2932_v57 = vadd.f32 -0.16666654, %v2931_v29  ;;  %vm5408_vm1 = vcmp.eq.s32.totalorder %v12087_v53, 2  ;;  %v3080_v34 = vadd.f32 -0.4999988, %v3079_v23  ;;  %vm15323_vm13 = vmmov %vm15321_vm3  ;;  %v2926_v15 = vmul.f32 %v2925_v2, %v12005_v41 }
 0x2e5   : > { %v12185_v56 = vshrl.u32 %v1652_v12, 30  ;;  %8628 = vmatmul.msk.f32.gmra.mxu2 %vm15323_vm13, %v12162_v37  ;;  %vm15324_vm10 = vmmov %vm15321_vm3  ;;  %vm5405_vm12 = vcmp.eq.s32.totalorder %v12087_v53, 0  ;;  %v3086_v43 = vmul.f32 %v3085_v51, %v12013_v39  ;;  %v1766_v6 = vshrl.u32 %v11230_v25, 16 }
 0x2e6   : > { %8632 = vmatmul.msk.f32.gmra.mxu3 %vm15324_vm10, %v12162_v37  ;;  %v1774_v1 = vsel %vm12170_vm6, 1, %v15022_v8  ;;  %vm15325_vm14 = vcmp.lt.s32.totalorder %v15303_v16, 0  ;;  %v2933_v22 = vmul.f32 %v2932_v57, %v12005_v41  ;;  %vm5404_vm9 = vcmp.lt.s32.totalorder %v12087_v53, 2 }
 0x2e7   : > { %v1521_v21 = vsel %vm15325_vm14, %v1520_v11, %v1519_v52  ;;  %v3081_v13 = vmul.f32 %v3080_v34, %v12013_v39  ;;  %v1654_v24 = vshll.u32 %v12185_v56, 30  ;;  %v12209_v25 = vadd.f32 1.0, %v2926_v15 }
 0x2e8   : > { %v12207_v28 = vsel %vm12028_vm11, %v15303_v16, %v1521_v21  ;;  %vm2936_vm7 = vweird.f32 %v15285_v55  ;;  %v3087_v33 = vadd.f32 -0.16666654, %v3086_v43  ;;  %vm12213_vm4 = vc.u32 %v11929_v36, %v1787_v58 }
 0x2e9   : > { %v1526_v41 = vmul.f32 %v12207_v28, %v12207_v28  ;;  %v2934_v49 = vadd.f32 1.0, %v2933_v22  ;;  %v12219_v48 = vadd.f32 1.0, %v3081_v13  ;;  %vm5559_vm0 = vcmp.eq.s32.totalorder %v12103_v17, 0 }
 0x2ea   : > { %vm5562_vm11 = vcmp.eq.s32.totalorder %v12103_v17, 2  ;;  %v12223_v5 = vsub.s32 %v1651_v4, %v1654_v24  ;;  %v2944_v18 = vxor.u32 2147483648, %v12209_v25  ;;  %v3088_v46 = vmul.f32 %v3087_v33, %v12013_v39 }
 0x2eb   : > { %vm5558_vm15 = vcmp.lt.s32.totalorder %v12103_v17, 2  ;;  %v1789_v10 = vshll.u32 %v11940_v9, 16  ;;  %v1793_v0 = vadd.s32 %v1787_v58, %v11929_v36  ;;  %v1527_v20 = vmul.f32 -0.001358992, %v1526_v41 }
 0x2ec   : > { %v1534_v44 = vmul.f32 -0.00019511016, %v1526_v41  ;;  %v12231_v45 = vmul.f32 %v2934_v49, %v11972_v38  ;;  %vm3091_vm2 = vweird.f32 %v15286_v31  ;;  %v1776_v62 = vadd.s32 %v1774_v1, %v12001_v42 }
 0x2ed   : > { %v3089_v4 = vadd.f32 1.0, %v3088_v46  ;;  %vm1656_vm8 = vcmp.lt.s32.totalorder %v12223_v5, 0  ;;  %v1657_v39 = vsub.s32 0, %v12223_v5  ;;  %v1792_v50 = vsel %vm12213_vm4, 1, %v15022_v8 }
 0x2ee   : > { %v1528_v26 = vadd.f32 0.041655596, %v1527_v20  ;;  %v1535_v36 = vadd.f32 0.008332121, %v1534_v44  ;;  %v2941_v14 = vxor.u32 2147483648, %v12231_v45  ;;  %v3099_v38 = vxor.u32 2147483648, %v12219_v48 }
 0x2ef   : > { %v5410_v42 = vsel %vm5408_vm1, %v2944_v18, %v12231_v45  ;;  %v12248_v61 = vmul.f32 %v3089_v4, %v11986_v27  ;;  %v1658_v35 = vsel %vm1656_vm8, %v1657_v39, %v12223_v5  ;;  %vm12251_vm6 = vc.u32 %v1793_v0, %v1789_v10 }
 0x2f0   : > { %v1529_v52 = vmul.f32 %v1528_v26, %v1526_v41  ;;  %v1536_v29 = vmul.f32 %v1535_v36, %v1526_v41  ;;  %v5407_v23 = vsel %vm5405_vm12, %v12209_v25, %v2941_v14  ;;  %v1659_v12 = vclz %v1658_v35 }
 0x2f1   : > { %v5411_v2 = vsel %vm5404_vm9, %v5407_v23, %v5410_v42  ;;  %v3096_v27 = vxor.u32 2147483648, %v12248_v61  ;;  %v1777_v51 = vadd.s32 %v1776_v62, %v1766_v6  ;;  %v1794_v58 = vadd.s32 %v1792_v50, %v11950_v60  ;;  %v15330_v23 = vld [vmem:[#allocation88_spill] sm:$0xff] }
 0x2f2   : > { %v1530_v11 = vadd.f32 -0.4999988, %v1529_v52  ;;  %v1537_v57 = vadd.f32 -0.16666654, %v1536_v29  ;;  %v5412_v34 = vsel %vm2936_vm7, nan, %v5411_v2  ;;  %v8541_v15 = vadd.s32 4294967294, %v1659_v12 }
 0x2f3   : > { %5794 = vmatpush.msrb.mxu2 %v5412_v34  ;;  %v5561_v43 = vsel %vm5559_vm0, %v12219_v48, %v3096_v27  ;;  %v5564_v53 = vsel %vm5562_vm11, %v3099_v38, %v12248_v61  ;;  %v1768_v60 = vshrl.u32 %v11900_v19, 16  ;;  %v1796_v6 = vsel %vm12251_vm6, 1, %v15022_v8  ;;  %v15331_v12 = vld [vmem:[#allocation38_spill] sm:$0xff] }
 0x2f4   : > { %v1531_v1 = vmul.f32 %v1530_v11, %v1526_v41  ;;  %v1538_v21 = vmul.f32 %v1537_v57, %v1526_v41  ;;  %v5565_v22 = vsel %vm5558_vm15, %v5561_v43, %v5564_v53  ;;  %vm8542_vm3 = vcmp.lt.s32.totalorder %v8541_v15, 0 }
 0x2f5   : > { %v5566_v13 = vsel %vm3091_vm2, nan, %v5565_v22  ;;  %v1662_v24 = vsel %vm8542_vm3, 0, %v8541_v15  ;;  %v1788_v33 = vshrl.u32 %v11935_v54, 16  ;;  %v1798_v40 = vadd.s32 %v1796_v6, %v1794_v58  ;;  %v15333_v6 = vld [vmem:[#allocation41_spill] sm:$0xff] }
 0x2f6   : > { %v1532_v49 = vadd.f32 1.0, %v1531_v1  ;;  %v1539_v46 = vadd.f32 1.0, %v1538_v21  ;;  %5823 = vmatpush.msrb.mxu3 %v5566_v13  ;;  %v1663_v19 = vsub.s32 32, %v1662_v24  ;;  %v12285_v20 = vadd.s32 %v1777_v51, %v1768_v60 }
 0x2f7   : > { %v1543_v8 = vand.u32 3, %v12108_v59  ;;  %v1667_v41 = vsub.s32 4294967266, %v1662_v24  ;;  %v1790_v17 = vshrl.u32 %v11940_v9, 16  ;;  %v1799_v44 = vadd.s32 %v1798_v40, %v1788_v33 }
 0x2f8   : > { %v1540_v62 = vmul.f32 %v1539_v46, %v12207_v28  ;;  %v1549_v4 = vxor.u32 2147483648, %v1532_v49  ;;  %v1665_v39 = vshrl.u32 %v12181_v63, %v1663_v19  ;;  %v12291_v50 = vadd.s32 %v1793_v0, %v1789_v10 }
 0x2f9   : > { %vm1541_vm5 = vweird.f32 %v15303_v16  ;;  %v1664_v54 = vshll.u32 %v12223_v5, %v1662_v24  ;;  %v1668_v26 = vadd.s32 127, %v1667_v41  ;;  %v1800_v36 = vadd.s32 %v1799_v44, %v1790_v17 }
 0x2fa   : > { %v1546_v42 = vxor.u32 2147483648, %v1540_v62  ;;  %vm4019_vm1 = vcmp.eq.s32.totalorder %v12106_v47, 0  ;;  %vm4022_vm13 = vcmp.eq.s32.totalorder %v12106_v47, 2  ;;  %vm1803_vm10 = vc.u32 %v12285_v20, %v12291_v50 }
 0x2fb   : > { %vm1545_vm12 = vcmp.eq.s32.totalorder %v1543_v8, 0  ;;  %v1666_v9 = vor.u32 %v1665_v39, %v1664_v54  ;;  %v1669_v59 = vshll.u32 %v1668_v26, 23  ;;  %v1804_v63 = vadd.s32 1, %v1800_v36 }
 0x2fc   : > { %vm4018_vm14 = vcmp.lt.s32.totalorder %v12106_v47, 2  ;;  %v4021_v28 = vsel %vm4019_vm1, %v1532_v49, %v1546_v42  ;;  %v4024_v10 = vsel %vm4022_vm13, %v1549_v4, %v1540_v62  ;;  %v1547_v0 = vsel %vm1545_vm12, %v1532_v49, %v1546_v42 }
 0x2fd   : > { %v4025_v5 = vsel %vm4018_vm14, %v4021_v28, %v4024_v10  ;;  %vm1548_vm9 = vcmp.eq.s32.totalorder %v1543_v8, 2  ;;  %v1670_v35 = vor.u32 4788187, %v1669_v59  ;;  %v1805_v3 = vsel %vm1803_vm10, %v1804_v63, %v1800_v36 }
 0x2fe   : > { %v4026_v52 = vsel %vm1541_vm5, nan, %v4025_v5  ;;  %vm1544_vm4 = vcmp.lt.s32.totalorder %v1543_v8, 2  ;;  %v1550_v29 = vsel %vm1548_vm9, %v1549_v4, %v1540_v62  ;;  %v15332_v2 = vmul.u32 %v15330_v23, %v15331_v12 }
 0x2ff   : > { %5766 = vmatpush.msrb.mxu1 %v4026_v52  ;;  %v1551_v58 = vsel %vm1544_vm4, %v1547_v0, %v1550_v29  ;;  %v1671_v11 = vand.u32 2147483647, %v1670_v35  ;;  %v1673_v47 = vcvt.s32.f32 %v1666_v9  ;;  %v1677_v43 = vsub.s32 4, %v12185_v56 }
 0x300   : > { %v1806_v51 = vadd.s32 %v1805_v3, %v15332_v2  ;;  %v1552_v15 = vsel %vm1541_vm5, nan, %v1551_v58  ;;  %vm1555_vm0 = vcmp.lt.s32.totalorder %v15333_v6, 0  ;;  %v15334_v21 = vand.u32 2147483647, %v15333_v6 }
 0x301   : > { %5767 = vmatpush.msrb.mxu1 %v12147_v32  ;;  %v1674_v34 = vmul.f32 %v1673_v47, %v1671_v11  ;;  %v1678_v32 = vsel %vm1555_vm0, %v1677_v43, %v12185_v56  ;;  %v2937_v44 = vadd.s32 3, %v12061_v30  ;;  %v3092_v26 = vadd.s32 3, %v12082_v7 }
 0x302   : > { %v1807_v57 = vadd.s32 536870912, %v1806_v51  ;;  %vm1554_vm11 = vcmp.le.f32.partialorder %v15334_v21, 0.7853982  ;;  %v1802_v0 = vadd.s32 %v12291_v50, %v12285_v20  ;;  %vm1696_vm3 = vweird.f32 %v15333_v6 }
 0x303   : > { %5768 = vmatpush.msrb.mxu1 %v1552_v15  ;;  %v1675_v60 = vxor.u32 2147483648, %v1674_v34  ;;  %v1680_v40 = vsel %vm1554_vm11, 0, %v1678_v32  ;;  %v2938_v59 = vand.u32 3, %v2937_v44  ;;  %v3093_v35 = vand.u32 3, %v3092_v26  ;;  %v9169_v44 = vld [vmem:[%s14700_s2] sm:$0xff] }
 0x304   : > { %v12309_v53 = vshrl.u32 %v1807_v57, 30  ;;  %v1697_v62 = vadd.s32 3, %v1680_v40  ;;  %v4171_v54 = vand.u32 3, %v1680_v40 }
 0x305   : > { %v1676_v22 = vsel %vm1555_vm0, %v1675_v60, %v1674_v34  ;;  %vm2939_vm13 = vcmp.lt.s32.totalorder %v2938_v59, 2  ;;  %vm2940_vm14 = vcmp.eq.s32.totalorder %v2938_v59, 0  ;;  %vm2943_vm9 = vcmp.eq.s32.totalorder %v2938_v59, 2  ;;  %v8239_v59 = vld [vmem:[#allocation2] sm:$0x1] }
 0x306   : > { %v1809_v1 = vshll.u32 %v12309_v53, 30  ;;  %v1679_v13 = vsel %vm1554_vm11, %v15333_v6, %v1676_v22  ;;  %v1698_v63 = vand.u32 3, %v1697_v62  ;;  %vm4172_vm6 = vcmp.lt.s32.totalorder %v4171_v54, 2  ;;  %v7671_v62 = vld [vmem:[%s14706_s8 + $0x8] sm:$0xff] }
 0x307   : > { %v1681_v24 = vmul.f32 %v1679_v13, %v1679_v13  ;;  %vm4173_vm5 = vcmp.eq.s32.totalorder %v4171_v54, 0  ;;  %vm4176_vm1 = vcmp.eq.s32.totalorder %v4171_v54, 2  ;;  %vm3094_vm4 = vcmp.lt.s32.totalorder %v3093_v35, 2 }
 0x308   : > { %v1810_v16 = vsub.s32 %v1806_v51, %v1809_v1  ;;  %vm1700_vm10 = vcmp.eq.s32.totalorder %v1698_v63, 0  ;;  %vm1703_vm12 = vcmp.eq.s32.totalorder %v1698_v63, 2  ;;  %vm3095_vm0 = vcmp.eq.s32.totalorder %v3093_v35, 0 }
 0x309   : > { %v1682_v49 = vmul.f32 -0.001358992, %v1681_v24  ;;  %v1689_v46 = vmul.f32 -0.00019511016, %v1681_v24  ;;  %v2942_v11 = vsel %vm2940_vm14, %v12209_v25, %v2941_v14  ;;  %vm3098_vm11 = vcmp.eq.s32.totalorder %v3093_v35, 2  ;;  %v12349_v25 = vld [vmem:[%s14700_s2 + $0x18] sm:$0xff] }
 0x30a   : > { %vm1811_vm15 = vcmp.lt.s32.totalorder %v1810_v16, 0  ;;  %v1812_v33 = vsub.s32 0, %v1810_v16  ;;  %v3097_v34 = vsel %vm3095_vm0, %v12219_v48, %v3096_v27  ;;  %v3100_v15 = vsel %vm3098_vm11, %v3099_v38, %v12248_v61  ;;  %v6363_v61 = vld [vmem:[%s14703_s5] sm:$0xff] }
 0x30b   : > { %v1683_v8 = vadd.f32 0.041655596, %v1682_v49  ;;  %v1690_v41 = vadd.f32 0.008332121, %v1689_v46  ;;  %v2945_v60 = vsel %vm2943_vm9, %v2944_v18, %v12231_v45  ;;  %v3101_v1 = vsel %vm3094_vm4, %v3097_v34, %v3100_v15  ;;  %v6364_v18 = vld [vmem:[%s14703_s5 + $0x8] sm:$0xff]  ;;  %6369 = vperm.xlu1 %8781, %v6363_v61   ;;  %v12429_v15 = vpop.permute.xlu1 %5582 }
 0x30c   : > { %v1813_v19 = vsel %vm1811_vm15, %v1812_v33, %v1810_v16  ;;  %v2946_v32 = vsel %vm2939_vm13, %v2942_v11, %v2945_v60  ;;  %v12341_v27 = vsel %vm3091_vm2, nan, %v3101_v1  ;;  %vm1699_vm15 = vcmp.lt.s32.totalorder %v1698_v63, 2  ;;  %6374 = vperm.xlu0 %8780, %v6364_v18   ;;  %v12425_v11 = vpop.f32.mrf.mxu0  ;;  %v12431_v1 = vpop.permute.xlu0 %5592 }
 0x30d   : > { %v1814_v17 = vclz %v1813_v19  ;;  %v1684_v4 = vmul.f32 %v1683_v8, %v1681_v24  ;;  %v1691_v39 = vmul.f32 %v1690_v41, %v1681_v24  ;;  %vm15335_vm2 = vcmask 261120   ;;  %v7672_v8 = vld [vmem:[%s14706_s8 + $0x10] sm:$0xff] }
 0x30e   : > { %8621 = vmatmul.msk.f32.gmra.mxu0 %vm15335_vm2, %v12349_v25  ;;  %v1832_v46 = vsub.s32 4, %v12309_v53 }
 0x30f   : > { %v8544_v56 = vadd.s32 4294967294, %v1814_v17  ;;  %v1685_v36 = vadd.f32 -0.4999988, %v1684_v4  ;;  %v1692_v42 = vadd.f32 -0.16666654, %v1691_v39 }
 0x311   : > { %vm8545_vm8 = vcmp.lt.s32.totalorder %v8544_v56, 0  ;;  %v1686_v28 = vmul.f32 %v1685_v36, %v1681_v24  ;;  %v1693_v10 = vmul.f32 %v1692_v42, %v1681_v24  ;;  %v15338_v24 = vld [vmem:[#allocation74_spill] sm:$0xff] }
 0x312   : > { %v1817_v9 = vsel %vm8545_vm8, 0, %v8544_v56  ;;  %vm15336_vm8 = vmmov %vm15335_vm2  ;;  %v15340_v55 = vand.u32 2147483647, %v15338_v24 }
 0x313   : > { %v1818_v30 = vsub.s32 32, %v1817_v9  ;;  %v1822_v5 = vsub.s32 4294967266, %v1817_v9  ;;  %v1687_v7 = vadd.f32 1.0, %v1686_v28  ;;  %v1694_v3 = vadd.f32 1.0, %v1693_v10  ;;  %8625 = vmatmul.msk.f32.gmra.mxu1 %vm15336_vm8, %v12349_v25  ;;  %7681 = vperm.xlu1 %8781, %v7671_v62  }
 0x314   : > { %v1819_v52 = vshll.u32 %v1810_v16, %v1817_v9  ;;  %7686 = vperm.xlu0 %8780, %v7672_v8   ;;  %vm1851_vm8 = vweird.f32 %v15338_v24 }
 0x315   : > { %v1820_v29 = vshrl.u32 %v1802_v0, %v1818_v30  ;;  %v1823_v23 = vadd.s32 127, %v1822_v5  ;;  %v1695_v12 = vmul.f32 %v1694_v3, %v1679_v13  ;;  %v1704_v2 = vxor.u32 2147483648, %v1687_v7 }
 0x316   : > { %v2947_v13 = vsel %vm2936_vm7, nan, %v2946_v32  ;;  %vm12372_vm7 = vcmp.le.f32.partialorder %v15340_v55, 0.7853982 }
 0x317   : > { %v1821_v51 = vor.u32 %v1820_v29, %v1819_v52  ;;  %v1824_v20 = vshll.u32 %v1823_v23, 23  ;;  %v1701_v50 = vxor.u32 2147483648, %v1695_v12  ;;  %v4178_v58 = vsel %vm4176_vm1, %v1704_v2, %v1695_v12  ;;  %vm15339_vm1 = vmmov %vm15335_vm2 }
 0x318   : > { %v1705_v38 = vsel %vm1703_vm12, %v1704_v2, %v1695_v12  ;;  %8629 = vmatmul.msk.f32.gmra.mxu2 %vm15339_vm1, %v12349_v25  ;;  %vm15344_vm13 = vmmov %vm15339_vm1 }
 0x319   : > { %v1825_v47 = vor.u32 4788187, %v1824_v20  ;;  %v1828_v57 = vcvt.s32.f32 %v1821_v51  ;;  %v4175_v43 = vsel %vm4173_vm5, %v1687_v7, %v1701_v50  ;;  %v1702_v14 = vsel %vm1700_vm10, %v1687_v7, %v1701_v50  ;;  %vm15345_vm10 = vmmov %vm15339_vm1 }
 0x31a   : > { %v4179_v21 = vsel %vm4172_vm6, %v4175_v43, %v4178_v58  ;;  %v1706_v31 = vsel %vm1699_vm15, %v1702_v14, %v1705_v38  ;;  %vm15337_vm6 = vmmov %vm15335_vm2  ;;  %vm1710_vm5 = vcmp.lt.s32.totalorder %v15338_v24, 0  ;;  %v5628_v43 = vpop.f32.mrf.mxu0 }
 0x31b   : > { %v1826_v22 = vand.u32 2147483647, %v1825_v47  ;;  %v4180_v48 = vsel %vm1696_vm3, nan, %v4179_v21  ;;  %8633 = vmatmul.msk.f32.gmra.mxu3 %vm15337_vm6, %v12349_v25  ;;  %v1707_v33 = vsel %vm1696_vm3, nan, %v1706_v31  ;;  %vm15343_vm3 = vmmov %vm15339_vm1  ;;  %v1833_v4 = vsel %vm1710_vm5, %v1832_v46, %v12309_v53  ;;  %8638 = vmatmul.msk.f32.vlgmr.msrb.gmra.mxu1 %vm15344_vm13, %v9169_v44  ;;  %v9170_v53 = vld [vmem:[%s14700_s2 + $0x8] sm:$0xff]  ;;  %v12427_v47 = vpop.f32.mrf.mxu1 }
 0x31c   : > { %5795 = vmatpush.msrb.mxu2 %v4180_v48  ;;  %8634 = vmatmul.msk.f32.vlgmr.msrb.gmra.mxu0 %vm15343_vm3, %v9169_v44  ;;  %v1835_v56 = vsel %vm12372_vm7, 0, %v1833_v4  ;;  %vm15346_vm12 = vmmov %vm15339_vm1 }
 0x31d   : > { %v1829_v45 = vmul.f32 %v1828_v57, %v1826_v22  ;;  %v1852_v63 = vadd.s32 3, %v1835_v56  ;;  %vm15347_vm14 = vmmov %vm15339_vm1  ;;  %8242 = vperm.xlu0 %8780, %v8239_v59   ;;  %v4325_v5 = vand.u32 3, %v1835_v56  ;;  %v12434_v22 = vadd.f32 %v5628_v43, %v12429_v15 }
 0x31e   : > { %5796 = vmatpush.msrb.mxu2 %v2947_v13  ;;  %vm15348_vm9 = vmmov %vm15339_vm1 }
 0x31f   : > { %v1830_v16 = vxor.u32 2147483648, %v1829_v45  ;;  %v1853_v35 = vand.u32 3, %v1852_v63  ;;  %vm4327_vm4 = vcmp.eq.s32.totalorder %v4325_v5, 0  ;;  %vm4330_vm0 = vcmp.eq.s32.totalorder %v4325_v5, 2  ;;  %vm15349_vm2 = vmmov %vm15339_vm1 }
 0x320   : > { %5797 = vmatpush.msrb.mxu2 %v1707_v33  ;;  %vm4326_vm15 = vcmp.lt.s32.totalorder %v4325_v5, 2  ;;  %vm15352_vm3 = vmmov %vm15349_vm2  ;;  %v5683_v57 = vpop.f32.mrf.mxu2 }
 0x321   : > { %v1831_v49 = vsel %vm1710_vm5, %v1830_v16, %v1829_v45  ;;  %8642 = vmatmul.msk.f32.vlgmr.msrb.gmra.mxu2 %vm15345_vm10, %v9169_v44  ;;  %vm1855_vm11 = vcmp.eq.s32.totalorder %v1853_v35, 0  ;;  %vm1858_vm6 = vcmp.eq.s32.totalorder %v1853_v35, 2  ;;  %vm15350_vm5 = vmmov %vm15339_vm1  ;;  %vm1854_vm1 = vcmp.lt.s32.totalorder %v1853_v35, 2 }
 0x322   : > { %v1834_v6 = vsel %vm12372_vm7, %v15338_v24, %v1831_v49  ;;  %vm15351_vm7 = vmmov %vm15349_vm2  ;;  %v12450_v45 = vmul.f32 100.0, %v12434_v22 }
 0x323   : > { %v1836_v19 = vmul.f32 %v1834_v6, %v1834_v6  ;;  %8639 = vmatmul.msk.f32.gmra.mxu1 %vm15347_vm14, %v9170_v53  ;;  %vm15353_vm13 = vmmov %vm15349_vm2  ;;  %v5657_v60 = vpop.f32.mrf.mxu1 }
 0x324   : > { %8635 = vmatmul.msk.f32.gmra.mxu0 %vm15346_vm12, %v9170_v53  ;;  %vm15354_vm10 = vmmov %vm15349_vm2  ;;  %v12439_v32 = vadd.f32 %v5657_v60, %v12429_v15  ;;  %v5880_v40 = vmin.f32 %v12450_v45, 20.0 }
 0x325   : > { %v1837_v41 = vmul.f32 -0.001358992, %v1836_v19  ;;  %v1844_v17 = vmul.f32 -0.00019511016, %v1836_v19  ;;  %vm15355_vm12 = vmmov %vm15349_vm2 }
 0x326   : > { %vm15356_vm14 = vmmov %vm15349_vm2  ;;  %v12453_v31 = vmul.f32 100.0, %v12439_v32 }
 0x327   : > { %v1838_v39 = vadd.f32 0.041655596, %v1837_v41  ;;  %v1845_v54 = vadd.f32 0.008332121, %v1844_v17 }
 0x328   : > { %v5686_v14 = vpop.f32.mrf.mxu2  ;;  %v5881_v46 = vmin.f32 %v12453_v31, 20.0 }
 0x329   : > { %v1839_v26 = vmul.f32 %v1838_v39, %v1836_v19  ;;  %v1846_v36 = vmul.f32 %v1845_v54, %v1836_v19  ;;  %8643 = vmatmul.msk.f32.gmra.mxu2 %vm15348_vm9, %v9170_v53  ;;  %vm15357_vm9 = vmmov %vm15349_vm2  ;;  %v12468_v33 = vadd.f32 %v5686_v14, %v12429_v15  ;;  %v5952_v54 = vmul.f32 1.442695, %v5880_v40 }
 0x32b   : > { %v1840_v42 = vadd.f32 -0.4999988, %v1839_v26  ;;  %v1847_v9 = vadd.f32 -0.16666654, %v1846_v36  ;;  %8640 = vmatmul.msk.f32.gmra.mxu1 %vm15350_vm5, %v12162_v37  ;;  %15363 = vst [vmem:[#allocation15_spill] sm:$0xff] %v12468_v33  ;;  %8783 = vpow2.f32 %v5952_v54 }
 0x32c   : > { %8636 = vmatmul.msk.f32.gmra.mxu0 %vm15349_vm2, %v12162_v37 }
 0x32d   : > { %v1841_v28 = vmul.f32 %v1840_v42, %v1836_v19  ;;  %v1848_v10 = vmul.f32 %v1847_v9, %v1836_v19  ;;  %v5954_v42 = vmul.f32 1.442695, %v5881_v46 }
 0x32f   : > { %v1842_v0 = vadd.f32 1.0, %v1841_v28  ;;  %v1849_v30 = vadd.f32 1.0, %v1848_v10  ;;  %8785 = vpow2.f32 %v5954_v42 }
 0x331   : > { %v1850_v7 = vmul.f32 %v1849_v30, %v1834_v6  ;;  %v1859_v3 = vxor.u32 2147483648, %v1842_v0  ;;  %8644 = vmatmul.msk.f32.gmra.mxu2 %vm15351_vm7, %v12162_v37 }
 0x333   : > { %v1856_v52 = vxor.u32 2147483648, %v1850_v7  ;;  %v4332_v23 = vsel %vm4330_vm0, %v1859_v3, %v1850_v7  ;;  %v1860_v20 = vsel %vm1858_vm6, %v1859_v3, %v1850_v7  ;;  %8641 = vmatmul.msk.f32.gmra.mxu1 %vm15354_vm10, %v12349_v25 }
 0x334   : > { %8637 = vmatmul.msk.f32.gmra.mxu0 %vm15353_vm13, %v12349_v25  ;;  %vm5912_vm13 = vcmp.gt.f32.partialorder %v12450_v45, 20.0 }
 0x335   : > { %v4329_v29 = vsel %vm4327_vm4, %v1842_v0, %v1856_v52  ;;  %v1857_v12 = vsel %vm1855_vm11, %v1842_v0, %v1856_v52  ;;  %vm15358_vm4 = vmmov %vm15349_vm2 }
 0x336   : > { %v4333_v2 = vsel %vm4326_vm15, %v4329_v29, %v4332_v23  ;;  %v1861_v50 = vsel %vm1854_vm1, %v1857_v12, %v1860_v20 }
 0x337   : > { %v4334_v51 = vsel %vm1851_vm8, nan, %v4333_v2  ;;  %v1862_v58 = vsel %vm1851_vm8, nan, %v1861_v50  ;;  %v5712_v34 = vpop.f32.mrf.mxu3 }
 0x338   : > { %5824 = vmatpush.msrb.mxu3 %v4334_v51 }
 0x339   : > { %8645 = vmatmul.msk.f32.gmra.mxu2 %vm15355_vm12, %v12349_v25  ;;  %vm5913_vm12 = vcmp.gt.f32.partialorder %v12453_v31, 20.0 }
 0x33a   : > { %5825 = vmatpush.msrb.mxu3 %v12341_v27 }
 0x33c   : > { %5826 = vmatpush.msrb.mxu3 %v1862_v58 }
 0x33d   : > { %8646 = vmatmul.msk.f32.vlgmr.msrb.gmra.mxu3 %vm15352_vm3, %v9169_v44  ;;  %v12484_v44 = vmul.f32 100.0, %v12468_v33 }
 0x33f   : > { %v5715_v21 = vpop.f32.mrf.mxu3  ;;  %15365 = vst [vmem:[#allocation17_spill] sm:$0xff] %v12484_v44  ;;  %v5882_v0 = vmin.f32 %v12484_v44, 20.0 }
 0x340   : > { %v12471_v55 = vadd.f32 %v5715_v21, %v12429_v15 }
 0x341   : > { %v5956_v23 = vmul.f32 1.442695, %v5882_v0 }
 0x342   : > { %15364 = vst [vmem:[#allocation13_spill] sm:$0xff] %v12471_v55  ;;  %v12487_v62 = vmul.f32 100.0, %v12471_v55 }
 0x344   : > { %15366 = vst [vmem:[#allocation19_spill] sm:$0xff] %v12487_v62  ;;  %v5883_v30 = vmin.f32 %v12487_v62, 20.0 }
 0x345   : > { %8647 = vmatmul.msk.f32.gmra.mxu3 %vm15356_vm14, %v9170_v53 }
 0x346   : > { %v5958_v12 = vmul.f32 1.442695, %v5883_v30 }
 0x34c   : > { %v12447_v18 = vpop.permute.xlu0 %5587 }
 0x34d   : > { %8648 = vmatmul.msk.f32.gmra.mxu3 %vm15357_vm9, %v12162_v37 }
 0x351   : > { %v12436_v37 = vpop.permute.xlu1 %5577 }
 0x352   : > { %v12442_v48 = vadd.f32 %v5683_v57, %v12436_v37  ;;  %v12528_v60 = vadd.f32 %v12425_v11, %v12436_v37  ;;  %v12544_v11 = vadd.f32 %v12427_v47, %v12436_v37 }
 0x354   : > { %15359 = vst [vmem:[#allocation18_spill] sm:$0xff] %v12442_v48  ;;  %v12459_v13 = vmul.f32 100.0, %v12442_v48  ;;  %v12561_v47 = vmul.f32 100.0, %v12528_v60  ;;  %v12568_v0 = vmul.f32 100.0, %v12544_v11 }
 0x355   : > { %8649 = vmatmul.msk.f32.gmra.mxu3 %vm15358_vm4, %v12349_v25  ;;  %v12445_v25 = vadd.f32 %v5712_v34, %v12436_v37 }
 0x356   : > { %15361 = vst [vmem:[#allocation21_spill] sm:$0xff] %v12459_v13  ;;  %v5874_v8 = vmin.f32 %v12459_v13, 20.0  ;;  %vm5904_vm9 = vcmp.gt.f32.partialorder %v12561_v47, 20.0  ;;  %vm5905_vm4 = vcmp.gt.f32.partialorder %v12568_v0, 20.0 }
 0x357   : > { %15360 = vst [vmem:[#allocation8_spill] sm:$0xff] %v12445_v25  ;;  %v12465_v24 = vmul.f32 100.0, %v12445_v25 }
 0x358   : > { %v5940_v63 = vmul.f32 1.442695, %v5874_v8 }
 0x359   : > { %15362 = vst [vmem:[#allocation14_spill] sm:$0xff] %v12465_v24  ;;  %v5875_v17 = vmin.f32 %v12465_v24, 20.0 }
 0x35a   : > { %8787 = vpow2.f32 %v5940_v63 }
 0x35b   : > { %v5942_v53 = vmul.f32 1.442695, %v5875_v17 }
 0x35d   : > { %8789 = vpow2.f32 %v5942_v53 }
 0x360   : > { %v5660_v38 = vpop.f32.mrf.mxu1 }
 0x361   : > { %v5631_v27 = vpop.f32.mrf.mxu0  ;;  %v12462_v16 = vadd.f32 %v5660_v38, %v12447_v18  ;;  %v12537_v38 = vpop.eup %8783 }
 0x362   : > { %v12456_v61 = vadd.f32 %v5631_v27, %v12447_v18  ;;  %v12546_v46 = vpop.eup %8785 }
 0x363   : > { %v12480_v41 = vmul.f32 100.0, %v12462_v16  ;;  %v12557_v54 = vpop.eup %8787 }
 0x364   : > { %v12476_v6 = vmul.f32 100.0, %v12456_v61  ;;  %15374 = vst [vmem:[#allocation6_spill] sm:$0xff] %v12557_v54 }
 0x365   : > { %v5889_v28 = vmin.f32 %v12480_v41, 20.0  ;;  %vm5921_vm1 = vcmp.gt.f32.partialorder %v12480_v41, 20.0 }
 0x366   : > { %v5888_v9 = vmin.f32 %v12476_v6, 20.0  ;;  %vm5920_vm5 = vcmp.gt.f32.partialorder %v12476_v6, 20.0  ;;  %v6087_v6 = vand.u32 2147483647, %v12546_v46 }
 0x367   : > { %v5970_v52 = vmul.f32 1.442695, %v5889_v28 }
 0x368   : > { %v5689_v49 = vpop.f32.mrf.mxu2  ;;  %v5968_v7 = vmul.f32 1.442695, %v5888_v9  ;;  %v12563_v9 = vpop.eup %8789  ;;  %vm12761_vm10 = vcmp.lt.f32.partialorder %v6087_v6, 0.0004427343 }
 0x369   : > { %v5718_v19 = vpop.f32.mrf.mxu3  ;;  %v12490_v39 = vadd.f32 %v5689_v49, %v12447_v18  ;;  %15375 = vst [vmem:[#allocation10_spill] sm:$0xff] %v12563_v9 }
 0x36a   : > { %v12496_v36 = vadd.f32 %v5718_v19, %v12447_v18  ;;  %8791 = vpow2.f32 %v5968_v7 }
 0x36b   : > { %15367 = vst [vmem:[#allocation26_spill] sm:$0xff] %v12490_v39  ;;  %v12509_v5 = vmul.f32 100.0, %v12490_v39  ;;  %8793 = vpow2.f32 %v5970_v52 }
 0x36c   : > { %15368 = vst [vmem:[#allocation23_spill] sm:$0xff] %v12496_v36  ;;  %v12512_v35 = vmul.f32 100.0, %v12496_v36  ;;  %8795 = vpow2.f32 %v5956_v23 }
 0x36d   : > { %v5890_v2 = vmin.f32 %v12509_v5, 20.0  ;;  %8797 = vpow2.f32 %v5958_v12 }
 0x36e   : > { %15369 = vst [vmem:[#allocation11_spill] sm:$0xff] %v12512_v35  ;;  %v5891_v50 = vmin.f32 %v12512_v35, 20.0 }
 0x36f   : > { %v5972_v19 = vmul.f32 1.442695, %v5890_v2 }
 0x370   : > { %v12570_v30 = vpop.eup %8791 }
 0x371   : > { %v12573_v23 = vpop.eup %8793 }
 0x38b   : > { %v5634_v4 = vpop.f32.mrf.mxu0 }
 0x38c   : > { %v12493_v56 = vadd.f32 %v5634_v4, %v12431_v1 }
 0x38e   : > { %v12504_v10 = vmul.f32 100.0, %v12493_v56 }
 0x390   : > { %v5663_v26 = vpop.f32.mrf.mxu1  ;;  %v5896_v29 = vmin.f32 %v12504_v10, 20.0  ;;  %vm5928_vm0 = vcmp.gt.f32.partialorder %v12504_v10, 20.0 }
 0x391   : > { %v12500_v59 = vadd.f32 %v5663_v26, %v12431_v1  ;;  %v5974_v26 = vmul.f32 1.442695, %v5891_v50 }
 0x392   : > { %v5984_v40 = vmul.f32 1.442695, %v5896_v29 }
 0x393   : > { %v12515_v3 = vmul.f32 100.0, %v12500_v59 }
 0x394   : > { %8799 = vpow2.f32 %v5984_v40 }
 0x395   : > { %v5897_v14 = vmin.f32 %v12515_v3, 20.0  ;;  %8801 = vpow2.f32 %v5972_v19  ;;  %vm5929_vm8 = vcmp.gt.f32.partialorder %v12515_v3, 20.0  ;;  %v6072_v3 = vadd.f32 1.0, %v12537_v38 }
 0x396   : > { %8803 = vpow2.f32 %v5974_v26  ;;  %v5873_v26 = vmin.f32 %v12568_v0, 20.0 }
 0x397   : > { %v5986_v63 = vmul.f32 1.442695, %v5897_v14  ;;  %v12585_v14 = vpop.eup %8795 }
 0x398   : > { %v5770_v57 = vpop.f32.mrf.mxu1 }
 0x399   : > { %v5741_v51 = vpop.f32.mrf.mxu0  ;;  %v12532_v21 = vadd.f32 %v5770_v57, %v12436_v37  ;;  %8805 = vpow2.f32 %v5986_v63 }
 0x39a   : > { %v12521_v58 = vadd.f32 %v5741_v51, %v12436_v37 }
 0x39b   : > { %v5692_v34 = vpop.f32.mrf.mxu2  ;;  %15371 = vst [vmem:[#allocation24_spill] sm:$0xff] %v12532_v21  ;;  %v12549_v8 = vmul.f32 100.0, %v12532_v21 }
 0x39c   : > { %15370 = vst [vmem:[#allocation29_spill] sm:$0xff] %v12521_v58  ;;  %v12535_v27 = vadd.f32 %v5692_v34, %v12431_v1  ;;  %v12540_v49 = vmul.f32 100.0, %v12521_v58 }
 0x39d   : > { %15373 = vst [vmem:[#allocation25_spill] sm:$0xff] %v12549_v8  ;;  %v5877_v28 = vmin.f32 %v12549_v8, 20.0 }
 0x39e   : > { %v5721_v20 = vpop.f32.mrf.mxu3  ;;  %15372 = vst [vmem:[#allocation22_spill] sm:$0xff] %v12540_v49  ;;  %v12552_v17 = vmul.f32 100.0, %v12535_v27  ;;  %v5876_v42 = vmin.f32 %v12540_v49, 20.0 }
 0x39f   : > { %v12524_v43 = vadd.f32 %v5721_v20, %v12431_v1  ;;  %v5872_v20 = vmin.f32 %v12561_v47, 20.0  ;;  %v5946_v50 = vmul.f32 1.442695, %v5877_v28 }
 0x3a0   : > { %v5898_v53 = vmin.f32 %v12552_v17, 20.0  ;;  %v5944_v7 = vmul.f32 1.442695, %v5876_v42  ;;  %v5773_v2 = vpop.f32.mrf.mxu1  ;;  %v12591_v42 = vpop.eup %8797 }
 0x3a1   : > { %v12555_v4 = vmul.f32 100.0, %v12524_v43  ;;  %v5744_v29 = vpop.f32.mrf.mxu0  ;;  %v12580_v57 = vadd.f32 %v5773_v2, %v12429_v15  ;;  %15380 = vst [vmem:[#allocation7_spill] sm:$0xff] %v12591_v42  ;;  %v12596_v28 = vpop.eup %8799  ;;  %v5936_v21 = vmul.f32 1.442695, %v5872_v20 }
 0x3a2   : > { %v12576_v12 = vadd.f32 %v5744_v29, %v12429_v15  ;;  %v5988_v40 = vmul.f32 1.442695, %v5898_v53  ;;  %8807 = vpow2.f32 %v5944_v7  ;;  %v9186_v53 = vmov 100.0   ;;  %v12602_v8 = vpop.eup %8801 }
 0x3a3   : > { %v5899_v52 = vmin.f32 %v12555_v4, 20.0  ;;  %15377 = vst [vmem:[#allocation91_spill] sm:$0xff] %v12580_v57  ;;  %v12594_v63 = vmul.f32 100.0, %v12580_v57  ;;  %8809 = vrcp.f32 %v9186_v53  ;;  %v12605_v7 = vpop.eup %8803  ;;  %v6165_v47 = vmul.f32 -0.5, %v12602_v8 }
 0x3a4   : > { %15376 = vst [vmem:[#allocation3_spill] sm:$0xff] %v12576_v12  ;;  %v5799_v51 = vpop.f32.mrf.mxu2  ;;  %v12588_v19 = vmul.f32 100.0, %v12576_v12  ;;  %8811 = vpow2.f32 %v5946_v50  ;;  %v12607_v49 = vpop.eup %8805  ;;  %v6216_v12 = vadd.f32 1.0, %v12596_v28 }
 0x3a5   : > { %v12583_v34 = vadd.f32 %v5799_v51, %v12436_v37  ;;  %v5990_v29 = vmul.f32 1.442695, %v5899_v52  ;;  %15381 = vst [vmem:[#allocation16_spill] sm:$0xff] %v12594_v63  ;;  %v5885_v58 = vmin.f32 %v12594_v63, 20.0  ;;  %8813 = vpow2.f32 %v5988_v40 }
 0x3a6   : > { %15379 = vst [vmem:[#allocation68_spill] sm:$0xff] %v12588_v19  ;;  %v5884_v2 = vmin.f32 %v12588_v19, 20.0  ;;  %v5938_v52 = vmul.f32 1.442695, %v5873_v26  ;;  %v6225_v48 = vadd.f32 1.0, %v12607_v49 }
 0x3a7   : > { %15378 = vst [vmem:[#allocation98_spill] sm:$0xff] %v12583_v34  ;;  %v12600_v51 = vmul.f32 100.0, %v12583_v34  ;;  %8815 = vpow2.f32 %v5990_v29  ;;  %v5962_v25 = vmul.f32 1.442695, %v5885_v58  ;;  %v6219_v29 = vmul.f32 -0.5, %v12596_v28 }
 0x3a8   : > { %v5960_v34 = vmul.f32 1.442695, %v5884_v2  ;;  %v5776_v53 = vpop.f32.mrf.mxu1  ;;  %8817 = vpow2.f32 %v5936_v21  ;;  %v12614_v63 = vpop.eup %8807 }
 0x3a9   : > { %15382 = vst [vmem:[#allocation97_spill] sm:$0xff] %v12600_v51  ;;  %v5747_v57 = vpop.f32.mrf.mxu0  ;;  %v5878_v19 = vmin.f32 %v12600_v51, 20.0  ;;  %v12617_v40 = vadd.f32 %v5776_v53, %v12447_v18  ;;  %v8810_v2 = vpop.eup %8809  ;;  %8819 = vpow2.f32 %v5938_v52 }
 0x3aa   : > { %v12612_v20 = vadd.f32 %v5747_v57, %v12447_v18  ;;  %15384 = vst [vmem:[#allocation34_spill] sm:$0xff] %v12614_v63  ;;  %v6222_v57 = vand.u32 2147483647, %v12596_v28  ;;  %v12628_v21 = vpop.eup %8811  ;;  %8821 = vlog2.f32 %v6216_v12  ;;  %vm6293_vm15 = vweird.f32 %v8810_v2 }
 0x3ab   : > { %15385 = vst [vmem:[#allocation44_spill] sm:$0xff] %v12617_v40  ;;  %v12631_v58 = vmul.f32 100.0, %v12617_v40  ;;  %v12636_v63 = vpop.eup %8813  ;;  %v5948_v24 = vmul.f32 1.442695, %v5878_v19  ;;  %8823 = vlog2.f32 %v6225_v48 }
 0x3ac   : > { %15383 = vst [vmem:[#allocation4_spill] sm:$0xff] %v12612_v20  ;;  %v5802_v50 = vpop.f32.mrf.mxu2  ;;  %v12624_v51 = vmul.f32 100.0, %v12612_v20  ;;  %v6228_v20 = vmul.f32 -0.5, %v12607_v49  ;;  %8825 = vpow2.f32 %v5960_v34  ;;  %vm12647_vm11 = vcmp.lt.f32.partialorder %v6222_v57, 0.0004427343 }
 0x3ad   : > { %v12620_v26 = vadd.f32 %v5802_v50, %v12429_v15  ;;  %15388 = vst [vmem:[#allocation28_spill] sm:$0xff] %v12628_v21  ;;  %v6289_v50 = vmul.f32 100.0, %v8810_v2  ;;  %v12639_v13 = vpop.eup %8815  ;;  %v5893_v21 = vmin.f32 %v12631_v58, 20.0  ;;  %8827 = vpow2.f32 %v5962_v25 }
 0x3ae   : > { %15387 = vst [vmem:[#allocation48_spill] sm:$0xff] %v12624_v51  ;;  %v5892_v52 = vmin.f32 %v12624_v51, 20.0  ;;  %v12643_v55 = vpop.eup %8817  ;;  %v6229_v33 = vadd.f32 1.0, %v6228_v20  ;;  %v6231_v34 = vand.u32 2147483647, %v12607_v49  ;;  %8829 = vpow2.f32 %v5948_v24 }
 0x3af   : > { %15386 = vst [vmem:[#allocation43_spill] sm:$0xff] %v12620_v26  ;;  %v12634_v53 = vmul.f32 100.0, %v12620_v26  ;;  %v6290_v40 = vsub.f32 1.0, %v6289_v50  ;;  %v6220_v26 = vadd.f32 1.0, %v6219_v29  ;;  %v12653_v50 = vpop.eup %8819  ;;  %v6147_v29 = vmul.f32 -0.5, %v12570_v30 }
 0x3b0   : > { %15389 = vst [vmem:[#allocation33_spill] sm:$0xff] %v12631_v58  ;;  %v6144_v58 = vadd.f32 1.0, %v12570_v30  ;;  %v8822_v57 = vpop.eup %8821  ;;  %v5976_v36 = vmul.f32 1.442695, %v5892_v52  ;;  %v5978_v62 = vmul.f32 1.442695, %v5893_v21  ;;  %v6230_v42 = vmul.f32 %v12607_v49, %v6229_v33 }
 0x3b1   : > { %15390 = vst [vmem:[#allocation46_spill] sm:$0xff] %v12634_v53  ;;  %v5886_v12 = vmin.f32 %v12634_v53, 20.0  ;;  %v6291_v19 = vmul.f32 %v8810_v2, %v6290_v40  ;;  %v5750_v51 = vpop.f32.mrf.mxu0  ;;  %v5779_v53 = vpop.f32.mrf.mxu1  ;;  %v6218_v54 = vmul.f32 0.6931472, %v8822_v57  ;;  %v6221_v44 = vmul.f32 %v12596_v28, %v6220_v26 }
 0x3b2   : > { %v12656_v25 = vadd.f32 %v5750_v51, %v12431_v1  ;;  %v12660_v20 = vadd.f32 %v5779_v53, %v12431_v1  ;;  %v8824_v9 = vpop.eup %8823  ;;  %vm6232_vm2 = vcmp.lt.f32.partialorder %v6231_v34, 0.0004427343  ;;  %8831 = vlog2.f32 %v6144_v58 }
 0x3b3   : > { %v6292_v40 = vadd.f32 %v8810_v2, %v6291_v19  ;;  %v5964_v39 = vmul.f32 1.442695, %v5886_v12  ;;  %v12666_v51 = vpop.eup %8825  ;;  %v6227_v35 = vmul.f32 0.6931472, %v8824_v9  ;;  %v6224_v53 = vsel %vm12647_vm11, %v6221_v44, %v6218_v54 }
 0x3b4   : > { %v12664_v24 = vmul.f32 100.0, %v12656_v25  ;;  %v12669_v21 = vpop.eup %8827  ;;  %v6148_v12 = vadd.f32 1.0, %v6147_v29  ;;  %v6150_v28 = vand.u32 2147483647, %v12570_v30  ;;  %v12680_v33 = vmul.f32 100.0, %v12660_v20  ;;  %v5805_v29 = vpop.f32.mrf.mxu2 }
 0x3b5   : > { %v12674_v52 = vsel %vm6293_vm15, %v8810_v2, %v6292_v40  ;;  %v6233_v57 = vsel %vm6232_vm2, %v6230_v42, %v6227_v35  ;;  %v12682_v49 = vpop.eup %8829  ;;  %8833 = vpow2.f32 %v5976_v36  ;;  %v6153_v54 = vadd.f32 1.0, %v12573_v23 }
 0x3b6   : > { %v6319_v19 = vmul.f32 %v12674_v52, %v6224_v53  ;;  %v5900_v9 = vmin.f32 %v12664_v24, 20.0  ;;  %v6320_v44 = vmul.f32 %v12674_v52, %v6233_v57  ;;  %8835 = vpow2.f32 %v5978_v62 }
 0x3b7   : > { %v6156_v42 = vmul.f32 -0.5, %v12573_v23  ;;  %8837 = vpow2.f32 %v5964_v39  ;;  %vm12696_vm6 = vcmp.lt.f32.partialorder %v6150_v28, 0.0004427343  ;;  %v5901_v10 = vmin.f32 %v12680_v33, 20.0 }
 0x3b8   : > { %v6351_v35 = vsel %vm5928_vm0, %v12493_v56, %v6319_v19  ;;  %v6352_v2 = vsel %vm5929_vm8, %v12500_v59, %v6320_v44  ;;  %v8832_v48 = vpop.eup %8831  ;;  %v5992_v62 = vmul.f32 1.442695, %v5900_v9  ;;  %v6159_v56 = vand.u32 2147483647, %v12573_v23 }
 0x3b9   : > { %6411 = vmatpush.msra.mxu0 %v6351_v35  ;;  %6440 = vmatpush.msra.mxu1 %v6352_v2  ;;  %v6146_v34 = vmul.f32 0.6931472, %v8832_v48  ;;  %8839 = vlog2.f32 %v6153_v54  ;;  %v6075_v59 = vmul.f32 -0.5, %v12537_v38  ;;  %v6078_v28 = vand.u32 2147483647, %v12537_v38 }
 0x3ba   : > { %8841 = vlog2.f32 %v6072_v3  ;;  %v5994_v9 = vmul.f32 1.442695, %v5901_v10  ;;  %v6084_v54 = vmul.f32 -0.5, %v12546_v46  ;;  %vm12722_vm7 = vcmp.lt.f32.partialorder %v6159_v56, 0.0004427343 }
 0x3bb   : > { %v12708_v40 = vpop.eup %8833  ;;  %8843 = vpow2.f32 %v5992_v62  ;;  %vm12737_vm3 = vcmp.lt.f32.partialorder %v6078_v28, 0.0004427343  ;;  %vm15405_vm11 = vcmask 261120   ;;  %vm5930_vm15 = vcmp.gt.f32.partialorder %v12552_v17, 20.0 }
 0x3bc   : > { %v12714_v19 = vpop.eup %8835  ;;  %vm5931_vm8 = vcmp.gt.f32.partialorder %v12555_v4, 20.0  ;;  %v15411_v4 = vld [vmem:[#allocation11_spill] sm:$0xff] }
 0x3bd   : > { %v12719_v35 = vpop.eup %8837 }
 0x3bf   : > { %v8840_v3 = vpop.eup %8839 }
 0x3c0   : > { %v5828_v26 = vpop.f32.mrf.mxu3 }
 0x3c1   : > { %v12685_v58 = vadd.f32 %v5828_v26, %v12436_v37  ;;  %v6149_v37 = vmul.f32 %v12570_v30, %v6148_v12  ;;  %v6157_v30 = vadd.f32 1.0, %v6156_v42  ;;  %v6076_v12 = vadd.f32 1.0, %v6075_v59 }
 0x3c2   : > { %v6081_v26 = vadd.f32 1.0, %v12546_v46  ;;  %v6000_v59 = vadd.f32 1.0, %v12643_v55 }
 0x3c3   : > { %v12704_v39 = vmul.f32 100.0, %v12685_v58  ;;  %v6152_v53 = vsel %vm12696_vm6, %v6149_v37, %v6146_v34  ;;  %v12727_v37 = vadd.f32 %v5805_v29, %v12447_v18  ;;  %v6158_v10 = vmul.f32 %v12573_v23, %v6157_v30 }
 0x3c4   : > { %v6311_v44 = vmul.f32 %v12674_v52, %v6152_v53  ;;  %8845 = vlog2.f32 %v6081_v26  ;;  %v6077_v62 = vmul.f32 %v12537_v38, %v6076_v12  ;;  %v6085_v34 = vadd.f32 1.0, %v6084_v54 }
 0x3c5   : > { %v5879_v42 = vmin.f32 %v12704_v39, 20.0  ;;  %8847 = vpow2.f32 %v5994_v9  ;;  %v6155_v29 = vmul.f32 0.6931472, %v8840_v3  ;;  %v12746_v30 = vmul.f32 100.0, %v12727_v37 }
 0x3c6   : > { %v6343_v48 = vsel %vm5920_vm5, %v12456_v61, %v6311_v44  ;;  %v6003_v61 = vmul.f32 -0.5, %v12643_v55  ;;  %8849 = vlog2.f32 %v6000_v59  ;;  %v6086_v44 = vmul.f32 %v12546_v46, %v6085_v34  ;;  %vm15408_vm5 = vmmov %vm15405_vm11 }
 0x3c7   : > { %6412 = vmatpush.msra.mxu0 %v6343_v48  ;;  %v5950_v38 = vmul.f32 1.442695, %v5879_v42  ;;  %v6161_v12 = vsel %vm12722_vm7, %v6158_v10, %v6155_v29  ;;  %v6006_v54 = vand.u32 2147483647, %v12643_v55  ;;  %v6009_v10 = vadd.f32 1.0, %v12653_v50 }
 0x3c8   : > { %v5831_v57 = vpop.f32.mrf.mxu3  ;;  %v6004_v28 = vadd.f32 1.0, %v6003_v61  ;;  %v6012_v59 = vmul.f32 -0.5, %v12653_v50  ;;  %v5894_v46 = vmin.f32 %v12746_v30, 20.0  ;;  %vm5922_vm7 = vcmp.gt.f32.partialorder %v12509_v5, 20.0  ;;  %v15419_v5 = vld [vmem:[#allocation19_spill] sm:$0xff] }
 0x3c9   : > { %v12730_v36 = vadd.f32 %v5831_v57, %v12429_v15  ;;  %v8842_v15 = vpop.eup %8841  ;;  %v6312_v57 = vmul.f32 %v12674_v52, %v6161_v12  ;;  %8851 = vpow2.f32 %v5950_v38  ;;  %vm12784_vm14 = vcmp.lt.f32.partialorder %v6006_v54, 0.0004427343 }
 0x3ca   : > { %v6074_v23 = vmul.f32 0.6931472, %v8842_v15  ;;  %v12753_v26 = vpop.eup %8843  ;;  %v6005_v6 = vmul.f32 %v12643_v55, %v6004_v28  ;;  %8853 = vlog2.f32 %v6009_v10  ;;  %v6015_v38 = vand.u32 2147483647, %v12653_v50  ;;  %v12816_v10 = vld [vmem:[%s14702_s4] sm:$0xff] }
 0x3cb   : > { %v12749_v53 = vmul.f32 100.0, %v12730_v36  ;;  %v8846_v48 = vpop.eup %8845  ;;  %v5980_v12 = vmul.f32 1.442695, %v5894_v46  ;;  %v6234_v28 = vadd.f32 1.0, %v12636_v63  ;;  %v6243_v54 = vadd.f32 1.0, %v12639_v13 }
 0x3cc   : > { %v6080_v9 = vsel %vm12737_vm3, %v6077_v62, %v6074_v23  ;;  %v6344_v62 = vsel %vm5921_vm1, %v12462_v16, %v6312_v57  ;;  %v6083_v56 = vmul.f32 0.6931472, %v8846_v48  ;;  %v12774_v15 = vpop.eup %8847  ;;  %v5808_v48 = vpop.f32.mrf.mxu2  ;;  %vm12809_vm0 = vcmp.lt.f32.partialorder %v6015_v38, 0.0004427343  ;;  %vm15409_vm1 = vmmov %vm15408_vm5 }
 0x3cd   : > { %v6303_v42 = vmul.f32 %v12674_v52, %v6080_v9  ;;  %6441 = vmatpush.msra.mxu1 %v6344_v62  ;;  %v8850_v41 = vpop.eup %8849  ;;  %v5887_v16 = vmin.f32 %v12749_v53, 20.0  ;;  %8855 = vlog2.f32 %v6234_v28 }
 0x3ce   : > { %v6002_v45 = vmul.f32 0.6931472, %v8850_v41  ;;  %8857 = vlog2.f32 %v6243_v54 }
 0x3cf   : > { %v6335_v29 = vsel %vm5912_vm13, %v12434_v22, %v6303_v42  ;;  %v6013_v22 = vadd.f32 1.0, %v6012_v59  ;;  %v12802_v42 = vmul.f32 1.442695, %v5887_v16  ;;  %v6246_v59 = vmul.f32 -0.5, %v12639_v13 }
 0x3d0   : > { %v5834_v2 = vpop.f32.mrf.mxu3  ;;  %6413 = vmatpush.msra.mxu0 %v6335_v29  ;;  %v6008_v9 = vsel %vm12784_vm14, %v6005_v6, %v6002_v45  ;;  %v6240_v29 = vand.u32 2147483647, %v12636_v63  ;;  %v12825_v6 = vadd.f32 %v5808_v48, %v12431_v1  ;;  %8859 = vpow2.f32 %v5980_v12  ;;  %vm15417_vm14 = vmmov %vm15409_vm1 }
 0x3d1   : > { %v12772_v34 = vadd.f32 %v5834_v2, %v12447_v18  ;;  %v6089_v18 = vsel %vm12761_vm10, %v6086_v44, %v6083_v56  ;;  %v6237_v44 = vmul.f32 -0.5, %v12636_v63  ;;  %v6295_v3 = vmul.f32 %v12674_v52, %v6008_v9  ;;  %v12806_v2 = vpop.eup %8851 }
 0x3d2   : > { %v6304_v23 = vmul.f32 %v12674_v52, %v6089_v18  ;;  %v8854_v56 = vpop.eup %8853  ;;  %v6247_v61 = vadd.f32 1.0, %v6246_v59  ;;  %vm12845_vm2 = vcmp.lt.f32.partialorder %v6240_v29, 0.0004427343  ;;  %vm5923_vm13 = vcmp.gt.f32.partialorder %v15411_v4, 20.0  ;;  %v15424_v4 = vld [vmem:[#allocation15_spill] sm:$0xff] }
 0x3d3   : > { %v12791_v55 = vmul.f32 100.0, %v12772_v34  ;;  %v6011_v41 = vmul.f32 0.6931472, %v8854_v56  ;;  %v6238_v16 = vadd.f32 1.0, %v6237_v44  ;;  %v8856_v38 = vpop.eup %8855 }
 0x3d4   : > { %v6336_v57 = vsel %vm5913_vm12, %v12439_v32, %v6304_v23  ;;  %v6014_v32 = vmul.f32 %v12653_v50, %v6013_v22  ;;  %v6327_v50 = vsel %vm5904_vm9, %v12528_v60, %v6295_v3  ;;  %v12833_v23 = vmul.f32 100.0, %v12825_v6  ;;  %v8858_v9 = vpop.eup %8857 }
 0x3d5   : > { %6442 = vmatpush.msra.mxu1 %v6336_v57  ;;  %v5895_v46 = vmin.f32 %v12791_v55, 20.0  ;;  %6414 = vmatpush.msra.mxu0 %v6327_v50  ;;  %v6162_v60 = vadd.f32 1.0, %v12602_v8  ;;  %v6249_v22 = vand.u32 2147483647, %v12639_v13  ;;  %v6236_v44 = vmul.f32 0.6931472, %v8856_v38 }
 0x3d6   : > { %8650 = vmatmul.msk.f32.vlgmr.msra.gmra.mxu0 %vm15405_vm11, %v12816_v10  ;;  %v6017_v45 = vsel %vm12809_vm0, %v6014_v32, %v6011_v41  ;;  %v6239_v54 = vmul.f32 %v12636_v63, %v6238_v16  ;;  %v5902_v48 = vmin.f32 %v12833_v23, 20.0  ;;  %v6166_v3 = vadd.f32 1.0, %v6165_v47  ;;  %v12856_v56 = vpop.eup %8859 }
 0x3d7   : > { %v5982_v12 = vmul.f32 1.442695, %v5895_v46  ;;  %v6296_v28 = vmul.f32 %v12674_v52, %v6017_v45  ;;  %8861 = vlog2.f32 %v6162_v60  ;;  %v6245_v31 = vmul.f32 0.6931472, %v8858_v9 }
 0x3d8   : > { %v5837_v62 = vpop.f32.mrf.mxu3  ;;  %v6248_v59 = vmul.f32 %v12639_v13, %v6247_v61  ;;  %v6242_v46 = vsel %vm12845_vm2, %v6239_v54, %v6236_v44  ;;  %vm6250_vm6 = vcmp.lt.f32.partialorder %v6249_v22, 0.0004427343  ;;  %v6171_v63 = vadd.f32 1.0, %v12605_v7  ;;  %vm15425_vm2 = vmmov %vm15409_vm1 }
 0x3d9   : > { %v12828_v18 = vadd.f32 %v5837_v62, %v12431_v1  ;;  %v6328_v32 = vsel %vm5905_vm4, %v12544_v11, %v6296_v28  ;;  %v12865_v11 = vld [vmem:[%s14702_s4 + $0x8] sm:$0xff]  ;;  %8863 = vpow2.f32 %v5982_v12  ;;  %v6321_v13 = vmul.f32 %v12674_v52, %v6242_v46  ;;  %vm15420_vm4 = vmmov %vm15409_vm1 }
 0x3da   : > { %6443 = vmatpush.msra.mxu1 %v6328_v32  ;;  %v6251_v0 = vsel %vm6250_vm6, %v6248_v59, %v6245_v31  ;;  %v6168_v50 = vand.u32 2147483647, %v12602_v8  ;;  %v5996_v41 = vmul.f32 1.442695, %v5902_v48  ;;  %v6167_v16 = vmul.f32 %v12602_v8, %v6166_v3  ;;  %v15414_v32 = vld [vmem:[#allocation17_spill] sm:$0xff]  ;;  %v15415_v31 = vld [vmem:[#allocation6_spill] sm:$0xff] }
 0x3db   : > { %v12842_v1 = vmul.f32 100.0, %v12828_v18  ;;  %8654 = vmatmul.msk.f32.vlgmr.msra.gmra.mxu1 %vm15408_vm5, %v12816_v10  ;;  %v6322_v29 = vmul.f32 %v12674_v52, %v6251_v0  ;;  %v6174_v61 = vmul.f32 -0.5, %v12605_v7  ;;  %v6353_v47 = vsel %vm5930_vm15, %v12535_v27, %v6321_v13  ;;  %v15410_v27 = vld [vmem:[#allocation7_spill] sm:$0xff] }
 0x3dc   : > { %8865 = vlog2.f32 %v6171_v63  ;;  %v6090_v22 = vadd.f32 1.0, %v12585_v14  ;;  %6469 = vmatpush.msra.mxu2 %v6353_v47  ;;  %v6177_v12 = vand.u32 2147483647, %v12605_v7  ;;  %v6093_v28 = vmul.f32 -0.5, %v12585_v14  ;;  %v15416_v63 = vld [vmem:[#allocation26_spill] sm:$0xff]  ;;  %v15421_v3 = vld [vmem:[#allocation23_spill] sm:$0xff] }
 0x3dd   : > { %v5903_v62 = vmin.f32 %v12842_v1, 20.0  ;;  %v8862_v60 = vpop.eup %8861  ;;  %v6354_v38 = vsel %vm5931_vm8, %v12524_v43, %v6322_v29  ;;  %vm6169_vm3 = vcmp.lt.f32.partialorder %v6168_v50, 0.0004427343  ;;  %v6099_v17 = vadd.f32 1.0, %v15410_v27  ;;  %vm15427_vm8 = vmmov %vm15409_vm1 }
 0x3de   : > { %8651 = vmatmul.msk.f32.gmra.mxu0 %vm15409_vm1, %v12865_v11  ;;  %v6164_v8 = vmul.f32 0.6931472, %v8862_v60  ;;  %6498 = vmatpush.msra.mxu3 %v6354_v38  ;;  %8867 = vlog2.f32 %v6090_v22  ;;  %v6175_v9 = vadd.f32 1.0, %v6174_v61  ;;  %v6102_v44 = vmul.f32 -0.5, %v15410_v27  ;;  %v15418_v61 = vld [vmem:[#allocation10_spill] sm:$0xff] }
 0x3df   : > { %v5998_v45 = vmul.f32 1.442695, %v5903_v62  ;;  %8869 = vpow2.f32 %v5996_v41  ;;  %v12888_v54 = vpop.eup %8863  ;;  %v6094_v48 = vadd.f32 1.0, %v6093_v28  ;;  %vm12892_vm10 = vcmp.lt.f32.partialorder %v6177_v12, 0.0004427343  ;;  %v12901_v62 = vld [vmem:[%s14702_s4 + $0x10] sm:$0xff] }
 0x3e0   : > { %v6170_v57 = vsel %vm6169_vm3, %v6167_v16, %v6164_v8  ;;  %8871 = vlog2.f32 %v6099_v17  ;;  %vm5914_vm12 = vcmp.gt.f32.partialorder %v15414_v32, 20.0  ;;  %v6018_v59 = vadd.f32 1.0, %v15415_v31  ;;  %v15426_v32 = vld [vmem:[#allocation13_spill] sm:$0xff] }
 0x3e1   : > { %v6313_v43 = vmul.f32 %v12674_v52, %v6170_v57  ;;  %8873 = vpow2.f32 %v5998_v45  ;;  %v6096_v0 = vand.u32 2147483647, %v12585_v14  ;;  %v6103_v50 = vadd.f32 1.0, %v6102_v44 }
 0x3e2   : > { %v8866_v46 = vpop.eup %8865  ;;  %v6021_v29 = vmul.f32 -0.5, %v15415_v31  ;;  %v6176_v16 = vmul.f32 %v12605_v7, %v6175_v9  ;;  %8875 = vlog2.f32 %v6018_v59  ;;  %v6027_v60 = vadd.f32 1.0, %v15418_v61 }
 0x3e3   : > { %v6345_v13 = vsel %vm5922_vm7, %v15416_v63, %v6313_v43  ;;  %8655 = vmatmul.msk.f32.gmra.mxu1 %vm15417_vm14, %v12865_v11  ;;  %v6173_v41 = vmul.f32 0.6931472, %v8866_v46  ;;  %v6095_v45 = vmul.f32 %v12585_v14, %v6094_v48  ;;  %vm5915_vm9 = vcmp.gt.f32.partialorder %v15419_v5, 20.0  ;;  %vm15434_vm14 = vmmov %vm15425_vm2 }
 0x3e4   : > { %6470 = vmatpush.msra.mxu2 %v6345_v13  ;;  %v8868_v47 = vpop.eup %8867  ;;  %v6105_v22 = vand.u32 2147483647, %v15410_v27  ;;  %v6030_v38 = vmul.f32 -0.5, %v15418_v61  ;;  %v6024_v28 = vand.u32 2147483647, %v15415_v31  ;;  %8877 = vlog2.f32 %v6027_v60 }
 0x3e5   : > { %v12918_v8 = vpop.eup %8869  ;;  %v6179_v7 = vsel %vm12892_vm10, %v6176_v16, %v6173_v41  ;;  %v6092_v12 = vmul.f32 0.6931472, %v8868_v47  ;;  %vm6097_vm0 = vcmp.lt.f32.partialorder %v6096_v0, 0.0004427343  ;;  %v6104_v57 = vmul.f32 %v15410_v27, %v6103_v50  ;;  %v12941_v16 = vld [vmem:[%s14702_s4 + $0x18] sm:$0xff]  ;;  %vm15433_vm10 = vmmov %vm15425_vm2 }
 0x3e6   : > { %8652 = vmatmul.msk.f32.gmra.mxu0 %vm15420_vm4, %v12901_v62  ;;  %v8872_v17 = vpop.eup %8871  ;;  %v6314_v14 = vmul.f32 %v12674_v52, %v6179_v7  ;;  %v6022_v9 = vadd.f32 1.0, %v6021_v29  ;;  %v6031_v59 = vadd.f32 1.0, %v6030_v38  ;;  %v6252_v46 = vadd.f32 1.0, %v12753_v26 }
 0x3e7   : > { %v12925_v44 = vpop.eup %8873  ;;  %v6098_v43 = vsel %vm6097_vm0, %v6095_v45, %v6092_v12  ;;  %v6101_v48 = vmul.f32 0.6931472, %v8872_v17  ;;  %vm6106_vm11 = vcmp.lt.f32.partialorder %v6105_v22, 0.0004427343  ;;  %v6255_v41 = vmul.f32 -0.5, %v12753_v26 }
 0x3e8   : > { %v6346_v63 = vsel %vm5923_vm13, %v15421_v3, %v6314_v14  ;;  %v6305_v13 = vmul.f32 %v12674_v52, %v6098_v43  ;;  %v8876_v0 = vpop.eup %8875  ;;  %vm12933_vm15 = vcmp.lt.f32.partialorder %v6024_v28, 0.0004427343  ;;  %v6033_v29 = vand.u32 2147483647, %v15418_v61  ;;  %vm15432_vm13 = vmmov %vm15425_vm2 }
 0x3e9   : > { %6499 = vmatpush.msra.mxu3 %v6346_v63  ;;  %v6107_v27 = vsel %vm6106_vm11, %v6104_v57, %v6101_v48  ;;  %8879 = vlog2.f32 %v6252_v46  ;;  %v6020_v45 = vmul.f32 0.6931472, %v8876_v0  ;;  %v6023_v22 = vmul.f32 %v15415_v31, %v6022_v9  ;;  %v15429_v48 = vld [vmem:[#allocation14_spill] sm:$0xff] }
 0x3ea   : > { %v6337_v60 = vsel %vm5914_vm12, %v15424_v4, %v6305_v13  ;;  %v6306_v47 = vmul.f32 %v12674_v52, %v6107_v27  ;;  %v8878_v38 = vpop.eup %8877  ;;  %v6032_v7 = vmul.f32 %v15418_v61, %v6031_v59  ;;  %v6258_v12 = vand.u32 2147483647, %v12753_v26  ;;  %v15428_v61 = vld [vmem:[#allocation21_spill] sm:$0xff]  ;;  %v15430_v63 = vld [vmem:[#allocation18_spill] sm:$0xff] }
 0x3eb   : > { %8656 = vmatmul.msk.f32.gmra.mxu1 %vm15425_vm2, %v12901_v62  ;;  %6471 = vmatpush.msra.mxu2 %v6337_v60  ;;  %v6261_v28 = vadd.f32 1.0, %v12774_v15  ;;  %v6264_v17 = vmul.f32 -0.5, %v12774_v15  ;;  %v6026_v31 = vsel %vm12933_vm15, %v6023_v22, %v6020_v45  ;;  %v6029_v57 = vmul.f32 0.6931472, %v8878_v38 }
 0x3ec   : > { %v6338_v14 = vsel %vm5915_vm9, %v15426_v32, %v6306_v47  ;;  %v6256_v9 = vadd.f32 1.0, %v6255_v41  ;;  %vm5906_vm6 = vcmp.gt.f32.partialorder %v15428_v61, 20.0  ;;  %v6297_v43 = vmul.f32 %v12674_v52, %v6026_v31 }
 0x3ed   : > { %6500 = vmatpush.msra.mxu3 %v6338_v14  ;;  %vm6034_vm5 = vcmp.lt.f32.partialorder %v6033_v29, 0.0004427343  ;;  %8881 = vlog2.f32 %v6261_v28  ;;  %vm5907_vm1 = vcmp.gt.f32.partialorder %v15429_v48, 20.0  ;;  %v6180_v5 = vadd.f32 1.0, %v12708_v40  ;;  %v15431_v29 = vld [vmem:[#allocation8_spill] sm:$0xff] }
 0x3ee   : > { %8653 = vmatmul.msk.f32.gmra.mxu0 %vm15427_vm8, %v12941_v16  ;;  %v6035_v59 = vsel %vm6034_vm5, %v6032_v7, %v6029_v57  ;;  %v6183_v46 = vmul.f32 -0.5, %v12708_v40  ;;  %v6329_v13 = vsel %vm5906_vm6, %v15430_v63, %v6297_v43  ;;  %vm5932_vm7 = vcmp.gt.f32.partialorder %v12664_v24, 20.0  ;;  %vm15440_vm8 = vmmov %vm15425_vm2 }
 0x3ef   : > { %v8880_v3 = vpop.eup %8879  ;;  %v6298_v0 = vmul.f32 %v12674_v52, %v6035_v59  ;;  %v6265_v41 = vadd.f32 1.0, %v6264_v17  ;;  %6472 = vmatpush.msra.mxu2 %v6329_v13  ;;  %v6257_v50 = vmul.f32 %v12753_v26, %v6256_v9  ;;  %vm6259_vm3 = vcmp.lt.f32.partialorder %v6258_v12, 0.0004427343  ;;  %v15435_v17 = vld [vmem:[#allocation48_spill] sm:$0xff] }
 0x3f0   : > { %v6254_v27 = vmul.f32 0.6931472, %v8880_v3  ;;  %8883 = vlog2.f32 %v6180_v5  ;;  %8658 = vmatmul.msk.f32.vlgmr.msra.gmra.mxu2 %vm15432_vm13, %v12816_v10  ;;  %v6267_v60 = vand.u32 2147483647, %v12774_v15  ;;  %v6184_v47 = vadd.f32 1.0, %v6183_v46 }
 0x3f1   : > { %v6330_v4 = vsel %vm5907_vm1, %v15431_v29, %v6298_v0  ;;  %v6189_v45 = vadd.f32 1.0, %v12714_v19  ;;  %vm5933_vm12 = vcmp.gt.f32.partialorder %v12680_v33, 20.0  ;;  %v6192_v26 = vmul.f32 -0.5, %v12714_v19  ;;  %v15441_v33 = vld [vmem:[#allocation4_spill] sm:$0xff] }
 0x3f2   : > { %6501 = vmatpush.msra.mxu3 %v6330_v4  ;;  %v6260_v22 = vsel %vm6259_vm3, %v6257_v50, %v6254_v27  ;;  %v6108_v38 = vadd.f32 1.0, %v12666_v51  ;;  %v6266_v28 = vmul.f32 %v12774_v15, %v6265_v41  ;;  %vm5924_vm9 = vcmp.gt.f32.partialorder %v15435_v17, 20.0 }
 0x3f3   : > { %8657 = vmatmul.msk.f32.gmra.mxu1 %vm15433_vm10, %v12941_v16  ;;  %v8882_v7 = vpop.eup %8881  ;;  %8662 = vmatmul.msk.f32.vlgmr.msra.gmra.mxu3 %vm15434_vm14, %v12816_v10  ;;  %v6323_v12 = vmul.f32 %v12674_v52, %v6260_v22  ;;  %v6186_v32 = vand.u32 2147483647, %v12708_v40  ;;  %8885 = vlog2.f32 %v6189_v45  ;;  %v6195_v31 = vand.u32 2147483647, %v12714_v19  ;;  %vm15448_vm10 = vmmov %vm15425_vm2 }
 0x3f4   : > { %v6263_v14 = vmul.f32 0.6931472, %v8882_v7  ;;  %8887 = vlog2.f32 %v6108_v38  ;;  %v6111_v57 = vmul.f32 -0.5, %v12666_v51  ;;  %vm6268_vm4 = vcmp.lt.f32.partialorder %v6267_v60, 0.0004427343 }
 0x3f5   : > { %v6355_v9 = vsel %vm5932_vm7, %v12656_v25, %v6323_v12  ;;  %v6185_v61 = vmul.f32 %v12708_v40, %v6184_v47  ;;  %v6117_v15 = vadd.f32 1.0, %v12669_v21  ;;  %v6193_v59 = vadd.f32 1.0, %v6192_v26  ;;  %v15436_v25 = vld [vmem:[#allocation33_spill] sm:$0xff]  ;;  %v15439_v40 = vld [vmem:[#allocation34_spill] sm:$0xff]  ;;  %vm15446_vm7 = vmmov %vm15425_vm2 }
 0x3f6   : > { %v8884_v43 = vpop.eup %8883  ;;  %6527 = vmatpush.msrb.mxu0 %v6355_v9  ;;  %v6269_v48 = vsel %vm6268_vm4, %v6266_v28, %v6263_v14  ;;  %v6114_v5 = vand.u32 2147483647, %v12666_v51  ;;  %v6120_v46 = vmul.f32 -0.5, %v12669_v21  ;;  %v6112_v13 = vadd.f32 1.0, %v6111_v57  ;;  %v6366_v14 = vld [vmem:[%s14703_s5 + $0x18] sm:$0xff] }
 0x3f7   : > { %v6324_v3 = vmul.f32 %v12674_v52, %v6269_v48  ;;  %v6182_v63 = vmul.f32 0.6931472, %v8884_v43  ;;  %8889 = vlog2.f32 %v6117_v15  ;;  %vm6187_vm0 = vcmp.lt.f32.partialorder %v6186_v32, 0.0004427343  ;;  %v15442_v32 = vld [vmem:[#allocation28_spill] sm:$0xff]  ;;  %6384 = vperm.xlu2 %8782, %v6366_v14  }
 0x3f8   : > { %vm5925_vm11 = vcmp.gt.f32.partialorder %v15436_v25, 20.0  ;;  %vm12997_vm15 = vcmp.lt.f32.partialorder %v6195_v31, 0.0004427343  ;;  %v6036_v0 = vadd.f32 1.0, %v15439_v40  ;;  %8659 = vmatmul.msk.f32.gmra.mxu2 %vm15425_vm2, %v12865_v11  ;;  %v6121_v29 = vadd.f32 1.0, %v6120_v46  ;;  %v15443_v48 = vld [vmem:[#allocation44_spill] sm:$0xff] }
 0x3f9   : > { %v8886_v41 = vpop.eup %8885  ;;  %v6356_v27 = vsel %vm5933_vm12, %v12660_v20, %v6324_v3  ;;  %v6188_v50 = vsel %vm6187_vm0, %v6185_v61, %v6182_v63  ;;  %v6039_v4 = vmul.f32 -0.5, %v15439_v40  ;;  %v6194_v22 = vmul.f32 %v12714_v19, %v6193_v59  ;;  %vm15454_vm0 = vmmov %vm15425_vm2 }
 0x3fa   : > { %v8888_v60 = vpop.eup %8887  ;;  %6556 = vmatpush.msrb.mxu1 %v6356_v27  ;;  %v6315_v47 = vmul.f32 %v12674_v52, %v6188_v50  ;;  %v6191_v45 = vmul.f32 0.6931472, %v8886_v41  ;;  %8891 = vlog2.f32 %v6036_v0  ;;  %v6113_v38 = vmul.f32 %v12666_v51, %v6112_v13  ;;  %v15447_v50 = vld [vmem:[#allocation16_spill] sm:$0xff] }
 0x3fb   : > { %8663 = vmatmul.msk.f32.gmra.mxu3 %vm15440_vm8, %v12865_v11  ;;  %v6110_v26 = vmul.f32 0.6931472, %v8888_v60  ;;  %vm6115_vm6 = vcmp.lt.f32.partialorder %v6114_v5, 0.0004427343  ;;  %v6123_v20 = vand.u32 2147483647, %v12669_v21  ;;  %v6122_v9 = vmul.f32 %v12669_v21, %v6121_v29  ;;  %vm15457_vm8 = vmmov %vm15454_vm0 }
 0x3fc   : > { %v6347_v7 = vsel %vm5924_vm9, %v15441_v33, %v6315_v47  ;;  %v6197_v12 = vsel %vm12997_vm15, %v6194_v22, %v6191_v45  ;;  %v6040_v28 = vadd.f32 1.0, %v6039_v4  ;;  %v6045_v19 = vadd.f32 1.0, %v15442_v32  ;;  %v15444_v5 = vld [vmem:[#allocation68_spill] sm:$0xff]  ;;  %v15445_v21 = vld [vmem:[#allocation3_spill] sm:$0xff]  ;;  %v15450_v33 = vld [vmem:[#allocation22_spill] sm:$0xff] }
 0x3fd   : > { %v8890_v31 = vpop.eup %8889  ;;  %6528 = vmatpush.msrb.mxu0 %v6347_v7  ;;  %v6316_v51 = vmul.f32 %v12674_v52, %v6197_v12  ;;  %v6116_v57 = vsel %vm6115_vm6, %v6113_v38, %v6110_v26  ;;  %v6048_v17 = vmul.f32 -0.5, %v15442_v32  ;;  %v6042_v43 = vand.u32 2147483647, %v15439_v40  ;;  %vm15452_vm9 = vmmov %vm15425_vm2 }
 0x3fe   : > { %v6307_v61 = vmul.f32 %v12674_v52, %v6116_v57  ;;  %v6119_v15 = vmul.f32 0.6931472, %v8890_v31  ;;  %8893 = vlog2.f32 %v6045_v19  ;;  %vm5916_vm5 = vcmp.gt.f32.partialorder %v15444_v5, 20.0  ;;  %vm15456_vm2 = vmmov %vm15454_vm0 }
 0x3ff   : > { %v6348_v59 = vsel %vm5925_vm11, %v15443_v48, %v6316_v51  ;;  %vm6124_vm1 = vcmp.lt.f32.partialorder %v6123_v20, 0.0004427343  ;;  %v6270_v46 = vadd.f32 1.0, %v12918_v8  ;;  %v6041_v24 = vmul.f32 %v15439_v40, %v6040_v28  ;;  %v15449_v40 = vld [vmem:[#allocation91_spill] sm:$0xff]  ;;  %v15451_v28 = vld [vmem:[#allocation29_spill] sm:$0xff] }
 0x400   : > { %v8892_v3 = vpop.eup %8891  ;;  %6557 = vmatpush.msrb.mxu1 %v6348_v59  ;;  %v6339_v63 = vsel %vm5916_vm5, %v15445_v21, %v6307_v61  ;;  %v6125_v13 = vsel %vm6124_vm1, %v6122_v9, %v6119_v15  ;;  %v6273_v0 = vmul.f32 -0.5, %v12918_v8  ;;  %8660 = vmatmul.msk.f32.gmra.mxu2 %vm15446_vm7, %v12901_v62  ;;  %v6049_v27 = vadd.f32 1.0, %v6048_v17  ;;  %v6365_v20 = vld [vmem:[%s14703_s5 + $0x10] sm:$0xff]  ;;  %v15453_v59 = vld [vmem:[#allocation25_spill] sm:$0xff]  ;;  %vm15460_vm7 = vmmov %vm15454_vm0 }
 0x401   : > { %6529 = vmatpush.msrb.mxu0 %v6339_v63  ;;  %v6308_v25 = vmul.f32 %v12674_v52, %v6125_v13  ;;  %v6038_v41 = vmul.f32 0.6931472, %v8892_v3  ;;  %8895 = vlog2.f32 %v6270_v46  ;;  %vm5917_vm3 = vcmp.gt.f32.partialorder %v15447_v50, 20.0  ;;  %6379 = vperm.xlu2 %8782, %v6365_v20   ;;  %v15455_v3 = vld [vmem:[#allocation24_spill] sm:$0xff] }
 0x402   : > { %vm6043_vm13 = vcmp.lt.f32.partialorder %v6042_v43, 0.0004427343  ;;  %v6051_v29 = vand.u32 2147483647, %v15442_v32  ;;  %v6279_v4 = vadd.f32 1.0, %v12925_v44  ;;  %8897 = vpow2.f32 %v12802_v42 }
 0x403   : > { %8664 = vmatmul.msk.f32.gmra.mxu3 %vm15448_vm10, %v12901_v62  ;;  %v6340_v60 = vsel %vm5917_vm3, %v15449_v40, %v6308_v25  ;;  %v6044_v47 = vsel %vm6043_vm13, %v6041_v24, %v6038_v41  ;;  %v6282_v45 = vmul.f32 -0.5, %v12925_v44  ;;  %v6274_v38 = vadd.f32 1.0, %v6273_v0 }
 0x404   : > { %v8894_v22 = vpop.eup %8893  ;;  %6558 = vmatpush.msrb.mxu1 %v6340_v60  ;;  %v6299_v26 = vmul.f32 %v12674_v52, %v6044_v47  ;;  %8899 = vlog2.f32 %v6279_v4  ;;  %vm5908_vm12 = vcmp.gt.f32.partialorder %v15450_v33, 20.0  ;;  %v6050_v7 = vmul.f32 %v15442_v32, %v6049_v27 }
 0x405   : > { %v6047_v42 = vmul.f32 0.6931472, %v8894_v22  ;;  %v6276_v12 = vand.u32 2147483647, %v12918_v8  ;;  %vm6052_vm14 = vcmp.lt.f32.partialorder %v6051_v29, 0.0004427343  ;;  %v6275_v43 = vmul.f32 %v12918_v8, %v6274_v38 }
 0x406   : > { %v6331_v19 = vsel %vm5908_vm12, %v15451_v28, %v6299_v26  ;;  %v6285_v14 = vand.u32 2147483647, %v12925_v44  ;;  %v6198_v31 = vadd.f32 1.0, %v12856_v56  ;;  %v6283_v9 = vadd.f32 1.0, %v6282_v45  ;;  %vm15461_vm12 = vmmov %vm15454_vm0 }
 0x407   : > { %v8896_v51 = vpop.eup %8895  ;;  %6530 = vmatpush.msrb.mxu0 %v6331_v19  ;;  %v6053_v57 = vsel %vm6052_vm14, %v6050_v7, %v6047_v42  ;;  %v6201_v17 = vmul.f32 -0.5, %v12856_v56  ;;  %v6207_v61 = vadd.f32 1.0, %v12888_v54  ;;  %vm5909_vm4 = vcmp.gt.f32.partialorder %v15453_v59, 20.0 }
 0x408   : > { %v6300_v32 = vmul.f32 %v12674_v52, %v6053_v57  ;;  %8666 = vmatmul.msk.f32.vlgmr.msrb.gmra.mxu0 %vm15452_vm9, %v12816_v10  ;;  %v6272_v15 = vmul.f32 0.6931472, %v8896_v51  ;;  %8901 = vlog2.f32 %v6198_v31  ;;  %v13063_v48 = vpop.eup %8897  ;;  %8661 = vmatmul.msk.f32.gmra.mxu2 %vm15454_vm0, %v12941_v16  ;;  %vm6277_vm11 = vcmp.lt.f32.partialorder %v6276_v12, 0.0004427343 }
 0x409   : > { %8903 = vlog2.f32 %v6207_v61  ;;  %v6210_v5 = vmul.f32 -0.5, %v12888_v54  ;;  %vm5934_vm15 = vcmp.gt.f32.partialorder %v12833_v23, 20.0  ;;  %v6204_v8 = vand.u32 2147483647, %v12856_v56 }
 0x40a   : > { %v8900_v46 = vpop.eup %8899  ;;  %v6332_v21 = vsel %vm5909_vm4, %v15455_v3, %v6300_v32  ;;  %v6278_v63 = vsel %vm6277_vm11, %v6275_v43, %v6272_v15  ;;  %v6284_v0 = vmul.f32 %v12925_v44, %v6283_v9  ;;  %v6202_v25 = vadd.f32 1.0, %v6201_v17  ;;  %vm15464_vm4 = vmmov %vm15454_vm0  ;;  %v15465_v3 = vld [vmem:[#allocation46_spill] sm:$0xff] }
 0x40b   : > { %6559 = vmatpush.msrb.mxu1 %v6332_v21  ;;  %8665 = vmatmul.msk.f32.gmra.mxu3 %vm15456_vm2, %v12941_v16  ;;  %v6325_v13 = vmul.f32 %v12674_v52, %v6278_v63  ;;  %v6281_v24 = vmul.f32 0.6931472, %v8900_v46  ;;  %vm6286_vm6 = vcmp.lt.f32.partialorder %v6285_v14, 0.0004427343  ;;  %v6211_v41 = vadd.f32 1.0, %v6210_v5  ;;  %v15466_v63 = vld [vmem:[#allocation43_spill] sm:$0xff] }
 0x40c   : > { %8670 = vmatmul.msk.f32.vlgmr.msrb.gmra.mxu1 %vm15457_vm8, %v12816_v10  ;;  %v6213_v23 = vand.u32 2147483647, %v12888_v54  ;;  %v6126_v27 = vadd.f32 1.0, %v12719_v35  ;;  %v6129_v4 = vmul.f32 -0.5, %v12719_v35  ;;  %v6135_v40 = vadd.f32 1.0, %v13063_v48 }
 0x40d   : > { %v6357_v50 = vsel %vm5934_vm15, %v12825_v6, %v6325_v13  ;;  %v6287_v29 = vsel %vm6286_vm6, %v6284_v0, %v6281_v24  ;;  %vm5935_vm5 = vcmp.gt.f32.partialorder %v12842_v1, 20.0  ;;  %vm13085_vm1 = vcmp.lt.f32.partialorder %v6204_v8, 0.0004427343 }
 0x40e   : > { %v8902_v60 = vpop.eup %8901  ;;  %6585 = vmatpush.msrb.mxu2 %v6357_v50  ;;  %v6326_v44 = vmul.f32 %v12674_v52, %v6287_v29  ;;  %8905 = vlog2.f32 %v6126_v27  ;;  %v6203_v6 = vmul.f32 %v12856_v56, %v6202_v25  ;;  %v6138_v26 = vmul.f32 -0.5, %v13063_v48  ;;  %v7158_v27 = vld.sshfl [vmem:[#allocation1] sm:$0xff pattern:$0x75316420] }
 0x40f   : > { %v8904_v45 = vpop.eup %8903  ;;  %v6200_v22 = vmul.f32 0.6931472, %v8902_v60  ;;  %8907 = vlog2.f32 %v6135_v40  ;;  %v6212_v33 = vmul.f32 %v12888_v54, %v6211_v41  ;;  %v6132_v1 = vand.u32 2147483647, %v12719_v35  ;;  %v15470_v40 = vld [vmem:[#allocation98_spill] sm:$0xff] }
 0x410   : > { %v6358_v38 = vsel %vm5935_vm5, %v12828_v18, %v6326_v44  ;;  %v6209_v20 = vmul.f32 0.6931472, %v8904_v45  ;;  %8667 = vmatmul.msk.f32.gmra.mxu0 %vm15460_vm7, %v12865_v11  ;;  %vm6214_vm3 = vcmp.lt.f32.partialorder %v6213_v23, 0.0004427343  ;;  %v6130_v7 = vadd.f32 1.0, %v6129_v4  ;;  %v15468_v4 = vld [vmem:[#allocation97_spill] sm:$0xff]  ;;  %vm15471_vm7 = vmmov %vm15456_vm2 }
 0x411   : > { %6614 = vmatpush.msrb.mxu3 %v6358_v38  ;;  %v6206_v42 = vsel %vm13085_vm1, %v6203_v6, %v6200_v22  ;;  %v6054_v56 = vadd.f32 1.0, %v12682_v49  ;;  %v6139_v18 = vadd.f32 1.0, %v6138_v26  ;;  %v6057_v19 = vmul.f32 -0.5, %v12682_v49  ;;  %v7670_v45 = vld [vmem:[%s14706_s8] sm:$0xff]  ;;  %v13211_v6 = vld [vmem:[%s14705_s7 + $0x18] sm:$0xff] }
 0x412   : > { %v6317_v12 = vmul.f32 %v12674_v52, %v6206_v42  ;;  %v6215_v28 = vsel %vm6214_vm3, %v6212_v33, %v6209_v20  ;;  %vm5926_vm13 = vcmp.gt.f32.partialorder %v12746_v30, 20.0  ;;  %v6141_v14 = vand.u32 2147483647, %v13063_v48  ;;  %v7162_v20 = vld.sshfl [vmem:[#allocation1 + $0x20] sm:$0xff pattern:$0x75316420] }
 0x413   : > { %v6318_v54 = vmul.f32 %v12674_v52, %v6215_v28  ;;  %8909 = vlog2.f32 %v6054_v56  ;;  %vm5927_vm10 = vcmp.gt.f32.partialorder %v12791_v55, 20.0  ;;  %vm13108_vm14 = vcmp.lt.f32.partialorder %v6132_v1, 0.0004427343  ;;  %v7163_v33 = vld.sshfl [vmem:[#allocation1 + $0x28] sm:$0xff pattern:$0x75316420]  ;;  %v13233_v56 = vpop.permute.xlu1 %6369 }
 0x414   : > { %v8906_v31 = vpop.eup %8905  ;;  %v6349_v51 = vsel %vm5926_vm13, %v12727_v37, %v6317_v12  ;;  %8671 = vmatmul.msk.f32.gmra.mxu1 %vm15461_vm12, %v12865_v11  ;;  %v6063_v9 = vadd.f32 1.0, %v12806_v2  ;;  %v6131_v32 = vmul.f32 %v12719_v35, %v6130_v7  ;;  %v6066_v37 = vmul.f32 -0.5, %v12806_v2  ;;  %vm15472_vm13 = vmmov %vm15456_vm2 }
 0x415   : > { %v8908_v30 = vpop.eup %8907  ;;  %6586 = vmatpush.msrb.mxu2 %v6349_v51  ;;  %v6350_v17 = vsel %vm5927_vm10, %v12772_v34, %v6318_v54  ;;  %v6128_v61 = vmul.f32 0.6931472, %v8906_v31  ;;  %v6140_v15 = vmul.f32 %v13063_v48, %v6139_v18  ;;  %v6058_v43 = vadd.f32 1.0, %v6057_v19  ;;  %vm15473_vm10 = vmmov %vm15456_vm2 }
 0x416   : > { %6615 = vmatpush.msrb.mxu3 %v6350_v17  ;;  %v6137_v55 = vmul.f32 0.6931472, %v8908_v30  ;;  %8911 = vlog2.f32 %v6063_v9  ;;  %vm6142_vm9 = vcmp.lt.f32.partialorder %v6141_v14, 0.0004427343  ;;  %v6060_v5 = vand.u32 2147483647, %v12682_v49  ;;  %vm15474_vm12 = vmmov %vm15456_vm2  ;;  %v13241_v14 = vpop.permute.xlu0 %6374 }
 0x417   : > { %v6134_v59 = vsel %vm13108_vm14, %v6131_v32, %v6128_v61  ;;  %vm5918_vm0 = vcmp.gt.f32.partialorder %v15465_v3, 20.0  ;;  %vm5919_vm11 = vcmp.gt.f32.partialorder %v12749_v53, 20.0  ;;  %v6067_v21 = vadd.f32 1.0, %v6066_v37  ;;  %v7673_v53 = vld [vmem:[%s14706_s8 + $0x18] sm:$0xff] }
 0x418   : > { %v6309_v46 = vmul.f32 %v12674_v52, %v6134_v59  ;;  %v6143_v34 = vsel %vm6142_vm9, %v6140_v15, %v6137_v55  ;;  %8668 = vmatmul.msk.f32.gmra.mxu0 %vm15464_vm4, %v12901_v62  ;;  %v6059_v24 = vmul.f32 %v12682_v49, %v6058_v43  ;;  %v6069_v0 = vand.u32 2147483647, %v12806_v2  ;;  %7691 = vperm.xlu2 %8782, %v7673_v53   ;;  %vm15476_vm9 = vmmov %vm15456_vm2  ;;  %v7164_v32 = vld.sshfl [vmem:[#allocation1 + $0x30] sm:$0xff pattern:$0x75316420] }
 0x419   : > { %v8910_v35 = vpop.eup %8909  ;;  %v6310_v48 = vmul.f32 %v12674_v52, %v6143_v34  ;;  %vm6061_vm15 = vcmp.lt.f32.partialorder %v6060_v5, 0.0004427343  ;;  %v6068_v29 = vmul.f32 %v12806_v2, %v6067_v21  ;;  %vm15467_vm8 = vcmask 1042432   ;;  %vm15477_vm4 = vmmov %vm15456_vm2  ;;  %v7165_v37 = vld.sshfl [vmem:[#allocation1 + $0x38] sm:$0xff pattern:$0x75316420] }
 0x41a   : > { %v6341_v8 = vsel %vm5918_vm0, %v15466_v63, %v6309_v46  ;;  %v6056_v13 = vmul.f32 0.6931472, %v8910_v35  ;;  %8682 = vmatpush.msk.msra.mxu0 %vm15467_vm8, %v7158_v27  ;;  %vm5910_vm6 = vcmp.gt.f32.partialorder %v15468_v4, 20.0  ;;  %vm6070_vm5 = vcmp.lt.f32.partialorder %v6069_v0, 0.0004427343  ;;  %vm15469_vm1 = vmmov %vm15467_vm8 }
 0x41b   : > { %6587 = vmatpush.msrb.mxu2 %v6341_v8  ;;  %v6342_v25 = vsel %vm5919_vm11, %v12730_v36, %v6310_v48  ;;  %v7159_v36 = vld.sshfl [vmem:[#allocation1 + $0x8] sm:$0xff pattern:$0x75316420]  ;;  %vm5911_vm3 = vcmp.gt.f32.partialorder %v12704_v39, 20.0  ;;  %v13158_v39 = vld [vmem:[%s14705_s7] sm:$0xff]  ;;  %vm15475_vm14 = vcmask 23552   ;;  %vm15479_vm11 = vmmov %vm15456_vm2 }
 0x41c   : > { %v8912_v41 = vpop.eup %8911  ;;  %6616 = vmatpush.msrb.mxu3 %v6342_v25  ;;  %v6062_v23 = vsel %vm6061_vm15, %v6059_v24, %v6056_v13  ;;  %8672 = vmatmul.msk.f32.gmra.mxu1 %vm15456_vm2, %v12901_v62  ;;  %vm15478_vm0 = vmmov %vm15475_vm14 }
 0x41d   : > { %v6301_v50 = vmul.f32 %v12674_v52, %v6062_v23  ;;  %v6065_v49 = vmul.f32 0.6931472, %v8912_v41  ;;  %8687 = vmatpush.msk.msra.mxu1 %vm15469_vm1, %v7159_v36  ;;  %vm15480_vm15 = vmmov %vm15456_vm2 }
 0x41e   : > { %vm15481_vm8 = vmmov %vm15456_vm2 }
 0x41f   : > { %v6333_v60 = vsel %vm5910_vm6, %v15470_v40, %v6301_v50  ;;  %v6071_v44 = vsel %vm6070_vm5, %v6068_v29, %v6065_v49  ;;  %vm15482_vm6 = vmmov %vm15478_vm0 }
 0x420   : > { %6588 = vmatpush.msrb.mxu2 %v6333_v60  ;;  %v6302_v47 = vmul.f32 %v12674_v52, %v6071_v44  ;;  %8669 = vmatmul.msk.f32.gmra.mxu0 %vm15471_vm7, %v12941_v16  ;;  %vm15483_vm5 = vmmov %vm15478_vm0 }
 0x421   : > { %8674 = vmatmul.msk.f32.vlgmr.msrb.gmra.mxu2 %vm15472_vm13, %v12816_v10  ;;  %7676 = vperm.xlu2 %8782, %v7670_v45   ;;  %vm15484_vm7 = vmmov %vm15469_vm1 }
 0x422   : > { %v6334_v2 = vsel %vm5911_vm3, %v12685_v58, %v6302_v47  ;;  %v13179_v58 = vld [vmem:[%s14705_s7 + $0x8] sm:$0xff]  ;;  %vm15485_vm3 = vmmov %vm15478_vm0 }
 0x423   : > { %6617 = vmatpush.msrb.mxu3 %v6334_v2  ;;  %vm15486_vm13 = vmmov %vm15478_vm0 }
 0x424   : > { %8678 = vmatmul.msk.f32.vlgmr.msrb.gmra.mxu3 %vm15473_vm10, %v12816_v10  ;;  %8673 = vmatmul.msk.f32.gmra.mxu1 %vm15474_vm12, %v12941_v16  ;;  %v7160_v10 = vld.sshfl [vmem:[#allocation1 + $0x10] sm:$0xff pattern:$0x75316420]  ;;  %vm15487_vm10 = vmmov %vm15478_vm0 }
 0x425   : > { %8692 = vmatpush.msk.msra.mxu2 %vm15469_vm1, %v7160_v10  ;;  %vm15488_vm12 = vmmov %vm15478_vm0 }
 0x428   : > { %8683 = vmatmul.msk.f32.vlgmr.msra.gmra.mxu0 %vm15475_vm14, %v13158_v39  ;;  %vm15489_vm14 = vmmov %vm15478_vm0 }
 0x429   : > { %8675 = vmatmul.msk.f32.gmra.mxu2 %vm15476_vm9, %v12865_v11  ;;  %vm15490_vm9 = vmmov %vm15478_vm0 }
 0x42c   : > { %8679 = vmatmul.msk.f32.gmra.mxu3 %vm15477_vm4, %v12865_v11  ;;  %8688 = vmatmul.msk.f32.vlgmr.msra.gmra.mxu1 %vm15478_vm0, %v13158_v39  ;;  %v7161_v11 = vld.sshfl [vmem:[#allocation1 + $0x18] sm:$0xff pattern:$0x75316420]  ;;  %vm15491_vm4 = vmmov %vm15478_vm0 }
 0x42d   : > { %8697 = vmatpush.msk.msra.mxu3 %vm15484_vm7, %v7161_v11  ;;  %vm15499_vm7 = vmmov %vm15478_vm0 }
 0x430   : > { %8684 = vmatmul.msk.f32.gmra.mxu0 %vm15482_vm6, %v13179_v58  ;;  %vm15496_vm6 = vmmov %vm15469_vm1 }
 0x431   : > { %8676 = vmatmul.msk.f32.gmra.mxu2 %vm15479_vm11, %v12901_v62  ;;  %vm15492_vm11 = vmmov %vm15478_vm0  ;;  %8702 = vmatpush.msk.msrb.mxu0 %vm15496_vm6, %v7162_v20 }
 0x432   : > { %vm15524_vm6 = vmmov %vm15478_vm0 }
 0x434   : > { %8680 = vmatmul.msk.f32.gmra.mxu3 %vm15480_vm15, %v12901_v62  ;;  %8689 = vmatmul.msk.f32.gmra.mxu1 %vm15483_vm5, %v13179_v58  ;;  %v13190_v62 = vld [vmem:[%s14705_s7 + $0x10] sm:$0xff]  ;;  %vm15493_vm15 = vmmov %vm15478_vm0 }
 0x435   : > { %vm15497_vm5 = vmmov %vm15469_vm1 }
 0x436   : > { %8707 = vmatpush.msk.msrb.mxu1 %vm15497_vm5, %v7163_v33  ;;  %vm15498_vm1 = vmmov %vm15478_vm0 }
 0x438   : > { %8685 = vmatmul.msk.f32.gmra.mxu0 %vm15485_vm3, %v13190_v62  ;;  %vm15500_vm3 = vmmov %vm15478_vm0 }
 0x439   : > { %8677 = vmatmul.msk.f32.gmra.mxu2 %vm15456_vm2, %v12941_v16  ;;  %vm15494_vm2 = vmmov %vm15478_vm0 }
 0x43c   : > { %8681 = vmatmul.msk.f32.gmra.mxu3 %vm15481_vm8, %v12941_v16  ;;  %8690 = vmatmul.msk.f32.gmra.mxu1 %vm15486_vm13, %v13190_v62  ;;  %vm15495_vm8 = vmmov %vm15478_vm0 }
 0x43d   : > { %vm15501_vm13 = vmmov %vm15478_vm0 }
 0x440   : > { %8686 = vmatmul.msk.f32.gmra.mxu0 %vm15492_vm11, %v13211_v6  ;;  %vm15510_vm11 = vmmov %vm15478_vm0 }
 0x441   : > { %8693 = vmatmul.msk.f32.vlgmr.msra.gmra.mxu2 %vm15487_vm10, %v13158_v39  ;;  %vm15502_vm10 = vmmov %vm15478_vm0 }
 0x444   : > { %8698 = vmatmul.msk.f32.vlgmr.msra.gmra.mxu3 %vm15488_vm12, %v13158_v39  ;;  %8691 = vmatmul.msk.f32.gmra.mxu1 %vm15493_vm15, %v13211_v6  ;;  %vm15503_vm12 = vmmov %vm15478_vm0 }
 0x445   : > { %vm15511_vm15 = vmmov %vm15478_vm0 }
 0x448   : > { %8703 = vmatmul.msk.f32.vlgmr.msrb.gmra.mxu0 %vm15498_vm1, %v13158_v39  ;;  %vm15529_vm1 = vmmov %vm15478_vm0 }
 0x449   : > { %8694 = vmatmul.msk.f32.gmra.mxu2 %vm15489_vm14, %v13179_v58  ;;  %vm15504_vm14 = vmmov %vm15497_vm5 }
 0x44a   : > { %8712 = vmatpush.msk.msrb.mxu2 %vm15504_vm14, %v7164_v32 }
 0x44c   : > { %8699 = vmatmul.msk.f32.gmra.mxu3 %vm15490_vm9, %v13179_v58  ;;  %8708 = vmatmul.msk.f32.vlgmr.msrb.gmra.mxu1 %vm15499_vm7, %v13158_v39  ;;  %vm15505_vm9 = vmmov %vm15497_vm5 }
 0x44d   : > { %8717 = vmatpush.msk.msrb.mxu3 %vm15505_vm9, %v7165_v37  ;;  %vm15525_vm5 = vmmov %vm15478_vm0 }
 0x44e   : > { %vm15530_vm7 = vmmov %vm15478_vm0 }
 0x450   : > { %8704 = vmatmul.msk.f32.gmra.mxu0 %vm15500_vm3, %v13179_v58 }
 0x451   : > { %8695 = vmatmul.msk.f32.gmra.mxu2 %vm15491_vm4, %v13190_v62  ;;  %v13227_v42 = vpop.permute.xlu2 %6384  ;;  %vm15506_vm4 = vmmov %vm15478_vm0 }
 0x453   : > { %v6416_v16 = vpop.f32.mrf.mxu0 }
 0x454   : > { %8700 = vmatmul.msk.f32.gmra.mxu3 %vm15478_vm0, %v13190_v62  ;;  %8709 = vmatmul.msk.f32.gmra.mxu1 %vm15501_vm13, %v13179_v58  ;;  %v13236_v12 = vadd.f32 %v6416_v16, %v13233_v56 }
 0x456   : > { %v13247_v51 = vmul.f32 100.0, %v13236_v12 }
 0x458   : > { %v6445_v22 = vpop.f32.mrf.mxu1  ;;  %8705 = vmatmul.msk.f32.gmra.mxu0 %vm15502_vm10, %v13190_v62  ;;  %v6663_v43 = vmin.f32 %v13247_v51, 20.0 }
 0x459   : > { %8696 = vmatmul.msk.f32.gmra.mxu2 %vm15494_vm2, %v13211_v6  ;;  %v13239_v19 = vadd.f32 %v6445_v22, %v13233_v56  ;;  %vm15515_vm2 = vmmov %vm15478_vm0 }
 0x45a   : > { %v6727_v24 = vmul.f32 1.442695, %v6663_v43 }
 0x45b   : > { %v6419_v26 = vpop.f32.mrf.mxu0  ;;  %v13252_v9 = vpop.permute.xlu2 %6379  ;;  %v13255_v30 = vmul.f32 100.0, %v13239_v19 }
 0x45c   : > { %8701 = vmatmul.msk.f32.gmra.mxu3 %vm15495_vm8, %v13211_v6  ;;  %v13250_v57 = vadd.f32 %v6419_v26, %v13241_v14  ;;  %8710 = vmatmul.msk.f32.gmra.mxu1 %vm15503_vm12, %v13190_v62  ;;  %8913 = vpow2.f32 %v6727_v24  ;;  %vm15516_vm8 = vmmov %vm15478_vm0 }
 0x45d   : > { %v6664_v3 = vmin.f32 %v13255_v30, 20.0 }
 0x45e   : > { %v13274_v59 = vmul.f32 100.0, %v13250_v57 }
 0x45f   : > { %v6729_v27 = vmul.f32 1.442695, %v6664_v3 }
 0x460   : > { %v6448_v38 = vpop.f32.mrf.mxu1  ;;  %v6671_v0 = vmin.f32 %v13274_v59, 20.0  ;;  %8706 = vmatmul.msk.f32.gmra.mxu0 %vm15510_vm11, %v13211_v6 }
 0x461   : > { %v13258_v17 = vadd.f32 %v6448_v38, %v13241_v14  ;;  %8713 = vmatmul.msk.f32.vlgmr.msrb.gmra.mxu2 %vm15506_vm4, %v13158_v39  ;;  %8915 = vpow2.f32 %v6729_v27 }
 0x462   : > { %v6743_v40 = vmul.f32 1.442695, %v6671_v0 }
 0x463   : > { %v6422_v1 = vpop.f32.mrf.mxu0  ;;  %v13284_v34 = vmul.f32 100.0, %v13258_v17 }
 0x464   : > { %v13265_v55 = vadd.f32 %v6422_v1, %v13252_v9  ;;  %8718 = vmatmul.msk.f32.vlgmr.msrb.gmra.mxu3 %vm15478_vm0, %v13158_v39  ;;  %8711 = vmatmul.msk.f32.gmra.mxu1 %vm15511_vm15, %v13211_v6  ;;  %vm6703_vm15 = vcmp.gt.f32.partialorder %v13274_v59, 20.0 }
 0x465   : > { %v6672_v41 = vmin.f32 %v13284_v34, 20.0 }
 0x466   : > { %v13294_v63 = vmul.f32 100.0, %v13265_v55 }
 0x467   : > { %v6745_v47 = vmul.f32 1.442695, %v6672_v41 }
 0x468   : > { %v6451_v7 = vpop.f32.mrf.mxu1  ;;  %v6679_v29 = vmin.f32 %v13294_v63, 20.0  ;;  %vm6711_vm14 = vcmp.gt.f32.partialorder %v13294_v63, 20.0 }
 0x469   : > { %v13287_v35 = vadd.f32 %v6451_v7, %v13252_v9  ;;  %8714 = vmatmul.msk.f32.gmra.mxu2 %vm15515_vm2, %v13179_v58  ;;  %vm6704_vm2 = vcmp.gt.f32.partialorder %v13284_v34, 20.0 }
 0x46a   : > { %v6759_v26 = vmul.f32 1.442695, %v6679_v29 }
 0x46b   : > { %v6425_v18 = vpop.f32.mrf.mxu0  ;;  %v13306_v23 = vmul.f32 100.0, %v13287_v35 }
 0x46c   : > { %v13244_v31 = vadd.f32 %v6425_v18, %v13227_v42  ;;  %8719 = vmatmul.msk.f32.gmra.mxu3 %vm15516_vm8, %v13179_v58  ;;  %vm6695_vm8 = vcmp.gt.f32.partialorder %v13247_v51, 20.0 }
 0x46d   : > { %v6680_v2 = vmin.f32 %v13306_v23, 20.0  ;;  %vm6712_vm0 = vcmp.gt.f32.partialorder %v13306_v23, 20.0 }
 0x46e   : > { %v13268_v15 = vmul.f32 100.0, %v13244_v31 }
 0x46f   : > { %v6761_v7 = vmul.f32 1.442695, %v6680_v2 }
 0x470   : > { %v6454_v61 = vpop.f32.mrf.mxu1  ;;  %v6687_v13 = vmin.f32 %v13268_v15, 20.0  ;;  %vm6719_vm3 = vcmp.gt.f32.partialorder %v13268_v15, 20.0 }
 0x471   : > { %v13277_v5 = vadd.f32 %v6454_v61, %v13227_v42  ;;  %v13355_v61 = vpop.eup %8913  ;;  %8715 = vmatmul.msk.f32.gmra.mxu2 %vm15524_vm6, %v13190_v62 }
 0x472   : > { %v6775_v4 = vmul.f32 1.442695, %v6687_v13 }
 0x473   : > { %v6474_v28 = vpop.f32.mrf.mxu2  ;;  %v13302_v25 = vmul.f32 100.0, %v13277_v5 }
 0x474   : > { %v13291_v48 = vadd.f32 %v6474_v28, %v13233_v56  ;;  %8917 = vpow2.f32 %v6775_v4  ;;  %8720 = vmatmul.msk.f32.gmra.mxu3 %vm15525_vm5, %v13190_v62  ;;  %vm6696_vm5 = vcmp.gt.f32.partialorder %v13255_v30, 20.0 }
 0x475   : > { %v6688_v60 = vmin.f32 %v13302_v25, 20.0  ;;  %8919 = vpow2.f32 %v6743_v40  ;;  %vm6720_vm10 = vcmp.gt.f32.partialorder %v13302_v25, 20.0 }
 0x476   : > { %v6503_v54 = vpop.f32.mrf.mxu3  ;;  %15507 = vst [vmem:[#allocation36_spill] sm:$0xff] %v13291_v48  ;;  %v13316_v50 = vmul.f32 100.0, %v13291_v48  ;;  %8921 = vpow2.f32 %v6745_v47 }
 0x477   : > { %v13297_v8 = vadd.f32 %v6503_v54, %v13233_v56  ;;  %v6777_v33 = vmul.f32 1.442695, %v6688_v60  ;;  %8923 = vpow2.f32 %v6759_v26 }
 0x478   : > { %15512 = vst [vmem:[#allocation37_spill] sm:$0xff] %v13316_v50  ;;  %v6665_v11 = vmin.f32 %v13316_v50, 20.0 }
 0x479   : > { %15508 = vst [vmem:[#allocation57_spill] sm:$0xff] %v13297_v8  ;;  %v13323_v36 = vmul.f32 100.0, %v13297_v8  ;;  %8925 = vpow2.f32 %v6777_v33  ;;  %8716 = vmatmul.msk.f32.gmra.mxu2 %vm15529_vm1, %v13211_v6 }
 0x47a   : > { %v6731_v32 = vmul.f32 1.442695, %v6665_v11  ;;  %8927 = vpow2.f32 %v6761_v7 }
 0x47b   : > { %v6477_v46 = vpop.f32.mrf.mxu2  ;;  %15514 = vst [vmem:[#allocation62_spill] sm:$0xff] %v13323_v36  ;;  %v6666_v38 = vmin.f32 %v13323_v36, 20.0 }
 0x47c   : > { %v13309_v53 = vadd.f32 %v6477_v46, %v13241_v14  ;;  %8929 = vpow2.f32 %v6731_v32  ;;  %8721 = vmatmul.msk.f32.gmra.mxu3 %vm15530_vm7, %v13211_v6 }
 0x47d   : > { %v6733_v3 = vmul.f32 1.442695, %v6666_v38 }
 0x47e   : > { %v6506_v21 = vpop.f32.mrf.mxu3  ;;  %15509 = vst [vmem:[#allocation32_spill] sm:$0xff] %v13309_v53  ;;  %v13332_v45 = vmul.f32 100.0, %v13309_v53 }
 0x47f   : > { %v13319_v49 = vadd.f32 %v6506_v21, %v13241_v14  ;;  %v13364_v21 = vpop.eup %8915  ;;  %8931 = vpow2.f32 %v6733_v3 }
 0x480   : > { %15517 = vst [vmem:[#allocation64_spill] sm:$0xff] %v13332_v45  ;;  %v6673_v28 = vmin.f32 %v13332_v45, 20.0  ;;  %v8918_v41 = vpop.eup %8917  ;;  %v6803_v59 = vmul.f32 -0.5, %v13364_v21 }
 0x481   : > { %15513 = vst [vmem:[#allocation35_spill] sm:$0xff] %v13319_v49  ;;  %v13339_v16 = vmul.f32 100.0, %v13319_v49  ;;  %v13378_v60 = vpop.eup %8919  ;;  %v7007_v7 = vadd.f32 1.0, %v8918_v41 }
 0x482   : > { %v6747_v27 = vmul.f32 1.442695, %v6673_v28  ;;  %v13384_v62 = vpop.eup %8921  ;;  %v7010_v28 = vmul.f32 -0.5, %v8918_v41 }
 0x483   : > { %v6480_v44 = vpop.f32.mrf.mxu2  ;;  %15518 = vst [vmem:[#allocation39_spill] sm:$0xff] %v13339_v16  ;;  %v6674_v37 = vmin.f32 %v13339_v16, 20.0 }
 0x484   : > { %v13335_v10 = vadd.f32 %v6480_v44, %v13252_v9  ;;  %8933 = vpow2.f32 %v6747_v27 }
 0x485   : > { %v6532_v39 = vpop.f32.mrf.mxu0  ;;  %v6749_v44 = vmul.f32 1.442695, %v6674_v37 }
 0x486   : > { %v13342_v22 = vadd.f32 %v6532_v39, %v13233_v56  ;;  %v6509_v58 = vpop.f32.mrf.mxu3  ;;  %v13349_v1 = vmul.f32 100.0, %v13335_v10 }
 0x487   : > { %v13346_v20 = vadd.f32 %v6509_v58, %v13252_v9  ;;  %8935 = vpow2.f32 %v6749_v44  ;;  %v7013_v44 = vand.u32 2147483647, %v8918_v41 }
 0x488   : > { %15519 = vst [vmem:[#allocation76_spill] sm:$0xff] %v13342_v22  ;;  %v13353_v18 = vmul.f32 100.0, %v13342_v22  ;;  %v6681_v24 = vmin.f32 %v13349_v1, 20.0  ;;  %8937 = vlog2.f32 %v7007_v7 }
 0x489   : > { %15520 = vst [vmem:[#allocation61_spill] sm:$0xff] %v13346_v20  ;;  %v6561_v54 = vpop.f32.mrf.mxu1  ;;  %v13362_v46 = vmul.f32 100.0, %v13346_v20  ;;  %vm13439_vm13 = vcmp.lt.f32.partialorder %v7013_v44, 0.0004427343 }
 0x48a   : > { %15521 = vst [vmem:[#allocation71_spill] sm:$0xff] %v13353_v18  ;;  %v13359_v43 = vadd.f32 %v6561_v54, %v13233_v56  ;;  %v6667_v29 = vmin.f32 %v13353_v18, 20.0  ;;  %v6763_v38 = vmul.f32 1.442695, %v6681_v24  ;;  %v13396_v54 = vpop.eup %8923 }
 0x48b   : > { %v6483_v0 = vpop.f32.mrf.mxu2  ;;  %v6682_v47 = vmin.f32 %v13362_v46, 20.0  ;;  %v13398_v3 = vpop.eup %8925  ;;  %v6935_v36 = vadd.f32 1.0, %v13396_v54 }
 0x48c   : > { %15522 = vst [vmem:[#allocation50_spill] sm:$0xff] %v13359_v43  ;;  %v13367_v13 = vmul.f32 100.0, %v13359_v43  ;;  %v13376_v40 = vadd.f32 %v6483_v0, %v13227_v42  ;;  %v6735_v32 = vmul.f32 1.442695, %v6667_v29  ;;  %v13404_v24 = vpop.eup %8927  ;;  %8939 = vpow2.f32 %v6763_v38 }
 0x48d   : > { %v6535_v4 = vpop.f32.mrf.mxu0  ;;  %v6765_v0 = vmul.f32 1.442695, %v6682_v47  ;;  %v13410_v27 = vpop.eup %8929  ;;  %v7011_v29 = vadd.f32 1.0, %v7010_v28  ;;  %v13413_v47 = vadd.f32 1.0, %v13355_v61  ;;  %v7016_v7 = vadd.f32 1.0, %v13398_v3 }
 0x48e   : > { %15523 = vst [vmem:[#allocation55_spill] sm:$0xff] %v13367_v13  ;;  %v13382_v2 = vadd.f32 %v6535_v4, %v13241_v14  ;;  %v6512_v39 = vpop.f32.mrf.mxu3  ;;  %v6668_v11 = vmin.f32 %v13367_v13, 20.0  ;;  %v13388_v58 = vmul.f32 100.0, %v13376_v40  ;;  %8941 = vpow2.f32 %v6735_v32 }
 0x48f   : > { %v13391_v26 = vadd.f32 %v6512_v39, %v13227_v42  ;;  %v7019_v18 = vmul.f32 -0.5, %v13398_v3  ;;  %v13424_v38 = vmul.f32 -0.5, %v13355_v61  ;;  %8943 = vpow2.f32 %v6765_v0 }
 0x490   : > { %15526 = vst [vmem:[#allocation20_spill] sm:$0xff] %v13382_v2  ;;  %v13394_v33 = vmul.f32 100.0, %v13382_v2  ;;  %v6689_v4 = vmin.f32 %v13388_v58, 20.0  ;;  %v6737_v43 = vmul.f32 1.442695, %v6668_v11  ;;  %v13419_v11 = vpop.eup %8931  ;;  %v7012_v49 = vmul.f32 %v8918_v41, %v7011_v29 }
 0x491   : > { %v6564_v37 = vpop.f32.mrf.mxu1  ;;  %v13402_v39 = vmul.f32 100.0, %v13391_v26  ;;  %15531 = vst [vmem:[#allocation85_spill] sm:$0xff] %v13419_v11  ;;  %v13431_v6 = vpop.eup %8933 }
 0x492   : > { %15527 = vst [vmem:[#allocation31_spill] sm:$0xff] %v13394_v33  ;;  %v6675_v13 = vmin.f32 %v13394_v33, 20.0  ;;  %v13408_v22 = vadd.f32 %v6564_v37, %v13241_v14  ;;  %v6779_v28 = vmul.f32 1.442695, %v6689_v4  ;;  %8945 = vpow2.f32 %v6737_v43  ;;  %v13437_v48 = vpop.eup %8935 }
 0x493   : > { %v6690_v2 = vmin.f32 %v13402_v39, 20.0  ;;  %8947 = vlog2.f32 %v7016_v7  ;;  %v7022_v4 = vand.u32 2147483647, %v13398_v3 }
 0x494   : > { %15528 = vst [vmem:[#allocation52_spill] sm:$0xff] %v13408_v22  ;;  %v6751_v32 = vmul.f32 1.442695, %v6675_v13  ;;  %v13434_v8 = vmul.f32 100.0, %v13408_v22  ;;  %v7020_v13 = vadd.f32 1.0, %v7019_v18  ;;  %8949 = vlog2.f32 %v6935_v36 }
 0x495   : > { %v6538_v37 = vpop.f32.mrf.mxu0  ;;  %v6938_v22 = vmul.f32 -0.5, %v13396_v54  ;;  %8951 = vpow2.f32 %v6779_v28  ;;  %v6781_v41 = vmul.f32 1.442695, %v6690_v2  ;;  %v6944_v36 = vadd.f32 1.0, %v13404_v24 }
 0x496   : > { %v13429_v33 = vadd.f32 %v6538_v37, %v13252_v9  ;;  %15533 = vst [vmem:[#allocation40_spill] sm:$0xff] %v13434_v8  ;;  %v8938_v37 = vpop.eup %8937  ;;  %8953 = vpow2.f32 %v6751_v32  ;;  %vm13462_vm12 = vcmp.lt.f32.partialorder %v7022_v4, 0.0004427343 }
 0x497   : > { %v13448_v50 = vpop.eup %8939  ;;  %v7009_v44 = vmul.f32 0.6931472, %v8938_v37  ;;  %v6939_v20 = vadd.f32 1.0, %v6938_v22  ;;  %v6941_v37 = vand.u32 2147483647, %v13396_v54  ;;  %8955 = vlog2.f32 %v6944_v36 }
 0x498   : > { %15532 = vst [vmem:[#allocation51_spill] sm:$0xff] %v13429_v33  ;;  %v13445_v53 = vmul.f32 100.0, %v13429_v33  ;;  %v13453_v7 = vpop.eup %8941  ;;  %v6676_v33 = vmin.f32 %v13434_v8, 20.0  ;;  %v7021_v8 = vmul.f32 %v13398_v3, %v7020_v13  ;;  %v6950_v3 = vand.u32 2147483647, %v13404_v24 }
 0x499   : > { %v6567_v43 = vpop.f32.mrf.mxu1  ;;  %15538 = vst [vmem:[#allocation54_spill] sm:$0xff] %v13453_v7  ;;  %v13458_v18 = vpop.eup %8943  ;;  %v7015_v28 = vsel %vm13439_vm13, %v7012_v49, %v7009_v44  ;;  %v6940_v44 = vmul.f32 %v13396_v54, %v6939_v20  ;;  %v6863_v13 = vadd.f32 1.0, %v13378_v60  ;;  %8957 = vpow2.f32 %v6781_v41 }
 0x49a   : > { %15536 = vst [vmem:[#allocation53_spill] sm:$0xff] %v13445_v53  ;;  %v13451_v29 = vadd.f32 %v6567_v43, %v13252_v9  ;;  %v6947_v43 = vmul.f32 -0.5, %v13404_v24  ;;  %v13468_v7 = vpop.eup %8945  ;;  %v6683_v32 = vmin.f32 %v13445_v53, 20.0  ;;  %v7103_v22 = vmul.f32 %v7015_v28, %v12674_v52 }
 0x49b   : > { %15541 = vst [vmem:[#allocation65_spill] sm:$0xff] %v13468_v7  ;;  %v8948_v0 = vpop.eup %8947  ;;  %vm13488_vm9 = vcmp.lt.f32.partialorder %v6941_v37, 0.0004427343  ;;  %8959 = vlog2.f32 %v6863_v13  ;;  %v6866_v41 = vmul.f32 -0.5, %v13378_v60  ;;  %vm13508_vm4 = vcmp.lt.f32.partialorder %v6950_v3, 0.0004427343 }
 0x49c   : > { %15537 = vst [vmem:[#allocation47_spill] sm:$0xff] %v13451_v29  ;;  %v13474_v49 = vmul.f32 100.0, %v13451_v29  ;;  %v6948_v11 = vadd.f32 1.0, %v6947_v43  ;;  %v8950_v45 = vpop.eup %8949  ;;  %v7135_v7 = vsel %vm6719_vm3, %v13244_v31, %v7103_v22  ;;  %v7018_v28 = vmul.f32 0.6931472, %v8948_v0 }
 0x49d   : > { %v6541_v16 = vpop.f32.mrf.mxu0  ;;  %v13485_v36 = vpop.eup %8951  ;;  %7450 = vmatpush.msra.mxu0 %v7135_v7  ;;  %v6753_v7 = vmul.f32 1.442695, %v6676_v33  ;;  %v6767_v22 = vmul.f32 1.442695, %v6683_v32  ;;  %v6867_v32 = vadd.f32 1.0, %v6866_v41  ;;  %v6872_v3 = vadd.f32 1.0, %v13384_v62 }
 0x49e   : > { %v13477_v4 = vadd.f32 %v6541_v16, %v13227_v42  ;;  %v6937_v16 = vmul.f32 0.6931472, %v8950_v45  ;;  %v13492_v54 = vpop.eup %8953  ;;  %v7024_v31 = vsel %vm13462_vm12, %v7021_v8, %v7018_v28  ;;  %v6949_v37 = vmul.f32 %v13404_v24, %v6948_v11 }
 0x49f   : > { %v7104_v45 = vmul.f32 %v7024_v31, %v12674_v52  ;;  %v8956_v0 = vpop.eup %8955  ;;  %v6684_v29 = vmin.f32 %v13474_v49, 20.0  ;;  %8961 = vpow2.f32 %v6753_v7  ;;  %v6875_v7 = vmul.f32 -0.5, %v13384_v62 }
 0x4a0   : > { %v13497_v15 = vmul.f32 100.0, %v13477_v4  ;;  %v6943_v8 = vsel %vm13488_vm9, %v6940_v44, %v6937_v16  ;;  %v6946_v11 = vmul.f32 0.6931472, %v8956_v0  ;;  %v6869_v44 = vand.u32 2147483647, %v13378_v60  ;;  %v13522_v16 = vpop.eup %8957 }
 0x4a1   : > { %v6570_v43 = vpop.f32.mrf.mxu1  ;;  %v7136_v33 = vsel %vm6720_vm10, %v13277_v5, %v7104_v45  ;;  %v7095_v24 = vmul.f32 %v6943_v8, %v12674_v52  ;;  %v6769_v41 = vmul.f32 1.442695, %v6684_v29  ;;  %8963 = vlog2.f32 %v6872_v3 }
 0x4a2   : > { %v13504_v53 = vadd.f32 %v6570_v43, %v13227_v42  ;;  %7479 = vmatpush.msra.mxu1 %v7136_v33  ;;  %v6691_v13 = vmin.f32 %v13497_v15, 20.0  ;;  %v6952_v20 = vsel %vm13508_vm4, %v6949_v37, %v6946_v11  ;;  %v8960_v43 = vpop.eup %8959  ;;  %v6868_v33 = vmul.f32 %v13378_v60, %v6867_v32 }
 0x4a3   : > { %v7127_v5 = vsel %vm6711_vm14, %v13265_v55, %v7095_v24  ;;  %v7096_v0 = vmul.f32 %v6952_v20, %v12674_v52  ;;  %8965 = vpow2.f32 %v6767_v22  ;;  %vm6870_vm11 = vcmp.lt.f32.partialorder %v6869_v44, 0.0004427343 }
 0x4a4   : > { %v6590_v28 = vpop.f32.mrf.mxu2  ;;  %v13518_v31 = vmul.f32 100.0, %v13504_v53  ;;  %7451 = vmatpush.msra.mxu0 %v7127_v5  ;;  %v6783_v55 = vmul.f32 1.442695, %v6691_v13  ;;  %8967 = vlog2.f32 %v13413_v47  ;;  %v6876_v22 = vadd.f32 1.0, %v6875_v7 }
 0x4a5   : > { %v13525_v25 = vadd.f32 %v6590_v28, %v13233_v56  ;;  %v6865_v28 = vmul.f32 0.6931472, %v8960_v43  ;;  %v7128_v63 = vsel %vm6712_vm0, %v13287_v35, %v7096_v0  ;;  %8969 = vpow2.f32 %v6769_v41  ;;  %v13547_v2 = vpop.eup %8961 }
 0x4a6   : > { %v6692_v8 = vmin.f32 %v13518_v31, 20.0  ;;  %7480 = vmatpush.msra.mxu1 %v7128_v63  ;;  %v6878_v11 = vand.u32 2147483647, %v13384_v62  ;;  %v6795_v32 = vadd.f32 1.0, %v13424_v38  ;;  %8971 = vpow2.f32 %v6783_v55 }
 0x4a7   : > { %15546 = vst [vmem:[#allocation69_spill] sm:$0xff] %v13525_v25  ;;  %v6619_v45 = vpop.f32.mrf.mxu3  ;;  %v13539_v29 = vmul.f32 100.0, %v13525_v25  ;;  %v6871_v37 = vsel %vm6870_vm11, %v6868_v33, %v6865_v28  ;;  %v8964_v47 = vpop.eup %8963  ;;  %v6797_v38 = vand.u32 2147483647, %v13355_v61  ;;  %v6877_v41 = vmul.f32 %v13384_v62, %v6876_v22 }
 0x4a8   : > { %v13542_v23 = vadd.f32 %v6619_v45, %v13233_v56  ;;  %v7087_v60 = vmul.f32 %v6871_v37, %v12674_v52  ;;  %v6785_v35 = vmul.f32 1.442695, %v6692_v8  ;;  %v6800_v56 = vadd.f32 1.0, %v13364_v21 }
 0x4a9   : > { %v6669_v44 = vmin.f32 %v13539_v29, 20.0  ;;  %v13561_v5 = vpop.eup %8965  ;;  %v6874_v43 = vmul.f32 0.6931472, %v8964_v47  ;;  %v7025_v45 = vadd.f32 1.0, %v13485_v36  ;;  %vm6879_vm6 = vcmp.lt.f32.partialorder %v6878_v11, 0.0004427343 }
 0x4aa   : > { %15547 = vst [vmem:[#allocation63_spill] sm:$0xff] %v13542_v23  ;;  %v7119_v13 = vsel %vm6703_vm15, %v13250_v57, %v7087_v60  ;;  %v13558_v3 = vmul.f32 100.0, %v13542_v23  ;;  %8973 = vlog2.f32 %v6800_v56  ;;  %v8968_v0 = vpop.eup %8967  ;;  %v6796_v7 = vmul.f32 %v13355_v61, %v6795_v32 }
 0x4ab   : > { %7452 = vmatpush.msra.mxu0 %v7119_v13  ;;  %8975 = vpow2.f32 %v6785_v35  ;;  %v7028_v8 = vmul.f32 -0.5, %v13485_v36  ;;  %v13570_v28 = vpop.eup %8969  ;;  %v6880_v33 = vsel %vm6879_vm6, %v6877_v41, %v6874_v43  ;;  %v6793_v55 = vmul.f32 0.6931472, %v8968_v0  ;;  %v13645_v41 = vld [vmem:[%s14704_s6 + $0x8] sm:$0xff] }
 0x4ac   : > { %v6593_v24 = vpop.f32.mrf.mxu2  ;;  %15548 = vst [vmem:[#allocation72_spill] sm:$0xff] %v13558_v3  ;;  %v6804_v63 = vadd.f32 1.0, %v6803_v59  ;;  %v6806_v37 = vand.u32 2147483647, %v13364_v21  ;;  %v6739_v60 = vmul.f32 1.442695, %v6669_v44  ;;  %v7088_v62 = vmul.f32 %v6880_v33, %v12674_v52  ;;  %v13575_v22 = vpop.eup %8971 }
 0x4ad   : > { %v13564_v57 = vadd.f32 %v6593_v24, %v13241_v14  ;;  %vm6798_vm1 = vcmp.lt.f32.partialorder %v6797_v38, 0.0004427343  ;;  %8977 = vlog2.f32 %v7025_v45  ;;  %v6670_v61 = vmin.f32 %v13558_v3, 20.0 }
 0x4ae   : > { %v6799_v24 = vsel %vm6798_vm1, %v6796_v7, %v6793_v55  ;;  %v7034_v11 = vadd.f32 1.0, %v13522_v16  ;;  %v7120_v13 = vsel %vm6704_vm2, %v13258_v17, %v7088_v62  ;;  %v7029_v44 = vadd.f32 1.0, %v7028_v8 }
 0x4af   : > { %v6622_v20 = vpop.f32.mrf.mxu3  ;;  %v13579_v35 = vmul.f32 100.0, %v13564_v57  ;;  %v7079_v59 = vmul.f32 %v6799_v24, %v12674_v52  ;;  %7481 = vmatpush.msra.mxu1 %v7120_v13  ;;  %v6805_v43 = vmul.f32 %v13364_v21, %v6804_v63  ;;  %vm13590_vm7 = vcmp.lt.f32.partialorder %v6806_v37, 0.0004427343 }
 0x4b0   : > { %v8974_v32 = vpop.eup %8973  ;;  %v13583_v56 = vadd.f32 %v6622_v20, %v13241_v14  ;;  %v13597_v14 = vld [vmem:[%s14704_s6] sm:$0xff]  ;;  %v7031_v21 = vand.u32 2147483647, %v13485_v36  ;;  %8979 = vlog2.f32 %v7034_v11  ;;  %v7037_v45 = vmul.f32 -0.5, %v13522_v16 }
 0x4b1   : > { %v6802_v38 = vmul.f32 0.6931472, %v8974_v32  ;;  %v13602_v17 = vpop.eup %8975  ;;  %v7111_v20 = vsel %vm6695_vm8, %v13236_v12, %v7079_v59  ;;  %8981 = vpow2.f32 %v6739_v60  ;;  %v6741_v0 = vmul.f32 1.442695, %v6670_v61 }
 0x4b2   : > { %v6677_v7 = vmin.f32 %v13579_v35, 20.0  ;;  %7453 = vmatpush.msra.mxu0 %v7111_v20  ;;  %v13613_v63 = vmul.f32 100.0, %v13583_v56  ;;  %vm15551_vm3 = vcmask 261120   ;;  %v7030_v37 = vmul.f32 %v13485_v36, %v7029_v44 }
 0x4b3   : > { %v6808_v8 = vsel %vm13590_vm7, %v6805_v43, %v6802_v38  ;;  %v8978_v55 = vpop.eup %8977  ;;  %8722 = vmatmul.msk.f32.vlgmr.msra.gmra.mxu0 %vm15551_vm3, %v13597_v14  ;;  %v7038_v61 = vadd.f32 1.0, %v7037_v45  ;;  %v6953_v24 = vadd.f32 1.0, %v13448_v50  ;;  %vm7032_vm13 = vcmp.lt.f32.partialorder %v7031_v21, 0.0004427343  ;;  %vm15552_vm12 = vmmov %vm15551_vm3 }
 0x4b4   : > { %v6596_v47 = vpop.f32.mrf.mxu2  ;;  %v7080_v12 = vmul.f32 %v6808_v8, %v12674_v52  ;;  %v7027_v62 = vmul.f32 0.6931472, %v8978_v55  ;;  %v7040_v32 = vand.u32 2147483647, %v13522_v16  ;;  %v6956_v13 = vmul.f32 -0.5, %v13448_v50  ;;  %vm15553_vm9 = vmmov %vm15551_vm3 }
 0x4b5   : > { %v13600_v34 = vadd.f32 %v6596_v47, %v13252_v9  ;;  %8983 = vlog2.f32 %v6953_v24  ;;  %vm6721_vm10 = vcmp.gt.f32.partialorder %v13388_v58, 20.0  ;;  %v6678_v44 = vmin.f32 %v13613_v63, 20.0  ;;  %vm15554_vm11 = vmmov %vm15551_vm3 }
 0x4b6   : > { %v7112_v11 = vsel %vm6696_vm5, %v13239_v19, %v7080_v12  ;;  %v7033_v59 = vsel %vm7032_vm13, %v7030_v37, %v7027_v62  ;;  %v8980_v47 = vpop.eup %8979  ;;  %8985 = vpow2.f32 %v6741_v0  ;;  %v7039_v58 = vmul.f32 %v13522_v16, %v7038_v61  ;;  %vm15555_vm8 = vmmov %vm15551_vm3 }
 0x4b7   : > { %v6625_v33 = vpop.f32.mrf.mxu3  ;;  %v13623_v60 = vmul.f32 100.0, %v13600_v34  ;;  %7482 = vmatpush.msra.mxu1 %v7112_v11  ;;  %v7105_v19 = vmul.f32 %v7033_v59, %v12674_v52  ;;  %v13639_v38 = vpop.eup %8981  ;;  %v7036_v20 = vmul.f32 0.6931472, %v8980_v47  ;;  %vm7041_vm14 = vcmp.lt.f32.partialorder %v7040_v32, 0.0004427343 }
 0x4b8   : > { %v13619_v51 = vadd.f32 %v6625_v33, %v13252_v9  ;;  %v6755_v9 = vmul.f32 1.442695, %v6677_v7  ;;  %8726 = vmatmul.msk.f32.vlgmr.msra.gmra.mxu1 %vm15552_vm12, %v13597_v14  ;;  %v6957_v0 = vadd.f32 1.0, %v6956_v13  ;;  %v6962_v7 = vadd.f32 1.0, %v13458_v18  ;;  %vm15565_vm12 = vmmov %vm15551_vm3 }
 0x4b9   : > { %v6685_v43 = vmin.f32 %v13623_v60, 20.0  ;;  %v7137_v45 = vsel %vm6721_vm10, %v13376_v40, %v7105_v19  ;;  %v7042_v33 = vsel %vm7041_vm14, %v7039_v58, %v7036_v20  ;;  %v6959_v12 = vand.u32 2147483647, %v13448_v50  ;;  %v13686_v58 = vld [vmem:[%s14704_s6 + $0x10] sm:$0xff] }
 0x4ba   : > { %v13632_v36 = vmul.f32 100.0, %v13619_v51  ;;  %8987 = vpow2.f32 %v6755_v9  ;;  %7508 = vmatpush.msra.mxu2 %v7137_v45  ;;  %v6757_v37 = vmul.f32 1.442695, %v6678_v44  ;;  %v7106_v16 = vmul.f32 %v7042_v33, %v12674_v52 }
 0x4bb   : > { %8723 = vmatmul.msk.f32.gmra.mxu0 %vm15553_vm9, %v13645_v41  ;;  %v6965_v62 = vmul.f32 -0.5, %v13458_v18  ;;  %v8984_v61 = vpop.eup %8983  ;;  %vm6722_vm4 = vcmp.gt.f32.partialorder %v13402_v39, 20.0  ;;  %v6771_v24 = vmul.f32 1.442695, %v6685_v43  ;;  %8989 = vlog2.f32 %v6962_v7 }
 0x4bc   : > { %v6599_v30 = vpop.f32.mrf.mxu2  ;;  %v6686_v8 = vmin.f32 %v13632_v36, 20.0  ;;  %v13666_v32 = vpop.eup %8985  ;;  %v7138_v13 = vsel %vm6722_vm4, %v13391_v26, %v7106_v16  ;;  %v6955_v59 = vmul.f32 0.6931472, %v8984_v61  ;;  %vm6960_vm0 = vcmp.lt.f32.partialorder %v6959_v12, 0.0004427343  ;;  %v15556_v61 = vld [vmem:[#allocation64_spill] sm:$0xff] }
 0x4bd   : > { %v13649_v21 = vadd.f32 %v6599_v30, %v13227_v42  ;;  %7537 = vmatpush.msra.mxu3 %v7138_v13  ;;  %v6881_v39 = vadd.f32 1.0, %v13431_v6  ;;  %v6884_v44 = vmul.f32 -0.5, %v13431_v6  ;;  %8991 = vpow2.f32 %v6757_v37 }
 0x4be   : > { %v6773_v47 = vmul.f32 1.442695, %v6686_v8  ;;  %vm6713_vm15 = vcmp.gt.f32.partialorder %v13349_v1, 20.0  ;;  %v6966_v19 = vadd.f32 1.0, %v6965_v62  ;;  %8993 = vpow2.f32 %v6771_v24 }
 0x4bf   : > { %v6628_v55 = vpop.f32.mrf.mxu3  ;;  %v13664_v11 = vmul.f32 100.0, %v13649_v21  ;;  %v6968_v20 = vand.u32 2147483647, %v13458_v18  ;;  %vm6714_vm2 = vcmp.gt.f32.partialorder %v13362_v46, 20.0  ;;  %8995 = vlog2.f32 %v6881_v39 }
 0x4c0   : > { %v13659_v40 = vadd.f32 %v6628_v55, %v13227_v42  ;;  %v6958_v42 = vmul.f32 %v13448_v50, %v6957_v0  ;;  %8727 = vmatmul.msk.f32.gmra.mxu1 %vm15554_vm11, %v13645_v41  ;;  %v13678_v30 = vpop.eup %8987  ;;  %v6890_v1 = vadd.f32 1.0, %v13437_v48  ;;  %8997 = vpow2.f32 %v6773_v47  ;;  %vm15569_vm11 = vmmov %vm15551_vm3 }
 0x4c1   : > { %v6693_v50 = vmin.f32 %v13664_v11, 20.0  ;;  %v8990_v0 = vpop.eup %8989  ;;  %v6885_v8 = vadd.f32 1.0, %v6884_v44  ;;  %v6887_v33 = vand.u32 2147483647, %v13431_v6  ;;  %v6967_v12 = vmul.f32 %v13458_v18, %v6966_v19  ;;  %v15566_v44 = vld [vmem:[#allocation32_spill] sm:$0xff] }
 0x4c2   : > { %v13670_v9 = vmul.f32 100.0, %v13659_v40  ;;  %v6961_v26 = vsel %vm6960_vm0, %v6958_v42, %v6955_v59  ;;  %v6964_v55 = vmul.f32 0.6931472, %v8990_v0  ;;  %v6893_v37 = vmul.f32 -0.5, %v13437_v48 }
 0x4c3   : > { %v7097_v43 = vmul.f32 %v6961_v26, %v12674_v52  ;;  %8724 = vmatmul.msk.f32.gmra.mxu0 %vm15555_vm8, %v13686_v58  ;;  %v6809_v16 = vadd.f32 1.0, %v13410_v27  ;;  %v13698_v62 = vmul.f32 1.442695, %v6693_v50  ;;  %vm6969_vm6 = vcmp.lt.f32.partialorder %v6968_v20, 0.0004427343  ;;  %v13702_v24 = vpop.eup %8991  ;;  %v15559_v26 = vld [vmem:[#allocation85_spill] sm:$0xff]  ;;  %vm15573_vm8 = vmmov %vm15551_vm3 }
 0x4c4   : > { %v6694_v45 = vmin.f32 %v13670_v9, 20.0  ;;  %vm6705_vm5 = vcmp.gt.f32.partialorder %v15556_v61, 20.0  ;;  %8999 = vlog2.f32 %v6890_v1  ;;  %v6970_v18 = vsel %vm6969_vm6, %v6967_v12, %v6964_v55  ;;  %v13707_v42 = vpop.eup %8993  ;;  %v15562_v55 = vld [vmem:[#allocation37_spill] sm:$0xff] }
 0x4c5   : > { %v7129_v7 = vsel %vm6713_vm15, %v13335_v10, %v7097_v43  ;;  %v6812_v10 = vmul.f32 -0.5, %v13410_v27  ;;  %v6896_v59 = vand.u32 2147483647, %v13437_v48  ;;  %9001 = vlog2.f32 %v6809_v16  ;;  %v8996_v50 = vpop.eup %8995  ;;  %v15560_v43 = vld [vmem:[#allocation39_spill] sm:$0xff] }
 0x4c6   : > { %7509 = vmatpush.msra.mxu2 %v7129_v7  ;;  %v13704_v13 = vmul.f32 1.442695, %v6694_v45  ;;  %v7098_v47 = vmul.f32 %v6970_v18, %v12674_v52  ;;  %v6886_v39 = vmul.f32 %v13431_v6, %v6885_v8  ;;  %vm13711_vm1 = vcmp.lt.f32.partialorder %v6887_v33, 0.0004427343  ;;  %v13722_v6 = vpop.eup %8997  ;;  %v15561_v7 = vld [vmem:[#allocation61_spill] sm:$0xff] }
 0x4c7   : > { %v6818_v19 = vadd.f32 1.0, %v15559_v26  ;;  %vm6706_vm7 = vcmp.gt.f32.partialorder %v15560_v43, 20.0  ;;  %v6894_v20 = vadd.f32 1.0, %v6893_v37  ;;  %v6815_v45 = vand.u32 2147483647, %v13410_v27  ;;  %v13731_v37 = vld [vmem:[%s14704_s6 + $0x18] sm:$0xff] }
 0x4c8   : > { %8728 = vmatmul.msk.f32.gmra.mxu1 %vm15551_vm3, %v13686_v58  ;;  %v6821_v1 = vmul.f32 -0.5, %v15559_v26  ;;  %v7043_v0 = vadd.f32 1.0, %v13575_v22  ;;  %v7130_v8 = vsel %vm6714_vm2, %v15561_v7, %v7098_v47  ;;  %v6883_v33 = vmul.f32 0.6931472, %v8996_v50 }
 0x4c9   : > { %vm6697_vm13 = vcmp.gt.f32.partialorder %v15562_v55, 20.0  ;;  %v6813_v12 = vadd.f32 1.0, %v6812_v10  ;;  %9003 = vlog2.f32 %v6818_v19  ;;  %7538 = vmatpush.msra.mxu3 %v7130_v8  ;;  %vm13733_vm10 = vcmp.lt.f32.partialorder %v6896_v59, 0.0004427343 }
 0x4ca   : > { %v6824_v18 = vand.u32 2147483647, %v15559_v26  ;;  %9005 = vlog2.f32 %v7043_v0  ;;  %v7046_v46 = vmul.f32 -0.5, %v13575_v22  ;;  %v9000_v47 = vpop.eup %8999  ;;  %v6889_v10 = vsel %vm13711_vm1, %v6886_v39, %v6883_v33 }
 0x4cb   : > { %v6822_v19 = vadd.f32 1.0, %v6821_v1  ;;  %v7052_v50 = vadd.f32 1.0, %v13602_v17  ;;  %v7055_v7 = vmul.f32 -0.5, %v13602_v17  ;;  %v9002_v23 = vpop.eup %9001  ;;  %v7089_v59 = vmul.f32 %v6889_v10, %v12674_v52  ;;  %8725 = vmatmul.msk.f32.gmra.mxu0 %vm15565_vm12, %v13731_v37  ;;  %v15570_v10 = vld [vmem:[#allocation35_spill] sm:$0xff] }
 0x4cc   : > { %v6892_v8 = vmul.f32 0.6931472, %v9000_v47  ;;  %v6895_v3 = vmul.f32 %v13437_v48, %v6894_v20  ;;  %v7047_v0 = vadd.f32 1.0, %v7046_v46  ;;  %vm6723_vm14 = vcmp.gt.f32.partialorder %v13497_v15, 20.0 }
 0x4cd   : > { %v6811_v25 = vmul.f32 0.6931472, %v9002_v23  ;;  %v6814_v39 = vmul.f32 %v13410_v27, %v6813_v12  ;;  %vm6816_vm9 = vcmp.lt.f32.partialorder %v6815_v45, 0.0004427343  ;;  %9007 = vlog2.f32 %v7052_v50 }
 0x4ce   : > { %v7121_v1 = vsel %vm6705_vm5, %v15566_v44, %v7089_v59  ;;  %v6898_v33 = vsel %vm13733_vm10, %v6895_v3, %v6892_v8  ;;  %vm13754_vm4 = vcmp.lt.f32.partialorder %v6824_v18, 0.0004427343  ;;  %v7049_v20 = vand.u32 2147483647, %v13575_v22  ;;  %vm15575_vm5 = vmmov %vm15551_vm3 }
 0x4cf   : > { %v9004_v46 = vpop.eup %9003  ;;  %7510 = vmatpush.msra.mxu2 %v7121_v1  ;;  %v7090_v23 = vmul.f32 %v6898_v33, %v12674_v52  ;;  %v6817_v27 = vsel %vm6816_vm9, %v6814_v39, %v6811_v25  ;;  %v6823_v45 = vmul.f32 %v15559_v26, %v6822_v19  ;;  %v7056_v12 = vadd.f32 1.0, %v7055_v7  ;;  %v15571_v7 = vld [vmem:[#allocation36_spill] sm:$0xff]  ;;  %vm15585_vm9 = vmmov %vm15575_vm5 }
 0x4d0   : > { %v9006_v47 = vpop.eup %9005  ;;  %vm6724_vm0 = vcmp.gt.f32.partialorder %v13518_v31, 20.0  ;;  %v7081_v61 = vmul.f32 %v6817_v27, %v12674_v52  ;;  %v6820_v3 = vmul.f32 0.6931472, %v9004_v46  ;;  %8729 = vmatmul.msk.f32.gmra.mxu1 %vm15569_vm11, %v13731_v37  ;;  %v7048_v16 = vmul.f32 %v13575_v22, %v7047_v0  ;;  %v15572_v0 = vld [vmem:[#allocation62_spill] sm:$0xff]  ;;  %vm15589_vm11 = vmmov %vm15575_vm5 }
 0x4d1   : > { %v6971_v18 = vadd.f32 1.0, %v13561_v5  ;;  %v7122_v25 = vsel %vm6706_vm7, %v15570_v10, %v7090_v23  ;;  %v7045_v50 = vmul.f32 0.6931472, %v9006_v47  ;;  %v7058_v26 = vand.u32 2147483647, %v13602_v17 }
 0x4d2   : > { %v6974_v19 = vmul.f32 -0.5, %v13561_v5  ;;  %7539 = vmatpush.msra.mxu3 %v7122_v25  ;;  %v7113_v59 = vsel %vm6697_vm13, %v15571_v7, %v7081_v61  ;;  %v6826_v8 = vsel %vm13754_vm4, %v6823_v45, %v6820_v3  ;;  %vm7050_vm15 = vcmp.lt.f32.partialorder %v7049_v20, 0.0004427343  ;;  %v15574_v20 = vld [vmem:[#allocation57_spill] sm:$0xff]  ;;  %v15577_v7 = vld [vmem:[#allocation54_spill] sm:$0xff]  ;;  %vm15578_vm13 = vmmov %vm15575_vm5 }
 0x4d3   : > { %9009 = vlog2.f32 %v6971_v18  ;;  %v9008_v22 = vpop.eup %9007  ;;  %7511 = vmatpush.msra.mxu2 %v7113_v59  ;;  %vm6698_vm2 = vcmp.gt.f32.partialorder %v15572_v0, 20.0  ;;  %v7082_v43 = vmul.f32 %v6826_v8, %v12674_v52  ;;  %v7051_v39 = vsel %vm7050_vm15, %v7048_v16, %v7045_v50  ;;  %v15576_v3 = vld [vmem:[#allocation53_spill] sm:$0xff]  ;;  %v15590_v8 = vld [vmem:[#allocation20_spill] sm:$0xff] }
 0x4d4   : > { %v7057_v44 = vmul.f32 %v13602_v17, %v7056_v12  ;;  %8730 = vmatmul.msk.f32.vlgmr.msra.gmra.mxu2 %vm15573_vm8, %v13597_v14  ;;  %v7107_v55 = vmul.f32 %v7051_v39, %v12674_v52  ;;  %v7054_v1 = vmul.f32 0.6931472, %v9008_v22  ;;  %v6975_v33 = vadd.f32 1.0, %v6974_v19  ;;  %v15581_v22 = vld [vmem:[#allocation31_spill] sm:$0xff]  ;;  %vm15592_vm8 = vmmov %vm15575_vm5 }
 0x4d5   : > { %v6980_v48 = vadd.f32 1.0, %v13570_v28  ;;  %9011 = vpow2.f32 %v13698_v62  ;;  %v7114_v46 = vsel %vm6698_vm2, %v15574_v20, %v7082_v43  ;;  %vm7059_vm6 = vcmp.lt.f32.partialorder %v7058_v26, 0.0004427343 }
 0x4d6   : > { %v6983_v23 = vmul.f32 -0.5, %v13570_v28  ;;  %7540 = vmatpush.msra.mxu3 %v7114_v46  ;;  %v7139_v17 = vsel %vm6723_vm14, %v13477_v4, %v7107_v55  ;;  %v7060_v27 = vsel %vm7059_vm6, %v7057_v44, %v7054_v1  ;;  %v6977_v45 = vand.u32 2147483647, %v13561_v5  ;;  %v15582_v1 = vld [vmem:[#allocation51_spill] sm:$0xff]  ;;  %v15584_v46 = vld [vmem:[#allocation65_spill] sm:$0xff] }
 0x4d7   : > { %9013 = vlog2.f32 %v6980_v48  ;;  %8734 = vmatmul.msk.f32.vlgmr.msra.gmra.mxu3 %vm15575_vm5, %v13597_v14  ;;  %7566 = vmatpush.msrb.mxu0 %v7139_v17  ;;  %v7108_v62 = vmul.f32 %v7060_v27, %v12674_v52  ;;  %v6899_v12 = vadd.f32 1.0, %v13492_v54  ;;  %v6902_v47 = vmul.f32 -0.5, %v13492_v54  ;;  %v15583_v48 = vld [vmem:[#allocation40_spill] sm:$0xff] }
 0x4d8   : > { %9015 = vpow2.f32 %v13704_v13  ;;  %vm6715_vm1 = vcmp.gt.f32.partialorder %v15576_v3, 20.0  ;;  %v6976_v4 = vmul.f32 %v13561_v5, %v6975_v33  ;;  %v6986_v15 = vand.u32 2147483647, %v13570_v28 }
 0x4d9   : > { %v9010_v61 = vpop.eup %9009  ;;  %v6908_v16 = vadd.f32 1.0, %v13547_v2  ;;  %v7140_v13 = vsel %vm6724_vm0, %v13504_v53, %v7108_v62  ;;  %v6984_v10 = vadd.f32 1.0, %v6983_v23  ;;  %9017 = vlog2.f32 %v6899_v12 }
 0x4da   : > { %v6973_v18 = vmul.f32 0.6931472, %v9010_v61  ;;  %7595 = vmatpush.msrb.mxu1 %v7140_v13  ;;  %vm6978_vm7 = vcmp.lt.f32.partialorder %v6977_v45, 0.0004427343  ;;  %vm6716_vm3 = vcmp.gt.f32.partialorder %v13474_v49, 20.0  ;;  %v6911_v25 = vmul.f32 -0.5, %v13547_v2 }
 0x4db   : > { %9019 = vlog2.f32 %v6908_v16  ;;  %v13806_v50 = vpop.eup %9011  ;;  %v6903_v26 = vadd.f32 1.0, %v6902_v47  ;;  %v6905_v19 = vand.u32 2147483647, %v13492_v54  ;;  %v6827_v59 = vadd.f32 1.0, %v15577_v7 }
 0x4dc   : > { %v6979_v5 = vsel %vm6978_vm7, %v6976_v4, %v6973_v18  ;;  %8731 = vmatmul.msk.f32.gmra.mxu2 %vm15578_vm13, %v13645_v41  ;;  %vm13813_vm10 = vcmp.lt.f32.partialorder %v6986_v15, 0.0004427343  ;;  %vm6707_vm12 = vcmp.gt.f32.partialorder %v15581_v22, 20.0  ;;  %v6830_v0 = vmul.f32 -0.5, %v15577_v7  ;;  %vm15596_vm7 = vmmov %vm15592_vm8 }
 0x4dd   : > { %v9014_v31 = vpop.eup %9013  ;;  %v7099_v53 = vmul.f32 %v6979_v5, %v12674_v52  ;;  %v6985_v44 = vmul.f32 %v13570_v28, %v6984_v10  ;;  %v6912_v55 = vadd.f32 1.0, %v6911_v25  ;;  %9021 = vlog2.f32 %v6827_v59 }
 0x4de   : > { %v13819_v43 = vpop.eup %9015  ;;  %v6982_v39 = vmul.f32 0.6931472, %v9014_v31  ;;  %vm6708_vm14 = vcmp.gt.f32.partialorder %v15583_v48, 20.0  ;;  %v6914_v20 = vand.u32 2147483647, %v13547_v2  ;;  %v6836_v23 = vadd.f32 1.0, %v15584_v46 }
 0x4df   : > { %v7131_v33 = vsel %vm6715_vm1, %v15582_v1, %v7099_v53  ;;  %v9018_v17 = vpop.eup %9017  ;;  %8735 = vmatmul.msk.f32.gmra.mxu3 %vm15585_vm9, %v13645_v41  ;;  %v6904_v27 = vmul.f32 %v13492_v54, %v6903_v26  ;;  %vm13833_vm4 = vcmp.lt.f32.partialorder %v6905_v19, 0.0004427343  ;;  %v6839_v62 = vmul.f32 -0.5, %v15584_v46  ;;  %v15588_v54 = vld [vmem:[#allocation47_spill] sm:$0xff]  ;;  %v15591_v1 = vld [vmem:[#allocation52_spill] sm:$0xff]  ;;  %vm15601_vm9 = vmmov %vm15596_vm7 }
 0x4e0   : > { %7567 = vmatpush.msrb.mxu0 %v7131_v33  ;;  %v6988_v28 = vsel %vm13813_vm10, %v6985_v44, %v6982_v39  ;;  %v6901_v61 = vmul.f32 0.6931472, %v9018_v17  ;;  %v6831_v3 = vadd.f32 1.0, %v6830_v0  ;;  %9023 = vlog2.f32 %v6836_v23  ;;  %vm15598_vm10 = vmmov %vm15596_vm7 }
 0x4e1   : > { %v9020_v12 = vpop.eup %9019  ;;  %v7100_v47 = vmul.f32 %v6988_v28, %v12674_v52  ;;  %v6913_v15 = vmul.f32 %v13547_v2, %v6912_v55  ;;  %v6833_v16 = vand.u32 2147483647, %v15577_v7  ;;  %v7061_v13 = vadd.f32 1.0, %v13806_v50 }
 0x4e2   : > { %v6910_v4 = vmul.f32 0.6931472, %v9020_v12  ;;  %v6907_v10 = vsel %vm13833_vm4, %v6904_v27, %v6901_v61  ;;  %vm6915_vm0 = vcmp.lt.f32.partialorder %v6914_v20, 0.0004427343  ;;  %v7064_v25 = vmul.f32 -0.5, %v13806_v50  ;;  %v15593_v27 = vld [vmem:[#allocation71_spill] sm:$0xff]  ;;  %vm15602_vm4 = vmmov %vm15596_vm7 }
 0x4e3   : > { %v7132_v18 = vsel %vm6716_vm3, %v15588_v54, %v7100_v47  ;;  %v9022_v5 = vpop.eup %9021  ;;  %v7091_v26 = vmul.f32 %v6907_v10, %v12674_v52  ;;  %v6840_v2 = vadd.f32 1.0, %v6839_v62  ;;  %9025 = vlog2.f32 %v7061_v13  ;;  %v15594_v12 = vld [vmem:[#allocation76_spill] sm:$0xff]  ;;  %v15595_v13 = vld [vmem:[#allocation55_spill] sm:$0xff] }
 0x4e4   : > { %7596 = vmatpush.msrb.mxu1 %v7132_v18  ;;  %v6916_v19 = vsel %vm6915_vm0, %v6913_v15, %v6910_v4  ;;  %v6829_v31 = vmul.f32 0.6931472, %v9022_v5  ;;  %v6832_v53 = vmul.f32 %v15577_v7, %v6831_v3  ;;  %v6842_v49 = vand.u32 2147483647, %v15584_v46  ;;  %8732 = vmatmul.msk.f32.gmra.mxu2 %vm15589_vm11, %v13686_v58 }
 0x4e5   : > { %v7092_v59 = vmul.f32 %v6916_v19, %v12674_v52  ;;  %v7123_v0 = vsel %vm6707_vm12, %v15590_v8, %v7091_v26  ;;  %vm6834_vm15 = vcmp.lt.f32.partialorder %v6833_v16, 0.0004427343  ;;  %v7065_v39 = vadd.f32 1.0, %v7064_v25 }
 0x4e6   : > { %v7070_v44 = vadd.f32 1.0, %v13819_v43  ;;  %v9024_v55 = vpop.eup %9023  ;;  %vm6725_vm2 = vcmp.gt.f32.partialorder %v13664_v11, 20.0  ;;  %7568 = vmatpush.msrb.mxu0 %v7123_v0  ;;  %v6835_v33 = vsel %vm6834_vm15, %v6832_v53, %v6829_v31  ;;  %v7067_v20 = vand.u32 2147483647, %v13806_v50  ;;  %v13896_v0 = vpop.f32.mrf.mxu0  ;;  %vm15603_vm15 = vmmov %vm15602_vm4 }
 0x4e7   : > { %v7124_v7 = vsel %vm6708_vm14, %v15591_v1, %v7092_v59  ;;  %v7073_v23 = vmul.f32 -0.5, %v13819_v43  ;;  %v7083_v22 = vmul.f32 %v6835_v33, %v12674_v52  ;;  %v6838_v17 = vmul.f32 0.6931472, %v9024_v55  ;;  %8736 = vmatmul.msk.f32.gmra.mxu3 %vm15592_vm8, %v13686_v58 }
 0x4e8   : > { %7597 = vmatpush.msrb.mxu1 %v7124_v7  ;;  %v6841_v28 = vmul.f32 %v15584_v46, %v6840_v2  ;;  %9027 = vlog2.f32 %v7070_v44  ;;  %vm6699_vm6 = vcmp.gt.f32.partialorder %v15593_v27, 20.0  ;;  %vm6843_vm5 = vcmp.lt.f32.partialorder %v6842_v49, 0.0004427343 }
 0x4e9   : > { %v6989_v48 = vadd.f32 1.0, %v13707_v42  ;;  %v6992_v45 = vmul.f32 -0.5, %v13707_v42  ;;  %v9026_v62 = vpop.eup %9025  ;;  %v7115_v47 = vsel %vm6699_vm6, %v15594_v12, %v7083_v22  ;;  %v7066_v3 = vmul.f32 %v13806_v50, %v7065_v39  ;;  %v15597_v50 = vld [vmem:[#allocation50_spill] sm:$0xff]  ;;  %v13898_v39 = vpop.f32.mrf.mxu1  ;;  %vm15606_vm6 = vmmov %vm15602_vm4 }
 0x4ea   : > { %v6844_v61 = vsel %vm6843_vm5, %v6841_v28, %v6838_v17  ;;  %v7076_v4 = vand.u32 2147483647, %v13819_v43  ;;  %7569 = vmatpush.msrb.mxu0 %v7115_v47  ;;  %v7063_v15 = vmul.f32 0.6931472, %v9026_v62  ;;  %v7074_v16 = vadd.f32 1.0, %v7073_v23 }
 0x4eb   : > { %v7084_v46 = vmul.f32 %v6844_v61, %v12674_v52  ;;  %9029 = vlog2.f32 %v6989_v48  ;;  %vm6700_vm1 = vcmp.gt.f32.partialorder %v15595_v13, 20.0  ;;  %8738 = vmatmul.msk.f32.vlgmr.msrb.gmra.mxu0 %vm15596_vm7, %v13597_v14  ;;  %vm7068_vm3 = vcmp.lt.f32.partialorder %v7067_v20, 0.0004427343  ;;  %vm15607_vm7 = vmmov %vm15602_vm4 }
 0x4ec   : > { %v6998_v54 = vadd.f32 1.0, %v13722_v6  ;;  %v7001_v18 = vmul.f32 -0.5, %v13722_v6  ;;  %vm6726_vm13 = vcmp.gt.f32.partialorder %v13670_v9, 20.0  ;;  %8733 = vmatmul.msk.f32.gmra.mxu2 %vm15598_vm10, %v13731_v37  ;;  %v7069_v25 = vsel %vm7068_vm3, %v7066_v3, %v7063_v15  ;;  %vm15608_vm10 = vmmov %vm15602_vm4 }
 0x4ed   : > { %v7116_v10 = vsel %vm6700_vm1, %v15597_v50, %v7084_v46  ;;  %v6993_v5 = vadd.f32 1.0, %v6992_v45  ;;  %v7109_v19 = vmul.f32 %v7069_v25, %v12674_v52  ;;  %vm13885_vm12 = vcmp.lt.f32.partialorder %v7076_v4, 0.0004427343 }
 0x4ee   : > { %v9028_v26 = vpop.eup %9027  ;;  %7598 = vmatpush.msrb.mxu1 %v7116_v10  ;;  %vm6717_vm14 = vcmp.gt.f32.partialorder %v13623_v60, 20.0  ;;  %v6995_v59 = vand.u32 2147483647, %v13707_v42  ;;  %9031 = vlog2.f32 %v6998_v54  ;;  %v7075_v53 = vmul.f32 %v13819_v43, %v7074_v16  ;;  %v13935_v16 = vpop.f32.mrf.mxu0 }
 0x4ef   : > { %8742 = vmatmul.msk.f32.vlgmr.msrb.gmra.mxu1 %vm15601_vm9, %v13597_v14  ;;  %v7072_v31 = vmul.f32 0.6931472, %v9028_v26  ;;  %v6917_v49 = vadd.f32 1.0, %v13678_v30  ;;  %v6920_v8 = vmul.f32 -0.5, %v13678_v30  ;;  %8737 = vmatmul.msk.f32.gmra.mxu3 %vm15602_vm4, %v13731_v37  ;;  %v7141_v44 = vsel %vm6725_vm2, %v13649_v21, %v7109_v19  ;;  %vm15610_vm9 = vmmov %vm15602_vm4 }
 0x4f0   : > { %v7002_v55 = vadd.f32 1.0, %v7001_v18  ;;  %v7004_v1 = vand.u32 2147483647, %v13722_v6  ;;  %v6926_v43 = vadd.f32 1.0, %v13702_v24  ;;  %7624 = vmatpush.msrb.mxu2 %v7141_v44  ;;  %v6994_v20 = vmul.f32 %v13707_v42, %v6993_v5 }
 0x4f1   : > { %v9030_v7 = vpop.eup %9029  ;;  %v7078_v33 = vsel %vm13885_vm12, %v7075_v53, %v7072_v31  ;;  %9033 = vlog2.f32 %v6917_v49  ;;  %v6923_v23 = vand.u32 2147483647, %v13678_v30  ;;  %v6929_v21 = vmul.f32 -0.5, %v13702_v24  ;;  %v13937_v13 = vpop.f32.mrf.mxu1 }
 0x4f2   : > { %v7110_v22 = vmul.f32 %v7078_v33, %v12674_v52  ;;  %v6991_v17 = vmul.f32 0.6931472, %v9030_v7  ;;  %9035 = vlog2.f32 %v6926_v43  ;;  %vm6996_vm0 = vcmp.lt.f32.partialorder %v6995_v59, 0.0004427343  ;;  %v15609_v43 = vld [vmem:[#allocation69_spill] sm:$0xff] }
 0x4f3   : > { %vm6718_vm11 = vcmp.gt.f32.partialorder %v13632_v36, 20.0  ;;  %v6921_v11 = vadd.f32 1.0, %v6920_v8  ;;  %v6845_v28 = vadd.f32 1.0, %v13639_v38  ;;  %8739 = vmatmul.msk.f32.gmra.mxu0 %vm15603_vm15, %v13645_v41  ;;  %v7003_v45 = vmul.f32 %v13722_v6, %v7002_v55 }
 0x4f4   : > { %v9032_v27 = vpop.eup %9031  ;;  %v7142_v42 = vsel %vm6726_vm13, %v13659_v40, %v7110_v22  ;;  %v6997_v48 = vsel %vm6996_vm0, %v6994_v20, %v6991_v17  ;;  %v6848_v62 = vmul.f32 -0.5, %v13639_v38  ;;  %v6930_v61 = vadd.f32 1.0, %v6929_v21  ;;  %v15611_v20 = vld [vmem:[#allocation72_spill] sm:$0xff]  ;;  %vm15612_vm0 = vmmov %vm15606_vm6  ;;  %v7269_v17 = vpop.f32.mrf.mxu2 }
 0x4f5   : > { %7653 = vmatpush.msrb.mxu3 %v7142_v42  ;;  %v7101_v12 = vmul.f32 %v6997_v48, %v12674_v52  ;;  %v7000_v47 = vmul.f32 0.6931472, %v9032_v27  ;;  %9037 = vlog2.f32 %v6845_v28  ;;  %vm7005_vm2 = vcmp.lt.f32.partialorder %v7004_v1, 0.0004427343  ;;  %vm15615_vm15 = vmmov %vm15612_vm0  ;;  %v7298_v21 = vpop.f32.mrf.mxu3 }
 0x4f6   : > { %vm13923_vm8 = vcmp.lt.f32.partialorder %v6923_v23, 0.0004427343  ;;  %v6932_v4 = vand.u32 2147483647, %v13702_v24  ;;  %v6922_v46 = vmul.f32 %v13678_v30, %v6921_v11  ;;  %v6854_v15 = vadd.f32 1.0, %v13666_v32  ;;  %v15613_v23 = vld [vmem:[#allocation63_spill] sm:$0xff] }
 0x4f7   : > { %v9034_v9 = vpop.eup %9033  ;;  %8743 = vmatmul.msk.f32.gmra.mxu1 %vm15606_vm6, %v13645_v41  ;;  %v7133_v40 = vsel %vm6717_vm14, %v13600_v34, %v7101_v12  ;;  %v7006_v6 = vsel %vm7005_vm2, %v7003_v45, %v7000_v47  ;;  %v6849_v10 = vadd.f32 1.0, %v6848_v62  ;;  %v6857_v25 = vmul.f32 -0.5, %v13666_v32  ;;  %vm15616_vm2 = vmmov %vm15612_vm0 }
 0x4f8   : > { %v9036_v54 = vpop.eup %9035  ;;  %7625 = vmatpush.msrb.mxu2 %v7133_v40  ;;  %v7102_v18 = vmul.f32 %v7006_v6, %v12674_v52  ;;  %v6919_v50 = vmul.f32 0.6931472, %v9034_v9  ;;  %v6931_v34 = vmul.f32 %v13702_v24, %v6930_v61  ;;  %v6851_v60 = vand.u32 2147483647, %v13639_v38  ;;  %vm15618_vm6 = vmmov %vm15612_vm0 }
 0x4f9   : > { %v6928_v5 = vmul.f32 0.6931472, %v9036_v54  ;;  %9039 = vlog2.f32 %v6854_v15  ;;  %vm6933_vm5 = vcmp.lt.f32.partialorder %v6932_v4, 0.0004427343  ;;  %vm6709_vm1 = vcmp.gt.f32.partialorder %v13579_v35, 20.0  ;;  %v13963_v1 = vpop.f32.mrf.mxu1 }
 0x4fa   : > { %v7134_v30 = vsel %vm6718_vm11, %v13619_v51, %v7102_v18  ;;  %v6925_v26 = vsel %vm13923_vm8, %v6922_v46, %v6919_v50  ;;  %v6850_v36 = vmul.f32 %v13639_v38, %v6849_v10  ;;  %v6858_v51 = vadd.f32 1.0, %v6857_v25  ;;  %v13961_v38 = vpop.f32.mrf.mxu0  ;;  %vm15614_vm11 = vmmov %vm15612_vm0  ;;  %v14031_v10 = vpop.permute.xlu2 %7691 }
 0x4fb   : > { %v9038_v19 = vpop.eup %9037  ;;  %7654 = vmatpush.msrb.mxu3 %v7134_v30  ;;  %v7093_v2 = vmul.f32 %v6925_v26, %v12674_v52  ;;  %v6934_v59 = vsel %vm6933_vm5, %v6931_v34, %v6928_v5  ;;  %8740 = vmatmul.msk.f32.gmra.mxu0 %vm15607_vm7, %v13686_v58  ;;  %vm6710_vm3 = vcmp.gt.f32.partialorder %v13613_v63, 20.0  ;;  %vm6852_vm13 = vcmp.lt.f32.partialorder %v6851_v60, 0.0004427343  ;;  %vm15617_vm8 = vmmov %vm15612_vm0 }
 0x4fc   : > { %v7094_v24 = vmul.f32 %v6934_v59, %v12674_v52  ;;  %v6847_v31 = vmul.f32 0.6931472, %v9038_v19  ;;  %v6860_v49 = vand.u32 2147483647, %v13666_v32  ;;  %vm6701_vm12 = vcmp.gt.f32.partialorder %v13539_v29, 20.0  ;;  %v13987_v27 = vpop.f32.mrf.mxu2  ;;  %vm15619_vm5 = vmmov %vm15612_vm0 }
 0x4fd   : > { %v7125_v53 = vsel %vm6709_vm1, %v13564_v57, %v7093_v2  ;;  %v6859_v63 = vmul.f32 %v13666_v32, %v6858_v51  ;;  %vm6702_vm4 = vcmp.gt.f32.partialorder %v15611_v20, 20.0  ;;  %vm15620_vm1 = vmmov %vm15612_vm0 }
 0x4fe   : > { %7626 = vmatpush.msrb.mxu2 %v7125_v53  ;;  %v7126_v35 = vsel %vm6710_vm3, %v13583_v56, %v7094_v24  ;;  %v6853_v8 = vsel %vm6852_vm13, %v6850_v36, %v6847_v31  ;;  %vm6861_vm14 = vcmp.lt.f32.partialorder %v6860_v49, 0.0004427343  ;;  %vm15621_vm7 = vmmov %vm15612_vm0  ;;  %v14050_v49 = vpop.permute.xlu1 %7681 }
 0x4ff   : > { %v9040_v44 = vpop.eup %9039  ;;  %7655 = vmatpush.msrb.mxu3 %v7126_v35  ;;  %8744 = vmatmul.msk.f32.gmra.mxu1 %vm15608_vm10, %v13686_v58  ;;  %v7085_v55 = vmul.f32 %v6853_v8, %v12674_v52  ;;  %v14056_v8 = vpop.permute.xlu0 %7686 }
 0x500   : > { %v6856_v57 = vmul.f32 0.6931472, %v9040_v44 }
 0x501   : > { %v7117_v7 = vsel %vm6701_vm12, %v15609_v43, %v7085_v55  ;;  %v7249_v22 = vpop.f32.mrf.mxu1 }
 0x502   : > { %7627 = vmatpush.msrb.mxu2 %v7117_v7  ;;  %v6862_v56 = vsel %vm6861_vm14, %v6859_v63, %v6856_v57  ;;  %v7220_v32 = vpop.f32.mrf.mxu0  ;;  %v14039_v19 = vpop.permute.xlu2 %7676 }
 0x503   : > { %v7086_v33 = vmul.f32 %v6862_v56, %v12674_v52  ;;  %8746 = vmatmul.msk.f32.vlgmr.msrb.gmra.mxu2 %vm15610_vm9, %v13597_v14  ;;  %8741 = vmatmul.msk.f32.gmra.mxu0 %vm15612_vm0, %v13731_v37 }
 0x504   : > { %v14001_v48 = vpop.f32.mrf.mxu2 }
 0x505   : > { %v7118_v29 = vsel %vm6702_vm4, %v15613_v23, %v7086_v33 }
 0x506   : > { %7656 = vmatpush.msrb.mxu3 %v7118_v29 }
 0x507   : > { %8750 = vmatmul.msk.f32.vlgmr.msrb.gmra.mxu3 %vm15614_vm11, %v13597_v14  ;;  %8745 = vmatmul.msk.f32.gmra.mxu1 %vm15615_vm15, %v13731_v37  ;;  %v13991_v14 = vpop.f32.mrf.mxu3 }
 0x509   : > { %v13985_v28 = vpop.f32.mrf.mxu1 }
 0x50a   : > { %v13983_v11 = vpop.f32.mrf.mxu0 }
 0x50b   : > { %8747 = vmatmul.msk.f32.gmra.mxu2 %vm15616_vm2, %v13645_v41 }
 0x50c   : > { %v14011_v47 = vpop.f32.mrf.mxu2 }
 0x50f   : > { %8751 = vmatmul.msk.f32.gmra.mxu3 %vm15617_vm8, %v13645_v41  ;;  %v14005_v45 = vpop.f32.mrf.mxu3 }
 0x511   : > { %v13999_v41 = vpop.f32.mrf.mxu1 }
 0x512   : > { %v13995_v42 = vpop.f32.mrf.mxu0 }
 0x513   : > { %8748 = vmatmul.msk.f32.gmra.mxu2 %vm15618_vm6, %v13686_v58 }
 0x514   : > { %v14019_v4 = vpop.f32.mrf.mxu2 }
 0x517   : > { %8752 = vmatmul.msk.f32.gmra.mxu3 %vm15619_vm5, %v13686_v58  ;;  %v14013_v58 = vpop.f32.mrf.mxu3 }
 0x519   : > { %v14009_v12 = vpop.f32.mrf.mxu1 }
 0x51a   : > { %v14007_v62 = vpop.f32.mrf.mxu0 }
 0x51b   : > { %8749 = vmatmul.msk.f32.gmra.mxu2 %vm15620_vm1, %v13731_v37 }
 0x51c   : > { %v14023_v6 = vpop.f32.mrf.mxu2 }
 0x51f   : > { %8753 = vmatmul.msk.f32.gmra.mxu3 %vm15621_vm7, %v13731_v37  ;;  %v14021_v9 = vpop.f32.mrf.mxu3 }
 0x521   : > { %v14017_v3 = vpop.f32.mrf.mxu1 }
 0x522   : > { %v14015_v61 = vpop.f32.mrf.mxu0 }
 0x524   : > { %v14027_v18 = vpop.f32.mrf.mxu2 }
 0x527   : > { %v14025_v46 = vpop.f32.mrf.mxu3 }
 0x52c   : > { %v14033_v34 = vpop.f32.mrf.mxu2 }
 0x52f   : > { %v14029_v50 = vpop.f32.mrf.mxu3 }
 0x530   : > { %v7455_v40 = vpop.f32.mrf.mxu0 }
 0x531   : > { %v7456_v30 = vadd.f32 %v7455_v40, %v13896_v0 }
 0x533   : > { %v14043_v59 = vadd.f32 %v14039_v19, %v7456_v30 }
 0x535   : > { %v7484_v37 = vpop.f32.mrf.mxu1 }
 0x536   : > { %v7485_v26 = vadd.f32 %v7484_v37, %v13898_v39 }
 0x537   : > { %v14035_v60 = vpop.f32.mrf.mxu3 }
 0x538   : > { %v7458_v15 = vpop.f32.mrf.mxu0  ;;  %v14047_v36 = vadd.f32 %v14039_v19, %v7485_v26 }
 0x539   : > { %v7459_v2 = vadd.f32 %v7458_v15, %v13935_v16 }
 0x53b   : > { %v14054_v35 = vadd.f32 %v14050_v49, %v7459_v2 }
 0x53d   : > { %v7487_v54 = vpop.f32.mrf.mxu1  ;;  %v14074_v56 = vmul.f32 100.0, %v14054_v35 }
 0x53e   : > { %v7488_v24 = vadd.f32 %v7487_v54, %v13937_v13  ;;  %v14059_v13 = vmul.f32 100.0, %v14043_v59 }
 0x53f   : > { %v7766_v15 = vmin.f32 %v14074_v56, 20.0  ;;  %vm7798_vm11 = vcmp.gt.f32.partialorder %v14074_v56, 20.0  ;;  %v14400_v56 = vld [vmem:[%s14707_s9] sm:$0x1] }
 0x540   : > { %v7461_v25 = vpop.f32.mrf.mxu0  ;;  %v14062_v44 = vadd.f32 %v14050_v49, %v7488_v24  ;;  %v7758_v20 = vmin.f32 %v14059_v13, 20.0  ;;  %vm7790_vm15 = vcmp.gt.f32.partialorder %v14059_v13, 20.0 }
 0x541   : > { %v7462_v51 = vadd.f32 %v7461_v25, %v13961_v38  ;;  %v14065_v38 = vmul.f32 100.0, %v14047_v36 }
 0x542   : > { %v14081_v23 = vmul.f32 100.0, %v14062_v44 }
 0x543   : > { %v14068_v57 = vadd.f32 %v14056_v8, %v7462_v51  ;;  %vm7791_vm5 = vcmp.gt.f32.partialorder %v14065_v38, 20.0 }
 0x544   : > { %v7767_v30 = vmin.f32 %v14081_v23, 20.0  ;;  %vm7799_vm6 = vcmp.gt.f32.partialorder %v14081_v23, 20.0 }
 0x545   : > { %v7490_v5 = vpop.f32.mrf.mxu1 }
 0x546   : > { %v7491_v0 = vadd.f32 %v7490_v5, %v13963_v1  ;;  %v7822_v5 = vmul.f32 1.442695, %v7758_v20 }
 0x548   : > { %v7464_v31 = vpop.f32.mrf.mxu0  ;;  %v14071_v43 = vadd.f32 %v14056_v8, %v7491_v0  ;;  %9041 = vpow2.f32 %v7822_v5 }
 0x549   : > { %v7465_v16 = vadd.f32 %v7464_v31, %v7220_v32  ;;  %v7759_v32 = vmin.f32 %v14065_v38, 20.0 }
 0x54b   : > { %v14077_v33 = vadd.f32 %v14031_v10, %v7465_v16  ;;  %v7824_v2 = vmul.f32 1.442695, %v7759_v32  ;;  %v7838_v16 = vmul.f32 1.442695, %v7766_v15 }
 0x54d   : > { %v7493_v53 = vpop.f32.mrf.mxu1  ;;  %v14101_v54 = vmul.f32 100.0, %v14077_v33  ;;  %9043 = vpow2.f32 %v7824_v2 }
 0x54e   : > { %v7494_v55 = vadd.f32 %v7493_v53, %v7249_v22  ;;  %v14088_v22 = vmul.f32 100.0, %v14068_v57  ;;  %9045 = vpow2.f32 %v7838_v16 }
 0x54f   : > { %vm7814_vm3 = vcmp.gt.f32.partialorder %v14101_v54, 20.0 }
 0x550   : > { %v14084_v29 = vadd.f32 %v14031_v10, %v7494_v55  ;;  %v7774_v24 = vmin.f32 %v14088_v22, 20.0  ;;  %v7782_v55 = vmin.f32 %v14101_v54, 20.0  ;;  %vm7806_vm0 = vcmp.gt.f32.partialorder %v14088_v22, 20.0 }
 0x552   : > { %v14106_v26 = vmul.f32 100.0, %v14084_v29  ;;  %v7854_v32 = vmul.f32 1.442695, %v7774_v24 }
 0x554   : > { %vm7815_vm10 = vcmp.gt.f32.partialorder %v14106_v26, 20.0 }
 0x557   : > { %v7513_v39 = vpop.f32.mrf.mxu2 }
 0x558   : > { %v7514_v1 = vadd.f32 %v7513_v39, %v7269_v17 }
 0x55a   : > { %v7542_v63 = vpop.f32.mrf.mxu3  ;;  %v14091_v17 = vadd.f32 %v14039_v19, %v7514_v1 }
 0x55b   : > { %v7543_v7 = vadd.f32 %v7542_v63, %v7298_v21  ;;  %v14094_v21 = vmul.f32 100.0, %v14071_v43  ;;  %v7840_v63 = vmul.f32 1.442695, %v7767_v30 }
 0x55c   : > { %15622 = vst [vmem:[#allocation5_spill] sm:$0xff] %v14091_v17  ;;  %v14110_v31 = vmul.f32 100.0, %v14091_v17 }
 0x55d   : > { %v14097_v40 = vadd.f32 %v14039_v19, %v7543_v7  ;;  %v7775_v0 = vmin.f32 %v14094_v21, 20.0  ;;  %v7783_v7 = vmin.f32 %v14106_v26, 20.0  ;;  %9047 = vpow2.f32 %v7840_v63 }
 0x55e   : > { %15624 = vst [vmem:[#allocation49_spill] sm:$0xff] %v14110_v31  ;;  %9049 = vpow2.f32 %v7854_v32  ;;  %vm7807_vm2 = vcmp.gt.f32.partialorder %v14094_v21, 20.0 }
 0x55f   : > { %15623 = vst [vmem:[#allocation27_spill] sm:$0xff] %v14097_v40  ;;  %v7516_v37 = vpop.f32.mrf.mxu2 }
 0x560   : > { %v7517_v25 = vadd.f32 %v7516_v37, %v13987_v27  ;;  %v14117_v27 = vmul.f32 100.0, %v14097_v40  ;;  %v7760_v37 = vmin.f32 %v14110_v31, 20.0  ;;  %v7870_v40 = vmul.f32 1.442695, %v7782_v55  ;;  %v14140_v31 = vpop.eup %9041 }
 0x562   : > { %v14113_v51 = vadd.f32 %v14050_v49, %v7517_v25  ;;  %v7545_v53 = vpop.f32.mrf.mxu3  ;;  %15626 = vst [vmem:[#allocation73_spill] sm:$0xff] %v14117_v27  ;;  %v7856_v25 = vmul.f32 1.442695, %v7775_v0  ;;  %v7826_v0 = vmul.f32 1.442695, %v7760_v37 }
 0x563   : > { %v7546_v39 = vadd.f32 %v7545_v53, %v13991_v14  ;;  %v7761_v14 = vmin.f32 %v14117_v27, 20.0 }
 0x564   : > { %15625 = vst [vmem:[#allocation66_spill] sm:$0xff] %v14113_v51  ;;  %v14122_v1 = vmul.f32 100.0, %v14113_v51  ;;  %9051 = vpow2.f32 %v7856_v25  ;;  %v7889_v51 = vmul.f32 -0.5, %v14140_v31 }
 0x565   : > { %v14126_v20 = vadd.f32 %v14050_v49, %v7546_v39  ;;  %v7872_v39 = vmul.f32 1.442695, %v7783_v7  ;;  %v7828_v16 = vmul.f32 1.442695, %v7761_v14  ;;  %v14146_v7 = vpop.eup %9043  ;;  %9053 = vpow2.f32 %v7870_v40 }
 0x566   : > { %15627 = vst [vmem:[#allocation58_spill] sm:$0xff] %v14122_v1  ;;  %v7768_v5 = vmin.f32 %v14122_v1, 20.0 }
 0x567   : > { %15628 = vst [vmem:[#allocation75_spill] sm:$0xff] %v14126_v20  ;;  %v14131_v15 = vmul.f32 100.0, %v14126_v20  ;;  %v7519_v53 = vpop.f32.mrf.mxu2  ;;  %9055 = vpow2.f32 %v7872_v39 }
 0x568   : > { %v7571_v30 = vpop.f32.mrf.mxu0  ;;  %v7520_v17 = vadd.f32 %v7519_v53, %v14001_v48  ;;  %v14158_v53 = vpop.eup %9045  ;;  %9057 = vpow2.f32 %v7826_v0 }
 0x569   : > { %15629 = vst [vmem:[#allocation9_spill] sm:$0xff] %v14131_v15  ;;  %v7769_v2 = vmin.f32 %v14131_v15, 20.0  ;;  %v7572_v24 = vadd.f32 %v7571_v30, %v13983_v11  ;;  %v7842_v11 = vmul.f32 1.442695, %v7768_v5  ;;  %9059 = vpow2.f32 %v7828_v16 }
 0x56a   : > { %v14138_v27 = vadd.f32 %v14056_v8, %v7520_v17  ;;  %v7548_v20 = vpop.f32.mrf.mxu3 }
 0x56b   : > { %v14143_v55 = vadd.f32 %v14039_v19, %v7572_v24  ;;  %v7549_v63 = vadd.f32 %v7548_v20, %v14005_v45  ;;  %v7844_v37 = vmul.f32 1.442695, %v7769_v2  ;;  %v14165_v20 = vpop.eup %9047  ;;  %v7895_v2 = vadd.f32 1.0, %v14146_v7 }
 0x56c   : > { %15630 = vst [vmem:[#allocation56_spill] sm:$0xff] %v14138_v27  ;;  %v7600_v48 = vpop.f32.mrf.mxu1  ;;  %v14150_v17 = vmul.f32 100.0, %v14138_v27  ;;  %v14172_v24 = vpop.eup %9049  ;;  %9061 = vpow2.f32 %v7842_v11 }
 0x56d   : > { %15631 = vst [vmem:[#allocation60_spill] sm:$0xff] %v14143_v55  ;;  %v7601_v32 = vadd.f32 %v7600_v48, %v13985_v28  ;;  %v14153_v25 = vmul.f32 100.0, %v14143_v55  ;;  %v14156_v14 = vadd.f32 %v14056_v8, %v7549_v63  ;;  %v7886_v28 = vadd.f32 1.0, %v14140_v31  ;;  %v14178_v55 = vpop.eup %9051 }
 0x56e   : > { %15632 = vst [vmem:[#allocation78_spill] sm:$0xff] %v14150_v17  ;;  %v7776_v40 = vmin.f32 %v14150_v17, 20.0  ;;  %9063 = vpow2.f32 %v7844_v37  ;;  %v8045_v54 = vand.u32 2147483647, %v14178_v55 }
 0x56f   : > { %15633 = vst [vmem:[#allocation79_spill] sm:$0xff] %v14153_v25  ;;  %v14161_v45 = vadd.f32 %v14039_v19, %v7601_v32  ;;  %v7762_v5 = vmin.f32 %v14153_v25, 20.0  ;;  %v14169_v30 = vmul.f32 100.0, %v14156_v14  ;;  %v7522_v39 = vpop.f32.mrf.mxu2  ;;  %9065 = vlog2.f32 %v7886_v28 }
 0x570   : > { %15634 = vst [vmem:[#allocation67_spill] sm:$0xff] %v14156_v14  ;;  %v7858_v48 = vmul.f32 1.442695, %v7776_v40  ;;  %v7574_v63 = vpop.f32.mrf.mxu0  ;;  %v7523_v32 = vadd.f32 %v7522_v39, %v14011_v47  ;;  %v14183_v14 = vpop.eup %9053  ;;  %9067 = vlog2.f32 %v7895_v2  ;;  %vm14318_vm9 = vcmp.lt.f32.partialorder %v8045_v54, 0.0004427343 }
 0x571   : > { %15635 = vst [vmem:[#allocation80_spill] sm:$0xff] %v14161_v45  ;;  %v14175_v0 = vmul.f32 100.0, %v14161_v45  ;;  %v7777_v16 = vmin.f32 %v14169_v30, 20.0  ;;  %v7575_v25 = vadd.f32 %v7574_v63, %v13995_v42  ;;  %v7830_v15 = vmul.f32 1.442695, %v7762_v5  ;;  %v14189_v47 = vpop.eup %9055 }
 0x572   : > { %15636 = vst [vmem:[#allocation83_spill] sm:$0xff] %v14169_v30  ;;  %v14187_v45 = vadd.f32 %v14031_v10, %v7523_v32  ;;  %v7551_v40 = vpop.f32.mrf.mxu3  ;;  %v14196_v27 = vpop.eup %9057  ;;  %9069 = vpow2.f32 %v7858_v48  ;;  %v8102_v2 = vadd.f32 1.0, %v14183_v14 }
 0x573   : > { %15637 = vst [vmem:[#allocation95_spill] sm:$0xff] %v14175_v0  ;;  %v7763_v11 = vmin.f32 %v14175_v0, 20.0  ;;  %v14192_v37 = vadd.f32 %v14050_v49, %v7575_v25  ;;  %v7552_v42 = vadd.f32 %v7551_v40, %v14013_v58  ;;  %v7860_v5 = vmul.f32 1.442695, %v7777_v16  ;;  %v14202_v28 = vpop.eup %9059 }
 0x574   : > { %15638 = vst [vmem:[#allocation84_spill] sm:$0xff] %v14187_v45  ;;  %v7603_v39 = vpop.f32.mrf.mxu1  ;;  %v14200_v0 = vmul.f32 100.0, %v14187_v45  ;;  %v14211_v40 = vpop.eup %9061  ;;  %9071 = vpow2.f32 %v7830_v15  ;;  %v8105_v16 = vmul.f32 -0.5, %v14183_v14 }
 0x575   : > { %15639 = vst [vmem:[#allocation77_spill] sm:$0xff] %v14192_v37  ;;  %v7604_v32 = vadd.f32 %v7603_v39, %v13999_v41  ;;  %v7832_v1 = vmul.f32 1.442695, %v7763_v11  ;;  %v14205_v25 = vmul.f32 100.0, %v14192_v37  ;;  %v14208_v58 = vadd.f32 %v14031_v10, %v7552_v42  ;;  %v14218_v39 = vpop.eup %9063 }
 0x576   : > { %15640 = vst [vmem:[#allocation42_spill] sm:$0xff] %v14196_v27  ;;  %v7784_v41 = vmin.f32 %v14200_v0, 20.0  ;;  %9073 = vlog2.f32 %v8102_v2  ;;  %v14224_v42 = vadd.f32 1.0, %v7889_v51  ;;  %v14226_v37 = vpop.eup %9065  ;;  %v8106_v27 = vadd.f32 1.0, %v8105_v16 }
 0x577   : > { %15641 = vst [vmem:[#allocation81_spill] sm:$0xff] %v14202_v28  ;;  %v14214_v48 = vadd.f32 %v14050_v49, %v7604_v32  ;;  %v7770_v11 = vmin.f32 %v14205_v25, 20.0  ;;  %v14222_v63 = vmul.f32 100.0, %v14208_v58  ;;  %9075 = vpow2.f32 %v7860_v5  ;;  %v14231_v30 = vpop.eup %9067 }
 0x578   : > { %15642 = vst [vmem:[#allocation100_spill] sm:$0xff] %v14205_v25  ;;  %v7874_v32 = vmul.f32 1.442695, %v7784_v41  ;;  %v7577_v28 = vpop.f32.mrf.mxu0  ;;  %9077 = vpow2.f32 %v7832_v1  ;;  %v14235_v2 = vpop.eup %9069  ;;  %v8108_v5 = vand.u32 2147483647, %v14183_v14 }
 0x579   : > { %15643 = vst [vmem:[#allocation87_spill] sm:$0xff] %v14208_v58  ;;  %v14229_v15 = vmul.f32 100.0, %v14214_v48  ;;  %v7785_v25 = vmin.f32 %v14222_v63, 20.0  ;;  %v7578_v58 = vadd.f32 %v7577_v28, %v14007_v62  ;;  %v8107_v28 = vmul.f32 %v14183_v14, %v8106_v27 }
 0x57a   : > { %15644 = vst [vmem:[#allocation101_spill] sm:$0xff] %v14211_v40  ;;  %9079 = vpow2.f32 %v7874_v32  ;;  %v14244_v17 = vpop.eup %9071  ;;  %vm8109_vm13 = vcmp.lt.f32.partialorder %v8108_v5, 0.0004427343  ;;  %v8033_v14 = vmul.f32 -0.5, %v14172_v24 }
 0x57b   : > { %15645 = vst [vmem:[#allocation59_spill] sm:$0xff] %v14214_v48  ;;  %v7771_v51 = vmin.f32 %v14229_v15, 20.0  ;;  %v8111_v48 = vadd.f32 1.0, %v14189_v47  ;;  %v7876_v41 = vmul.f32 1.442695, %v7785_v25  ;;  %v14241_v16 = vadd.f32 %v14056_v8, %v7578_v58 }
 0x57c   : > { %15646 = vst [vmem:[#allocation70_spill] sm:$0xff] %v14218_v39  ;;  %v7846_v39 = vmul.f32 1.442695, %v7770_v11  ;;  %v7606_v1 = vpop.f32.mrf.mxu1  ;;  %v8114_v11 = vmul.f32 -0.5, %v14189_v47  ;;  %v9074_v32 = vpop.eup %9073  ;;  %v8117_v25 = vand.u32 2147483647, %v14189_v47 }
 0x57d   : > { %15647 = vst [vmem:[#allocation93_spill] sm:$0xff] %v14222_v63  ;;  %v7607_v62 = vadd.f32 %v7606_v1, %v14009_v12  ;;  %v8030_v58 = vadd.f32 1.0, %v14172_v24  ;;  %v14254_v40 = vpop.eup %9075  ;;  %v8104_v12 = vmul.f32 0.6931472, %v9074_v32  ;;  %v8036_v32 = vand.u32 2147483647, %v14172_v24 }
 0x57e   : > { %15648 = vst [vmem:[#allocation90_spill] sm:$0xff] %v14229_v15  ;;  %9081 = vpow2.f32 %v7846_v39  ;;  %v7848_v15 = vmul.f32 1.442695, %v7771_v51  ;;  %v14250_v39 = vmul.f32 100.0, %v14241_v16  ;;  %v8115_v1 = vadd.f32 1.0, %v8114_v11  ;;  %v14259_v63 = vpop.eup %9077 }
 0x57f   : > { %15649 = vst [vmem:[#allocation99_spill] sm:$0xff] %v14241_v16  ;;  %9083 = vlog2.f32 %v8111_v48  ;;  %v8039_v11 = vadd.f32 1.0, %v14178_v55  ;;  %vm14275_vm12 = vcmp.lt.f32.partialorder %v8117_v25, 0.0004427343  ;;  %vm14291_vm14 = vcmp.lt.f32.partialorder %v8036_v32, 0.0004427343 }
 0x580   : > { %15650 = vst [vmem:[#allocation94_spill] sm:$0xff] %v14244_v17  ;;  %9085 = vpow2.f32 %v7876_v41  ;;  %v14257_v17 = vadd.f32 %v14056_v8, %v7607_v62  ;;  %v7778_v27 = vmin.f32 %v14250_v39, 20.0  ;;  %v14264_v48 = vpop.eup %9079  ;;  %v7580_v41 = vpop.f32.mrf.mxu0  ;;  %v8110_v62 = vsel %vm8109_vm13, %v8107_v28, %v8104_v12 }
 0x581   : > { %15651 = vst [vmem:[#allocation45_spill] sm:$0xff] %v14250_v39  ;;  %9087 = vlog2.f32 %v8030_v58  ;;  %v7581_v5 = vadd.f32 %v7580_v41, %v14015_v61  ;;  %v8198_v58 = vmul.f32 %v8110_v62, %v12674_v52  ;;  %v8116_v28 = vmul.f32 %v14189_v47, %v8115_v1 }
 0x582   : > { %15652 = vst [vmem:[#allocation92_spill] sm:$0xff] %v14254_v40  ;;  %v14267_v51 = vmul.f32 100.0, %v14257_v17  ;;  %9089 = vpow2.f32 %v7848_v15  ;;  %v8042_v12 = vmul.f32 -0.5, %v14178_v55  ;;  %v8034_v41 = vadd.f32 1.0, %v8033_v14 }
 0x583   : > { %15653 = vst [vmem:[#allocation30_spill] sm:$0xff] %v14257_v17  ;;  %9091 = vlog2.f32 %v8039_v11  ;;  %v14283_v40 = vadd.f32 %v14031_v10, %v7581_v5  ;;  %v8230_v61 = vsel %vm7814_vm3, %v14077_v33, %v8198_v58  ;;  %v8120_v13 = vadd.f32 1.0, %v14264_v48 }
 0x584   : > { %15654 = vst [vmem:[#allocation12_spill] sm:$0xff] %v14259_v63  ;;  %v14271_v63 = vpop.eup %9081  ;;  %v7779_v17 = vmin.f32 %v14267_v51, 20.0  ;;  %v7609_v15 = vpop.f32.mrf.mxu1  ;;  %8261 = vmatpush.msra.mxu0 %v8230_v61  ;;  %v8043_v1 = vadd.f32 1.0, %v8042_v12  ;;  %v8035_v16 = vmul.f32 %v14172_v24, %v8034_v41  ;;  %v7961_v41 = vmul.f32 -0.5, %v14158_v53 }
 0x585   : > { %15655 = vst [vmem:[#allocation89_spill] sm:$0xff] %v14267_v51  ;;  %v9084_v39 = vpop.eup %9083  ;;  %v7610_v51 = vadd.f32 %v7609_v15, %v14017_v3  ;;  %v14296_v5 = vmul.f32 100.0, %v14283_v40  ;;  %vm15668_vm3 = vcmask 261120  }
 0x586   : > { %15656 = vst [vmem:[#allocation96_spill] sm:$0xff] %v14271_v63  ;;  %v8113_v25 = vmul.f32 0.6931472, %v9084_v39  ;;  %v14288_v62 = vpop.eup %9085  ;;  %v7862_v63 = vmul.f32 1.442695, %v7778_v27  ;;  %v7629_v45 = vpop.f32.mrf.mxu2  ;;  %v7958_v39 = vadd.f32 1.0, %v14158_v53  ;;  %vm15669_vm13 = vmmov %vm15668_vm3 }
 0x587   : > { %v9088_v11 = vpop.eup %9087  ;;  %v7864_v27 = vmul.f32 1.442695, %v7779_v17  ;;  %v14303_v3 = vadd.f32 %v14031_v10, %v7610_v51  ;;  %v7630_v14 = vadd.f32 %v7629_v45, %v14019_v4  ;;  %v7786_v12 = vmin.f32 %v14296_v5, 20.0 }
 0x588   : > { %v8119_v33 = vsel %vm14275_vm12, %v8116_v28, %v8113_v25  ;;  %v14307_v58 = vpop.eup %9089  ;;  %v8032_v15 = vmul.f32 0.6931472, %v9088_v11  ;;  %v8044_v28 = vmul.f32 %v14178_v55, %v8043_v1  ;;  %9093 = vlog2.f32 %v7958_v39 }
 0x589   : > { %v8199_v32 = vmul.f32 %v8119_v33, %v12674_v52  ;;  %v9092_v61 = vpop.eup %9091  ;;  %v14313_v25 = vadd.f32 %v14039_v19, %v7630_v14  ;;  %v14323_v45 = vmul.f32 100.0, %v14303_v3  ;;  %v15663_v1 = vand.u32 2147483647, %v14140_v31 }
 0x58a   : > { %v7658_v51 = vpop.f32.mrf.mxu3  ;;  %v8038_v55 = vsel %vm14291_vm14, %v8035_v16, %v8032_v15  ;;  %v8041_v24 = vmul.f32 0.6931472, %v9092_v61  ;;  %v7878_v26 = vmul.f32 1.442695, %v7786_v12  ;;  %9095 = vpow2.f32 %v7862_v63 }
 0x58b   : > { %v8231_v17 = vsel %vm7815_vm10, %v14084_v29, %v8199_v32  ;;  %vm14330_vm4 = vcmp.lt.f32.partialorder %v15663_v1, 0.0004427343  ;;  %v14335_v11 = vmul.f32 100.0, %v14313_v25  ;;  %v7659_v33 = vadd.f32 %v7658_v51, %v14021_v9 }
 0x58c   : > { %8281 = vmatpush.msra.mxu1 %v8231_v17  ;;  %v8190_v54 = vmul.f32 %v8038_v55, %v12674_v52  ;;  %v8047_v47 = vsel %vm14318_vm9, %v8044_v28, %v8041_v24  ;;  %v7962_v39 = vadd.f32 1.0, %v7961_v41  ;;  %9097 = vpow2.f32 %v7864_v27 }
 0x58d   : > { %v14344_v14 = vadd.f32 %v14039_v19, %v7659_v33  ;;  %v7964_v12 = vand.u32 2147483647, %v14158_v53  ;;  %v7787_v9 = vmin.f32 %v14323_v45, 20.0  ;;  %v7764_v22 = vmin.f32 %v14335_v11, 20.0 }
 0x58e   : > { %v8222_v32 = vsel %vm7806_vm0, %v14068_v57, %v8190_v54  ;;  %v8191_v63 = vmul.f32 %v8047_v47, %v12674_v52  ;;  %v7967_v15 = vadd.f32 1.0, %v14165_v20  ;;  %v7632_v16 = vpop.f32.mrf.mxu2  ;;  %v9094_v27 = vpop.eup %9093  ;;  %9099 = vpow2.f32 %v7878_v26 }
 0x58f   : > { %8262 = vmatpush.msra.mxu0 %v8222_v32  ;;  %v7970_v19 = vmul.f32 -0.5, %v14165_v20  ;;  %v7891_v57 = vmul.f32 %v14140_v31, %v14224_v42  ;;  %v7960_v61 = vmul.f32 0.6931472, %v9094_v27  ;;  %v7963_v17 = vmul.f32 %v14158_v53, %v7962_v39 }
 0x590   : > { %v8223_v28 = vsel %vm7807_vm2, %v14071_v43, %v8191_v63  ;;  %9101 = vlog2.f32 %v7967_v15  ;;  %v14360_v4 = vmul.f32 100.0, %v14344_v14  ;;  %vm7965_vm8 = vcmp.lt.f32.partialorder %v7964_v12, 0.0004427343  ;;  %v14363_v21 = vpop.eup %9095 }
 0x591   : > { %8282 = vmatpush.msra.mxu1 %v8223_v28  ;;  %v7971_v51 = vadd.f32 1.0, %v7970_v19  ;;  %v7888_v55 = vmul.f32 0.6931472, %v14226_v37  ;;  %v7880_v24 = vmul.f32 1.442695, %v7787_v9  ;;  %v7966_v1 = vsel %vm7965_vm8, %v7963_v17, %v7960_v61 }
 0x592   : > { %v7834_v41 = vmul.f32 1.442695, %v7764_v22  ;;  %v7898_v31 = vmul.f32 -0.5, %v14146_v7  ;;  %v7661_v43 = vpop.f32.mrf.mxu3  ;;  %v14366_v42 = vpop.eup %9097  ;;  %v8182_v53 = vmul.f32 %v7966_v1, %v12674_v52  ;;  %v7973_v26 = vand.u32 2147483647, %v14165_v20 }
 0x593   : > { %v7894_v33 = vsel %vm14330_vm4, %v7891_v57, %v7888_v55  ;;  %v7897_v37 = vmul.f32 0.6931472, %v14231_v30  ;;  %v7901_v39 = vand.u32 2147483647, %v14146_v7  ;;  %v7633_v32 = vadd.f32 %v7632_v16, %v14023_v6 }
 0x594   : > { %v8174_v54 = vmul.f32 %v7894_v33, %v12674_v52  ;;  %v7899_v47 = vadd.f32 1.0, %v7898_v31  ;;  %v14377_v12 = vpop.eup %9099  ;;  %v7765_v9 = vmin.f32 %v14360_v4, 20.0  ;;  %v8214_v22 = vsel %vm7798_vm11, %v14054_v35, %v8182_v53 }
 0x595   : > { %v7972_v29 = vmul.f32 %v14165_v20, %v7971_v51  ;;  %v7662_v30 = vadd.f32 %v7661_v43, %v14025_v46  ;;  %8263 = vmatpush.msra.mxu0 %v8214_v22  ;;  %vm14390_vm1 = vcmp.lt.f32.partialorder %v7901_v39, 0.0004427343  ;;  %v14395_v35 = vadd.f32 %v14050_v49, %v7633_v32 }
 0x596   : > { %v9102_v63 = vpop.eup %9101  ;;  %v8206_v6 = vsel %vm7790_vm15, %v14043_v59, %v8174_v54  ;;  %v7900_v15 = vmul.f32 %v14146_v7, %v7899_v47  ;;  %v7635_v46 = vpop.f32.mrf.mxu2  ;;  %vm7974_vm7 = vcmp.lt.f32.partialorder %v7973_v26, 0.0004427343  ;;  %v8123_v57 = vmul.f32 -0.5, %v14264_v48 }
 0x597   : > { %v7969_v20 = vmul.f32 0.6931472, %v9102_v63  ;;  %v14403_v27 = vadd.f32 %v14050_v49, %v7662_v30  ;;  %v7636_v59 = vadd.f32 %v7635_v46, %v14027_v18  ;;  %8264 = vmatpush.msra.mxu0 %v8206_v6  ;;  %v14410_v19 = vmul.f32 100.0, %v14395_v35 }
 0x598   : > { %v7903_v7 = vsel %vm14390_vm1, %v7900_v15, %v7897_v37  ;;  %v7836_v28 = vmul.f32 1.442695, %v7765_v9  ;;  %8754 = vmatmul.msk.f32.vlgmr.msra.gmra.mxu0 %vm15668_vm3, %v14400_v56  ;;  %9103 = vlog2.f32 %v8120_v13  ;;  %v8124_v37 = vadd.f32 1.0, %v8123_v57 }
 0x599   : > { %v7975_v61 = vsel %vm7974_vm7, %v7972_v29, %v7969_v20  ;;  %v14414_v17 = vmul.f32 100.0, %v14403_v27  ;;  %v14419_v18 = vadd.f32 %v14056_v8, %v7636_v59  ;;  %v8175_v51 = vmul.f32 %v7903_v7, %v12674_v52 }
 0x59a   : > { %v8183_v49 = vmul.f32 %v7975_v61, %v12674_v52  ;;  %v7772_v55 = vmin.f32 %v14410_v19, 20.0  ;;  %v7664_v1 = vpop.f32.mrf.mxu3  ;;  %9105 = vpow2.f32 %v7880_v24  ;;  %v8126_v47 = vand.u32 2147483647, %v14264_v48 }
 0x59b   : > { %v7773_v31 = vmin.f32 %v14414_v17, 20.0  ;;  %v14426_v43 = vmul.f32 100.0, %v14419_v18  ;;  %v7665_v53 = vadd.f32 %v7664_v1, %v14029_v50  ;;  %9107 = vpow2.f32 %v7834_v41 }
 0x59c   : > { %v8215_v26 = vsel %vm7799_vm6, %v14062_v44, %v8183_v49  ;;  %v7850_v33 = vmul.f32 1.442695, %v7772_v55  ;;  %9109 = vpow2.f32 %v7836_v28  ;;  %v8207_v50 = vsel %vm7791_vm5, %v14047_v36, %v8175_v51  ;;  %v15670_v55 = vld [vmem:[#allocation84_spill] sm:$0xff] }
 0x59d   : > { %8283 = vmatpush.msra.mxu1 %v8215_v26  ;;  %v7780_v54 = vmin.f32 %v14426_v43, 20.0  ;;  %v14434_v24 = vadd.f32 %v14056_v8, %v7665_v53  ;;  %v7852_v41 = vmul.f32 1.442695, %v7773_v31  ;;  %v8129_v23 = vadd.f32 1.0, %v14288_v62  ;;  %v15671_v53 = vld [vmem:[#allocation92_spill] sm:$0xff] }
 0x59e   : > { %v7638_v39 = vpop.f32.mrf.mxu2  ;;  %v8132_v44 = vmul.f32 -0.5, %v14288_v62  ;;  %9111 = vpow2.f32 %v7850_v33  ;;  %v9104_v9 = vpop.eup %9103  ;;  %v8125_v38 = vmul.f32 %v14264_v48, %v8124_v37  ;;  %vm8127_vm10 = vcmp.lt.f32.partialorder %v8126_v47, 0.0004427343 }
 0x59f   : > { %8284 = vmatpush.msra.mxu1 %v8207_v50  ;;  %v14443_v32 = vmul.f32 100.0, %v14434_v24  ;;  %v7639_v8 = vadd.f32 %v7638_v39, %v14033_v34  ;;  %9113 = vlog2.f32 %v8129_v23  ;;  %v7866_v22 = vmul.f32 1.442695, %v7780_v54 }
 0x5a0   : > { %8755 = vmatmul.msk.f32.vlgmr.msra.gmra.mxu1 %vm15669_vm13, %v14400_v56  ;;  %v14449_v36 = vpop.eup %9105  ;;  %v8122_v63 = vmul.f32 0.6931472, %v9104_v9  ;;  %9115 = vpow2.f32 %v7852_v41  ;;  %v8133_v15 = vadd.f32 1.0, %v8132_v44  ;;  %v8048_v16 = vadd.f32 1.0, %v14235_v2  ;;  %v15673_v41 = vld [vmem:[#allocation101_spill] sm:$0xff] }
 0x5a1   : > { %v7781_v29 = vmin.f32 %v14443_v32, 20.0  ;;  %v14453_v30 = vadd.f32 %v14031_v10, %v7639_v8  ;;  %v14455_v6 = vpop.eup %9107  ;;  %v8051_v13 = vmul.f32 -0.5, %v14235_v2  ;;  %vm7816_vm12 = vcmp.gt.f32.partialorder %v14200_v0, 20.0 }
 0x5a2   : > { %v7667_v34 = vpop.f32.mrf.mxu3  ;;  %v14458_v46 = vpop.eup %9109  ;;  %v8128_v59 = vsel %vm8127_vm10, %v8125_v38, %v8122_v63  ;;  %v8135_v57 = vand.u32 2147483647, %v14288_v62  ;;  %9117 = vlog2.f32 %v8048_v16  ;;  %v8134_v31 = vmul.f32 %v14288_v62, %v8133_v15  ;;  %v15674_v38 = vld [vmem:[#allocation78_spill] sm:$0xff] }
 0x5a3   : > { %v14461_v48 = vmul.f32 100.0, %v14453_v30  ;;  %v7668_v20 = vadd.f32 %v7667_v34, %v14035_v60  ;;  %v8200_v7 = vmul.f32 %v8128_v59, %v12674_v52  ;;  %9119 = vpow2.f32 %v7866_v22 }
 0x5a4   : > { %v14468_v28 = vpop.eup %9111  ;;  %v7868_v61 = vmul.f32 1.442695, %v7781_v29  ;;  %v8054_v0 = vand.u32 2147483647, %v14235_v2  ;;  %v8057_v26 = vadd.f32 1.0, %v15671_v53  ;;  %v8052_v54 = vadd.f32 1.0, %v8051_v13 }
 0x5a5   : > { %v7788_v49 = vmin.f32 %v14461_v48, 20.0  ;;  %v14472_v51 = vadd.f32 %v14031_v10, %v7668_v20  ;;  %v9114_v60 = vpop.eup %9113  ;;  %v8232_v1 = vsel %vm7816_vm12, %v15670_v55, %v8200_v7  ;;  %v8060_v47 = vmul.f32 -0.5, %v15671_v53  ;;  %v15672_v10 = vld [vmem:[#allocation93_spill] sm:$0xff]  ;;  %v15677_v20 = vld [vmem:[#allocation87_spill] sm:$0xff] }
 0x5a6   : > { %8301 = vmatpush.msra.mxu2 %v8232_v1  ;;  %v8131_v37 = vmul.f32 0.6931472, %v9114_v60  ;;  %v14482_v50 = vpop.eup %9115  ;;  %vm7817_vm14 = vcmp.gt.f32.partialorder %v15672_v10, 20.0  ;;  %vm8136_vm9 = vcmp.lt.f32.partialorder %v8135_v57, 0.0004427343  ;;  %9121 = vlog2.f32 %v8057_v26  ;;  %v15678_v57 = vld [vmem:[#allocation70_spill] sm:$0xff] }
 0x5a7   : > { %v14479_v33 = vmul.f32 100.0, %v14472_v51  ;;  %v7976_v62 = vadd.f32 1.0, %v15673_v41  ;;  %9123 = vpow2.f32 %v7868_v61  ;;  %v7882_v39 = vmul.f32 1.442695, %v7788_v49  ;;  %v15679_v60 = vld [vmem:[#allocation83_spill] sm:$0xff]  ;;  %v15681_v10 = vld [vmem:[#allocation42_spill] sm:$0xff] }
 0x5a8   : > { %v8137_v23 = vsel %vm8136_vm9, %v8134_v31, %v8131_v37  ;;  %v7979_v44 = vmul.f32 -0.5, %v15673_v41  ;;  %v9118_v8 = vpop.eup %9117  ;;  %vm7808_vm4 = vcmp.gt.f32.partialorder %v15674_v38, 20.0  ;;  %vm14489_vm0 = vcmp.lt.f32.partialorder %v8054_v0, 0.0004427343  ;;  %v15680_v31 = vld [vmem:[#allocation58_spill] sm:$0xff] }
 0x5a9   : > { %v8201_v9 = vmul.f32 %v8137_v23, %v12674_v52  ;;  %9125 = vlog2.f32 %v7976_v62  ;;  %v14493_v29 = vpop.eup %9119  ;;  %v7789_v63 = vmin.f32 %v14479_v33, 20.0  ;;  %v8050_v34 = vmul.f32 0.6931472, %v9118_v8  ;;  %v15682_v23 = vld [vmem:[#allocation56_spill] sm:$0xff] }
 0x5aa   : > { %v8053_v15 = vmul.f32 %v14235_v2, %v8052_v54  ;;  %v8061_v16 = vadd.f32 1.0, %v8060_v47  ;;  %v8063_v13 = vand.u32 2147483647, %v15671_v53  ;;  %v7980_v7 = vadd.f32 1.0, %v7979_v44 }
 0x5ab   : > { %v8233_v59 = vsel %vm7817_vm14, %v15677_v20, %v8201_v9  ;;  %v7985_v61 = vadd.f32 1.0, %v15678_v57  ;;  %9127 = vpow2.f32 %v7882_v39  ;;  %vm7809_vm11 = vcmp.gt.f32.partialorder %v15679_v60, 20.0 }
 0x5ac   : > { %8321 = vmatpush.msra.mxu3 %v8233_v59  ;;  %v8056_v49 = vsel %vm14489_vm0, %v8053_v15, %v8050_v34  ;;  %v7988_v55 = vmul.f32 -0.5, %v15678_v57  ;;  %v9122_v2 = vpop.eup %9121  ;;  %vm7800_vm15 = vcmp.gt.f32.partialorder %v15680_v31, 20.0  ;;  %v7982_v0 = vand.u32 2147483647, %v15673_v41 }
 0x5ad   : > { %v8192_v1 = vmul.f32 %v8056_v49, %v12674_v52  ;;  %9129 = vlog2.f32 %v7985_v61  ;;  %v14509_v26 = vpop.eup %9123  ;;  %v7884_v37 = vmul.f32 1.442695, %v7789_v63  ;;  %v8059_v54 = vmul.f32 0.6931472, %v9122_v2  ;;  %v15685_v61 = vld [vmem:[#allocation67_spill] sm:$0xff] }
 0x5ae   : > { %v8062_v47 = vmul.f32 %v15671_v53, %v8061_v16  ;;  %v7904_v62 = vadd.f32 1.0, %v15681_v10  ;;  %vm8064_vm2 = vcmp.lt.f32.partialorder %v8063_v13, 0.0004427343  ;;  %v7981_v8 = vmul.f32 %v15673_v41, %v7980_v7  ;;  %v15683_v16 = vld [vmem:[#allocation81_spill] sm:$0xff] }
 0x5af   : > { %v9126_v39 = vpop.eup %9125  ;;  %v8224_v44 = vsel %vm7808_vm4, %v15682_v23, %v8192_v1  ;;  %v7907_v9 = vmul.f32 -0.5, %v15681_v10  ;;  %v7989_v15 = vadd.f32 1.0, %v7988_v55  ;;  %vm7983_vm8 = vcmp.lt.f32.partialorder %v7982_v0, 0.0004427343  ;;  %v15684_v13 = vld [vmem:[#allocation9_spill] sm:$0xff] }
 0x5b0   : > { %8302 = vmatpush.msra.mxu2 %v8224_v44  ;;  %v8065_v22 = vsel %vm8064_vm2, %v8062_v47, %v8059_v54  ;;  %v7978_v34 = vmul.f32 0.6931472, %v9126_v39  ;;  %9131 = vlog2.f32 %v7904_v62  ;;  %v7991_v53 = vand.u32 2147483647, %v15678_v57  ;;  %v15686_v47 = vld [vmem:[#allocation66_spill] sm:$0xff]  ;;  %v15687_v39 = vld [vmem:[#allocation49_spill] sm:$0xff] }
 0x5b1   : > { %v8193_v63 = vmul.f32 %v8065_v22, %v12674_v52  ;;  %v7913_v20 = vadd.f32 1.0, %v15683_v16  ;;  %v14521_v59 = vpop.eup %9127  ;;  %9133 = vpow2.f32 %v7884_v37  ;;  %vm7801_vm6 = vcmp.gt.f32.partialorder %v15684_v13, 20.0  ;;  %v15690_v13 = vld [vmem:[#allocation5_spill] sm:$0xff] }
 0x5b2   : > { %v7984_v38 = vsel %vm7983_vm8, %v7981_v8, %v7978_v34  ;;  %v7916_v41 = vmul.f32 -0.5, %v15683_v16  ;;  %v7908_v2 = vadd.f32 1.0, %v7907_v9  ;;  %v7990_v0 = vmul.f32 %v15678_v57, %v7989_v15 }
 0x5b3   : > { %v9130_v7 = vpop.eup %9129  ;;  %v8225_v49 = vsel %vm7809_vm11, %v15685_v61, %v8193_v63  ;;  %v8184_v55 = vmul.f32 %v7984_v38, %v12674_v52  ;;  %9135 = vlog2.f32 %v7913_v20  ;;  %v7910_v37 = vand.u32 2147483647, %v15681_v10  ;;  %v15688_v38 = vld [vmem:[#allocation75_spill] sm:$0xff] }
 0x5b4   : > { %8322 = vmatpush.msra.mxu3 %v8225_v49  ;;  %v7987_v1 = vmul.f32 0.6931472, %v9130_v7  ;;  %v8138_v54 = vadd.f32 1.0, %v14377_v12  ;;  %vm7992_vm5 = vcmp.lt.f32.partialorder %v7991_v53, 0.0004427343  ;;  %vm7792_vm1 = vcmp.gt.f32.partialorder %v15687_v39, 20.0 }
 0x5b5   : > { %v8216_v62 = vsel %vm7800_vm15, %v15686_v47, %v8184_v55  ;;  %v8141_v60 = vmul.f32 -0.5, %v14377_v12  ;;  %v7917_v8 = vadd.f32 1.0, %v7916_v41  ;;  %v8147_v57 = vadd.f32 1.0, %v14449_v36  ;;  %v15689_v55 = vld [vmem:[#allocation73_spill] sm:$0xff] }
 0x5b6   : > { %v9132_v23 = vpop.eup %9131  ;;  %8303 = vmatpush.msra.mxu2 %v8216_v62  ;;  %v7993_v44 = vsel %vm7992_vm5, %v7990_v0, %v7987_v1  ;;  %9137 = vlog2.f32 %v8138_v54  ;;  %v7909_v34 = vmul.f32 %v15681_v10, %v7908_v2  ;;  %v7919_v31 = vand.u32 2147483647, %v15683_v16 }
 0x5b7   : > { %v8185_v9 = vmul.f32 %v7993_v44, %v12674_v52  ;;  %v7906_v22 = vmul.f32 0.6931472, %v9132_v23  ;;  %v14541_v15 = vpop.eup %9133  ;;  %vm7911_vm7 = vcmp.lt.f32.partialorder %v7910_v37, 0.0004427343  ;;  %v8144_v63 = vand.u32 2147483647, %v14377_v12 }
 0x5b8   : > { %9139 = vlog2.f32 %v8147_v57  ;;  %v8150_v53 = vmul.f32 -0.5, %v14449_v36  ;;  %v8142_v61 = vadd.f32 1.0, %v8141_v60  ;;  %v8066_v49 = vadd.f32 1.0, %v14363_v21 }
 0x5b9   : > { %v9136_v20 = vpop.eup %9135  ;;  %v8217_v41 = vsel %vm7801_vm6, %v15688_v38, %v8185_v9  ;;  %v7912_v7 = vsel %vm7911_vm7, %v7909_v34, %v7906_v22  ;;  %vm7793_vm3 = vcmp.gt.f32.partialorder %v15689_v55, 20.0  ;;  %v7918_v1 = vmul.f32 %v15683_v16, %v7917_v8  ;;  %v15692_v34 = vld [vmem:[#allocation27_spill] sm:$0xff] }
 0x5ba   : > { %8323 = vmatpush.msra.mxu3 %v8217_v41  ;;  %v8176_v10 = vmul.f32 %v7912_v7, %v12674_v52  ;;  %v7915_v2 = vmul.f32 0.6931472, %v9136_v20  ;;  %vm7920_vm13 = vcmp.lt.f32.partialorder %v7919_v31, 0.0004427343  ;;  %v8151_v0 = vadd.f32 1.0, %v8150_v53  ;;  %v15693_v41 = vld [vmem:[#allocation96_spill] sm:$0xff] }
 0x5bb   : > { %9141 = vlog2.f32 %v8066_v49  ;;  %v8069_v37 = vmul.f32 -0.5, %v14363_v21  ;;  %v8153_v60 = vand.u32 2147483647, %v14449_v36  ;;  %v8075_v23 = vadd.f32 1.0, %v14366_v42 }
 0x5bc   : > { %v9138_v54 = vpop.eup %9137  ;;  %v8208_v47 = vsel %vm7792_vm1, %v15690_v13, %v8176_v10  ;;  %v7921_v62 = vsel %vm7920_vm13, %v7918_v1, %v7915_v2  ;;  %v8143_v16 = vmul.f32 %v14377_v12, %v8142_v61  ;;  %vm8145_vm10 = vcmp.lt.f32.partialorder %v8144_v63, 0.0004427343 }
 0x5bd   : > { %8304 = vmatpush.msra.mxu2 %v8208_v47  ;;  %v8177_v44 = vmul.f32 %v7921_v62, %v12674_v52  ;;  %v8140_v57 = vmul.f32 0.6931472, %v9138_v54  ;;  %vm15691_vm12 = vcmask 261120   ;;  %v8070_v9 = vadd.f32 1.0, %v8069_v37 }
 0x5be   : > { %v9140_v8 = vpop.eup %9139  ;;  %8756 = vmatmul.msk.f32.vlgmr.msra.gmra.mxu2 %vm15691_vm12, %v14400_v56  ;;  %v8072_v39 = vand.u32 2147483647, %v14363_v21  ;;  %9143 = vlog2.f32 %v8075_v23  ;;  %v8078_v22 = vmul.f32 -0.5, %v14366_v42  ;;  %v8152_v38 = vmul.f32 %v14449_v36, %v8151_v0  ;;  %vm15694_vm9 = vmmov %vm15691_vm12  ;;  %v15695_v23 = vld [vmem:[#allocation45_spill] sm:$0xff] }
 0x5bf   : > { %v8209_v31 = vsel %vm7793_vm3, %v15692_v34, %v8177_v44  ;;  %v8146_v53 = vsel %vm8145_vm10, %v8143_v16, %v8140_v57  ;;  %v8149_v20 = vmul.f32 0.6931472, %v9140_v8  ;;  %vm8154_vm14 = vcmp.lt.f32.partialorder %v8153_v60, 0.0004427343  ;;  %v15697_v44 = vld [vmem:[#allocation94_spill] sm:$0xff]  ;;  %v15698_v16 = vld [vmem:[#allocation99_spill] sm:$0xff] }
 0x5c0   : > { %8324 = vmatpush.msra.mxu3 %v8209_v31  ;;  %v8202_v12 = vmul.f32 %v8146_v53, %v12674_v52  ;;  %v8079_v63 = vadd.f32 1.0, %v8078_v22  ;;  %v7994_v7 = vadd.f32 1.0, %v15693_v41  ;;  %vm7818_vm4 = vcmp.gt.f32.partialorder %v14296_v5, 20.0  ;;  %v15699_v22 = vld [vmem:[#allocation100_spill] sm:$0xff] }
 0x5c1   : > { %v9142_v61 = vpop.eup %9141  ;;  %8757 = vmatmul.msk.f32.vlgmr.msra.gmra.mxu3 %vm15694_vm9, %v14400_v56  ;;  %v8155_v49 = vsel %vm8154_vm14, %v8152_v38, %v8149_v20  ;;  %v8081_v10 = vand.u32 2147483647, %v14366_v42  ;;  %v7997_v55 = vmul.f32 -0.5, %v15693_v41  ;;  %v8071_v0 = vmul.f32 %v14363_v21, %v8070_v9  ;;  %v15700_v20 = vld [vmem:[#allocation90_spill] sm:$0xff] }
 0x5c2   : > { %v8234_v36 = vsel %vm7818_vm4, %v14283_v40, %v8202_v12  ;;  %v8203_v2 = vmul.f32 %v8155_v49, %v12674_v52  ;;  %v8068_v1 = vmul.f32 0.6931472, %v9142_v61  ;;  %vm7819_vm0 = vcmp.gt.f32.partialorder %v14323_v45, 20.0  ;;  %v15696_v45 = vld [vmem:[#allocation89_spill] sm:$0xff]  ;;  %v15701_v12 = vld [vmem:[#allocation12_spill] sm:$0xff] }
 0x5c3   : > { %8341 = vmatpush.msrb.mxu0 %v8234_v36  ;;  %vm8073_vm11 = vcmp.lt.f32.partialorder %v8072_v39, 0.0004427343  ;;  %9145 = vlog2.f32 %v7994_v7  ;;  %v8003_v37 = vadd.f32 1.0, %v14307_v58  ;;  %v8080_v47 = vmul.f32 %v14366_v42, %v8079_v63  ;;  %v15702_v7 = vld [vmem:[#allocation30_spill] sm:$0xff] }
 0x5c4   : > { %v9144_v5 = vpop.eup %9143  ;;  %v8235_v54 = vsel %vm7819_vm0, %v14303_v3, %v8203_v2  ;;  %v8074_v13 = vsel %vm8073_vm11, %v8071_v0, %v8068_v1  ;;  %v8006_v40 = vmul.f32 -0.5, %v14307_v58  ;;  %v7998_v21 = vadd.f32 1.0, %v7997_v55  ;;  %vm15709_vm11 = vmmov %vm15694_vm9 }
 0x5c5   : > { %8361 = vmatpush.msrb.mxu1 %v8235_v54  ;;  %v8194_v62 = vmul.f32 %v8074_v13, %v12674_v52  ;;  %v8077_v60 = vmul.f32 0.6931472, %v9144_v5  ;;  %9147 = vlog2.f32 %v8003_v37  ;;  %vm7810_vm15 = vcmp.gt.f32.partialorder %v15695_v23, 20.0  ;;  %v15703_v23 = vld [vmem:[#allocation77_spill] sm:$0xff] }
 0x5c6   : > { %vm7811_vm2 = vcmp.gt.f32.partialorder %v15696_v45, 20.0  ;;  %vm8082_vm8 = vcmp.lt.f32.partialorder %v8081_v10, 0.0004427343  ;;  %v7922_v57 = vadd.f32 1.0, %v15697_v44  ;;  %v8000_v42 = vand.u32 2147483647, %v15693_v41 }
 0x5c7   : > { %v8226_v3 = vsel %vm7810_vm15, %v15698_v16, %v8194_v62  ;;  %v8083_v8 = vsel %vm8082_vm8, %v8080_v47, %v8077_v60  ;;  %v7925_v9 = vmul.f32 -0.5, %v15697_v44  ;;  %vm7802_vm6 = vcmp.gt.f32.partialorder %v15699_v22, 20.0 }
 0x5c8   : > { %8342 = vmatpush.msrb.mxu0 %v8226_v3  ;;  %v8195_v39 = vmul.f32 %v8083_v8, %v12674_v52  ;;  %v8007_v34 = vadd.f32 1.0, %v8006_v40  ;;  %9149 = vlog2.f32 %v7922_v57  ;;  %v7999_v53 = vmul.f32 %v15693_v41, %v7998_v21  ;;  %v15704_v3 = vld [vmem:[#allocation79_spill] sm:$0xff] }
 0x5c9   : > { %v9146_v31 = vpop.eup %9145  ;;  %vm7803_vm5 = vcmp.gt.f32.partialorder %v15700_v20, 20.0  ;;  %v8009_v38 = vand.u32 2147483647, %v14307_v58  ;;  %v7931_v63 = vadd.f32 1.0, %v15701_v12  ;;  %v7926_v10 = vadd.f32 1.0, %v7925_v9 }
 0x5ca   : > { %v8227_v61 = vsel %vm7811_vm2, %v15702_v7, %v8195_v39  ;;  %v7996_v49 = vmul.f32 0.6931472, %v9146_v31  ;;  %v7934_v55 = vmul.f32 -0.5, %v15701_v12  ;;  %vm8001_vm1 = vcmp.lt.f32.partialorder %v8000_v42, 0.0004427343 }
 0x5cb   : > { %v9148_v36 = vpop.eup %9147  ;;  %8362 = vmatpush.msrb.mxu1 %v8227_v61  ;;  %v7928_v2 = vand.u32 2147483647, %v15697_v44  ;;  %9151 = vlog2.f32 %v7931_v63  ;;  %v8156_v41 = vadd.f32 1.0, %v14521_v59  ;;  %v8008_v37 = vmul.f32 %v14307_v58, %v8007_v34 }
 0x5cc   : > { %v8002_v1 = vsel %vm8001_vm1, %v7999_v53, %v7996_v49  ;;  %v8005_v0 = vmul.f32 0.6931472, %v9148_v36  ;;  %v8159_v5 = vmul.f32 -0.5, %v14521_v59  ;;  %vm8010_vm7 = vcmp.lt.f32.partialorder %v8009_v38, 0.0004427343  ;;  %v15706_v49 = vld [vmem:[#allocation60_spill] sm:$0xff] }
 0x5cd   : > { %v8186_v54 = vmul.f32 %v8002_v1, %v12674_v52  ;;  %v7937_v13 = vand.u32 2147483647, %v15701_v12  ;;  %9153 = vlog2.f32 %v8156_v41  ;;  %v7927_v62 = vmul.f32 %v15697_v44, %v7926_v10  ;;  %v15705_v44 = vld [vmem:[#allocation59_spill] sm:$0xff] }
 0x5ce   : > { %v9150_v47 = vpop.eup %9149  ;;  %v8011_v40 = vsel %vm8010_vm7, %v8008_v37, %v8005_v0  ;;  %v7935_v60 = vadd.f32 1.0, %v7934_v55  ;;  %v8165_v21 = vadd.f32 1.0, %v14541_v15  ;;  %v8160_v16 = vadd.f32 1.0, %v8159_v5  ;;  %v15707_v41 = vld [vmem:[#allocation95_spill] sm:$0xff] }
 0x5cf   : > { %v8218_v45 = vsel %vm7802_vm6, %v15703_v23, %v8186_v54  ;;  %v8187_v58 = vmul.f32 %v8011_v40, %v12674_v52  ;;  %v7924_v57 = vmul.f32 0.6931472, %v9150_v47  ;;  %vm7794_vm3 = vcmp.gt.f32.partialorder %v15704_v3, 20.0 }
 0x5d0   : > { %8343 = vmatpush.msrb.mxu0 %v8218_v45  ;;  %vm7929_vm13 = vcmp.lt.f32.partialorder %v7928_v2, 0.0004427343  ;;  %9155 = vlog2.f32 %v8165_v21  ;;  %v8168_v8 = vmul.f32 -0.5, %v14541_v15  ;;  %v8162_v22 = vand.u32 2147483647, %v14521_v59 }
 0x5d1   : > { %v9152_v42 = vpop.eup %9151  ;;  %v8219_v9 = vsel %vm7803_vm5, %v15705_v44, %v8187_v58  ;;  %v7930_v39 = vsel %vm7929_vm13, %v7927_v62, %v7924_v57  ;;  %v8084_v34 = vadd.f32 1.0, %v14493_v29  ;;  %v7936_v38 = vmul.f32 %v15701_v12, %v7935_v60 }
 0x5d2   : > { %8363 = vmatpush.msrb.mxu1 %v8219_v9  ;;  %v8178_v31 = vmul.f32 %v7930_v39, %v12674_v52  ;;  %v7933_v53 = vmul.f32 0.6931472, %v9152_v42  ;;  %v8169_v63 = vadd.f32 1.0, %v8168_v8  ;;  %vm7938_vm10 = vcmp.lt.f32.partialorder %v7937_v13, 0.0004427343  ;;  %v15708_v13 = vld [vmem:[#allocation80_spill] sm:$0xff] }
 0x5d3   : > { %v9154_v7 = vpop.eup %9153  ;;  %v8161_v61 = vmul.f32 %v14521_v59, %v8160_v16  ;;  %9157 = vlog2.f32 %v8084_v34  ;;  %v8087_v20 = vmul.f32 -0.5, %v14493_v29  ;;  %v8171_v2 = vand.u32 2147483647, %v14541_v15 }
 0x5d4   : > { %v8210_v10 = vsel %vm7794_vm3, %v15706_v49, %v8178_v31  ;;  %v7939_v55 = vsel %vm7938_vm10, %v7936_v38, %v7933_v53  ;;  %v8158_v36 = vmul.f32 0.6931472, %v9154_v7  ;;  %vm7795_vm12 = vcmp.gt.f32.partialorder %v15707_v41, 20.0 }
 0x5d5   : > { %8344 = vmatpush.msrb.mxu0 %v8210_v10  ;;  %v8179_v12 = vmul.f32 %v7939_v55, %v12674_v52  ;;  %vm8163_vm14 = vcmp.lt.f32.partialorder %v8162_v22, 0.0004427343  ;;  %v8093_v1 = vadd.f32 1.0, %v14509_v26  ;;  %v8170_v37 = vmul.f32 %v14541_v15, %v8169_v63 }
 0x5d6   : > { %v9156_v59 = vpop.eup %9155  ;;  %8758 = vmatmul.msk.f32.vlgmr.msrb.gmra.mxu0 %vm15694_vm9, %v14400_v56  ;;  %v8164_v0 = vsel %vm8163_vm14, %v8161_v61, %v8158_v36  ;;  %v8088_v5 = vadd.f32 1.0, %v8087_v20  ;;  %v8090_v54 = vand.u32 2147483647, %v14493_v29  ;;  %v8096_v60 = vmul.f32 -0.5, %v14509_v26 }
 0x5d7   : > { %v8211_v47 = vsel %vm7795_vm12, %v15708_v13, %v8179_v12  ;;  %v8204_v40 = vmul.f32 %v8164_v0, %v12674_v52  ;;  %v8167_v62 = vmul.f32 0.6931472, %v9156_v59  ;;  %vm7820_vm4 = vcmp.gt.f32.partialorder %v14461_v48, 20.0 }
 0x5d8   : > { %8364 = vmatpush.msrb.mxu1 %v8211_v47  ;;  %vm8172_vm0 = vcmp.lt.f32.partialorder %v8171_v2, 0.0004427343  ;;  %9159 = vlog2.f32 %v8093_v1  ;;  %v8012_v21 = vadd.f32 1.0, %v14468_v28  ;;  %v8099_v58 = vand.u32 2147483647, %v14509_v26 }
 0x5d9   : > { %v9158_v23 = vpop.eup %9157  ;;  %8759 = vmatmul.msk.f32.vlgmr.msrb.gmra.mxu1 %vm15709_vm11, %v14400_v56  ;;  %v8236_v15 = vsel %vm7820_vm4, %v14453_v30, %v8204_v40  ;;  %v8173_v45 = vsel %vm8172_vm0, %v8170_v37, %v8167_v62  ;;  %v8015_v57 = vmul.f32 -0.5, %v14468_v28  ;;  %v8089_v48 = vmul.f32 %v14493_v29, %v8088_v5  ;;  %vm15712_vm4 = vmmov %vm15709_vm11 }
 0x5da   : > { %8381 = vmatpush.msrb.mxu2 %v8236_v15  ;;  %v8205_v16 = vmul.f32 %v8173_v45, %v12674_v52  ;;  %v8086_v3 = vmul.f32 0.6931472, %v9158_v23  ;;  %9161 = vlog2.f32 %v8012_v21  ;;  %vm7821_vm15 = vcmp.gt.f32.partialorder %v14479_v33, 20.0  ;;  %vm15713_vm0 = vmmov %vm15712_vm4 }
 0x5db   : > { %vm8091_vm2 = vcmp.lt.f32.partialorder %v8090_v54, 0.0004427343  ;;  %v8097_v8 = vadd.f32 1.0, %v8096_v60  ;;  %v8021_v42 = vadd.f32 1.0, %v14482_v50  ;;  %v8024_v9 = vmul.f32 -0.5, %v14482_v50 }
 0x5dc   : > { %v8237_v30 = vsel %vm7821_vm15, %v14472_v51, %v8205_v16  ;;  %v8092_v44 = vsel %vm8091_vm2, %v8089_v48, %v8086_v3  ;;  %v8016_v22 = vadd.f32 1.0, %v8015_v57  ;;  %vm7812_vm8 = vcmp.gt.f32.partialorder %v14426_v43, 20.0 }
 0x5dd   : > { %8401 = vmatpush.msrb.mxu3 %v8237_v30  ;;  %v8196_v39 = vmul.f32 %v8092_v44, %v12674_v52  ;;  %9163 = vlog2.f32 %v8021_v42  ;;  %vm14652_vm6 = vcmp.lt.f32.partialorder %v8099_v58, 0.0004427343  ;;  %v8018_v33 = vand.u32 2147483647, %v14468_v28 }
 0x5de   : > { %v9160_v34 = vpop.eup %9159  ;;  %v7940_v31 = vadd.f32 1.0, %v14455_v6  ;;  %v8098_v38 = vmul.f32 %v14509_v26, %v8097_v8  ;;  %v7943_v63 = vmul.f32 -0.5, %v14455_v6  ;;  %v8025_v61 = vadd.f32 1.0, %v8024_v9 }
 0x5df   : > { %v8228_v51 = vsel %vm7812_vm8, %v14419_v18, %v8196_v39  ;;  %v8095_v53 = vmul.f32 0.6931472, %v9160_v34  ;;  %v8027_v43 = vand.u32 2147483647, %v14482_v50  ;;  %v7949_v20 = vadd.f32 1.0, %v14458_v46 }
 0x5e0   : > { %v9162_v7 = vpop.eup %9161  ;;  %8382 = vmatpush.msrb.mxu2 %v8228_v51  ;;  %9165 = vlog2.f32 %v7940_v31  ;;  %v8017_v55 = vmul.f32 %v14468_v28, %v8016_v22  ;;  %v7952_v18 = vmul.f32 -0.5, %v14458_v46  ;;  %vm8019_vm5 = vcmp.lt.f32.partialorder %v8018_v33, 0.0004427343 }
 0x5e1   : > { %v8101_v49 = vsel %vm14652_vm6, %v8098_v38, %v8095_v53  ;;  %v8014_v10 = vmul.f32 0.6931472, %v9162_v7  ;;  %9167 = vlog2.f32 %v7949_v20  ;;  %vm7813_vm1 = vcmp.gt.f32.partialorder %v14443_v32, 20.0 }
 0x5e2   : > { %v8197_v26 = vmul.f32 %v8101_v49, %v12674_v52  ;;  %v7944_v41 = vadd.f32 1.0, %v7943_v63  ;;  %v7946_v12 = vand.u32 2147483647, %v14455_v6  ;;  %v8026_v28 = vmul.f32 %v14482_v50, %v8025_v61 }
 0x5e3   : > { %v9164_v36 = vpop.eup %9163  ;;  %v8020_v2 = vsel %vm8019_vm5, %v8017_v55, %v8014_v10  ;;  %vm7804_vm7 = vcmp.gt.f32.partialorder %v14410_v19, 20.0  ;;  %vm8028_vm3 = vcmp.lt.f32.partialorder %v8027_v43, 0.0004427343  ;;  %v7953_v37 = vadd.f32 1.0, %v7952_v18 }
 0x5e4   : > { %v8229_v1 = vsel %vm7813_vm1, %v14434_v24, %v8197_v26  ;;  %v8188_v59 = vmul.f32 %v8020_v2, %v12674_v52  ;;  %v8023_v0 = vmul.f32 0.6931472, %v9164_v36  ;;  %v7955_v13 = vand.u32 2147483647, %v14458_v46 }
 0x5e5   : > { %8402 = vmatpush.msrb.mxu3 %v8229_v1  ;;  %v7945_v40 = vmul.f32 %v14455_v6, %v7944_v41  ;;  %vm7805_vm13 = vcmp.gt.f32.partialorder %v14414_v17, 20.0  ;;  %vm7947_vm10 = vcmp.lt.f32.partialorder %v7946_v12, 0.0004427343  ;;  %v7954_v21 = vmul.f32 %v14458_v46, %v7953_v37 }
 0x5e6   : > { %v9166_v5 = vpop.eup %9165  ;;  %v8220_v54 = vsel %vm7804_vm7, %v14395_v35, %v8188_v59  ;;  %v8029_v32 = vsel %vm8028_vm3, %v8026_v28, %v8023_v0  ;;  %vm7956_vm12 = vcmp.lt.f32.partialorder %v7955_v13, 0.0004427343  ;;  %vm7796_vm14 = vcmp.gt.f32.partialorder %v14335_v11, 20.0  ;;  %v8243_v11 = vpop.permute.xlu0 %8242 }
 0x5e7   : > { %8383 = vmatpush.msrb.mxu2 %v8220_v54  ;;  %v8189_v47 = vmul.f32 %v8029_v32, %v12674_v52  ;;  %v7942_v24 = vmul.f32 0.6931472, %v9166_v5  ;;  %v9168_v62 = vpop.eup %9167  ;;  %vm7797_vm9 = vcmp.gt.f32.partialorder %v14360_v4, 20.0  ;;  %vm8426_vm11 = vcmask 1042434  }
 0x5e8   : > { %v7951_v60 = vmul.f32 0.6931472, %v9168_v62  ;;  %vm8424_vm15 = vcmask 1040384   ;;  %vm8430_vm2 = vcmask 1044484   ;;  %vm8432_vm8 = vcmask 1046534  }
 0x5e9   : > { %v8221_v19 = vsel %vm7805_vm13, %v14403_v27, %v8189_v47  ;;  %v7948_v50 = vsel %vm7947_vm10, %v7945_v40, %v7942_v24  ;;  %vm8428_vm6 = vcmask 1041408   ;;  %vm8434_vm5 = vcmask 1045508  }
 0x5ea   : > { %8403 = vmatpush.msrb.mxu3 %v8221_v19  ;;  %v8180_v35 = vmul.f32 %v7948_v50, %v12674_v52  ;;  %v7957_v23 = vsel %vm7956_vm12, %v7954_v21, %v7951_v60  ;;  %vm8436_vm1 = vcmask 1043456  }
 0x5eb   : > { %v8181_v6 = vmul.f32 %v7957_v23, %v12674_v52 }
 0x5ec   : > { %v8212_v15 = vsel %vm7796_vm14, %v14313_v25, %v8180_v35  ;;  %v8245_v25 = vperm.slane %v8243_v11, 0 }
 0x5ed   : > { %8384 = vmatpush.msrb.mxu2 %v8212_v15  ;;  %v8213_v27 = vsel %vm7797_vm9, %v14344_v14, %v8181_v6 }
 0x5ee   : > { %8760 = vmatmul.msk.f32.vlgmr.msrb.gmra.mxu2 %vm15712_vm4, %v14400_v56  ;;  %8404 = vmatpush.msrb.mxu3 %v8213_v27 }
 0x5ef   : > { %8761 = vmatmul.msk.f32.vlgmr.msrb.gmra.mxu3 %vm15713_vm0, %v14400_v56 }
 0x615   : > { %v8266_v17 = vpop.f32.mrf.mxu0 }
 0x616   : > { %v8267_v33 = vadd.f32 %v8266_v17, %v8245_v25 }
 0x61d   : > { %v8286_v46 = vpop.f32.mrf.mxu1 }
 0x61e   : > { %v8287_v4 = vadd.f32 %v8286_v46, %v8245_v25 }
 0x620   : > { %v8417_v9 = vrot.slane %v8287_v4, 7 }
 0x622   : > { %v8425_v53 = vsel %vm8424_vm15, %v8267_v33, %v8417_v9 }
 0x641   : > { %v8306_v45 = vpop.f32.mrf.mxu2 }
 0x642   : > { %v8307_v16 = vadd.f32 %v8306_v45, %v8245_v25 }
 0x644   : > { %v8326_v58 = vpop.f32.mrf.mxu3  ;;  %v8418_v42 = vrot.slane %v8307_v16, 6 }
 0x645   : > { %v8327_v3 = vadd.f32 %v8326_v58, %v8245_v25 }
 0x647   : > { %v8419_v30 = vrot.slane %v8327_v3, 5 }
 0x649   : > { %v8427_v31 = vsel %vm8426_vm11, %v8418_v42, %v8419_v30 }
 0x64a   : > { %v8429_v7 = vsel %vm8428_vm6, %v8425_v53, %v8427_v31 }
 0x653   : > { %v8346_v57 = vpop.f32.mrf.mxu0 }
 0x654   : > { %v8347_v48 = vadd.f32 %v8346_v57, %v8245_v25 }
 0x656   : > { %v8366_v52 = vpop.f32.mrf.mxu1  ;;  %v8420_v39 = vrot.slane %v8347_v48, 4 }
 0x657   : > { %v8367_v14 = vadd.f32 %v8366_v52, %v8245_v25 }
 0x659   : > { %v8421_v22 = vrot.slane %v8367_v14, 3 }
 0x65b   : > { %v8431_v38 = vsel %vm8430_vm2, %v8420_v39, %v8421_v22 }
 0x671   : > { %v8386_v8 = vpop.f32.mrf.mxu2 }
 0x672   : > { %v8387_v44 = vadd.f32 %v8386_v8, %v8245_v25  ;;  %v8406_v56 = vpop.f32.mrf.mxu3 }
 0x673   : > { %v8407_v29 = vadd.f32 %v8406_v56, %v8245_v25 }
 0x674   : > { %v8422_v34 = vrot.slane %v8387_v44, 2 }
 0x675   : > { %v8423_v51 = vrot.slane %v8407_v29, 1 }
 0x677   : > { %v8433_v63 = vsel %vm8432_vm8, %v8422_v34, %v8423_v51 }
 0x678   : > { %v8435_v61 = vsel %vm8434_vm5, %v8431_v38, %v8433_v63 }
 0x679   : > { %v8437_v43 = vsel %vm8436_vm1, %v8429_v7, %v8435_v61 }
 0x67a   : > { %8439 = vst [vmem:[%s388_s10] sm:$0xff] %v8437_v43 }
 0x67b PF: > { %s23_s19 = sadd.s32 1, %s9177_s19  }
 0x67c   : > { %p20_p4 = scmp.ge.s32.totalorder %s23_s19, 4  }
 0x67e   :  { %22 = sbr.rel (!%p20_p4) target bundleno = 3 (0x3), region = 100 }

</bundles_post_ra>
